<compile_context>
chip_gen: v5e
topology: v5e:2x2
jax: 0.10.0
libtpu: 0.0.40
codegen_flags: <defaults>
</compile_context>

<pallas_src>
import functools
import math

import jax
import jax.numpy as jnp
import numpy as np
from jax.experimental import pallas as pl
from jax.experimental.pallas import tpu as pltpu

NEG_SLOPE = 0.1                          # LeakyReLU slope used everywhere in HiFi-GAN
VMEM_LIMIT_BYTES = 48 * 1024 * 1024      # safe on v5e/v6e (128 MiB) and v7x (64 MiB)
VMEM_TILE_BUDGET = 28 * 1024 * 1024      # target working set incl. double buffers


# --------------------------------------------------------------------------- utilities
def _round_up(v, m):
    return -(-v // m) * m


def _cdiv(a, b):
    return -(-a // b)


def _cparams(grid_rank):
    return pltpu.CompilerParams(
        dimension_semantics=("parallel",) * grid_rank,
        vmem_limit_bytes=VMEM_LIMIT_BYTES)


def _choose_time_tile(span, fixed_bytes, col_bytes, t_out, budget=VMEM_TILE_BUDGET):
    """Largest time tile (multiple of 128 lanes) whose estimated working set fits VMEM."""
    best = 128
    for cand in (256, 512, 1024, 2048, 4096):
        if fixed_bytes + col_bytes * (cand + span) <= budget:
            best = cand
    return max(128, min(best, _round_up(max(t_out, 1), 128)))


def _pad_or_crop_time(x, lo, hi):
    if lo < 0:
        x = x[:, :, -lo:]
        lo = 0
    if hi < 0:
        x = x[:, :, :hi]
        hi = 0
    if lo > 0 or hi > 0:
        x = jnp.pad(x, ((0, 0), (0, 0), (lo, hi)))
    return x


def _gather_time_windows(xp, nt, tile_t, tile_in):
    """[B, C, Tp] -> [B, nt, C, tile_in] overlapping windows (conv halo per time tile)."""
    idx = jnp.arange(nt)[:, None] * tile_t + jnp.arange(tile_in)[None, :]
    win = xp[:, :, idx]                      # [B, C, nt, tile_in]
    return jnp.transpose(win, (0, 2, 1, 3))  # [B, nt, C, tile_in]


# ----------------------------------------------------------------------------- kernels
def _conv_taps_kernel(x_ref, w_ref, b_ref, o_ref, *, K, dil, tile_t, pre_leaky):
    # x: [1,1,Cin,tile_in]  w: [K,Cout_blk,Cin] bf16  b: [Cout_blk,1] f32  o: [1,Cout_blk,tile_t]
    xf = x_ref[0, 0].astype(jnp.float32)
    if pre_leaky:
        xf = jnp.where(xf >= 0, xf, NEG_SLOPE * xf)     # LeakyReLU in f32 (v5e has no bf16 VPU)
    xb = xf.astype(jnp.bfloat16)
    co = o_ref.shape[1]
    acc = jnp.zeros((co, tile_t), jnp.float32)
    for k in range(K):                                   # K MXU matmuls, f32 accumulate
        acc = acc + jnp.dot(w_ref[k], xb[:, k * dil:k * dil + tile_t],
                            preferred_element_type=jnp.float32)
    o_ref[0] = (acc + b_ref[...]).astype(o_ref.dtype)


def _conv_im2col_kernel(x_ref, w_ref, b_ref, o_ref, *, K, dil, tile_t, pre_leaky):
    # Small-Cin path: fold the K taps into the contraction -> one [Cout, K*Cin] MXU dot.
    xf = x_ref[0, 0].astype(jnp.float32)
    if pre_leaky:
        xf = jnp.where(xf >= 0, xf, NEG_SLOPE * xf)
    xb = xf.astype(jnp.bfloat16)
    slab = jnp.concatenate([xb[:, k * dil:k * dil + tile_t] for k in range(K)], axis=0)
    acc = jnp.dot(w_ref[...], slab, preferred_element_type=jnp.float32)
    o_ref[0] = (acc + b_ref[...]).astype(o_ref.dtype)


def _resblock_step_kernel(x_ref, w1_ref, b1_ref, w2_ref, b2_ref, o_ref, *, K, dil, tile_t):
    # Fused: leaky -> dilated KxC conv -> leaky -> 1x1 conv -> + residual (all in VMEM).
    xf = x_ref[0, 0].astype(jnp.float32)                 # [C, tile_in]
    a = jnp.where(xf >= 0, xf, NEG_SLOPE * xf).astype(jnp.bfloat16)
    C = o_ref.shape[1]
    acc = jnp.zeros((C, tile_t), jnp.float32)
    for k in range(K):
        acc = acc + jnp.dot(w1_ref[k], a[:, k * dil:k * dil + tile_t],
                            preferred_element_type=jnp.float32)
    t = acc + b1_ref[...]
    u = jnp.where(t >= 0, t, NEG_SLOPE * t).astype(jnp.bfloat16)
    v = jnp.dot(w2_ref[...], u, preferred_element_type=jnp.float32) + b2_ref[...]
    half = dil * (K - 1) // 2
    o_ref[0] = (v + xf[:, half:half + tile_t]).astype(o_ref.dtype)


def _epilogue_kernel(*refs, tile_t, t_valid, use_hnm):
    # Fused VPU epilogue: leaky -> conv_post (Cout=1) -> tanh [-> harmonic/noise convs,
    # sigmoid gate on f0, mix].  No MXU: 1-row matmuls would waste the MXU entirely.
    if use_hnm:
        (x_ref, f0_ref, wp_ref, bp_ref, wh_ref, bh_ref,
         wn_ref, bn_ref, wg_ref, bg_ref, o_ref) = refs
    else:
        x_ref, wp_ref, bp_ref, o_ref = refs

    kp = wp_ref.shape[1]
    ext = (wn_ref.shape[1] - 1) // 2 if use_hnm else 0   # noise-conv halo on y (=15)
    ly = tile_t + 2 * ext

    xf = x_ref[0, 0].astype(jnp.float32)                 # [C, tile_t + 2*(pp+ext)]
    a = jnp.where(xf >= 0, xf, NEG_SLOPE * xf)

    acc = jnp.zeros((a.shape[0], ly), jnp.float32)
    for k in range(kp):                                  # conv_post as shifted multiply-adds
        acc = acc + a[:, k:k + ly] * wp_ref[:, k:k + 1]
    y = jnp.sum(acc, axis=0, keepdims=True) + bp_ref[...]   # [1, ly]
    y = jnp.tanh(y)

    if not use_hnm:
        o_ref[0] = y
        return

    # Outside the real waveform extent the harmonic/noise convs must see zeros
    # (PyTorch zero-pads their input), so mask the extended tanh output.
    t0 = pl.program_id(1) * tile_t
    pos = t0 - ext + jax.lax.broadcasted_iota(jnp.int32, (1, ly), 1)
    y = jnp.where((pos >= 0) & (pos < t_valid), y, 0.0)

    def small_conv(src, w_r, b_r, start):
        acc2 = jnp.zeros((1, tile_t), jnp.float32)
        for k in range(w_r.shape[1]):
            acc2 = acc2 + src[:, start + k:start + k + tile_t] * w_r[:, k:k + 1]
        return acc2 + b_r[...]

    ph = (wh_ref.shape[1] - 1) // 2
    harmonic = small_conv(y, wh_ref, bh_ref, ext - ph)
    noise = small_conv(y, wn_ref, bn_ref, 0)
    f0w = f0_ref[0, 0].astype(jnp.float32)               # [1, tile_t + 2*pg]
    gate = jax.nn.sigmoid(small_conv(f0w, wg_ref, bg_ref, 0))
    o_ref[0] = harmonic * gate + noise * (1.0 - gate)


# ---------------------------------------------------------------------------- wrappers
def conv1d_prepped(x, wd, *, dil, pad, pre_leaky, out_dtype=jnp.bfloat16):
    """Stride-1 (dilated) Conv1d with time + Cout tiling.  x: [B, Cin, T]."""
    Bb, cin, _ = x.shape
    w, bias = wd['w'], wd['b']
    im2col = (w.ndim == 2)
    if im2col:
        cout = w.shape[0]
        K = w.shape[1] // cin
    else:
        K, cout = w.shape[0], w.shape[1]

    lo, hi = pad if isinstance(pad, tuple) else (pad, pad)
    xe = _pad_or_crop_time(x, lo, hi)
    Te = xe.shape[-1]
    span = dil * (K - 1)
    t_out = Te - span

    # Cout tiling (keeps accumulator / weight block a few hundred KB on wide layers).
    if cout <= 256:
        co_blk = cout
    elif cout % 256 == 0:
        co_blk = 256
    elif cout % 128 == 0:
        co_blk = 128
    else:
        co_blk = cout
    nco = cout // co_blk

    in_item = xe.dtype.itemsize
    out_item = np.dtype(out_dtype).itemsize
    w_blk_bytes = (co_blk * K * cin) * 2
    col = (2 * cin * in_item + 2 * co_blk * out_item + 4 * co_blk
           + (2 * K * cin if im2col else 2 * cin))
    tile_t = _choose_time_tile(span, 2 * w_blk_bytes, col, t_out)
    nt = _cdiv(t_out, tile_t)
    tile_in = tile_t + span
    need = (nt - 1) * tile_t + tile_in
    if need > Te:
        xe = jnp.pad(xe, ((0, 0), (0, 0), (0, need - Te)))
    xw = _gather_time_windows(xe, nt, tile_t, tile_in)     # [B, nt, Cin, tile_in]

    if im2col:
        kern = functools.partial(_conv_im2col_kernel, K=K, dil=dil, tile_t=tile_t,
                                 pre_leaky=pre_leaky)
        w_spec = pl.BlockSpec((co_blk, K * cin), lambda b, co, t: (co, 0))
    else:
        kern = functools.partial(_conv_taps_kernel, K=K, dil=dil, tile_t=tile_t,
                                 pre_leaky=pre_leaky)
        w_spec = pl.BlockSpec((K, co_blk, cin), lambda b, co, t: (0, co, 0))

    out = pl.pallas_call(
        kern,
        grid=(Bb, nco, nt),
        in_specs=[
            pl.BlockSpec((1, 1, cin, tile_in), lambda b, co, t: (b, t, 0, 0)),
            w_spec,
            pl.BlockSpec((co_blk, 1), lambda b, co, t: (co, 0)),
        ],
        out_specs=pl.BlockSpec((1, co_blk, tile_t), lambda b, co, t: (b, co, t)),
        out_shape=jax.ShapeDtypeStruct((Bb, cout, nt * tile_t), out_dtype),
        compiler_params=_cparams(3),
    )(xw, w, bias)
    return out[:, :, :t_out]


def _polyphase_geometry(K, s, p):
    c, base = [], []
    for r in range(s):
        cr = (K - 1 - p - r) % s
        br = (r + cr + p - (K - 1)) // s    # exact division by construction
        c.append(cr)
        base.append(br)
    B0 = min(base)
    Km = [max(0, -(-(K - cr) // s)) for cr in c]
    M = max(Km[r] + base[r] - B0 for r in range(s))
    return B0, M, c, base


def upsample_prepped(x, wd, *, stride, K, padding):
    """ConvTranspose1d via polyphase: one stride-1 conv with phase-stacked taps."""
    Bb, _, T = x.shape
    s, p = stride, padding
    B0, M, _, _ = _polyphase_geometry(K, s, p)
    Tout = (T - 1) * s + K - 2 * p
    Tq = _cdiv(Tout, s)
    lo = -B0
    hi = (Tq + M - 1 + B0) - T
    y = conv1d_prepped(x, wd, dil=1, pad=(lo, hi), pre_leaky=True,
                       out_dtype=jnp.bfloat16)           # [B, s*cout, Tq]
    scout = y.shape[1]
    cout = scout // s
    y = y.reshape(Bb, s, cout, Tq)
    y = jnp.transpose(y, (0, 2, 3, 1)).reshape(Bb, cout, Tq * s)
    return y[:, :, :Tout]


def resblock_step(x, wd, *, dil):
    """Fused (LeakyReLU, dilated conv, LeakyReLU, 1x1 conv) + residual."""
    Bb, C, T = x.shape
    K = wd['w1'].shape[0]
    pad = dil * (K - 1) // 2
    span = 2 * pad
    w_bytes = (wd['w1'].size + wd['w2'].size) * 2
    col = 2 * C * x.dtype.itemsize + 2 * C * 2 + 12 * C
    tile_t = _choose_time_tile(span, 2 * w_bytes, col, T)
    nt = _cdiv(T, tile_t)
    tile_in = tile_t + span
    need = (nt - 1) * tile_t + tile_in
    xe = jnp.pad(x, ((0, 0), (0, 0), (pad, need - pad - T)))
    xw = _gather_time_windows(xe, nt, tile_t, tile_in)

    out = pl.pallas_call(
        functools.partial(_resblock_step_kernel, K=K, dil=dil, tile_t=tile_t),
        grid=(Bb, nt),
        in_specs=[
            pl.BlockSpec((1, 1, C, tile_in), lambda b, t: (b, t, 0, 0)),
            pl.BlockSpec((K, C, C), lambda b, t: (0, 0, 0)),
            pl.BlockSpec((C, 1), lambda b, t: (0, 0)),
            pl.BlockSpec((C, C), lambda b, t: (0, 0)),
            pl.BlockSpec((C, 1), lambda b, t: (0, 0)),
        ],
        out_specs=pl.BlockSpec((1, C, tile_t), lambda b, t: (b, 0, t)),
        out_shape=jax.ShapeDtypeStruct((Bb, C, nt * tile_t), x.dtype),
        compiler_params=_cparams(2),
    )(xw, wd['w1'], wd['b1'], wd['w2'], wd['b2'])
    return out[:, :, :T]


def epilogue(x, f0_up, pw, *, use_hnm):
    """Fused conv_post + tanh (+ HNM harmonic/noise/gate mix). Returns f32 [B,1,T]."""
    Bb, C, T = x.shape
    kp = pw['wp'].shape[1]
    pp = (kp - 1) // 2
    ext = (pw['wn'].shape[1] - 1) // 2 if use_hnm else 0
    pg = (pw['wg'].shape[1] - 1) // 2 if use_hnm else 0
    hx = pp + ext
    col = 2 * C * x.dtype.itemsize + 8 * C + 64
    tile_t = _choose_time_tile(2 * hx, 2 * 4096, col, T)
    nt = _cdiv(T, tile_t)
    tile_in = tile_t + 2 * hx
    need = (nt - 1) * tile_t + tile_in
    xe = jnp.pad(x, ((0, 0), (0, 0), (hx, need - hx - T)))
    xw = _gather_time_windows(xe, nt, tile_t, tile_in)

    args = [xw]
    in_specs = [pl.BlockSpec((1, 1, C, tile_in), lambda b, t: (b, t, 0, 0))]
    if use_hnm:
        tf = tile_t + 2 * pg
        needf = (nt - 1) * tile_t + tf
        f0e = jnp.pad(f0_up[:, None, :].astype(jnp.float32),
                      ((0, 0), (0, 0), (pg, needf - pg - T)))
        f0w = _gather_time_windows(f0e, nt, tile_t, tf)
        args.append(f0w)
        in_specs.append(pl.BlockSpec((1, 1, 1, tf), lambda b, t: (b, t, 0, 0)))

    def _const(shape):
        return pl.BlockSpec(shape, lambda b, t: (0, 0))

    args += [pw['wp'], pw['bp']]
    in_specs += [_const(pw['wp'].shape), _const((1, 1))]
    if use_hnm:
        for wn_, bn_ in (('wh', 'bh'), ('wn', 'bn'), ('wg', 'bg')):
            args += [pw[wn_], pw[bn_]]
            in_specs += [_const(pw[wn_].shape), _const((1, 1))]

    out = pl.pallas_call(
        functools.partial(_epilogue_kernel, tile_t=tile_t, t_valid=T, use_hnm=use_hnm),
        grid=(Bb, nt),
        in_specs=in_specs,
        out_specs=pl.BlockSpec((1, 1, tile_t), lambda b, t: (b, 0, t)),
        out_shape=jax.ShapeDtypeStruct((Bb, 1, nt * tile_t), jnp.float32),
        compiler_params=_cparams(2),
    )(*args)
    return out[:, :, :T]


# ------------------------------------------------------------------- params + preparation
def _kaiming_std(fan_in, a=NEG_SLOPE):
    return math.sqrt(2.0 / (1.0 + a * a)) / math.sqrt(fan_in)


def _init_conv(key, cout, cin, k):
    w = jax.random.normal(key, (cout, cin, k), jnp.float32) * _kaiming_std(cin * k)
    return w, jnp.zeros((cout,), jnp.float32)


def _init_convT(key, cin, cout, k):
    w = jax.random.normal(key, (cin, cout, k), jnp.float32) * _kaiming_std(cout * k)
    return w, jnp.zeros((cout,), jnp.float32)


def build_params(key, cfg):
    n_mels = cfg['n_mels']
    uic = cfg['upsample_initial_channel']
    ur, uk = cfg['upsample_rates'], cfg['upsample_kernel_sizes']
    rk, rd = cfg['resblock_kernel_sizes'], cfg['resblock_dilation_sizes']
    num = len(ur)
    ki = iter(jax.random.split(key, 256))
    params = {'conv_pre': _init_conv(next(ki), uic, n_mels, 7)}
    ups, mrfs = [], []
    for i, (u, k) in enumerate(zip(ur, uk)):
        cin = uic // 2 ** i
        cout = uic // 2 ** (i + 1) if i < num - 1 else uic // 2 ** i
        ups.append(_init_convT(next(ki), cin, cout, k))
        stage = []
        for ksz, dils in zip(rk, rd):
            blocks = []
            for _d in dils:
                blocks.append((_init_conv(next(ki), cout, cout, ksz),
                               _init_conv(next(ki), cout, cout, 1)))
            stage.append(blocks)
        mrfs.append(stage)
    params['ups'] = ups
    params['mrfs'] = mrfs
    post_in = uic // 2 ** (num - 1) if num > 0 else uic
    params['conv_post'] = _init_conv(next(ki), 1, post_in, 7)
    params['harmonic_conv'] = _init_conv(next(ki), 1, 1, 7)
    params['noise_conv'] = _init_conv(next(ki), 1, 1, 31)
    params['harmonic_gate'] = _init_conv(next(ki), 1, 1, 3)
    return params


def _prep_conv(w, b):
    cout, cin, K = w.shape
    if cin < 128 and cin % 8 == 0 and K * cin <= 2048:
        wp = jnp.transpose(w, (0, 2, 1)).reshape(cout, K * cin).astype(jnp.bfloat16)
    else:
        wp = jnp.transpose(w, (2, 0, 1)).astype(jnp.bfloat16)
    return {'w': wp, 'b': b.reshape(-1, 1).astype(jnp.float32)}


def _prep_res_step(step):
    (w1, b1), (w2, b2) = step
    return {'w1': jnp.transpose(w1, (2, 0, 1)).astype(jnp.bfloat16),
            'b1': b1.reshape(-1, 1).astype(jnp.float32),
            'w2': w2[:, :, 0].astype(jnp.bfloat16),
            'b2': b2.reshape(-1, 1).astype(jnp.float32)}


def _prep_upsample(w_pt, b, s, K, p):
    cin, cout, _ = w_pt.shape
    wf = jnp.transpose(w_pt, (1, 0, 2))[:, :, ::-1]            # flipped conv weight
    B0, M, c, base = _polyphase_geometry(K, s, p)
    W = jnp.zeros((s, cout, cin, M), w_pt.dtype)
    for r in range(s):
        taps = wf[:, :, c[r]::s]                                # phase-subsampled taps
        off = base[r] - B0
        W = W.at[r, :, :, off:off + taps.shape[-1]].set(taps)
    Wst = W.reshape(s * cout, cin, M)
    bst = jnp.tile(b, s)
    return _prep_conv(Wst, bst)


def prepare_params(params, cfg):
    """One-time weight layout transforms + bf16 casts (kept outside jit)."""
    p = {'conv_pre': _prep_conv(*params['conv_pre'])}
    p['ups'] = [_prep_upsample(w, b, u, k, (k - u) // 2)
                for (w, b), u, k in zip(params['ups'], cfg['upsample_rates'],
                                        cfg['upsample_kernel_sizes'])]
    p['mrfs'] = [[[_prep_res_step(step) for step in blocks] for blocks in stage]
                 for stage in params['mrfs']]
    wpo, bpo = params['conv_post']
    wh, bh = params['harmonic_conv']
    wn, bn = params['noise_conv']
    wg, bg = params['harmonic_gate']
    p['post_hnm'] = {
        'wp': wpo[0].astype(jnp.float32), 'bp': bpo.reshape(1, 1).astype(jnp.float32),
        'wh': wh[0].astype(jnp.float32), 'bh': bh.reshape(1, 1).astype(jnp.float32),
        'wn': wn[0].astype(jnp.float32), 'bn': bn.reshape(1, 1).astype(jnp.float32),
        'wg': wg[0].astype(jnp.float32), 'bg': bg.reshape(1, 1).astype(jnp.float32),
    }
    return p


# --------------------------------------------------------------------------------- glue
def linear_interpolate(f0, t_out):
    """Matches F.interpolate(f0[:,None,:], size=t_out, mode='linear', align_corners=False)."""
    _, t_in = f0.shape
    scale = t_in / t_out
    pos = (jnp.arange(t_out, dtype=jnp.float32) + 0.5) * scale - 0.5
    pos = jnp.clip(pos, 0.0, float(t_in - 1))
    i0 = jnp.floor(pos).astype(jnp.int32)
    i1 = jnp.minimum(i0 + 1, t_in - 1)
    frac = pos - i0.astype(jnp.float32)
    return f0[:, i0] * (1.0 - frac) + f0[:, i1] * frac


def hifigan_forward(prepped, mel, f0, *, cfg):
    """HiFiGANVocoder.forward == Generator.forward.  mel: [B, n_mels, T], f0: [B, T] or None."""
    ur, uk = cfg['upsample_rates'], cfg['upsample_kernel_sizes']
    rd = cfg['resblock_dilation_sizes']

    x = conv1d_prepped(mel, prepped['conv_pre'], dil=1, pad=(3, 3),
                       pre_leaky=False, out_dtype=jnp.bfloat16)
    for i, (u, k) in enumerate(zip(ur, uk)):
        # F.leaky_relu is fused into the (polyphase) upsample kernel.
        x = upsample_prepped(x, prepped['ups'][i], stride=u, K=k, padding=(k - u) // 2)
        out = None
        for j, dils in enumerate(rd):
            h = x
            for l, d in enumerate(dils):
                h = resblock_step(h, prepped['mrfs'][i][j][l], dil=d)
            out = h.astype(jnp.float32) if out is None else out + h.astype(jnp.float32)
        x = (out / float(len(rd))).astype(jnp.bfloat16)

    f0_up = linear_interpolate(f0.astype(jnp.float32), x.shape[-1]) if f0 is not None else None
    return epilogue(x, f0_up, prepped['post_hnm'], use_hnm=(f0 is not None))


# TODO(synk): MPD/MSD discriminators and loss helpers are training-only (not part of
# Generator.forward) and are not implemented here.


# ----------------------------------------------------------- pure-JAX reference (self-check)
def reference_forward(params, mel, f0, *, cfg):
    ur, uk = cfg['upsample_rates'], cfg['upsample_kernel_sizes']
    rk, rd = cfg['resblock_kernel_sizes'], cfg['resblock_dilation_sizes']
    dn = ('NCH', 'OIH', 'NCH')
    hp = jax.lax.Precision.HIGHEST

    def lrelu(v):
        return jnp.where(v >= 0, v, NEG_SLOPE * v)

    def conv(x, w, b, *, dil=1, pad=0, pre=False):
        xf = x.astype(jnp.float32)
        if pre:
            xf = lrelu(xf)
        y = jax.lax.conv_general_dilated(
            xf.astype(jnp.bfloat16), w.astype(jnp.bfloat16), (1,), [(pad, pad)],
            rhs_dilation=(dil,), dimension_numbers=dn,
            preferred_element_type=jnp.float32)
        return y + b[None, :, None]

    def convT(x, w_pt, b, *, stride, pad, pre=False):
        K = w_pt.shape[-1]
        xf = x.astype(jnp.float32)
        if pre:
            xf = lrelu(xf)
        wf = jnp.transpose(w_pt, (1, 0, 2))[:, :, ::-1]
        y = jax.lax.conv_general_dilated(
            xf.astype(jnp.bfloat16), wf.astype(jnp.bfloat16), (1,),
            [(K - 1 - pad, K - 1 - pad)], lhs_dilation=(stride,),
            dimension_numbers=dn, preferred_element_type=jnp.float32)
        return y + b[None, :, None]

    w, b = params['conv_pre']
    x = conv(mel, w, b, pad=3).astype(jnp.bfloat16)
    for i, (u, k) in enumerate(zip(ur, uk)):
        wt, bt = params['ups'][i]
        x = convT(x, wt, bt, stride=u, pad=(k - u) // 2, pre=True).astype(jnp.bfloat16)
        out = None
        for j, (ksz, dils) in enumerate(zip(rk, rd)):
            h = x
            for l, d in enumerate(dils):
                (w1, b1), (w2, b2) = params['mrfs'][i][j][l]
                hf = h.astype(jnp.float32)
                t = conv(h, w1, b1, dil=d, pad=(ksz * d - d) // 2, pre=True)
                u2 = lrelu(t)
                v = conv(u2, w2, b2)
                h = (v + hf).astype(jnp.bfloat16)
            out = h.astype(jnp.float32) if out is None else out + h.astype(jnp.float32)
        x = (out / float(len(rk))).astype(jnp.bfloat16)

    wpo, bpo = params['conv_post']
    xf = lrelu(x.astype(jnp.float32))
    y = jax.lax.conv_general_dilated(xf, wpo, (1,), [(3, 3)], dimension_numbers=dn,
                                     precision=hp) + bpo[None, :, None]
    y = jnp.tanh(y)
    if f0 is not None:
        f0u = linear_interpolate(f0.astype(jnp.float32), y.shape[-1])[:, None, :]
        wh, bh = params['harmonic_conv']
        wn, bn = params['noise_conv']
        wg, bg = params['harmonic_gate']
        harm = jax.lax.conv_general_dilated(y, wh, (1,), [(3, 3)], dimension_numbers=dn,
                                            precision=hp) + bh[None, :, None]
        noise = jax.lax.conv_general_dilated(y, wn, (1,), [(15, 15)], dimension_numbers=dn,
                                             precision=hp) + bn[None, :, None]
        gate = jax.nn.sigmoid(
            jax.lax.conv_general_dilated(f0u, wg, (1,), [(1, 1)], dimension_numbers=dn,
                                         precision=hp) + bg[None, :, None])
        y = harm * gate + noise * (1.0 - gate)
    return y


# --------------------------------------------------------------------------------- main
if __name__ == "__main__":
    cfg = {
        'n_mels': 16,
        'upsample_initial_channel': 32,
        'upsample_rates': [2, 2],
        'upsample_kernel_sizes': [4, 4],
        'resblock_kernel_sizes': [3, 7, 11],
        'resblock_dilation_sizes': [[1, 3, 5], [1, 3, 5], [1, 3, 5]],
    }
    key = jax.random.PRNGKey(0)
    kparam, kmel, kf0 = jax.random.split(key, 3)
    params = build_params(kparam, cfg)
    prepped = prepare_params(params, cfg)

    B, T = 2, 8
    mel = jax.random.normal(kmel, (B, cfg['n_mels'], T), jnp.float32)     # [B, n_mels, T]
    f0 = 100.0 + 50.0 * jax.random.uniform(kf0, (B, T), jnp.float32)      # [B, T]

    fwd = jax.jit(functools.partial(hifigan_forward, cfg=cfg))
    wav = fwd(prepped, mel, f0)
    jax.block_until_ready(wav)

    expected_T = T
    for r in cfg['upsample_rates']:
        expected_T *= r
    assert wav.shape == (B, 1, expected_T), wav.shape
    assert bool(jnp.all(jnp.isfinite(wav)))

    # Numerical self-check against a pure-JAX reference with the same dtype handling.
    ref = jax.jit(functools.partial(reference_forward, cfg=cfg))(params, mel, f0)
    jax.block_until_ready(ref)
    err = float(jnp.max(jnp.abs(wav - ref)))
    assert err < 2e-2, f"max abs err vs reference: {err}"

    print("KERNEL_OK")
</pallas_src>

<mosaic_0001>
module attributes {stable_mosaic.version = 11 : i64} {
  func.func @_conv_im2col_kernel(%arg0: i32, %arg1: i32, %arg2: i32, %arg3: memref<1x1x16x134xf32, #tpu.memory_space<vmem>>, %arg4: memref<32x112xbf16, #tpu.memory_space<vmem>>, %arg5: memref<32x1xf32, #tpu.memory_space<vmem>>, %arg6: memref<1x32x128xbf16, #tpu.memory_space<vmem>>) attributes {dimension_semantics = [#tpu.dimension_semantics<parallel>, #tpu.dimension_semantics<parallel>, #tpu.dimension_semantics<parallel>], iteration_bounds = array<i64: 2, 1, 1>, scalar_prefetch = 0 : i64, scratch_operands = 0 : i64, tpu.core_type = #tpu.core_type<tc>, window_params = [{transform_indices = @transform_0, window_bounds = array<i64: 1, 1, 16, 134>}, {transform_indices = @transform_1, window_bounds = array<i64: 32, 112>}, {transform_indices = @transform_2, window_bounds = array<i64: 32, 1>}, {transform_indices = @transform_3, window_bounds = array<i64: 1, 32, 128>}]} {
    %c0 = arith.constant 0 : index
    %c0_0 = arith.constant 0 : index
    %c0_1 = arith.constant 0 : index
    %c0_2 = arith.constant 0 : index
    %0 = vector.load %arg3[%c0, %c0_0, %c0_1, %c0_2] : memref<1x1x16x134xf32, #tpu.memory_space<vmem>>, vector<1x1x16x134xf32>
    %1 = vector.shape_cast %0 : vector<1x1x16x134xf32> to vector<16x134xf32>
    %2 = arith.truncf %1 : vector<16x134xf32> to vector<16x134xbf16>
    %3 = vector.extract_strided_slice %2 {offsets = [0, 0], sizes = [16, 128], strides = [1, 1]} : vector<16x134xbf16> to vector<16x128xbf16>
    %4 = vector.extract_strided_slice %2 {offsets = [0, 1], sizes = [16, 128], strides = [1, 1]} : vector<16x134xbf16> to vector<16x128xbf16>
    %5 = vector.extract_strided_slice %2 {offsets = [0, 2], sizes = [16, 128], strides = [1, 1]} : vector<16x134xbf16> to vector<16x128xbf16>
    %6 = vector.extract_strided_slice %2 {offsets = [0, 3], sizes = [16, 128], strides = [1, 1]} : vector<16x134xbf16> to vector<16x128xbf16>
    %7 = vector.extract_strided_slice %2 {offsets = [0, 4], sizes = [16, 128], strides = [1, 1]} : vector<16x134xbf16> to vector<16x128xbf16>
    %8 = vector.extract_strided_slice %2 {offsets = [0, 5], sizes = [16, 128], strides = [1, 1]} : vector<16x134xbf16> to vector<16x128xbf16>
    %9 = vector.extract_strided_slice %2 {offsets = [0, 6], sizes = [16, 128], strides = [1, 1]} : vector<16x134xbf16> to vector<16x128xbf16>
    %10 = tpu.concatenate %3, %4, %5, %6, %7, %8, %9 in 0 : vector<16x128xbf16>, vector<16x128xbf16>, vector<16x128xbf16>, vector<16x128xbf16>, vector<16x128xbf16>, vector<16x128xbf16>, vector<16x128xbf16> -> vector<112x128xbf16>
    %c0_3 = arith.constant 0 : index
    %c0_4 = arith.constant 0 : index
    %11 = vector.load %arg4[%c0_3, %c0_4] : memref<32x112xbf16, #tpu.memory_space<vmem>>, vector<32x112xbf16>
    %cst = arith.constant dense<0.000000e+00> : vector<32x128xf32>
    %12 = tpu.matmul %11, %10, %cst {dimension_numbers = #tpu.dot_dimension_numbers<[1], [0], [0], [1], [0, 0, 1, 1], [], []>} : vector<32x112xbf16>, vector<112x128xbf16>, vector<32x128xf32> -> vector<32x128xf32>
    %c0_5 = arith.constant 0 : index
    %c0_6 = arith.constant 0 : index
    %13 = vector.load %arg5[%c0_5, %c0_6] : memref<32x1xf32, #tpu.memory_space<vmem>>, vector<32x1xf32>
    %14 = vector.broadcast %13 : vector<32x1xf32> to vector<32x128xf32>
    %15 = arith.addf %12, %14 : vector<32x128xf32>
    %16 = arith.truncf %15 : vector<32x128xf32> to vector<32x128xbf16>
    %c0_7 = arith.constant 0 : index
    %c0_8 = arith.constant 0 : index
    %c0_9 = arith.constant 0 : index
    %17 = vector.load %arg6[%c0_7, %c0_8, %c0_9] : memref<1x32x128xbf16, #tpu.memory_space<vmem>>, vector<1x32x128xbf16>
    %18 = vector.shape_cast %17 : vector<1x32x128xbf16> to vector<32x128xbf16>
    %19 = vector.shape_cast %16 : vector<32x128xbf16> to vector<1x32x128xbf16>
    tpu.vector_store %arg6[%c0_7, %c0_8, %c0_9], %19 {strides = array<i32>} : memref<1x32x128xbf16, #tpu.memory_space<vmem>>, vector<1x32x128xbf16>,
    return
  }
  func.func @transform_0(%arg0: i32, %arg1: i32, %arg2: i32) -> (i32, i32, i32, i32) {
    %c0_i32 = arith.constant 0 : i32
    %c0_i32_0 = arith.constant 0 : i32
    %c0_i32_1 = arith.constant 0 : i32
    return %arg0, %arg2, %c0_i32, %c0_i32_0 : i32, i32, i32, i32
  }
  func.func @transform_1(%arg0: i32, %arg1: i32, %arg2: i32) -> (i32, i32) {
    %c0_i32 = arith.constant 0 : i32
    %c0_i32_0 = arith.constant 0 : i32
    return %arg1, %c0_i32 : i32, i32
  }
  func.func @transform_2(%arg0: i32, %arg1: i32, %arg2: i32) -> (i32, i32) {
    %c0_i32 = arith.constant 0 : i32
    %c0_i32_0 = arith.constant 0 : i32
    return %arg1, %c0_i32 : i32, i32
  }
  func.func @transform_3(%arg0: i32, %arg1: i32, %arg2: i32) -> (i32, i32, i32) {
    %c0_i32 = arith.constant 0 : i32
    return %arg0, %arg1, %arg2 : i32, i32, i32
  }
}

module attributes {stable_mosaic.version = 11 : i64} {
  func.func @_conv_im2col_kernel(%arg0: i32, %arg1: i32, %arg2: i32, %arg3: memref<1x1x32x130xbf16, #tpu.memory_space<vmem>>, %arg4: memref<32x96xbf16, #tpu.memory_space<vmem>>, %arg5: memref<32x1xf32, #tpu.memory_space<vmem>>, %arg6: memref<1x32x128xbf16, #tpu.memory_space<vmem>>) attributes {dimension_semantics = [#tpu.dimension_semantics<parallel>, #tpu.dimension_semantics<parallel>, #tpu.dimension_semantics<parallel>], iteration_bounds = array<i64: 2, 1, 1>, scalar_prefetch = 0 : i64, scratch_operands = 0 : i64, tpu.core_type = #tpu.core_type<tc>, window_params = [{transform_indices = @transform_0, window_bounds = array<i64: 1, 1, 32, 130>}, {transform_indices = @transform_1, window_bounds = array<i64: 32, 96>}, {transform_indices = @transform_2, window_bounds = array<i64: 32, 1>}, {transform_indices = @transform_3, window_bounds = array<i64: 1, 32, 128>}]} {
    %c0 = arith.constant 0 : index
    %c0_0 = arith.constant 0 : index
    %c0_1 = arith.constant 0 : index
    %c0_2 = arith.constant 0 : index
    %0 = vector.load %arg3[%c0, %c0_0, %c0_1, %c0_2] : memref<1x1x32x130xbf16, #tpu.memory_space<vmem>>, vector<1x1x32x130xbf16>
    %1 = vector.shape_cast %0 : vector<1x1x32x130xbf16> to vector<32x130xbf16>
    %2 = arith.extf %1 : vector<32x130xbf16> to vector<32x130xf32>
    %cst = arith.constant 0.000000e+00 : f32
    %3 = vector.broadcast %cst : f32 to vector<32x130xf32>
    %4 = arith.cmpf oge, %2, %3 : vector<32x130xf32>
    %cst_3 = arith.constant 1.000000e-01 : f32
    %5 = vector.broadcast %cst_3 : f32 to vector<32x130xf32>
    %6 = arith.mulf %5, %2 : vector<32x130xf32>
    %7 = arith.select %4, %2, %6 : vector<32x130xi1>, vector<32x130xf32>
    %8 = arith.truncf %7 : vector<32x130xf32> to vector<32x130xbf16>
    %9 = vector.extract_strided_slice %8 {offsets = [0, 0], sizes = [32, 128], strides = [1, 1]} : vector<32x130xbf16> to vector<32x128xbf16>
    %10 = vector.extract_strided_slice %8 {offsets = [0, 1], sizes = [32, 128], strides = [1, 1]} : vector<32x130xbf16> to vector<32x128xbf16>
    %11 = vector.extract_strided_slice %8 {offsets = [0, 2], sizes = [32, 128], strides = [1, 1]} : vector<32x130xbf16> to vector<32x128xbf16>
    %12 = tpu.concatenate %9, %10, %11 in 0 : vector<32x128xbf16>, vector<32x128xbf16>, vector<32x128xbf16> -> vector<96x128xbf16>
    %c0_4 = arith.constant 0 : index
    %c0_5 = arith.constant 0 : index
    %13 = vector.load %arg4[%c0_4, %c0_5] : memref<32x96xbf16, #tpu.memory_space<vmem>>, vector<32x96xbf16>
    %cst_6 = arith.constant dense<0.000000e+00> : vector<32x128xf32>
    %14 = tpu.matmul %13, %12, %cst_6 {dimension_numbers = #tpu.dot_dimension_numbers<[1], [0], [0], [1], [0, 0, 1, 1], [], []>} : vector<32x96xbf16>, vector<96x128xbf16>, vector<32x128xf32> -> vector<32x128xf32>
    %c0_7 = arith.constant 0 : index
    %c0_8 = arith.constant 0 : index
    %15 = vector.load %arg5[%c0_7, %c0_8] : memref<32x1xf32, #tpu.memory_space<vmem>>, vector<32x1xf32>
    %16 = vector.broadcast %15 : vector<32x1xf32> to vector<32x128xf32>
    %17 = arith.addf %14, %16 : vector<32x128xf32>
    %18 = arith.truncf %17 : vector<32x128xf32> to vector<32x128xbf16>
    %c0_9 = arith.constant 0 : index
    %c0_10 = arith.constant 0 : index
    %c0_11 = arith.constant 0 : index
    %19 = vector.load %arg6[%c0_9, %c0_10, %c0_11] : memref<1x32x128xbf16, #tpu.memory_space<vmem>>, vector<1x32x128xbf16>
    %20 = vector.shape_cast %19 : vector<1x32x128xbf16> to vector<32x128xbf16>
    %21 = vector.shape_cast %18 : vector<32x128xbf16> to vector<1x32x128xbf16>
    tpu.vector_store %arg6[%c0_9, %c0_10, %c0_11], %21 {strides = array<i32>} : memref<1x32x128xbf16, #tpu.memory_space<vmem>>, vector<1x32x128xbf16>,
    return
  }
  func.func @transform_0(%arg0: i32, %arg1: i32, %arg2: i32) -> (i32, i32, i32, i32) {
    %c0_i32 = arith.constant 0 : i32
    %c0_i32_0 = arith.constant 0 : i32
    %c0_i32_1 = arith.constant 0 : i32
    return %arg0, %arg2, %c0_i32, %c0_i32_0 : i32, i32, i32, i32
  }
  func.func @transform_1(%arg0: i32, %arg1: i32, %arg2: i32) -> (i32, i32) {
    %c0_i32 = arith.constant 0 : i32
    %c0_i32_0 = arith.constant 0 : i32
    return %arg1, %c0_i32 : i32, i32
  }
  func.func @transform_2(%arg0: i32, %arg1: i32, %arg2: i32) -> (i32, i32) {
    %c0_i32 = arith.constant 0 : i32
    %c0_i32_0 = arith.constant 0 : i32
    return %arg1, %c0_i32 : i32, i32
  }
  func.func @transform_3(%arg0: i32, %arg1: i32, %arg2: i32) -> (i32, i32, i32) {
    %c0_i32 = arith.constant 0 : i32
    return %arg0, %arg1, %arg2 : i32, i32, i32
  }
}

module attributes {stable_mosaic.version = 11 : i64} {
  func.func @_resblock_step_kernel(%arg0: i32, %arg1: i32, %arg2: memref<1x1x16x130xbf16, #tpu.memory_space<vmem>>, %arg3: memref<3x16x16xbf16, #tpu.memory_space<vmem>>, %arg4: memref<16x1xf32, #tpu.memory_space<vmem>>, %arg5: memref<16x16xbf16, #tpu.memory_space<vmem>>, %arg6: memref<16x1xf32, #tpu.memory_space<vmem>>, %arg7: memref<1x16x128xbf16, #tpu.memory_space<vmem>>) attributes {dimension_semantics = [#tpu.dimension_semantics<parallel>, #tpu.dimension_semantics<parallel>], iteration_bounds = array<i64: 2, 1>, scalar_prefetch = 0 : i64, scratch_operands = 0 : i64, tpu.core_type = #tpu.core_type<tc>, window_params = [{transform_indices = @transform_0, window_bounds = array<i64: 1, 1, 16, 130>}, {pipeline_mode = #tpu.pipeline_mode<synchronous>, transform_indices = @transform_1, window_bounds = array<i64: 3, 16, 16>}, {pipeline_mode = #tpu.pipeline_mode<synchronous>, transform_indices = @transform_2, window_bounds = array<i64: 16, 1>}, {pipeline_mode = #tpu.pipeline_mode<synchronous>, transform_indices = @transform_3, window_bounds = array<i64: 16, 16>}, {pipeline_mode = #tpu.pipeline_mode<synchronous>, transform_indices = @transform_4, window_bounds = array<i64: 16, 1>}, {transform_indices = @transform_5, window_bounds = array<i64: 1, 16, 128>}]} {
    %c0 = arith.constant 0 : index
    %c0_0 = arith.constant 0 : index
    %c0_1 = arith.constant 0 : index
    %c0_2 = arith.constant 0 : index
    %0 = vector.load %arg2[%c0, %c0_0, %c0_1, %c0_2] : memref<1x1x16x130xbf16, #tpu.memory_space<vmem>>, vector<1x1x16x130xbf16>
    %1 = vector.shape_cast %0 : vector<1x1x16x130xbf16> to vector<16x130xbf16>
    %2 = arith.extf %1 : vector<16x130xbf16> to vector<16x130xf32>
    %cst = arith.constant 0.000000e+00 : f32
    %3 = vector.broadcast %cst : f32 to vector<16x130xf32>
    %4 = arith.cmpf oge, %2, %3 : vector<16x130xf32>
    %cst_3 = arith.constant 1.000000e-01 : f32
    %5 = vector.broadcast %cst_3 : f32 to vector<16x130xf32>
    %6 = arith.mulf %5, %2 : vector<16x130xf32>
    %7 = arith.select %4, %2, %6 : vector<16x130xi1>, vector<16x130xf32>
    %8 = arith.truncf %7 : vector<16x130xf32> to vector<16x130xbf16>
    %cst_4 = arith.constant 0.000000e+00 : f32
    %9 = vector.broadcast %cst_4 : f32 to vector<16x128xf32>
    %c0_5 = arith.constant 0 : index
    %c0_6 = arith.constant 0 : index
    %c0_7 = arith.constant 0 : index
    %10 = vector.load %arg3[%c0_5, %c0_6, %c0_7] : memref<3x16x16xbf16, #tpu.memory_space<vmem>>, vector<1x16x16xbf16>
    %11 = vector.shape_cast %10 : vector<1x16x16xbf16> to vector<16x16xbf16>
    %12 = vector.extract_strided_slice %8 {offsets = [0, 0], sizes = [16, 128], strides = [1, 1]} : vector<16x130xbf16> to vector<16x128xbf16>
    %cst_8 = arith.constant dense<0.000000e+00> : vector<16x128xf32>
    %13 = tpu.matmul %11, %12, %cst_8 {dimension_numbers = #tpu.dot_dimension_numbers<[1], [0], [0], [1], [0, 0, 1, 1], [], []>} : vector<16x16xbf16>, vector<16x128xbf16>, vector<16x128xf32> -> vector<16x128xf32>
    %14 = arith.addf %9, %13 : vector<16x128xf32>
    %c1 = arith.constant 1 : index
    %c0_9 = arith.constant 0 : index
    %c0_10 = arith.constant 0 : index
    %15 = vector.load %arg3[%c1, %c0_9, %c0_10] : memref<3x16x16xbf16, #tpu.memory_space<vmem>>, vector<1x16x16xbf16>
    %16 = vector.shape_cast %15 : vector<1x16x16xbf16> to vector<16x16xbf16>
    %17 = vector.extract_strided_slice %8 {offsets = [0, 1], sizes = [16, 128], strides = [1, 1]} : vector<16x130xbf16> to vector<16x128xbf16>
    %cst_11 = arith.constant dense<0.000000e+00> : vector<16x128xf32>
    %18 = tpu.matmul %16, %17, %cst_11 {dimension_numbers = #tpu.dot_dimension_numbers<[1], [0], [0], [1], [0, 0, 1, 1], [], []>} : vector<16x16xbf16>, vector<16x128xbf16>, vector<16x128xf32> -> vector<16x128xf32>
    %19 = arith.addf %14, %18 : vector<16x128xf32>
    %c2 = arith.constant 2 : index
    %c0_12 = arith.constant 0 : index
    %c0_13 = arith.constant 0 : index
    %20 = vector.load %arg3[%c2, %c0_12, %c0_13] : memref<3x16x16xbf16, #tpu.memory_space<vmem>>, vector<1x16x16xbf16>
    %21 = vector.shape_cast %20 : vector<1x16x16xbf16> to vector<16x16xbf16>
    %22 = vector.extract_strided_slice %8 {offsets = [0, 2], sizes = [16, 128], strides = [1, 1]} : vector<16x130xbf16> to vector<16x128xbf16>
    %cst_14 = arith.constant dense<0.000000e+00> : vector<16x128xf32>
    %23 = tpu.matmul %21, %22, %cst_14 {dimension_numbers = #tpu.dot_dimension_numbers<[1], [0], [0], [1], [0, 0, 1, 1], [], []>} : vector<16x16xbf16>, vector<16x128xbf16>, vector<16x128xf32> -> vector<16x128xf32>
    %24 = arith.addf %19, %23 : vector<16x128xf32>
    %c0_15 = arith.constant 0 : index
    %c0_16 = arith.constant 0 : index
    %25 = vector.load %arg4[%c0_15, %c0_16] : memref<16x1xf32, #tpu.memory_space<vmem>>, vector<16x1xf32>
    %26 = vector.broadcast %25 : vector<16x1xf32> to vector<16x128xf32>
    %27 = arith.addf %24, %26 : vector<16x128xf32>
    %cst_17 = arith.constant 0.000000e+00 : f32
    %28 = vector.broadcast %cst_17 : f32 to vector<16x128xf32>
    %29 = arith.cmpf oge, %27, %28 : vector<16x128xf32>
    %cst_18 = arith.constant 1.000000e-01 : f32
    %30 = vector.broadcast %cst_18 : f32 to vector<16x128xf32>
    %31 = arith.mulf %30, %27 : vector<16x128xf32>
    %32 = arith.select %29, %27, %31 : vector<16x128xi1>, vector<16x128xf32>
    %33 = arith.truncf %32 : vector<16x128xf32> to vector<16x128xbf16>
    %c0_19 = arith.constant 0 : index
    %c0_20 = arith.constant 0 : index
    %34 = vector.load %arg5[%c0_19, %c0_20] : memref<16x16xbf16, #tpu.memory_space<vmem>>, vector<16x16xbf16>
    %cst_21 = arith.constant dense<0.000000e+00> : vector<16x128xf32>
    %35 = tpu.matmul %34, %33, %cst_21 {dimension_numbers = #tpu.dot_dimension_numbers<[1], [0], [0], [1], [0, 0, 1, 1], [], []>} : vector<16x16xbf16>, vector<16x128xbf16>, vector<16x128xf32> -> vector<16x128xf32>
    %c0_22 = arith.constant 0 : index
    %c0_23 = arith.constant 0 : index
    %36 = vector.load %arg6[%c0_22, %c0_23] : memref<16x1xf32, #tpu.memory_space<vmem>>, vector<16x1xf32>
    %37 = vector.broadcast %36 : vector<16x1xf32> to vector<16x128xf32>
    %38 = arith.addf %35, %37 : vector<16x128xf32>
    %39 = vector.extract_strided_slice %2 {offsets = [0, 1], sizes = [16, 128], strides = [1, 1]} : vector<16x130xf32> to vector<16x128xf32>
    %40 = arith.addf %38, %39 : vector<16x128xf32>
    %41 = arith.truncf %40 : vector<16x128xf32> to vector<16x128xbf16>
    %c0_24 = arith.constant 0 : index
    %c0_25 = arith.constant 0 : index
    %c0_26 = arith.constant 0 : index
    %42 = vector.load %arg7[%c0_24, %c0_25, %c0_26] : memref<1x16x128xbf16, #tpu.memory_space<vmem>>, vector<1x16x128xbf16>
    %43 = vector.shape_cast %42 : vector<1x16x128xbf16> to vector<16x128xbf16>
    %44 = vector.shape_cast %41 : vector<16x128xbf16> to vector<1x16x128xbf16>
    tpu.vector_store %arg7[%c0_24, %c0_25, %c0_26], %44 {strides = array<i32>} : memref<1x16x128xbf16, #tpu.memory_space<vmem>>, vector<1x16x128xbf16>,
    return
  }
  func.func @transform_0(%arg0: i32, %arg1: i32) -> (i32, i32, i32, i32) {
    %c0_i32 = arith.constant 0 : i32
    %c0_i32_0 = arith.constant 0 : i32
    %c0_i32_1 = arith.constant 0 : i32
    return %arg0, %arg1, %c0_i32, %c0_i32_0 : i32, i32, i32, i32
  }
  func.func @transform_1(%arg0: i32, %arg1: i32) -> (i32, i32, i32) {
    %c0_i32 = arith.constant 0 : i32
    %c0_i32_0 = arith.constant 0 : i32
    %c0_i32_1 = arith.constant 0 : i32
    %c0_i32_2 = arith.constant 0 : i32
    return %c0_i32, %c0_i32_0, %c0_i32_1 : i32, i32, i32
  }
  func.func @transform_2(%arg0: i32, %arg1: i32) -> (i32, i32) {
    %c0_i32 = arith.constant 0 : i32
    %c0_i32_0 = arith.constant 0 : i32
    %c0_i32_1 = arith.constant 0 : i32
    return %c0_i32, %c0_i32_0 : i32, i32
  }
  func.func @transform_3(%arg0: i32, %arg1: i32) -> (i32, i32) {
    %c0_i32 = arith.constant 0 : i32
    %c0_i32_0 = arith.constant 0 : i32
    %c0_i32_1 = arith.constant 0 : i32
    return %c0_i32, %c0_i32_0 : i32, i32
  }
  func.func @transform_4(%arg0: i32, %arg1: i32) -> (i32, i32) {
    %c0_i32 = arith.constant 0 : i32
    %c0_i32_0 = arith.constant 0 : i32
    %c0_i32_1 = arith.constant 0 : i32
    return %c0_i32, %c0_i32_0 : i32, i32
  }
  func.func @transform_5(%arg0: i32, %arg1: i32) -> (i32, i32, i32) {
    %c0_i32 = arith.constant 0 : i32
    %c0_i32_0 = arith.constant 0 : i32
    return %arg0, %c0_i32, %arg1 : i32, i32, i32
  }
}

module attributes {stable_mosaic.version = 11 : i64} {
  func.func @_resblock_step_kernel(%arg0: i32, %arg1: i32, %arg2: memref<1x1x16x134xbf16, #tpu.memory_space<vmem>>, %arg3: memref<3x16x16xbf16, #tpu.memory_space<vmem>>, %arg4: memref<16x1xf32, #tpu.memory_space<vmem>>, %arg5: memref<16x16xbf16, #tpu.memory_space<vmem>>, %arg6: memref<16x1xf32, #tpu.memory_space<vmem>>, %arg7: memref<1x16x128xbf16, #tpu.memory_space<vmem>>) attributes {dimension_semantics = [#tpu.dimension_semantics<parallel>, #tpu.dimension_semantics<parallel>], iteration_bounds = array<i64: 2, 1>, scalar_prefetch = 0 : i64, scratch_operands = 0 : i64, tpu.core_type = #tpu.core_type<tc>, window_params = [{transform_indices = @transform_0, window_bounds = array<i64: 1, 1, 16, 134>}, {pipeline_mode = #tpu.pipeline_mode<synchronous>, transform_indices = @transform_1, window_bounds = array<i64: 3, 16, 16>}, {pipeline_mode = #tpu.pipeline_mode<synchronous>, transform_indices = @transform_2, window_bounds = array<i64: 16, 1>}, {pipeline_mode = #tpu.pipeline_mode<synchronous>, transform_indices = @transform_3, window_bounds = array<i64: 16, 16>}, {pipeline_mode = #tpu.pipeline_mode<synchronous>, transform_indices = @transform_4, window_bounds = array<i64: 16, 1>}, {transform_indices = @transform_5, window_bounds = array<i64: 1, 16, 128>}]} {
    %c0 = arith.constant 0 : index
    %c0_0 = arith.constant 0 : index
    %c0_1 = arith.constant 0 : index
    %c0_2 = arith.constant 0 : index
    %0 = vector.load %arg2[%c0, %c0_0, %c0_1, %c0_2] : memref<1x1x16x134xbf16, #tpu.memory_space<vmem>>, vector<1x1x16x134xbf16>
    %1 = vector.shape_cast %0 : vector<1x1x16x134xbf16> to vector<16x134xbf16>
    %2 = arith.extf %1 : vector<16x134xbf16> to vector<16x134xf32>
    %cst = arith.constant 0.000000e+00 : f32
    %3 = vector.broadcast %cst : f32 to vector<16x134xf32>
    %4 = arith.cmpf oge, %2, %3 : vector<16x134xf32>
    %cst_3 = arith.constant 1.000000e-01 : f32
    %5 = vector.broadcast %cst_3 : f32 to vector<16x134xf32>
    %6 = arith.mulf %5, %2 : vector<16x134xf32>
    %7 = arith.select %4, %2, %6 : vector<16x134xi1>, vector<16x134xf32>
    %8 = arith.truncf %7 : vector<16x134xf32> to vector<16x134xbf16>
    %cst_4 = arith.constant 0.000000e+00 : f32
    %9 = vector.broadcast %cst_4 : f32 to vector<16x128xf32>
    %c0_5 = arith.constant 0 : index
    %c0_6 = arith.constant 0 : index
    %c0_7 = arith.constant 0 : index
    %10 = vector.load %arg3[%c0_5, %c0_6, %c0_7] : memref<3x16x16xbf16, #tpu.memory_space<vmem>>, vector<1x16x16xbf16>
    %11 = vector.shape_cast %10 : vector<1x16x16xbf16> to vector<16x16xbf16>
    %12 = vector.extract_strided_slice %8 {offsets = [0, 0], sizes = [16, 128], strides = [1, 1]} : vector<16x134xbf16> to vector<16x128xbf16>
    %cst_8 = arith.constant dense<0.000000e+00> : vector<16x128xf32>
    %13 = tpu.matmul %11, %12, %cst_8 {dimension_numbers = #tpu.dot_dimension_numbers<[1], [0], [0], [1], [0, 0, 1, 1], [], []>} : vector<16x16xbf16>, vector<16x128xbf16>, vector<16x128xf32> -> vector<16x128xf32>
    %14 = arith.addf %9, %13 : vector<16x128xf32>
    %c1 = arith.constant 1 : index
    %c0_9 = arith.constant 0 : index
    %c0_10 = arith.constant 0 : index
    %15 = vector.load %arg3[%c1, %c0_9, %c0_10] : memref<3x16x16xbf16, #tpu.memory_space<vmem>>, vector<1x16x16xbf16>
    %16 = vector.shape_cast %15 : vector<1x16x16xbf16> to vector<16x16xbf16>
    %17 = vector.extract_strided_slice %8 {offsets = [0, 3], sizes = [16, 128], strides = [1, 1]} : vector<16x134xbf16> to vector<16x128xbf16>
    %cst_11 = arith.constant dense<0.000000e+00> : vector<16x128xf32>
    %18 = tpu.matmul %16, %17, %cst_11 {dimension_numbers = #tpu.dot_dimension_numbers<[1], [0], [0], [1], [0, 0, 1, 1], [], []>} : vector<16x16xbf16>, vector<16x128xbf16>, vector<16x128xf32> -> vector<16x128xf32>
    %19 = arith.addf %14, %18 : vector<16x128xf32>
    %c2 = arith.constant 2 : index
    %c0_12 = arith.constant 0 : index
    %c0_13 = arith.constant 0 : index
    %20 = vector.load %arg3[%c2, %c0_12, %c0_13] : memref<3x16x16xbf16, #tpu.memory_space<vmem>>, vector<1x16x16xbf16>
    %21 = vector.shape_cast %20 : vector<1x16x16xbf16> to vector<16x16xbf16>
    %22 = vector.extract_strided_slice %8 {offsets = [0, 6], sizes = [16, 128], strides = [1, 1]} : vector<16x134xbf16> to vector<16x128xbf16>
    %cst_14 = arith.constant dense<0.000000e+00> : vector<16x128xf32>
    %23 = tpu.matmul %21, %22, %cst_14 {dimension_numbers = #tpu.dot_dimension_numbers<[1], [0], [0], [1], [0, 0, 1, 1], [], []>} : vector<16x16xbf16>, vector<16x128xbf16>, vector<16x128xf32> -> vector<16x128xf32>
    %24 = arith.addf %19, %23 : vector<16x128xf32>
    %c0_15 = arith.constant 0 : index
    %c0_16 = arith.constant 0 : index
    %25 = vector.load %arg4[%c0_15, %c0_16] : memref<16x1xf32, #tpu.memory_space<vmem>>, vector<16x1xf32>
    %26 = vector.broadcast %25 : vector<16x1xf32> to vector<16x128xf32>
    %27 = arith.addf %24, %26 : vector<16x128xf32>
    %cst_17 = arith.constant 0.000000e+00 : f32
    %28 = vector.broadcast %cst_17 : f32 to vector<16x128xf32>
    %29 = arith.cmpf oge, %27, %28 : vector<16x128xf32>
    %cst_18 = arith.constant 1.000000e-01 : f32
    %30 = vector.broadcast %cst_18 : f32 to vector<16x128xf32>
    %31 = arith.mulf %30, %27 : vector<16x128xf32>
    %32 = arith.select %29, %27, %31 : vector<16x128xi1>, vector<16x128xf32>
    %33 = arith.truncf %32 : vector<16x128xf32> to vector<16x128xbf16>
    %c0_19 = arith.constant 0 : index
    %c0_20 = arith.constant 0 : index
    %34 = vector.load %arg5[%c0_19, %c0_20] : memref<16x16xbf16, #tpu.memory_space<vmem>>, vector<16x16xbf16>
    %cst_21 = arith.constant dense<0.000000e+00> : vector<16x128xf32>
    %35 = tpu.matmul %34, %33, %cst_21 {dimension_numbers = #tpu.dot_dimension_numbers<[1], [0], [0], [1], [0, 0, 1, 1], [], []>} : vector<16x16xbf16>, vector<16x128xbf16>, vector<16x128xf32> -> vector<16x128xf32>
    %c0_22 = arith.constant 0 : index
    %c0_23 = arith.constant 0 : index
    %36 = vector.load %arg6[%c0_22, %c0_23] : memref<16x1xf32, #tpu.memory_space<vmem>>, vector<16x1xf32>
    %37 = vector.broadcast %36 : vector<16x1xf32> to vector<16x128xf32>
    %38 = arith.addf %35, %37 : vector<16x128xf32>
    %39 = vector.extract_strided_slice %2 {offsets = [0, 3], sizes = [16, 128], strides = [1, 1]} : vector<16x134xf32> to vector<16x128xf32>
    %40 = arith.addf %38, %39 : vector<16x128xf32>
    %41 = arith.truncf %40 : vector<16x128xf32> to vector<16x128xbf16>
    %c0_24 = arith.constant 0 : index
    %c0_25 = arith.constant 0 : index
    %c0_26 = arith.constant 0 : index
    %42 = vector.load %arg7[%c0_24, %c0_25, %c0_26] : memref<1x16x128xbf16, #tpu.memory_space<vmem>>, vector<1x16x128xbf16>
    %43 = vector.shape_cast %42 : vector<1x16x128xbf16> to vector<16x128xbf16>
    %44 = vector.shape_cast %41 : vector<16x128xbf16> to vector<1x16x128xbf16>
    tpu.vector_store %arg7[%c0_24, %c0_25, %c0_26], %44 {strides = array<i32>} : memref<1x16x128xbf16, #tpu.memory_space<vmem>>, vector<1x16x128xbf16>,
    return
  }
  func.func @transform_0(%arg0: i32, %arg1: i32) -> (i32, i32, i32, i32) {
    %c0_i32 = arith.constant 0 : i32
    %c0_i32_0 = arith.constant 0 : i32
    %c0_i32_1 = arith.constant 0 : i32
    return %arg0, %arg1, %c0_i32, %c0_i32_0 : i32, i32, i32, i32
  }
  func.func @transform_1(%arg0: i32, %arg1: i32) -> (i32, i32, i32) {
    %c0_i32 = arith.constant 0 : i32
    %c0_i32_0 = arith.constant 0 : i32
    %c0_i32_1 = arith.constant 0 : i32
    %c0_i32_2 = arith.constant 0 : i32
    return %c0_i32, %c0_i32_0, %c0_i32_1 : i32, i32, i32
  }
  func.func @transform_2(%arg0: i32, %arg1: i32) -> (i32, i32) {
    %c0_i32 = arith.constant 0 : i32
    %c0_i32_0 = arith.constant 0 : i32
    %c0_i32_1 = arith.constant 0 : i32
    return %c0_i32, %c0_i32_0 : i32, i32
  }
  func.func @transform_3(%arg0: i32, %arg1: i32) -> (i32, i32) {
    %c0_i32 = arith.constant 0 : i32
    %c0_i32_0 = arith.constant 0 : i32
    %c0_i32_1 = arith.constant 0 : i32
    return %c0_i32, %c0_i32_0 : i32, i32
  }
  func.func @transform_4(%arg0: i32, %arg1: i32) -> (i32, i32) {
    %c0_i32 = arith.constant 0 : i32
    %c0_i32_0 = arith.constant 0 : i32
    %c0_i32_1 = arith.constant 0 : i32
    return %c0_i32, %c0_i32_0 : i32, i32
  }
  func.func @transform_5(%arg0: i32, %arg1: i32) -> (i32, i32, i32) {
    %c0_i32 = arith.constant 0 : i32
    %c0_i32_0 = arith.constant 0 : i32
    return %arg0, %c0_i32, %arg1 : i32, i32, i32
  }
}

module attributes {stable_mosaic.version = 11 : i64} {
  func.func @_resblock_step_kernel(%arg0: i32, %arg1: i32, %arg2: memref<1x1x16x138xbf16, #tpu.memory_space<vmem>>, %arg3: memref<3x16x16xbf16, #tpu.memory_space<vmem>>, %arg4: memref<16x1xf32, #tpu.memory_space<vmem>>, %arg5: memref<16x16xbf16, #tpu.memory_space<vmem>>, %arg6: memref<16x1xf32, #tpu.memory_space<vmem>>, %arg7: memref<1x16x128xbf16, #tpu.memory_space<vmem>>) attributes {dimension_semantics = [#tpu.dimension_semantics<parallel>, #tpu.dimension_semantics<parallel>], iteration_bounds = array<i64: 2, 1>, scalar_prefetch = 0 : i64, scratch_operands = 0 : i64, tpu.core_type = #tpu.core_type<tc>, window_params = [{transform_indices = @transform_0, window_bounds = array<i64: 1, 1, 16, 138>}, {pipeline_mode = #tpu.pipeline_mode<synchronous>, transform_indices = @transform_1, window_bounds = array<i64: 3, 16, 16>}, {pipeline_mode = #tpu.pipeline_mode<synchronous>, transform_indices = @transform_2, window_bounds = array<i64: 16, 1>}, {pipeline_mode = #tpu.pipeline_mode<synchronous>, transform_indices = @transform_3, window_bounds = array<i64: 16, 16>}, {pipeline_mode = #tpu.pipeline_mode<synchronous>, transform_indices = @transform_4, window_bounds = array<i64: 16, 1>}, {transform_indices = @transform_5, window_bounds = array<i64: 1, 16, 128>}]} {
    %c0 = arith.constant 0 : index
    %c0_0 = arith.constant 0 : index
    %c0_1 = arith.constant 0 : index
    %c0_2 = arith.constant 0 : index
    %0 = vector.load %arg2[%c0, %c0_0, %c0_1, %c0_2] : memref<1x1x16x138xbf16, #tpu.memory_space<vmem>>, vector<1x1x16x138xbf16>
    %1 = vector.shape_cast %0 : vector<1x1x16x138xbf16> to vector<16x138xbf16>
    %2 = arith.extf %1 : vector<16x138xbf16> to vector<16x138xf32>
    %cst = arith.constant 0.000000e+00 : f32
    %3 = vector.broadcast %cst : f32 to vector<16x138xf32>
    %4 = arith.cmpf oge, %2, %3 : vector<16x138xf32>
    %cst_3 = arith.constant 1.000000e-01 : f32
    %5 = vector.broadcast %cst_3 : f32 to vector<16x138xf32>
    %6 = arith.mulf %5, %2 : vector<16x138xf32>
    %7 = arith.select %4, %2, %6 : vector<16x138xi1>, vector<16x138xf32>
    %8 = arith.truncf %7 : vector<16x138xf32> to vector<16x138xbf16>
    %cst_4 = arith.constant 0.000000e+00 : f32
    %9 = vector.broadcast %cst_4 : f32 to vector<16x128xf32>
    %c0_5 = arith.constant 0 : index
    %c0_6 = arith.constant 0 : index
    %c0_7 = arith.constant 0 : index
    %10 = vector.load %arg3[%c0_5, %c0_6, %c0_7] : memref<3x16x16xbf16, #tpu.memory_space<vmem>>, vector<1x16x16xbf16>
    %11 = vector.shape_cast %10 : vector<1x16x16xbf16> to vector<16x16xbf16>
    %12 = vector.extract_strided_slice %8 {offsets = [0, 0], sizes = [16, 128], strides = [1, 1]} : vector<16x138xbf16> to vector<16x128xbf16>
    %cst_8 = arith.constant dense<0.000000e+00> : vector<16x128xf32>
    %13 = tpu.matmul %11, %12, %cst_8 {dimension_numbers = #tpu.dot_dimension_numbers<[1], [0], [0], [1], [0, 0, 1, 1], [], []>} : vector<16x16xbf16>, vector<16x128xbf16>, vector<16x128xf32> -> vector<16x128xf32>
    %14 = arith.addf %9, %13 : vector<16x128xf32>
    %c1 = arith.constant 1 : index
    %c0_9 = arith.constant 0 : index
    %c0_10 = arith.constant 0 : index
    %15 = vector.load %arg3[%c1, %c0_9, %c0_10] : memref<3x16x16xbf16, #tpu.memory_space<vmem>>, vector<1x16x16xbf16>
    %16 = vector.shape_cast %15 : vector<1x16x16xbf16> to vector<16x16xbf16>
    %17 = vector.extract_strided_slice %8 {offsets = [0, 5], sizes = [16, 128], strides = [1, 1]} : vector<16x138xbf16> to vector<16x128xbf16>
    %cst_11 = arith.constant dense<0.000000e+00> : vector<16x128xf32>
    %18 = tpu.matmul %16, %17, %cst_11 {dimension_numbers = #tpu.dot_dimension_numbers<[1], [0], [0], [1], [0, 0, 1, 1], [], []>} : vector<16x16xbf16>, vector<16x128xbf16>, vector<16x128xf32> -> vector<16x128xf32>
    %19 = arith.addf %14, %18 : vector<16x128xf32>
    %c2 = arith.constant 2 : index
    %c0_12 = arith.constant 0 : index
    %c0_13 = arith.constant 0 : index
    %20 = vector.load %arg3[%c2, %c0_12, %c0_13] : memref<3x16x16xbf16, #tpu.memory_space<vmem>>, vector<1x16x16xbf16>
    %21 = vector.shape_cast %20 : vector<1x16x16xbf16> to vector<16x16xbf16>
    %22 = vector.extract_strided_slice %8 {offsets = [0, 10], sizes = [16, 128], strides = [1, 1]} : vector<16x138xbf16> to vector<16x128xbf16>
    %cst_14 = arith.constant dense<0.000000e+00> : vector<16x128xf32>
    %23 = tpu.matmul %21, %22, %cst_14 {dimension_numbers = #tpu.dot_dimension_numbers<[1], [0], [0], [1], [0, 0, 1, 1], [], []>} : vector<16x16xbf16>, vector<16x128xbf16>, vector<16x128xf32> -> vector<16x128xf32>
    %24 = arith.addf %19, %23 : vector<16x128xf32>
    %c0_15 = arith.constant 0 : index
    %c0_16 = arith.constant 0 : index
    %25 = vector.load %arg4[%c0_15, %c0_16] : memref<16x1xf32, #tpu.memory_space<vmem>>, vector<16x1xf32>
    %26 = vector.broadcast %25 : vector<16x1xf32> to vector<16x128xf32>
    %27 = arith.addf %24, %26 : vector<16x128xf32>
    %cst_17 = arith.constant 0.000000e+00 : f32
    %28 = vector.broadcast %cst_17 : f32 to vector<16x128xf32>
    %29 = arith.cmpf oge, %27, %28 : vector<16x128xf32>
    %cst_18 = arith.constant 1.000000e-01 : f32
    %30 = vector.broadcast %cst_18 : f32 to vector<16x128xf32>
    %31 = arith.mulf %30, %27 : vector<16x128xf32>
    %32 = arith.select %29, %27, %31 : vector<16x128xi1>, vector<16x128xf32>
    %33 = arith.truncf %32 : vector<16x128xf32> to vector<16x128xbf16>
    %c0_19 = arith.constant 0 : index
    %c0_20 = arith.constant 0 : index
    %34 = vector.load %arg5[%c0_19, %c0_20] : memref<16x16xbf16, #tpu.memory_space<vmem>>, vector<16x16xbf16>
    %cst_21 = arith.constant dense<0.000000e+00> : vector<16x128xf32>
    %35 = tpu.matmul %34, %33, %cst_21 {dimension_numbers = #tpu.dot_dimension_numbers<[1], [0], [0], [1], [0, 0, 1, 1], [], []>} : vector<16x16xbf16>, vector<16x128xbf16>, vector<16x128xf32> -> vector<16x128xf32>
    %c0_22 = arith.constant 0 : index
    %c0_23 = arith.constant 0 : index
    %36 = vector.load %arg6[%c0_22, %c0_23] : memref<16x1xf32, #tpu.memory_space<vmem>>, vector<16x1xf32>
    %37 = vector.broadcast %36 : vector<16x1xf32> to vector<16x128xf32>
    %38 = arith.addf %35, %37 : vector<16x128xf32>
    %39 = vector.extract_strided_slice %2 {offsets = [0, 5], sizes = [16, 128], strides = [1, 1]} : vector<16x138xf32> to vector<16x128xf32>
    %40 = arith.addf %38, %39 : vector<16x128xf32>
    %41 = arith.truncf %40 : vector<16x128xf32> to vector<16x128xbf16>
    %c0_24 = arith.constant 0 : index
    %c0_25 = arith.constant 0 : index
    %c0_26 = arith.constant 0 : index
    %42 = vector.load %arg7[%c0_24, %c0_25, %c0_26] : memref<1x16x128xbf16, #tpu.memory_space<vmem>>, vector<1x16x128xbf16>
    %43 = vector.shape_cast %42 : vector<1x16x128xbf16> to vector<16x128xbf16>
    %44 = vector.shape_cast %41 : vector<16x128xbf16> to vector<1x16x128xbf16>
    tpu.vector_store %arg7[%c0_24, %c0_25, %c0_26], %44 {strides = array<i32>} : memref<1x16x128xbf16, #tpu.memory_space<vmem>>, vector<1x16x128xbf16>,
    return
  }
  func.func @transform_0(%arg0: i32, %arg1: i32) -> (i32, i32, i32, i32) {
    %c0_i32 = arith.constant 0 : i32
    %c0_i32_0 = arith.constant 0 : i32
    %c0_i32_1 = arith.constant 0 : i32
    return %arg0, %arg1, %c0_i32, %c0_i32_0 : i32, i32, i32, i32
  }
  func.func @transform_1(%arg0: i32, %arg1: i32) -> (i32, i32, i32) {
    %c0_i32 = arith.constant 0 : i32
    %c0_i32_0 = arith.constant 0 : i32
    %c0_i32_1 = arith.constant 0 : i32
    %c0_i32_2 = arith.constant 0 : i32
    return %c0_i32, %c0_i32_0, %c0_i32_1 : i32, i32, i32
  }
  func.func @transform_2(%arg0: i32, %arg1: i32) -> (i32, i32) {
    %c0_i32 = arith.constant 0 : i32
    %c0_i32_0 = arith.constant 0 : i32
    %c0_i32_1 = arith.constant 0 : i32
    return %c0_i32, %c0_i32_0 : i32, i32
  }
  func.func @transform_3(%arg0: i32, %arg1: i32) -> (i32, i32) {
    %c0_i32 = arith.constant 0 : i32
    %c0_i32_0 = arith.constant 0 : i32
    %c0_i32_1 = arith.constant 0 : i32
    return %c0_i32, %c0_i32_0 : i32, i32
  }
  func.func @transform_4(%arg0: i32, %arg1: i32) -> (i32, i32) {
    %c0_i32 = arith.constant 0 : i32
    %c0_i32_0 = arith.constant 0 : i32
    %c0_i32_1 = arith.constant 0 : i32
    return %c0_i32, %c0_i32_0 : i32, i32
  }
  func.func @transform_5(%arg0: i32, %arg1: i32) -> (i32, i32, i32) {
    %c0_i32 = arith.constant 0 : i32
    %c0_i32_0 = arith.constant 0 : i32
    return %arg0, %c0_i32, %arg1 : i32, i32, i32
  }
}

module attributes {stable_mosaic.version = 11 : i64} {
  func.func @_resblock_step_kernel(%arg0: i32, %arg1: i32, %arg2: memref<1x1x16x134xbf16, #tpu.memory_space<vmem>>, %arg3: memref<7x16x16xbf16, #tpu.memory_space<vmem>>, %arg4: memref<16x1xf32, #tpu.memory_space<vmem>>, %arg5: memref<16x16xbf16, #tpu.memory_space<vmem>>, %arg6: memref<16x1xf32, #tpu.memory_space<vmem>>, %arg7: memref<1x16x128xbf16, #tpu.memory_space<vmem>>) attributes {dimension_semantics = [#tpu.dimension_semantics<parallel>, #tpu.dimension_semantics<parallel>], iteration_bounds = array<i64: 2, 1>, scalar_prefetch = 0 : i64, scratch_operands = 0 : i64, tpu.core_type = #tpu.core_type<tc>, window_params = [{transform_indices = @transform_0, window_bounds = array<i64: 1, 1, 16, 134>}, {pipeline_mode = #tpu.pipeline_mode<synchronous>, transform_indices = @transform_1, window_bounds = array<i64: 7, 16, 16>}, {pipeline_mode = #tpu.pipeline_mode<synchronous>, transform_indices = @transform_2, window_bounds = array<i64: 16, 1>}, {pipeline_mode = #tpu.pipeline_mode<synchronous>, transform_indices = @transform_3, window_bounds = array<i64: 16, 16>}, {pipeline_mode = #tpu.pipeline_mode<synchronous>, transform_indices = @transform_4, window_bounds = array<i64: 16, 1>}, {transform_indices = @transform_5, window_bounds = array<i64: 1, 16, 128>}]} {
    %c0 = arith.constant 0 : index
    %c0_0 = arith.constant 0 : index
    %c0_1 = arith.constant 0 : index
    %c0_2 = arith.constant 0 : index
    %0 = vector.load %arg2[%c0, %c0_0, %c0_1, %c0_2] : memref<1x1x16x134xbf16, #tpu.memory_space<vmem>>, vector<1x1x16x134xbf16>
    %1 = vector.shape_cast %0 : vector<1x1x16x134xbf16> to vector<16x134xbf16>
    %2 = arith.extf %1 : vector<16x134xbf16> to vector<16x134xf32>
    %cst = arith.constant 0.000000e+00 : f32
    %3 = vector.broadcast %cst : f32 to vector<16x134xf32>
    %4 = arith.cmpf oge, %2, %3 : vector<16x134xf32>
    %cst_3 = arith.constant 1.000000e-01 : f32
    %5 = vector.broadcast %cst_3 : f32 to vector<16x134xf32>
    %6 = arith.mulf %5, %2 : vector<16x134xf32>
    %7 = arith.select %4, %2, %6 : vector<16x134xi1>, vector<16x134xf32>
    %8 = arith.truncf %7 : vector<16x134xf32> to vector<16x134xbf16>
    %cst_4 = arith.constant 0.000000e+00 : f32
    %9 = vector.broadcast %cst_4 : f32 to vector<16x128xf32>
    %c0_5 = arith.constant 0 : index
    %c0_6 = arith.constant 0 : index
    %c0_7 = arith.constant 0 : index
    %10 = vector.load %arg3[%c0_5, %c0_6, %c0_7] : memref<7x16x16xbf16, #tpu.memory_space<vmem>>, vector<1x16x16xbf16>
    %11 = vector.shape_cast %10 : vector<1x16x16xbf16> to vector<16x16xbf16>
    %12 = vector.extract_strided_slice %8 {offsets = [0, 0], sizes = [16, 128], strides = [1, 1]} : vector<16x134xbf16> to vector<16x128xbf16>
    %cst_8 = arith.constant dense<0.000000e+00> : vector<16x128xf32>
    %13 = tpu.matmul %11, %12, %cst_8 {dimension_numbers = #tpu.dot_dimension_numbers<[1], [0], [0], [1], [0, 0, 1, 1], [], []>} : vector<16x16xbf16>, vector<16x128xbf16>, vector<16x128xf32> -> vector<16x128xf32>
    %14 = arith.addf %9, %13 : vector<16x128xf32>
    %c1 = arith.constant 1 : index
    %c0_9 = arith.constant 0 : index
    %c0_10 = arith.constant 0 : index
    %15 = vector.load %arg3[%c1, %c0_9, %c0_10] : memref<7x16x16xbf16, #tpu.memory_space<vmem>>, vector<1x16x16xbf16>
    %16 = vector.shape_cast %15 : vector<1x16x16xbf16> to vector<16x16xbf16>
    %17 = vector.extract_strided_slice %8 {offsets = [0, 1], sizes = [16, 128], strides = [1, 1]} : vector<16x134xbf16> to vector<16x128xbf16>
    %cst_11 = arith.constant dense<0.000000e+00> : vector<16x128xf32>
    %18 = tpu.matmul %16, %17, %cst_11 {dimension_numbers = #tpu.dot_dimension_numbers<[1], [0], [0], [1], [0, 0, 1, 1], [], []>} : vector<16x16xbf16>, vector<16x128xbf16>, vector<16x128xf32> -> vector<16x128xf32>
    %19 = arith.addf %14, %18 : vector<16x128xf32>
    %c2 = arith.constant 2 : index
    %c0_12 = arith.constant 0 : index
    %c0_13 = arith.constant 0 : index
    %20 = vector.load %arg3[%c2, %c0_12, %c0_13] : memref<7x16x16xbf16, #tpu.memory_space<vmem>>, vector<1x16x16xbf16>
    %21 = vector.shape_cast %20 : vector<1x16x16xbf16> to vector<16x16xbf16>
    %22 = vector.extract_strided_slice %8 {offsets = [0, 2], sizes = [16, 128], strides = [1, 1]} : vector<16x134xbf16> to vector<16x128xbf16>
    %cst_14 = arith.constant dense<0.000000e+00> : vector<16x128xf32>
    %23 = tpu.matmul %21, %22, %cst_14 {dimension_numbers = #tpu.dot_dimension_numbers<[1], [0], [0], [1], [0, 0, 1, 1], [], []>} : vector<16x16xbf16>, vector<16x128xbf16>, vector<16x128xf32> -> vector<16x128xf32>
    %24 = arith.addf %19, %23 : vector<16x128xf32>
    %c3 = arith.constant 3 : index
    %c0_15 = arith.constant 0 : index
    %c0_16 = arith.constant 0 : index
    %25 = vector.load %arg3[%c3, %c0_15, %c0_16] : memref<7x16x16xbf16, #tpu.memory_space<vmem>>, vector<1x16x16xbf16>
    %26 = vector.shape_cast %25 : vector<1x16x16xbf16> to vector<16x16xbf16>
    %27 = vector.extract_strided_slice %8 {offsets = [0, 3], sizes = [16, 128], strides = [1, 1]} : vector<16x134xbf16> to vector<16x128xbf16>
    %cst_17 = arith.constant dense<0.000000e+00> : vector<16x128xf32>
    %28 = tpu.matmul %26, %27, %cst_17 {dimension_numbers = #tpu.dot_dimension_numbers<[1], [0], [0], [1], [0, 0, 1, 1], [], []>} : vector<16x16xbf16>, vector<16x128xbf16>, vector<16x128xf32> -> vector<16x128xf32>
    %29 = arith.addf %24, %28 : vector<16x128xf32>
    %c4 = arith.constant 4 : index
    %c0_18 = arith.constant 0 : index
    %c0_19 = arith.constant 0 : index
    %30 = vector.load %arg3[%c4, %c0_18, %c0_19] : memref<7x16x16xbf16, #tpu.memory_space<vmem>>, vector<1x16x16xbf16>
    %31 = vector.shape_cast %30 : vector<1x16x16xbf16> to vector<16x16xbf16>
    %32 = vector.extract_strided_slice %8 {offsets = [0, 4], sizes = [16, 128], strides = [1, 1]} : vector<16x134xbf16> to vector<16x128xbf16>
    %cst_20 = arith.constant dense<0.000000e+00> : vector<16x128xf32>
    %33 = tpu.matmul %31, %32, %cst_20 {dimension_numbers = #tpu.dot_dimension_numbers<[1], [0], [0], [1], [0, 0, 1, 1], [], []>} : vector<16x16xbf16>, vector<16x128xbf16>, vector<16x128xf32> -> vector<16x128xf32>
    %34 = arith.addf %29, %33 : vector<16x128xf32>
    %c5 = arith.constant 5 : index
    %c0_21 = arith.constant 0 : index
    %c0_22 = arith.constant 0 : index
    %35 = vector.load %arg3[%c5, %c0_21, %c0_22] : memref<7x16x16xbf16, #tpu.memory_space<vmem>>, vector<1x16x16xbf16>
    %36 = vector.shape_cast %35 : vector<1x16x16xbf16> to vector<16x16xbf16>
    %37 = vector.extract_strided_slice %8 {offsets = [0, 5], sizes = [16, 128], strides = [1, 1]} : vector<16x134xbf16> to vector<16x128xbf16>
    %cst_23 = arith.constant dense<0.000000e+00> : vector<16x128xf32>
    %38 = tpu.matmul %36, %37, %cst_23 {dimension_numbers = #tpu.dot_dimension_numbers<[1], [0], [0], [1], [0, 0, 1, 1], [], []>} : vector<16x16xbf16>, vector<16x128xbf16>, vector<16x128xf32> -> vector<16x128xf32>
    %39 = arith.addf %34, %38 : vector<16x128xf32>
    %c6 = arith.constant 6 : index
    %c0_24 = arith.constant 0 : index
    %c0_25 = arith.constant 0 : index
    %40 = vector.load %arg3[%c6, %c0_24, %c0_25] : memref<7x16x16xbf16, #tpu.memory_space<vmem>>, vector<1x16x16xbf16>
    %41 = vector.shape_cast %40 : vector<1x16x16xbf16> to vector<16x16xbf16>
    %42 = vector.extract_strided_slice %8 {offsets = [0, 6], sizes = [16, 128], strides = [1, 1]} : vector<16x134xbf16> to vector<16x128xbf16>
    %cst_26 = arith.constant dense<0.000000e+00> : vector<16x128xf32>
    %43 = tpu.matmul %41, %42, %cst_26 {dimension_numbers = #tpu.dot_dimension_numbers<[1], [0], [0], [1], [0, 0, 1, 1], [], []>} : vector<16x16xbf16>, vector<16x128xbf16>, vector<16x128xf32> -> vector<16x128xf32>
    %44 = arith.addf %39, %43 : vector<16x128xf32>
    %c0_27 = arith.constant 0 : index
    %c0_28 = arith.constant 0 : index
    %45 = vector.load %arg4[%c0_27, %c0_28] : memref<16x1xf32, #tpu.memory_space<vmem>>, vector<16x1xf32>
    %46 = vector.broadcast %45 : vector<16x1xf32> to vector<16x128xf32>
    %47 = arith.addf %44, %46 : vector<16x128xf32>
    %cst_29 = arith.constant 0.000000e+00 : f32
    %48 = vector.broadcast %cst_29 : f32 to vector<16x128xf32>
    %49 = arith.cmpf oge, %47, %48 : vector<16x128xf32>
    %cst_30 = arith.constant 1.000000e-01 : f32
    %50 = vector.broadcast %cst_30 : f32 to vector<16x128xf32>
    %51 = arith.mulf %50, %47 : vector<16x128xf32>
    %52 = arith.select %49, %47, %51 : vector<16x128xi1>, vector<16x128xf32>
    %53 = arith.truncf %52 : vector<16x128xf32> to vector<16x128xbf16>
    %c0_31 = arith.constant 0 : index
    %c0_32 = arith.constant 0 : index
    %54 = vector.load %arg5[%c0_31, %c0_32] : memref<16x16xbf16, #tpu.memory_space<vmem>>, vector<16x16xbf16>
    %cst_33 = arith.constant dense<0.000000e+00> : vector<16x128xf32>
    %55 = tpu.matmul %54, %53, %cst_33 {dimension_numbers = #tpu.dot_dimension_numbers<[1], [0], [0], [1], [0, 0, 1, 1], [], []>} : vector<16x16xbf16>, vector<16x128xbf16>, vector<16x128xf32> -> vector<16x128xf32>
    %c0_34 = arith.constant 0 : index
    %c0_35 = arith.constant 0 : index
    %56 = vector.load %arg6[%c0_34, %c0_35] : memref<16x1xf32, #tpu.memory_space<vmem>>, vector<16x1xf32>
    %57 = vector.broadcast %56 : vector<16x1xf32> to vector<16x128xf32>
    %58 = arith.addf %55, %57 : vector<16x128xf32>
    %59 = vector.extract_strided_slice %2 {offsets = [0, 3], sizes = [16, 128], strides = [1, 1]} : vector<16x134xf32> to vector<16x128xf32>
    %60 = arith.addf %58, %59 : vector<16x128xf32>
    %61 = arith.truncf %60 : vector<16x128xf32> to vector<16x128xbf16>
    %c0_36 = arith.constant 0 : index
    %c0_37 = arith.constant 0 : index
    %c0_38 = arith.constant 0 : index
    %62 = vector.load %arg7[%c0_36, %c0_37, %c0_38] : memref<1x16x128xbf16, #tpu.memory_space<vmem>>, vector<1x16x128xbf16>
    %63 = vector.shape_cast %62 : vector<1x16x128xbf16> to vector<16x128xbf16>
    %64 = vector.shape_cast %61 : vector<16x128xbf16> to vector<1x16x128xbf16>
    tpu.vector_store %arg7[%c0_36, %c0_37, %c0_38], %64 {strides = array<i32>} : memref<1x16x128xbf16, #tpu.memory_space<vmem>>, vector<1x16x128xbf16>,
    return
  }
  func.func @transform_0(%arg0: i32, %arg1: i32) -> (i32, i32, i32, i32) {
    %c0_i32 = arith.constant 0 : i32
    %c0_i32_0 = arith.constant 0 : i32
    %c0_i32_1 = arith.constant 0 : i32
    return %arg0, %arg1, %c0_i32, %c0_i32_0 : i32, i32, i32, i32
  }
  func.func @transform_1(%arg0: i32, %arg1: i32) -> (i32, i32, i32) {
    %c0_i32 = arith.constant 0 : i32
    %c0_i32_0 = arith.constant 0 : i32
    %c0_i32_1 = arith.constant 0 : i32
    %c0_i32_2 = arith.constant 0 : i32
    return %c0_i32, %c0_i32_0, %c0_i32_1 : i32, i32, i32
  }
  func.func @transform_2(%arg0: i32, %arg1: i32) -> (i32, i32) {
    %c0_i32 = arith.constant 0 : i32
    %c0_i32_0 = arith.constant 0 : i32
    %c0_i32_1 = arith.constant 0 : i32
    return %c0_i32, %c0_i32_0 : i32, i32
  }
  func.func @transform_3(%arg0: i32, %arg1: i32) -> (i32, i32) {
    %c0_i32 = arith.constant 0 : i32
    %c0_i32_0 = arith.constant 0 : i32
    %c0_i32_1 = arith.constant 0 : i32
    return %c0_i32, %c0_i32_0 : i32, i32
  }
  func.func @transform_4(%arg0: i32, %arg1: i32) -> (i32, i32) {
    %c0_i32 = arith.constant 0 : i32
    %c0_i32_0 = arith.constant 0 : i32
    %c0_i32_1 = arith.constant 0 : i32
    return %c0_i32, %c0_i32_0 : i32, i32
  }
  func.func @transform_5(%arg0: i32, %arg1: i32) -> (i32, i32, i32) {
    %c0_i32 = arith.constant 0 : i32
    %c0_i32_0 = arith.constant 0 : i32
    return %arg0, %c0_i32, %arg1 : i32, i32, i32
  }
}

module attributes {stable_mosaic.version = 11 : i64} {
  func.func @_resblock_step_kernel(%arg0: i32, %arg1: i32, %arg2: memref<1x1x16x146xbf16, #tpu.memory_space<vmem>>, %arg3: memref<7x16x16xbf16, #tpu.memory_space<vmem>>, %arg4: memref<16x1xf32, #tpu.memory_space<vmem>>, %arg5: memref<16x16xbf16, #tpu.memory_space<vmem>>, %arg6: memref<16x1xf32, #tpu.memory_space<vmem>>, %arg7: memref<1x16x128xbf16, #tpu.memory_space<vmem>>) attributes {dimension_semantics = [#tpu.dimension_semantics<parallel>, #tpu.dimension_semantics<parallel>], iteration_bounds = array<i64: 2, 1>, scalar_prefetch = 0 : i64, scratch_operands = 0 : i64, tpu.core_type = #tpu.core_type<tc>, window_params = [{transform_indices = @transform_0, window_bounds = array<i64: 1, 1, 16, 146>}, {pipeline_mode = #tpu.pipeline_mode<synchronous>, transform_indices = @transform_1, window_bounds = array<i64: 7, 16, 16>}, {pipeline_mode = #tpu.pipeline_mode<synchronous>, transform_indices = @transform_2, window_bounds = array<i64: 16, 1>}, {pipeline_mode = #tpu.pipeline_mode<synchronous>, transform_indices = @transform_3, window_bounds = array<i64: 16, 16>}, {pipeline_mode = #tpu.pipeline_mode<synchronous>, transform_indices = @transform_4, window_bounds = array<i64: 16, 1>}, {transform_indices = @transform_5, window_bounds = array<i64: 1, 16, 128>}]} {
    %c0 = arith.constant 0 : index
    %c0_0 = arith.constant 0 : index
    %c0_1 = arith.constant 0 : index
    %c0_2 = arith.constant 0 : index
    %0 = vector.load %arg2[%c0, %c0_0, %c0_1, %c0_2] : memref<1x1x16x146xbf16, #tpu.memory_space<vmem>>, vector<1x1x16x146xbf16>
    %1 = vector.shape_cast %0 : vector<1x1x16x146xbf16> to vector<16x146xbf16>
    %2 = arith.extf %1 : vector<16x146xbf16> to vector<16x146xf32>
    %cst = arith.constant 0.000000e+00 : f32
    %3 = vector.broadcast %cst : f32 to vector<16x146xf32>
    %4 = arith.cmpf oge, %2, %3 : vector<16x146xf32>
    %cst_3 = arith.constant 1.000000e-01 : f32
    %5 = vector.broadcast %cst_3 : f32 to vector<16x146xf32>
    %6 = arith.mulf %5, %2 : vector<16x146xf32>
    %7 = arith.select %4, %2, %6 : vector<16x146xi1>, vector<16x146xf32>
    %8 = arith.truncf %7 : vector<16x146xf32> to vector<16x146xbf16>
    %cst_4 = arith.constant 0.000000e+00 : f32
    %9 = vector.broadcast %cst_4 : f32 to vector<16x128xf32>
    %c0_5 = arith.constant 0 : index
    %c0_6 = arith.constant 0 : index
    %c0_7 = arith.constant 0 : index
    %10 = vector.load %arg3[%c0_5, %c0_6, %c0_7] : memref<7x16x16xbf16, #tpu.memory_space<vmem>>, vector<1x16x16xbf16>
    %11 = vector.shape_cast %10 : vector<1x16x16xbf16> to vector<16x16xbf16>
    %12 = vector.extract_strided_slice %8 {offsets = [0, 0], sizes = [16, 128], strides = [1, 1]} : vector<16x146xbf16> to vector<16x128xbf16>
    %cst_8 = arith.constant dense<0.000000e+00> : vector<16x128xf32>
    %13 = tpu.matmul %11, %12, %cst_8 {dimension_numbers = #tpu.dot_dimension_numbers<[1], [0], [0], [1], [0, 0, 1, 1], [], []>} : vector<16x16xbf16>, vector<16x128xbf16>, vector<16x128xf32> -> vector<16x128xf32>
    %14 = arith.addf %9, %13 : vector<16x128xf32>
    %c1 = arith.constant 1 : index
    %c0_9 = arith.constant 0 : index
    %c0_10 = arith.constant 0 : index
    %15 = vector.load %arg3[%c1, %c0_9, %c0_10] : memref<7x16x16xbf16, #tpu.memory_space<vmem>>, vector<1x16x16xbf16>
    %16 = vector.shape_cast %15 : vector<1x16x16xbf16> to vector<16x16xbf16>
    %17 = vector.extract_strided_slice %8 {offsets = [0, 3], sizes = [16, 128], strides = [1, 1]} : vector<16x146xbf16> to vector<16x128xbf16>
    %cst_11 = arith.constant dense<0.000000e+00> : vector<16x128xf32>
    %18 = tpu.matmul %16, %17, %cst_11 {dimension_numbers = #tpu.dot_dimension_numbers<[1], [0], [0], [1], [0, 0, 1, 1], [], []>} : vector<16x16xbf16>, vector<16x128xbf16>, vector<16x128xf32> -> vector<16x128xf32>
    %19 = arith.addf %14, %18 : vector<16x128xf32>
    %c2 = arith.constant 2 : index
    %c0_12 = arith.constant 0 : index
    %c0_13 = arith.constant 0 : index
    %20 = vector.load %arg3[%c2, %c0_12, %c0_13] : memref<7x16x16xbf16, #tpu.memory_space<vmem>>, vector<1x16x16xbf16>
    %21 = vector.shape_cast %20 : vector<1x16x16xbf16> to vector<16x16xbf16>
    %22 = vector.extract_strided_slice %8 {offsets = [0, 6], sizes = [16, 128], strides = [1, 1]} : vector<16x146xbf16> to vector<16x128xbf16>
    %cst_14 = arith.constant dense<0.000000e+00> : vector<16x128xf32>
    %23 = tpu.matmul %21, %22, %cst_14 {dimension_numbers = #tpu.dot_dimension_numbers<[1], [0], [0], [1], [0, 0, 1, 1], [], []>} : vector<16x16xbf16>, vector<16x128xbf16>, vector<16x128xf32> -> vector<16x128xf32>
    %24 = arith.addf %19, %23 : vector<16x128xf32>
    %c3 = arith.constant 3 : index
    %c0_15 = arith.constant 0 : index
    %c0_16 = arith.constant 0 : index
    %25 = vector.load %arg3[%c3, %c0_15, %c0_16] : memref<7x16x16xbf16, #tpu.memory_space<vmem>>, vector<1x16x16xbf16>
    %26 = vector.shape_cast %25 : vector<1x16x16xbf16> to vector<16x16xbf16>
    %27 = vector.extract_strided_slice %8 {offsets = [0, 9], sizes = [16, 128], strides = [1, 1]} : vector<16x146xbf16> to vector<16x128xbf16>
    %cst_17 = arith.constant dense<0.000000e+00> : vector<16x128xf32>
    %28 = tpu.matmul %26, %27, %cst_17 {dimension_numbers = #tpu.dot_dimension_numbers<[1], [0], [0], [1], [0, 0, 1, 1], [], []>} : vector<16x16xbf16>, vector<16x128xbf16>, vector<16x128xf32> -> vector<16x128xf32>
    %29 = arith.addf %24, %28 : vector<16x128xf32>
    %c4 = arith.constant 4 : index
    %c0_18 = arith.constant 0 : index
    %c0_19 = arith.constant 0 : index
    %30 = vector.load %arg3[%c4, %c0_18, %c0_19] : memref<7x16x16xbf16, #tpu.memory_space<vmem>>, vector<1x16x16xbf16>
    %31 = vector.shape_cast %30 : vector<1x16x16xbf16> to vector<16x16xbf16>
    %32 = vector.extract_strided_slice %8 {offsets = [0, 12], sizes = [16, 128], strides = [1, 1]} : vector<16x146xbf16> to vector<16x128xbf16>
    %cst_20 = arith.constant dense<0.000000e+00> : vector<16x128xf32>
    %33 = tpu.matmul %31, %32, %cst_20 {dimension_numbers = #tpu.dot_dimension_numbers<[1], [0], [0], [1], [0, 0, 1, 1], [], []>} : vector<16x16xbf16>, vector<16x128xbf16>, vector<16x128xf32> -> vector<16x128xf32>
    %34 = arith.addf %29, %33 : vector<16x128xf32>
    %c5 = arith.constant 5 : index
    %c0_21 = arith.constant 0 : index
    %c0_22 = arith.constant 0 : index
    %35 = vector.load %arg3[%c5, %c0_21, %c0_22] : memref<7x16x16xbf16, #tpu.memory_space<vmem>>, vector<1x16x16xbf16>
    %36 = vector.shape_cast %35 : vector<1x16x16xbf16> to vector<16x16xbf16>
    %37 = vector.extract_strided_slice %8 {offsets = [0, 15], sizes = [16, 128], strides = [1, 1]} : vector<16x146xbf16> to vector<16x128xbf16>
    %cst_23 = arith.constant dense<0.000000e+00> : vector<16x128xf32>
    %38 = tpu.matmul %36, %37, %cst_23 {dimension_numbers = #tpu.dot_dimension_numbers<[1], [0], [0], [1], [0, 0, 1, 1], [], []>} : vector<16x16xbf16>, vector<16x128xbf16>, vector<16x128xf32> -> vector<16x128xf32>
    %39 = arith.addf %34, %38 : vector<16x128xf32>
    %c6 = arith.constant 6 : index
    %c0_24 = arith.constant 0 : index
    %c0_25 = arith.constant 0 : index
    %40 = vector.load %arg3[%c6, %c0_24, %c0_25] : memref<7x16x16xbf16, #tpu.memory_space<vmem>>, vector<1x16x16xbf16>
    %41 = vector.shape_cast %40 : vector<1x16x16xbf16> to vector<16x16xbf16>
    %42 = vector.extract_strided_slice %8 {offsets = [0, 18], sizes = [16, 128], strides = [1, 1]} : vector<16x146xbf16> to vector<16x128xbf16>
    %cst_26 = arith.constant dense<0.000000e+00> : vector<16x128xf32>
    %43 = tpu.matmul %41, %42, %cst_26 {dimension_numbers = #tpu.dot_dimension_numbers<[1], [0], [0], [1], [0, 0, 1, 1], [], []>} : vector<16x16xbf16>, vector<16x128xbf16>, vector<16x128xf32> -> vector<16x128xf32>
    %44 = arith.addf %39, %43 : vector<16x128xf32>
    %c0_27 = arith.constant 0 : index
    %c0_28 = arith.constant 0 : index
    %45 = vector.load %arg4[%c0_27, %c0_28] : memref<16x1xf32, #tpu.memory_space<vmem>>, vector<16x1xf32>
    %46 = vector.broadcast %45 : vector<16x1xf32> to vector<16x128xf32>
    %47 = arith.addf %44, %46 : vector<16x128xf32>
    %cst_29 = arith.constant 0.000000e+00 : f32
    %48 = vector.broadcast %cst_29 : f32 to vector<16x128xf32>
    %49 = arith.cmpf oge, %47, %48 : vector<16x128xf32>
    %cst_30 = arith.constant 1.000000e-01 : f32
    %50 = vector.broadcast %cst_30 : f32 to vector<16x128xf32>
    %51 = arith.mulf %50, %47 : vector<16x128xf32>
    %52 = arith.select %49, %47, %51 : vector<16x128xi1>, vector<16x128xf32>
    %53 = arith.truncf %52 : vector<16x128xf32> to vector<16x128xbf16>
    %c0_31 = arith.constant 0 : index
    %c0_32 = arith.constant 0 : index
    %54 = vector.load %arg5[%c0_31, %c0_32] : memref<16x16xbf16, #tpu.memory_space<vmem>>, vector<16x16xbf16>
    %cst_33 = arith.constant dense<0.000000e+00> : vector<16x128xf32>
    %55 = tpu.matmul %54, %53, %cst_33 {dimension_numbers = #tpu.dot_dimension_numbers<[1], [0], [0], [1], [0, 0, 1, 1], [], []>} : vector<16x16xbf16>, vector<16x128xbf16>, vector<16x128xf32> -> vector<16x128xf32>
    %c0_34 = arith.constant 0 : index
    %c0_35 = arith.constant 0 : index
    %56 = vector.load %arg6[%c0_34, %c0_35] : memref<16x1xf32, #tpu.memory_space<vmem>>, vector<16x1xf32>
    %57 = vector.broadcast %56 : vector<16x1xf32> to vector<16x128xf32>
    %58 = arith.addf %55, %57 : vector<16x128xf32>
    %59 = vector.extract_strided_slice %2 {offsets = [0, 9], sizes = [16, 128], strides = [1, 1]} : vector<16x146xf32> to vector<16x128xf32>
    %60 = arith.addf %58, %59 : vector<16x128xf32>
    %61 = arith.truncf %60 : vector<16x128xf32> to vector<16x128xbf16>
    %c0_36 = arith.constant 0 : index
    %c0_37 = arith.constant 0 : index
    %c0_38 = arith.constant 0 : index
    %62 = vector.load %arg7[%c0_36, %c0_37, %c0_38] : memref<1x16x128xbf16, #tpu.memory_space<vmem>>, vector<1x16x128xbf16>
    %63 = vector.shape_cast %62 : vector<1x16x128xbf16> to vector<16x128xbf16>
    %64 = vector.shape_cast %61 : vector<16x128xbf16> to vector<1x16x128xbf16>
    tpu.vector_store %arg7[%c0_36, %c0_37, %c0_38], %64 {strides = array<i32>} : memref<1x16x128xbf16, #tpu.memory_space<vmem>>, vector<1x16x128xbf16>,
    return
  }
  func.func @transform_0(%arg0: i32, %arg1: i32) -> (i32, i32, i32, i32) {
    %c0_i32 = arith.constant 0 : i32
    %c0_i32_0 = arith.constant 0 : i32
    %c0_i32_1 = arith.constant 0 : i32
    return %arg0, %arg1, %c0_i32, %c0_i32_0 : i32, i32, i32, i32
  }
  func.func @transform_1(%arg0: i32, %arg1: i32) -> (i32, i32, i32) {
    %c0_i32 = arith.constant 0 : i32
    %c0_i32_0 = arith.constant 0 : i32
    %c0_i32_1 = arith.constant 0 : i32
    %c0_i32_2 = arith.constant 0 : i32
    return %c0_i32, %c0_i32_0, %c0_i32_1 : i32, i32, i32
  }
  func.func @transform_2(%arg0: i32, %arg1: i32) -> (i32, i32) {
    %c0_i32 = arith.constant 0 : i32
    %c0_i32_0 = arith.constant 0 : i32
    %c0_i32_1 = arith.constant 0 : i32
    return %c0_i32, %c0_i32_0 : i32, i32
  }
  func.func @transform_3(%arg0: i32, %arg1: i32) -> (i32, i32) {
    %c0_i32 = arith.constant 0 : i32
    %c0_i32_0 = arith.constant 0 : i32
    %c0_i32_1 = arith.constant 0 : i32
    return %c0_i32, %c0_i32_0 : i32, i32
  }
  func.func @transform_4(%arg0: i32, %arg1: i32) -> (i32, i32) {
    %c0_i32 = arith.constant 0 : i32
    %c0_i32_0 = arith.constant 0 : i32
    %c0_i32_1 = arith.constant 0 : i32
    return %c0_i32, %c0_i32_0 : i32, i32
  }
  func.func @transform_5(%arg0: i32, %arg1: i32) -> (i32, i32, i32) {
    %c0_i32 = arith.constant 0 : i32
    %c0_i32_0 = arith.constant 0 : i32
    return %arg0, %c0_i32, %arg1 : i32, i32, i32
  }
}

module attributes {stable_mosaic.version = 11 : i64} {
  func.func @_resblock_step_kernel(%arg0: i32, %arg1: i32, %arg2: memref<1x1x16x158xbf16, #tpu.memory_space<vmem>>, %arg3: memref<7x16x16xbf16, #tpu.memory_space<vmem>>, %arg4: memref<16x1xf32, #tpu.memory_space<vmem>>, %arg5: memref<16x16xbf16, #tpu.memory_space<vmem>>, %arg6: memref<16x1xf32, #tpu.memory_space<vmem>>, %arg7: memref<1x16x128xbf16, #tpu.memory_space<vmem>>) attributes {dimension_semantics = [#tpu.dimension_semantics<parallel>, #tpu.dimension_semantics<parallel>], iteration_bounds = array<i64: 2, 1>, scalar_prefetch = 0 : i64, scratch_operands = 0 : i64, tpu.core_type = #tpu.core_type<tc>, window_params = [{transform_indices = @transform_0, window_bounds = array<i64: 1, 1, 16, 158>}, {pipeline_mode = #tpu.pipeline_mode<synchronous>, transform_indices = @transform_1, window_bounds = array<i64: 7, 16, 16>}, {pipeline_mode = #tpu.pipeline_mode<synchronous>, transform_indices = @transform_2, window_bounds = array<i64: 16, 1>}, {pipeline_mode = #tpu.pipeline_mode<synchronous>, transform_indices = @transform_3, window_bounds = array<i64: 16, 16>}, {pipeline_mode = #tpu.pipeline_mode<synchronous>, transform_indices = @transform_4, window_bounds = array<i64: 16, 1>}, {transform_indices = @transform_5, window_bounds = array<i64: 1, 16, 128>}]} {
    %c0 = arith.constant 0 : index
    %c0_0 = arith.constant 0 : index
    %c0_1 = arith.constant 0 : index
    %c0_2 = arith.constant 0 : index
    %0 = vector.load %arg2[%c0, %c0_0, %c0_1, %c0_2] : memref<1x1x16x158xbf16, #tpu.memory_space<vmem>>, vector<1x1x16x158xbf16>
    %1 = vector.shape_cast %0 : vector<1x1x16x158xbf16> to vector<16x158xbf16>
    %2 = arith.extf %1 : vector<16x158xbf16> to vector<16x158xf32>
    %cst = arith.constant 0.000000e+00 : f32
    %3 = vector.broadcast %cst : f32 to vector<16x158xf32>
    %4 = arith.cmpf oge, %2, %3 : vector<16x158xf32>
    %cst_3 = arith.constant 1.000000e-01 : f32
    %5 = vector.broadcast %cst_3 : f32 to vector<16x158xf32>
    %6 = arith.mulf %5, %2 : vector<16x158xf32>
    %7 = arith.select %4, %2, %6 : vector<16x158xi1>, vector<16x158xf32>
    %8 = arith.truncf %7 : vector<16x158xf32> to vector<16x158xbf16>
    %cst_4 = arith.constant 0.000000e+00 : f32
    %9 = vector.broadcast %cst_4 : f32 to vector<16x128xf32>
    %c0_5 = arith.constant 0 : index
    %c0_6 = arith.constant 0 : index
    %c0_7 = arith.constant 0 : index
    %10 = vector.load %arg3[%c0_5, %c0_6, %c0_7] : memref<7x16x16xbf16, #tpu.memory_space<vmem>>, vector<1x16x16xbf16>
    %11 = vector.shape_cast %10 : vector<1x16x16xbf16> to vector<16x16xbf16>
    %12 = vector.extract_strided_slice %8 {offsets = [0, 0], sizes = [16, 128], strides = [1, 1]} : vector<16x158xbf16> to vector<16x128xbf16>
    %cst_8 = arith.constant dense<0.000000e+00> : vector<16x128xf32>
    %13 = tpu.matmul %11, %12, %cst_8 {dimension_numbers = #tpu.dot_dimension_numbers<[1], [0], [0], [1], [0, 0, 1, 1], [], []>} : vector<16x16xbf16>, vector<16x128xbf16>, vector<16x128xf32> -> vector<16x128xf32>
    %14 = arith.addf %9, %13 : vector<16x128xf32>
    %c1 = arith.constant 1 : index
    %c0_9 = arith.constant 0 : index
    %c0_10 = arith.constant 0 : index
    %15 = vector.load %arg3[%c1, %c0_9, %c0_10] : memref<7x16x16xbf16, #tpu.memory_space<vmem>>, vector<1x16x16xbf16>
    %16 = vector.shape_cast %15 : vector<1x16x16xbf16> to vector<16x16xbf16>
    %17 = vector.extract_strided_slice %8 {offsets = [0, 5], sizes = [16, 128], strides = [1, 1]} : vector<16x158xbf16> to vector<16x128xbf16>
    %cst_11 = arith.constant dense<0.000000e+00> : vector<16x128xf32>
    %18 = tpu.matmul %16, %17, %cst_11 {dimension_numbers = #tpu.dot_dimension_numbers<[1], [0], [0], [1], [0, 0, 1, 1], [], []>} : vector<16x16xbf16>, vector<16x128xbf16>, vector<16x128xf32> -> vector<16x128xf32>
    %19 = arith.addf %14, %18 : vector<16x128xf32>
    %c2 = arith.constant 2 : index
    %c0_12 = arith.constant 0 : index
    %c0_13 = arith.constant 0 : index
    %20 = vector.load %arg3[%c2, %c0_12, %c0_13] : memref<7x16x16xbf16, #tpu.memory_space<vmem>>, vector<1x16x16xbf16>
    %21 = vector.shape_cast %20 : vector<1x16x16xbf16> to vector<16x16xbf16>
    %22 = vector.extract_strided_slice %8 {offsets = [0, 10], sizes = [16, 128], strides = [1, 1]} : vector<16x158xbf16> to vector<16x128xbf16>
    %cst_14 = arith.constant dense<0.000000e+00> : vector<16x128xf32>
    %23 = tpu.matmul %21, %22, %cst_14 {dimension_numbers = #tpu.dot_dimension_numbers<[1], [0], [0], [1], [0, 0, 1, 1], [], []>} : vector<16x16xbf16>, vector<16x128xbf16>, vector<16x128xf32> -> vector<16x128xf32>
    %24 = arith.addf %19, %23 : vector<16x128xf32>
    %c3 = arith.constant 3 : index
    %c0_15 = arith.constant 0 : index
    %c0_16 = arith.constant 0 : index
    %25 = vector.load %arg3[%c3, %c0_15, %c0_16] : memref<7x16x16xbf16, #tpu.memory_space<vmem>>, vector<1x16x16xbf16>
    %26 = vector.shape_cast %25 : vector<1x16x16xbf16> to vector<16x16xbf16>
    %27 = vector.extract_strided_slice %8 {offsets = [0, 15], sizes = [16, 128], strides = [1, 1]} : vector<16x158xbf16> to vector<16x128xbf16>
    %cst_17 = arith.constant dense<0.000000e+00> : vector<16x128xf32>
    %28 = tpu.matmul %26, %27, %cst_17 {dimension_numbers = #tpu.dot_dimension_numbers<[1], [0], [0], [1], [0, 0, 1, 1], [], []>} : vector<16x16xbf16>, vector<16x128xbf16>, vector<16x128xf32> -> vector<16x128xf32>
    %29 = arith.addf %24, %28 : vector<16x128xf32>
    %c4 = arith.constant 4 : index
    %c0_18 = arith.constant 0 : index
    %c0_19 = arith.constant 0 : index
    %30 = vector.load %arg3[%c4, %c0_18, %c0_19] : memref<7x16x16xbf16, #tpu.memory_space<vmem>>, vector<1x16x16xbf16>
    %31 = vector.shape_cast %30 : vector<1x16x16xbf16> to vector<16x16xbf16>
    %32 = vector.extract_strided_slice %8 {offsets = [0, 20], sizes = [16, 128], strides = [1, 1]} : vector<16x158xbf16> to vector<16x128xbf16>
    %cst_20 = arith.constant dense<0.000000e+00> : vector<16x128xf32>
    %33 = tpu.matmul %31, %32, %cst_20 {dimension_numbers = #tpu.dot_dimension_numbers<[1], [0], [0], [1], [0, 0, 1, 1], [], []>} : vector<16x16xbf16>, vector<16x128xbf16>, vector<16x128xf32> -> vector<16x128xf32>
    %34 = arith.addf %29, %33 : vector<16x128xf32>
    %c5 = arith.constant 5 : index
    %c0_21 = arith.constant 0 : index
    %c0_22 = arith.constant 0 : index
    %35 = vector.load %arg3[%c5, %c0_21, %c0_22] : memref<7x16x16xbf16, #tpu.memory_space<vmem>>, vector<1x16x16xbf16>
    %36 = vector.shape_cast %35 : vector<1x16x16xbf16> to vector<16x16xbf16>
    %37 = vector.extract_strided_slice %8 {offsets = [0, 25], sizes = [16, 128], strides = [1, 1]} : vector<16x158xbf16> to vector<16x128xbf16>
    %cst_23 = arith.constant dense<0.000000e+00> : vector<16x128xf32>
    %38 = tpu.matmul %36, %37, %cst_23 {dimension_numbers = #tpu.dot_dimension_numbers<[1], [0], [0], [1], [0, 0, 1, 1], [], []>} : vector<16x16xbf16>, vector<16x128xbf16>, vector<16x128xf32> -> vector<16x128xf32>
    %39 = arith.addf %34, %38 : vector<16x128xf32>
    %c6 = arith.constant 6 : index
    %c0_24 = arith.constant 0 : index
    %c0_25 = arith.constant 0 : index
    %40 = vector.load %arg3[%c6, %c0_24, %c0_25] : memref<7x16x16xbf16, #tpu.memory_space<vmem>>, vector<1x16x16xbf16>
    %41 = vector.shape_cast %40 : vector<1x16x16xbf16> to vector<16x16xbf16>
    %42 = vector.extract_strided_slice %8 {offsets = [0, 30], sizes = [16, 128], strides = [1, 1]} : vector<16x158xbf16> to vector<16x128xbf16>
    %cst_26 = arith.constant dense<0.000000e+00> : vector<16x128xf32>
    %43 = tpu.matmul %41, %42, %cst_26 {dimension_numbers = #tpu.dot_dimension_numbers<[1], [0], [0], [1], [0, 0, 1, 1], [], []>} : vector<16x16xbf16>, vector<16x128xbf16>, vector<16x128xf32> -> vector<16x128xf32>
    %44 = arith.addf %39, %43 : vector<16x128xf32>
    %c0_27 = arith.constant 0 : index
    %c0_28 = arith.constant 0 : index
    %45 = vector.load %arg4[%c0_27, %c0_28] : memref<16x1xf32, #tpu.memory_space<vmem>>, vector<16x1xf32>
    %46 = vector.broadcast %45 : vector<16x1xf32> to vector<16x128xf32>
    %47 = arith.addf %44, %46 : vector<16x128xf32>
    %cst_29 = arith.constant 0.000000e+00 : f32
    %48 = vector.broadcast %cst_29 : f32 to vector<16x128xf32>
    %49 = arith.cmpf oge, %47, %48 : vector<16x128xf32>
    %cst_30 = arith.constant 1.000000e-01 : f32
    %50 = vector.broadcast %cst_30 : f32 to vector<16x128xf32>
    %51 = arith.mulf %50, %47 : vector<16x128xf32>
    %52 = arith.select %49, %47, %51 : vector<16x128xi1>, vector<16x128xf32>
    %53 = arith.truncf %52 : vector<16x128xf32> to vector<16x128xbf16>
    %c0_31 = arith.constant 0 : index
    %c0_32 = arith.constant 0 : index
    %54 = vector.load %arg5[%c0_31, %c0_32] : memref<16x16xbf16, #tpu.memory_space<vmem>>, vector<16x16xbf16>
    %cst_33 = arith.constant dense<0.000000e+00> : vector<16x128xf32>
    %55 = tpu.matmul %54, %53, %cst_33 {dimension_numbers = #tpu.dot_dimension_numbers<[1], [0], [0], [1], [0, 0, 1, 1], [], []>} : vector<16x16xbf16>, vector<16x128xbf16>, vector<16x128xf32> -> vector<16x128xf32>
    %c0_34 = arith.constant 0 : index
    %c0_35 = arith.constant 0 : index
    %56 = vector.load %arg6[%c0_34, %c0_35] : memref<16x1xf32, #tpu.memory_space<vmem>>, vector<16x1xf32>
    %57 = vector.broadcast %56 : vector<16x1xf32> to vector<16x128xf32>
    %58 = arith.addf %55, %57 : vector<16x128xf32>
    %59 = vector.extract_strided_slice %2 {offsets = [0, 15], sizes = [16, 128], strides = [1, 1]} : vector<16x158xf32> to vector<16x128xf32>
    %60 = arith.addf %58, %59 : vector<16x128xf32>
    %61 = arith.truncf %60 : vector<16x128xf32> to vector<16x128xbf16>
    %c0_36 = arith.constant 0 : index
    %c0_37 = arith.constant 0 : index
    %c0_38 = arith.constant 0 : index
    %62 = vector.load %arg7[%c0_36, %c0_37, %c0_38] : memref<1x16x128xbf16, #tpu.memory_space<vmem>>, vector<1x16x128xbf16>
    %63 = vector.shape_cast %62 : vector<1x16x128xbf16> to vector<16x128xbf16>
    %64 = vector.shape_cast %61 : vector<16x128xbf16> to vector<1x16x128xbf16>
    tpu.vector_store %arg7[%c0_36, %c0_37, %c0_38], %64 {strides = array<i32>} : memref<1x16x128xbf16, #tpu.memory_space<vmem>>, vector<1x16x128xbf16>,
    return
  }
  func.func @transform_0(%arg0: i32, %arg1: i32) -> (i32, i32, i32, i32) {
    %c0_i32 = arith.constant 0 : i32
    %c0_i32_0 = arith.constant 0 : i32
    %c0_i32_1 = arith.constant 0 : i32
    return %arg0, %arg1, %c0_i32, %c0_i32_0 : i32, i32, i32, i32
  }
  func.func @transform_1(%arg0: i32, %arg1: i32) -> (i32, i32, i32) {
    %c0_i32 = arith.constant 0 : i32
    %c0_i32_0 = arith.constant 0 : i32
    %c0_i32_1 = arith.constant 0 : i32
    %c0_i32_2 = arith.constant 0 : i32
    return %c0_i32, %c0_i32_0, %c0_i32_1 : i32, i32, i32
  }
  func.func @transform_2(%arg0: i32, %arg1: i32) -> (i32, i32) {
    %c0_i32 = arith.constant 0 : i32
    %c0_i32_0 = arith.constant 0 : i32
    %c0_i32_1 = arith.constant 0 : i32
    return %c0_i32, %c0_i32_0 : i32, i32
  }
  func.func @transform_3(%arg0: i32, %arg1: i32) -> (i32, i32) {
    %c0_i32 = arith.constant 0 : i32
    %c0_i32_0 = arith.constant 0 : i32
    %c0_i32_1 = arith.constant 0 : i32
    return %c0_i32, %c0_i32_0 : i32, i32
  }
  func.func @transform_4(%arg0: i32, %arg1: i32) -> (i32, i32) {
    %c0_i32 = arith.constant 0 : i32
    %c0_i32_0 = arith.constant 0 : i32
    %c0_i32_1 = arith.constant 0 : i32
    return %c0_i32, %c0_i32_0 : i32, i32
  }
  func.func @transform_5(%arg0: i32, %arg1: i32) -> (i32, i32, i32) {
    %c0_i32 = arith.constant 0 : i32
    %c0_i32_0 = arith.constant 0 : i32
    return %arg0, %c0_i32, %arg1 : i32, i32, i32
  }
}

module attributes {stable_mosaic.version = 11 : i64} {
  func.func @_resblock_step_kernel(%arg0: i32, %arg1: i32, %arg2: memref<1x1x16x138xbf16, #tpu.memory_space<vmem>>, %arg3: memref<11x16x16xbf16, #tpu.memory_space<vmem>>, %arg4: memref<16x1xf32, #tpu.memory_space<vmem>>, %arg5: memref<16x16xbf16, #tpu.memory_space<vmem>>, %arg6: memref<16x1xf32, #tpu.memory_space<vmem>>, %arg7: memref<1x16x128xbf16, #tpu.memory_space<vmem>>) attributes {dimension_semantics = [#tpu.dimension_semantics<parallel>, #tpu.dimension_semantics<parallel>], iteration_bounds = array<i64: 2, 1>, scalar_prefetch = 0 : i64, scratch_operands = 0 : i64, tpu.core_type = #tpu.core_type<tc>, window_params = [{transform_indices = @transform_0, window_bounds = array<i64: 1, 1, 16, 138>}, {pipeline_mode = #tpu.pipeline_mode<synchronous>, transform_indices = @transform_1, window_bounds = array<i64: 11, 16, 16>}, {pipeline_mode = #tpu.pipeline_mode<synchronous>, transform_indices = @transform_2, window_bounds = array<i64: 16, 1>}, {pipeline_mode = #tpu.pipeline_mode<synchronous>, transform_indices = @transform_3, window_bounds = array<i64: 16, 16>}, {pipeline_mode = #tpu.pipeline_mode<synchronous>, transform_indices = @transform_4, window_bounds = array<i64: 16, 1>}, {transform_indices = @transform_5, window_bounds = array<i64: 1, 16, 128>}]} {
    %c0 = arith.constant 0 : index
    %c0_0 = arith.constant 0 : index
    %c0_1 = arith.constant 0 : index
    %c0_2 = arith.constant 0 : index
    %0 = vector.load %arg2[%c0, %c0_0, %c0_1, %c0_2] : memref<1x1x16x138xbf16, #tpu.memory_space<vmem>>, vector<1x1x16x138xbf16>
    %1 = vector.shape_cast %0 : vector<1x1x16x138xbf16> to vector<16x138xbf16>
    %2 = arith.extf %1 : vector<16x138xbf16> to vector<16x138xf32>
    %cst = arith.constant 0.000000e+00 : f32
    %3 = vector.broadcast %cst : f32 to vector<16x138xf32>
    %4 = arith.cmpf oge, %2, %3 : vector<16x138xf32>
    %cst_3 = arith.constant 1.000000e-01 : f32
    %5 = vector.broadcast %cst_3 : f32 to vector<16x138xf32>
    %6 = arith.mulf %5, %2 : vector<16x138xf32>
    %7 = arith.select %4, %2, %6 : vector<16x138xi1>, vector<16x138xf32>
    %8 = arith.truncf %7 : vector<16x138xf32> to vector<16x138xbf16>
    %cst_4 = arith.constant 0.000000e+00 : f32
    %9 = vector.broadcast %cst_4 : f32 to vector<16x128xf32>
    %c0_5 = arith.constant 0 : index
    %c0_6 = arith.constant 0 : index
    %c0_7 = arith.constant 0 : index
    %10 = vector.load %arg3[%c0_5, %c0_6, %c0_7] : memref<11x16x16xbf16, #tpu.memory_space<vmem>>, vector<1x16x16xbf16>
    %11 = vector.shape_cast %10 : vector<1x16x16xbf16> to vector<16x16xbf16>
    %12 = vector.extract_strided_slice %8 {offsets = [0, 0], sizes = [16, 128], strides = [1, 1]} : vector<16x138xbf16> to vector<16x128xbf16>
    %cst_8 = arith.constant dense<0.000000e+00> : vector<16x128xf32>
    %13 = tpu.matmul %11, %12, %cst_8 {dimension_numbers = #tpu.dot_dimension_numbers<[1], [0], [0], [1], [0, 0, 1, 1], [], []>} : vector<16x16xbf16>, vector<16x128xbf16>, vector<16x128xf32> -> vector<16x128xf32>
    %14 = arith.addf %9, %13 : vector<16x128xf32>
    %c1 = arith.constant 1 : index
    %c0_9 = arith.constant 0 : index
    %c0_10 = arith.constant 0 : index
    %15 = vector.load %arg3[%c1, %c0_9, %c0_10] : memref<11x16x16xbf16, #tpu.memory_space<vmem>>, vector<1x16x16xbf16>
    %16 = vector.shape_cast %15 : vector<1x16x16xbf16> to vector<16x16xbf16>
    %17 = vector.extract_strided_slice %8 {offsets = [0, 1], sizes = [16, 128], strides = [1, 1]} : vector<16x138xbf16> to vector<16x128xbf16>
    %cst_11 = arith.constant dense<0.000000e+00> : vector<16x128xf32>
    %18 = tpu.matmul %16, %17, %cst_11 {dimension_numbers = #tpu.dot_dimension_numbers<[1], [0], [0], [1], [0, 0, 1, 1], [], []>} : vector<16x16xbf16>, vector<16x128xbf16>, vector<16x128xf32> -> vector<16x128xf32>
    %19 = arith.addf %14, %18 : vector<16x128xf32>
    %c2 = arith.constant 2 : index
    %c0_12 = arith.constant 0 : index
    %c0_13 = arith.constant 0 : index
    %20 = vector.load %arg3[%c2, %c0_12, %c0_13] : memref<11x16x16xbf16, #tpu.memory_space<vmem>>, vector<1x16x16xbf16>
    %21 = vector.shape_cast %20 : vector<1x16x16xbf16> to vector<16x16xbf16>
    %22 = vector.extract_strided_slice %8 {offsets = [0, 2], sizes = [16, 128], strides = [1, 1]} : vector<16x138xbf16> to vector<16x128xbf16>
    %cst_14 = arith.constant dense<0.000000e+00> : vector<16x128xf32>
    %23 = tpu.matmul %21, %22, %cst_14 {dimension_numbers = #tpu.dot_dimension_numbers<[1], [0], [0], [1], [0, 0, 1, 1], [], []>} : vector<16x16xbf16>, vector<16x128xbf16>, vector<16x128xf32> -> vector<16x128xf32>
    %24 = arith.addf %19, %23 : vector<16x128xf32>
    %c3 = arith.constant 3 : index
    %c0_15 = arith.constant 0 : index
    %c0_16 = arith.constant 0 : index
    %25 = vector.load %arg3[%c3, %c0_15, %c0_16] : memref<11x16x16xbf16, #tpu.memory_space<vmem>>, vector<1x16x16xbf16>
    %26 = vector.shape_cast %25 : vector<1x16x16xbf16> to vector<16x16xbf16>
    %27 = vector.extract_strided_slice %8 {offsets = [0, 3], sizes = [16, 128], strides = [1, 1]} : vector<16x138xbf16> to vector<16x128xbf16>
    %cst_17 = arith.constant dense<0.000000e+00> : vector<16x128xf32>
    %28 = tpu.matmul %26, %27, %cst_17 {dimension_numbers = #tpu.dot_dimension_numbers<[1], [0], [0], [1], [0, 0, 1, 1], [], []>} : vector<16x16xbf16>, vector<16x128xbf16>, vector<16x128xf32> -> vector<16x128xf32>
    %29 = arith.addf %24, %28 : vector<16x128xf32>
    %c4 = arith.constant 4 : index
    %c0_18 = arith.constant 0 : index
    %c0_19 = arith.constant 0 : index
    %30 = vector.load %arg3[%c4, %c0_18, %c0_19] : memref<11x16x16xbf16, #tpu.memory_space<vmem>>, vector<1x16x16xbf16>
    %31 = vector.shape_cast %30 : vector<1x16x16xbf16> to vector<16x16xbf16>
    %32 = vector.extract_strided_slice %8 {offsets = [0, 4], sizes = [16, 128], strides = [1, 1]} : vector<16x138xbf16> to vector<16x128xbf16>
    %cst_20 = arith.constant dense<0.000000e+00> : vector<16x128xf32>
    %33 = tpu.matmul %31, %32, %cst_20 {dimension_numbers = #tpu.dot_dimension_numbers<[1], [0], [0], [1], [0, 0, 1, 1], [], []>} : vector<16x16xbf16>, vector<16x128xbf16>, vector<16x128xf32> -> vector<16x128xf32>
    %34 = arith.addf %29, %33 : vector<16x128xf32>
    %c5 = arith.constant 5 : index
    %c0_21 = arith.constant 0 : index
    %c0_22 = arith.constant 0 : index
    %35 = vector.load %arg3[%c5, %c0_21, %c0_22] : memref<11x16x16xbf16, #tpu.memory_space<vmem>>, vector<1x16x16xbf16>
    %36 = vector.shape_cast %35 : vector<1x16x16xbf16> to vector<16x16xbf16>
    %37 = vector.extract_strided_slice %8 {offsets = [0, 5], sizes = [16, 128], strides = [1, 1]} : vector<16x138xbf16> to vector<16x128xbf16>
    %cst_23 = arith.constant dense<0.000000e+00> : vector<16x128xf32>
    %38 = tpu.matmul %36, %37, %cst_23 {dimension_numbers = #tpu.dot_dimension_numbers<[1], [0], [0], [1], [0, 0, 1, 1], [], []>} : vector<16x16xbf16>, vector<16x128xbf16>, vector<16x128xf32> -> vector<16x128xf32>
    %39 = arith.addf %34, %38 : vector<16x128xf32>
    %c6 = arith.constant 6 : index
    %c0_24 = arith.constant 0 : index
    %c0_25 = arith.constant 0 : index
    %40 = vector.load %arg3[%c6, %c0_24, %c0_25] : memref<11x16x16xbf16, #tpu.memory_space<vmem>>, vector<1x16x16xbf16>
    %41 = vector.shape_cast %40 : vector<1x16x16xbf16> to vector<16x16xbf16>
    %42 = vector.extract_strided_slice %8 {offsets = [0, 6], sizes = [16, 128], strides = [1, 1]} : vector<16x138xbf16> to vector<16x128xbf16>
    %cst_26 = arith.constant dense<0.000000e+00> : vector<16x128xf32>
    %43 = tpu.matmul %41, %42, %cst_26 {dimension_numbers = #tpu.dot_dimension_numbers<[1], [0], [0], [1], [0, 0, 1, 1], [], []>} : vector<16x16xbf16>, vector<16x128xbf16>, vector<16x128xf32> -> vector<16x128xf32>
    %44 = arith.addf %39, %43 : vector<16x128xf32>
    %c7 = arith.constant 7 : index
    %c0_27 = arith.constant 0 : index
    %c0_28 = arith.constant 0 : index
    %45 = vector.load %arg3[%c7, %c0_27, %c0_28] : memref<11x16x16xbf16, #tpu.memory_space<vmem>>, vector<1x16x16xbf16>
    %46 = vector.shape_cast %45 : vector<1x16x16xbf16> to vector<16x16xbf16>
    %47 = vector.extract_strided_slice %8 {offsets = [0, 7], sizes = [16, 128], strides = [1, 1]} : vector<16x138xbf16> to vector<16x128xbf16>
    %cst_29 = arith.constant dense<0.000000e+00> : vector<16x128xf32>
    %48 = tpu.matmul %46, %47, %cst_29 {dimension_numbers = #tpu.dot_dimension_numbers<[1], [0], [0], [1], [0, 0, 1, 1], [], []>} : vector<16x16xbf16>, vector<16x128xbf16>, vector<16x128xf32> -> vector<16x128xf32>
    %49 = arith.addf %44, %48 : vector<16x128xf32>
    %c8 = arith.constant 8 : index
    %c0_30 = arith.constant 0 : index
    %c0_31 = arith.constant 0 : index
    %50 = vector.load %arg3[%c8, %c0_30, %c0_31] : memref<11x16x16xbf16, #tpu.memory_space<vmem>>, vector<1x16x16xbf16>
    %51 = vector.shape_cast %50 : vector<1x16x16xbf16> to vector<16x16xbf16>
    %52 = vector.extract_strided_slice %8 {offsets = [0, 8], sizes = [16, 128], strides = [1, 1]} : vector<16x138xbf16> to vector<16x128xbf16>
    %cst_32 = arith.constant dense<0.000000e+00> : vector<16x128xf32>
    %53 = tpu.matmul %51, %52, %cst_32 {dimension_numbers = #tpu.dot_dimension_numbers<[1], [0], [0], [1], [0, 0, 1, 1], [], []>} : vector<16x16xbf16>, vector<16x128xbf16>, vector<16x128xf32> -> vector<16x128xf32>
    %54 = arith.addf %49, %53 : vector<16x128xf32>
    %c9 = arith.constant 9 : index
    %c0_33 = arith.constant 0 : index
    %c0_34 = arith.constant 0 : index
    %55 = vector.load %arg3[%c9, %c0_33, %c0_34] : memref<11x16x16xbf16, #tpu.memory_space<vmem>>, vector<1x16x16xbf16>
    %56 = vector.shape_cast %55 : vector<1x16x16xbf16> to vector<16x16xbf16>
    %57 = vector.extract_strided_slice %8 {offsets = [0, 9], sizes = [16, 128], strides = [1, 1]} : vector<16x138xbf16> to vector<16x128xbf16>
    %cst_35 = arith.constant dense<0.000000e+00> : vector<16x128xf32>
    %58 = tpu.matmul %56, %57, %cst_35 {dimension_numbers = #tpu.dot_dimension_numbers<[1], [0], [0], [1], [0, 0, 1, 1], [], []>} : vector<16x16xbf16>, vector<16x128xbf16>, vector<16x128xf32> -> vector<16x128xf32>
    %59 = arith.addf %54, %58 : vector<16x128xf32>
    %c10 = arith.constant 10 : index
    %c0_36 = arith.constant 0 : index
    %c0_37 = arith.constant 0 : index
    %60 = vector.load %arg3[%c10, %c0_36, %c0_37] : memref<11x16x16xbf16, #tpu.memory_space<vmem>>, vector<1x16x16xbf16>
    %61 = vector.shape_cast %60 : vector<1x16x16xbf16> to vector<16x16xbf16>
    %62 = vector.extract_strided_slice %8 {offsets = [0, 10], sizes = [16, 128], strides = [1, 1]} : vector<16x138xbf16> to vector<16x128xbf16>
    %cst_38 = arith.constant dense<0.000000e+00> : vector<16x128xf32>
    %63 = tpu.matmul %61, %62, %cst_38 {dimension_numbers = #tpu.dot_dimension_numbers<[1], [0], [0], [1], [0, 0, 1, 1], [], []>} : vector<16x16xbf16>, vector<16x128xbf16>, vector<16x128xf32> -> vector<16x128xf32>
    %64 = arith.addf %59, %63 : vector<16x128xf32>
    %c0_39 = arith.constant 0 : index
    %c0_40 = arith.constant 0 : index
    %65 = vector.load %arg4[%c0_39, %c0_40] : memref<16x1xf32, #tpu.memory_space<vmem>>, vector<16x1xf32>
    %66 = vector.broadcast %65 : vector<16x1xf32> to vector<16x128xf32>
    %67 = arith.addf %64, %66 : vector<16x128xf32>
    %cst_41 = arith.constant 0.000000e+00 : f32
    %68 = vector.broadcast %cst_41 : f32 to vector<16x128xf32>
    %69 = arith.cmpf oge, %67, %68 : vector<16x128xf32>
    %cst_42 = arith.constant 1.000000e-01 : f32
    %70 = vector.broadcast %cst_42 : f32 to vector<16x128xf32>
    %71 = arith.mulf %70, %67 : vector<16x128xf32>
    %72 = arith.select %69, %67, %71 : vector<16x128xi1>, vector<16x128xf32>
    %73 = arith.truncf %72 : vector<16x128xf32> to vector<16x128xbf16>
    %c0_43 = arith.constant 0 : index
    %c0_44 = arith.constant 0 : index
    %74 = vector.load %arg5[%c0_43, %c0_44] : memref<16x16xbf16, #tpu.memory_space<vmem>>, vector<16x16xbf16>
    %cst_45 = arith.constant dense<0.000000e+00> : vector<16x128xf32>
    %75 = tpu.matmul %74, %73, %cst_45 {dimension_numbers = #tpu.dot_dimension_numbers<[1], [0], [0], [1], [0, 0, 1, 1], [], []>} : vector<16x16xbf16>, vector<16x128xbf16>, vector<16x128xf32> -> vector<16x128xf32>
    %c0_46 = arith.constant 0 : index
    %c0_47 = arith.constant 0 : index
    %76 = vector.load %arg6[%c0_46, %c0_47] : memref<16x1xf32, #tpu.memory_space<vmem>>, vector<16x1xf32>
    %77 = vector.broadcast %76 : vector<16x1xf32> to vector<16x128xf32>
    %78 = arith.addf %75, %77 : vector<16x128xf32>
    %79 = vector.extract_strided_slice %2 {offsets = [0, 5], sizes = [16, 128], strides = [1, 1]} : vector<16x138xf32> to vector<16x128xf32>
    %80 = arith.addf %78, %79 : vector<16x128xf32>
    %81 = arith.truncf %80 : vector<16x128xf32> to vector<16x128xbf16>
    %c0_48 = arith.constant 0 : index
    %c0_49 = arith.constant 0 : index
    %c0_50 = arith.constant 0 : index
    %82 = vector.load %arg7[%c0_48, %c0_49, %c0_50] : memref<1x16x128xbf16, #tpu.memory_space<vmem>>, vector<1x16x128xbf16>
    %83 = vector.shape_cast %82 : vector<1x16x128xbf16> to vector<16x128xbf16>
    %84 = vector.shape_cast %81 : vector<16x128xbf16> to vector<1x16x128xbf16>
    tpu.vector_store %arg7[%c0_48, %c0_49, %c0_50], %84 {strides = array<i32>} : memref<1x16x128xbf16, #tpu.memory_space<vmem>>, vector<1x16x128xbf16>,
    return
  }
  func.func @transform_0(%arg0: i32, %arg1: i32) -> (i32, i32, i32, i32) {
    %c0_i32 = arith.constant 0 : i32
    %c0_i32_0 = arith.constant 0 : i32
    %c0_i32_1 = arith.constant 0 : i32
    return %arg0, %arg1, %c0_i32, %c0_i32_0 : i32, i32, i32, i32
  }
  func.func @transform_1(%arg0: i32, %arg1: i32) -> (i32, i32, i32) {
    %c0_i32 = arith.constant 0 : i32
    %c0_i32_0 = arith.constant 0 : i32
    %c0_i32_1 = arith.constant 0 : i32
    %c0_i32_2 = arith.constant 0 : i32
    return %c0_i32, %c0_i32_0, %c0_i32_1 : i32, i32, i32
  }
  func.func @transform_2(%arg0: i32, %arg1: i32) -> (i32, i32) {
    %c0_i32 = arith.constant 0 : i32
    %c0_i32_0 = arith.constant 0 : i32
    %c0_i32_1 = arith.constant 0 : i32
    return %c0_i32, %c0_i32_0 : i32, i32
  }
  func.func @transform_3(%arg0: i32, %arg1: i32) -> (i32, i32) {
    %c0_i32 = arith.constant 0 : i32
    %c0_i32_0 = arith.constant 0 : i32
    %c0_i32_1 = arith.constant 0 : i32
    return %c0_i32, %c0_i32_0 : i32, i32
  }
  func.func @transform_4(%arg0: i32, %arg1: i32) -> (i32, i32) {
    %c0_i32 = arith.constant 0 : i32
    %c0_i32_0 = arith.constant 0 : i32
    %c0_i32_1 = arith.constant 0 : i32
    return %c0_i32, %c0_i32_0 : i32, i32
  }
  func.func @transform_5(%arg0: i32, %arg1: i32) -> (i32, i32, i32) {
    %c0_i32 = arith.constant 0 : i32
    %c0_i32_0 = arith.constant 0 : i32
    return %arg0, %c0_i32, %arg1 : i32, i32, i32
  }
}

module attributes {stable_mosaic.version = 11 : i64} {
  func.func @_resblock_step_kernel(%arg0: i32, %arg1: i32, %arg2: memref<1x1x16x158xbf16, #tpu.memory_space<vmem>>, %arg3: memref<11x16x16xbf16, #tpu.memory_space<vmem>>, %arg4: memref<16x1xf32, #tpu.memory_space<vmem>>, %arg5: memref<16x16xbf16, #tpu.memory_space<vmem>>, %arg6: memref<16x1xf32, #tpu.memory_space<vmem>>, %arg7: memref<1x16x128xbf16, #tpu.memory_space<vmem>>) attributes {dimension_semantics = [#tpu.dimension_semantics<parallel>, #tpu.dimension_semantics<parallel>], iteration_bounds = array<i64: 2, 1>, scalar_prefetch = 0 : i64, scratch_operands = 0 : i64, tpu.core_type = #tpu.core_type<tc>, window_params = [{transform_indices = @transform_0, window_bounds = array<i64: 1, 1, 16, 158>}, {pipeline_mode = #tpu.pipeline_mode<synchronous>, transform_indices = @transform_1, window_bounds = array<i64: 11, 16, 16>}, {pipeline_mode = #tpu.pipeline_mode<synchronous>, transform_indices = @transform_2, window_bounds = array<i64: 16, 1>}, {pipeline_mode = #tpu.pipeline_mode<synchronous>, transform_indices = @transform_3, window_bounds = array<i64: 16, 16>}, {pipeline_mode = #tpu.pipeline_mode<synchronous>, transform_indices = @transform_4, window_bounds = array<i64: 16, 1>}, {transform_indices = @transform_5, window_bounds = array<i64: 1, 16, 128>}]} {
    %c0 = arith.constant 0 : index
    %c0_0 = arith.constant 0 : index
    %c0_1 = arith.constant 0 : index
    %c0_2 = arith.constant 0 : index
    %0 = vector.load %arg2[%c0, %c0_0, %c0_1, %c0_2] : memref<1x1x16x158xbf16, #tpu.memory_space<vmem>>, vector<1x1x16x158xbf16>
    %1 = vector.shape_cast %0 : vector<1x1x16x158xbf16> to vector<16x158xbf16>
    %2 = arith.extf %1 : vector<16x158xbf16> to vector<16x158xf32>
    %cst = arith.constant 0.000000e+00 : f32
    %3 = vector.broadcast %cst : f32 to vector<16x158xf32>
    %4 = arith.cmpf oge, %2, %3 : vector<16x158xf32>
    %cst_3 = arith.constant 1.000000e-01 : f32
    %5 = vector.broadcast %cst_3 : f32 to vector<16x158xf32>
    %6 = arith.mulf %5, %2 : vector<16x158xf32>
    %7 = arith.select %4, %2, %6 : vector<16x158xi1>, vector<16x158xf32>
    %8 = arith.truncf %7 : vector<16x158xf32> to vector<16x158xbf16>
    %cst_4 = arith.constant 0.000000e+00 : f32
    %9 = vector.broadcast %cst_4 : f32 to vector<16x128xf32>
    %c0_5 = arith.constant 0 : index
    %c0_6 = arith.constant 0 : index
    %c0_7 = arith.constant 0 : index
    %10 = vector.load %arg3[%c0_5, %c0_6, %c0_7] : memref<11x16x16xbf16, #tpu.memory_space<vmem>>, vector<1x16x16xbf16>
    %11 = vector.shape_cast %10 : vector<1x16x16xbf16> to vector<16x16xbf16>
    %12 = vector.extract_strided_slice %8 {offsets = [0, 0], sizes = [16, 128], strides = [1, 1]} : vector<16x158xbf16> to vector<16x128xbf16>
    %cst_8 = arith.constant dense<0.000000e+00> : vector<16x128xf32>
    %13 = tpu.matmul %11, %12, %cst_8 {dimension_numbers = #tpu.dot_dimension_numbers<[1], [0], [0], [1], [0, 0, 1, 1], [], []>} : vector<16x16xbf16>, vector<16x128xbf16>, vector<16x128xf32> -> vector<16x128xf32>
    %14 = arith.addf %9, %13 : vector<16x128xf32>
    %c1 = arith.constant 1 : index
    %c0_9 = arith.constant 0 : index
    %c0_10 = arith.constant 0 : index
    %15 = vector.load %arg3[%c1, %c0_9, %c0_10] : memref<11x16x16xbf16, #tpu.memory_space<vmem>>, vector<1x16x16xbf16>
    %16 = vector.shape_cast %15 : vector<1x16x16xbf16> to vector<16x16xbf16>
    %17 = vector.extract_strided_slice %8 {offsets = [0, 3], sizes = [16, 128], strides = [1, 1]} : vector<16x158xbf16> to vector<16x128xbf16>
    %cst_11 = arith.constant dense<0.000000e+00> : vector<16x128xf32>
    %18 = tpu.matmul %16, %17, %cst_11 {dimension_numbers = #tpu.dot_dimension_numbers<[1], [0], [0], [1], [0, 0, 1, 1], [], []>} : vector<16x16xbf16>, vector<16x128xbf16>, vector<16x128xf32> -> vector<16x128xf32>
    %19 = arith.addf %14, %18 : vector<16x128xf32>
    %c2 = arith.constant 2 : index
    %c0_12 = arith.constant 0 : index
    %c0_13 = arith.constant 0 : index
    %20 = vector.load %arg3[%c2, %c0_12, %c0_13] : memref<11x16x16xbf16, #tpu.memory_space<vmem>>, vector<1x16x16xbf16>
    %21 = vector.shape_cast %20 : vector<1x16x16xbf16> to vector<16x16xbf16>
    %22 = vector.extract_strided_slice %8 {offsets = [0, 6], sizes = [16, 128], strides = [1, 1]} : vector<16x158xbf16> to vector<16x128xbf16>
    %cst_14 = arith.constant dense<0.000000e+00> : vector<16x128xf32>
    %23 = tpu.matmul %21, %22, %cst_14 {dimension_numbers = #tpu.dot_dimension_numbers<[1], [0], [0], [1], [0, 0, 1, 1], [], []>} : vector<16x16xbf16>, vector<16x128xbf16>, vector<16x128xf32> -> vector<16x128xf32>
    %24 = arith.addf %19, %23 : vector<16x128xf32>
    %c3 = arith.constant 3 : index
    %c0_15 = arith.constant 0 : index
    %c0_16 = arith.constant 0 : index
    %25 = vector.load %arg3[%c3, %c0_15, %c0_16] : memref<11x16x16xbf16, #tpu.memory_space<vmem>>, vector<1x16x16xbf16>
    %26 = vector.shape_cast %25 : vector<1x16x16xbf16> to vector<16x16xbf16>
    %27 = vector.extract_strided_slice %8 {offsets = [0, 9], sizes = [16, 128], strides = [1, 1]} : vector<16x158xbf16> to vector<16x128xbf16>
    %cst_17 = arith.constant dense<0.000000e+00> : vector<16x128xf32>
    %28 = tpu.matmul %26, %27, %cst_17 {dimension_numbers = #tpu.dot_dimension_numbers<[1], [0], [0], [1], [0, 0, 1, 1], [], []>} : vector<16x16xbf16>, vector<16x128xbf16>, vector<16x128xf32> -> vector<16x128xf32>
    %29 = arith.addf %24, %28 : vector<16x128xf32>
    %c4 = arith.constant 4 : index
    %c0_18 = arith.constant 0 : index
    %c0_19 = arith.constant 0 : index
    %30 = vector.load %arg3[%c4, %c0_18, %c0_19] : memref<11x16x16xbf16, #tpu.memory_space<vmem>>, vector<1x16x16xbf16>
    %31 = vector.shape_cast %30 : vector<1x16x16xbf16> to vector<16x16xbf16>
    %32 = vector.extract_strided_slice %8 {offsets = [0, 12], sizes = [16, 128], strides = [1, 1]} : vector<16x158xbf16> to vector<16x128xbf16>
    %cst_20 = arith.constant dense<0.000000e+00> : vector<16x128xf32>
    %33 = tpu.matmul %31, %32, %cst_20 {dimension_numbers = #tpu.dot_dimension_numbers<[1], [0], [0], [1], [0, 0, 1, 1], [], []>} : vector<16x16xbf16>, vector<16x128xbf16>, vector<16x128xf32> -> vector<16x128xf32>
    %34 = arith.addf %29, %33 : vector<16x128xf32>
    %c5 = arith.constant 5 : index
    %c0_21 = arith.constant 0 : index
    %c0_22 = arith.constant 0 : index
    %35 = vector.load %arg3[%c5, %c0_21, %c0_22] : memref<11x16x16xbf16, #tpu.memory_space<vmem>>, vector<1x16x16xbf16>
    %36 = vector.shape_cast %35 : vector<1x16x16xbf16> to vector<16x16xbf16>
    %37 = vector.extract_strided_slice %8 {offsets = [0, 15], sizes = [16, 128], strides = [1, 1]} : vector<16x158xbf16> to vector<16x128xbf16>
    %cst_23 = arith.constant dense<0.000000e+00> : vector<16x128xf32>
    %38 = tpu.matmul %36, %37, %cst_23 {dimension_numbers = #tpu.dot_dimension_numbers<[1], [0], [0], [1], [0, 0, 1, 1], [], []>} : vector<16x16xbf16>, vector<16x128xbf16>, vector<16x128xf32> -> vector<16x128xf32>
    %39 = arith.addf %34, %38 : vector<16x128xf32>
    %c6 = arith.constant 6 : index
    %c0_24 = arith.constant 0 : index
    %c0_25 = arith.constant 0 : index
    %40 = vector.load %arg3[%c6, %c0_24, %c0_25] : memref<11x16x16xbf16, #tpu.memory_space<vmem>>, vector<1x16x16xbf16>
    %41 = vector.shape_cast %40 : vector<1x16x16xbf16> to vector<16x16xbf16>
    %42 = vector.extract_strided_slice %8 {offsets = [0, 18], sizes = [16, 128], strides = [1, 1]} : vector<16x158xbf16> to vector<16x128xbf16>
    %cst_26 = arith.constant dense<0.000000e+00> : vector<16x128xf32>
    %43 = tpu.matmul %41, %42, %cst_26 {dimension_numbers = #tpu.dot_dimension_numbers<[1], [0], [0], [1], [0, 0, 1, 1], [], []>} : vector<16x16xbf16>, vector<16x128xbf16>, vector<16x128xf32> -> vector<16x128xf32>
    %44 = arith.addf %39, %43 : vector<16x128xf32>
    %c7 = arith.constant 7 : index
    %c0_27 = arith.constant 0 : index
    %c0_28 = arith.constant 0 : index
    %45 = vector.load %arg3[%c7, %c0_27, %c0_28] : memref<11x16x16xbf16, #tpu.memory_space<vmem>>, vector<1x16x16xbf16>
    %46 = vector.shape_cast %45 : vector<1x16x16xbf16> to vector<16x16xbf16>
    %47 = vector.extract_strided_slice %8 {offsets = [0, 21], sizes = [16, 128], strides = [1, 1]} : vector<16x158xbf16> to vector<16x128xbf16>
    %cst_29 = arith.constant dense<0.000000e+00> : vector<16x128xf32>
    %48 = tpu.matmul %46, %47, %cst_29 {dimension_numbers = #tpu.dot_dimension_numbers<[1], [0], [0], [1], [0, 0, 1, 1], [], []>} : vector<16x16xbf16>, vector<16x128xbf16>, vector<16x128xf32> -> vector<16x128xf32>
    %49 = arith.addf %44, %48 : vector<16x128xf32>
    %c8 = arith.constant 8 : index
    %c0_30 = arith.constant 0 : index
    %c0_31 = arith.constant 0 : index
    %50 = vector.load %arg3[%c8, %c0_30, %c0_31] : memref<11x16x16xbf16, #tpu.memory_space<vmem>>, vector<1x16x16xbf16>
    %51 = vector.shape_cast %50 : vector<1x16x16xbf16> to vector<16x16xbf16>
    %52 = vector.extract_strided_slice %8 {offsets = [0, 24], sizes = [16, 128], strides = [1, 1]} : vector<16x158xbf16> to vector<16x128xbf16>
    %cst_32 = arith.constant dense<0.000000e+00> : vector<16x128xf32>
    %53 = tpu.matmul %51, %52, %cst_32 {dimension_numbers = #tpu.dot_dimension_numbers<[1], [0], [0], [1], [0, 0, 1, 1], [], []>} : vector<16x16xbf16>, vector<16x128xbf16>, vector<16x128xf32> -> vector<16x128xf32>
    %54 = arith.addf %49, %53 : vector<16x128xf32>
    %c9 = arith.constant 9 : index
    %c0_33 = arith.constant 0 : index
    %c0_34 = arith.constant 0 : index
    %55 = vector.load %arg3[%c9, %c0_33, %c0_34] : memref<11x16x16xbf16, #tpu.memory_space<vmem>>, vector<1x16x16xbf16>
    %56 = vector.shape_cast %55 : vector<1x16x16xbf16> to vector<16x16xbf16>
    %57 = vector.extract_strided_slice %8 {offsets = [0, 27], sizes = [16, 128], strides = [1, 1]} : vector<16x158xbf16> to vector<16x128xbf16>
    %cst_35 = arith.constant dense<0.000000e+00> : vector<16x128xf32>
    %58 = tpu.matmul %56, %57, %cst_35 {dimension_numbers = #tpu.dot_dimension_numbers<[1], [0], [0], [1], [0, 0, 1, 1], [], []>} : vector<16x16xbf16>, vector<16x128xbf16>, vector<16x128xf32> -> vector<16x128xf32>
    %59 = arith.addf %54, %58 : vector<16x128xf32>
    %c10 = arith.constant 10 : index
    %c0_36 = arith.constant 0 : index
    %c0_37 = arith.constant 0 : index
    %60 = vector.load %arg3[%c10, %c0_36, %c0_37] : memref<11x16x16xbf16, #tpu.memory_space<vmem>>, vector<1x16x16xbf16>
    %61 = vector.shape_cast %60 : vector<1x16x16xbf16> to vector<16x16xbf16>
    %62 = vector.extract_strided_slice %8 {offsets = [0, 30], sizes = [16, 128], strides = [1, 1]} : vector<16x158xbf16> to vector<16x128xbf16>
    %cst_38 = arith.constant dense<0.000000e+00> : vector<16x128xf32>
    %63 = tpu.matmul %61, %62, %cst_38 {dimension_numbers = #tpu.dot_dimension_numbers<[1], [0], [0], [1], [0, 0, 1, 1], [], []>} : vector<16x16xbf16>, vector<16x128xbf16>, vector<16x128xf32> -> vector<16x128xf32>
    %64 = arith.addf %59, %63 : vector<16x128xf32>
    %c0_39 = arith.constant 0 : index
    %c0_40 = arith.constant 0 : index
    %65 = vector.load %arg4[%c0_39, %c0_40] : memref<16x1xf32, #tpu.memory_space<vmem>>, vector<16x1xf32>
    %66 = vector.broadcast %65 : vector<16x1xf32> to vector<16x128xf32>
    %67 = arith.addf %64, %66 : vector<16x128xf32>
    %cst_41 = arith.constant 0.000000e+00 : f32
    %68 = vector.broadcast %cst_41 : f32 to vector<16x128xf32>
    %69 = arith.cmpf oge, %67, %68 : vector<16x128xf32>
    %cst_42 = arith.constant 1.000000e-01 : f32
    %70 = vector.broadcast %cst_42 : f32 to vector<16x128xf32>
    %71 = arith.mulf %70, %67 : vector<16x128xf32>
    %72 = arith.select %69, %67, %71 : vector<16x128xi1>, vector<16x128xf32>
    %73 = arith.truncf %72 : vector<16x128xf32> to vector<16x128xbf16>
    %c0_43 = arith.constant 0 : index
    %c0_44 = arith.constant 0 : index
    %74 = vector.load %arg5[%c0_43, %c0_44] : memref<16x16xbf16, #tpu.memory_space<vmem>>, vector<16x16xbf16>
    %cst_45 = arith.constant dense<0.000000e+00> : vector<16x128xf32>
    %75 = tpu.matmul %74, %73, %cst_45 {dimension_numbers = #tpu.dot_dimension_numbers<[1], [0], [0], [1], [0, 0, 1, 1], [], []>} : vector<16x16xbf16>, vector<16x128xbf16>, vector<16x128xf32> -> vector<16x128xf32>
    %c0_46 = arith.constant 0 : index
    %c0_47 = arith.constant 0 : index
    %76 = vector.load %arg6[%c0_46, %c0_47] : memref<16x1xf32, #tpu.memory_space<vmem>>, vector<16x1xf32>
    %77 = vector.broadcast %76 : vector<16x1xf32> to vector<16x128xf32>
    %78 = arith.addf %75, %77 : vector<16x128xf32>
    %79 = vector.extract_strided_slice %2 {offsets = [0, 15], sizes = [16, 128], strides = [1, 1]} : vector<16x158xf32> to vector<16x128xf32>
    %80 = arith.addf %78, %79 : vector<16x128xf32>
    %81 = arith.truncf %80 : vector<16x128xf32> to vector<16x128xbf16>
    %c0_48 = arith.constant 0 : index
    %c0_49 = arith.constant 0 : index
    %c0_50 = arith.constant 0 : index
    %82 = vector.load %arg7[%c0_48, %c0_49, %c0_50] : memref<1x16x128xbf16, #tpu.memory_space<vmem>>, vector<1x16x128xbf16>
    %83 = vector.shape_cast %82 : vector<1x16x128xbf16> to vector<16x128xbf16>
    %84 = vector.shape_cast %81 : vector<16x128xbf16> to vector<1x16x128xbf16>
    tpu.vector_store %arg7[%c0_48, %c0_49, %c0_50], %84 {strides = array<i32>} : memref<1x16x128xbf16, #tpu.memory_space<vmem>>, vector<1x16x128xbf16>,
    return
  }
  func.func @transform_0(%arg0: i32, %arg1: i32) -> (i32, i32, i32, i32) {
    %c0_i32 = arith.constant 0 : i32
    %c0_i32_0 = arith.constant 0 : i32
    %c0_i32_1 = arith.constant 0 : i32
    return %arg0, %arg1, %c0_i32, %c0_i32_0 : i32, i32, i32, i32
  }
  func.func @transform_1(%arg0: i32, %arg1: i32) -> (i32, i32, i32) {
    %c0_i32 = arith.constant 0 : i32
    %c0_i32_0 = arith.constant 0 : i32
    %c0_i32_1 = arith.constant 0 : i32
    %c0_i32_2 = arith.constant 0 : i32
    return %c0_i32, %c0_i32_0, %c0_i32_1 : i32, i32, i32
  }
  func.func @transform_2(%arg0: i32, %arg1: i32) -> (i32, i32) {
    %c0_i32 = arith.constant 0 : i32
    %c0_i32_0 = arith.constant 0 : i32
    %c0_i32_1 = arith.constant 0 : i32
    return %c0_i32, %c0_i32_0 : i32, i32
  }
  func.func @transform_3(%arg0: i32, %arg1: i32) -> (i32, i32) {
    %c0_i32 = arith.constant 0 : i32
    %c0_i32_0 = arith.constant 0 : i32
    %c0_i32_1 = arith.constant 0 : i32
    return %c0_i32, %c0_i32_0 : i32, i32
  }
  func.func @transform_4(%arg0: i32, %arg1: i32) -> (i32, i32) {
    %c0_i32 = arith.constant 0 : i32
    %c0_i32_0 = arith.constant 0 : i32
    %c0_i32_1 = arith.constant 0 : i32
    return %c0_i32, %c0_i32_0 : i32, i32
  }
  func.func @transform_5(%arg0: i32, %arg1: i32) -> (i32, i32, i32) {
    %c0_i32 = arith.constant 0 : i32
    %c0_i32_0 = arith.constant 0 : i32
    return %arg0, %c0_i32, %arg1 : i32, i32, i32
  }
}

module attributes {stable_mosaic.version = 11 : i64} {
  func.func @_resblock_step_kernel(%arg0: i32, %arg1: i32, %arg2: memref<1x1x16x178xbf16, #tpu.memory_space<vmem>>, %arg3: memref<11x16x16xbf16, #tpu.memory_space<vmem>>, %arg4: memref<16x1xf32, #tpu.memory_space<vmem>>, %arg5: memref<16x16xbf16, #tpu.memory_space<vmem>>, %arg6: memref<16x1xf32, #tpu.memory_space<vmem>>, %arg7: memref<1x16x128xbf16, #tpu.memory_space<vmem>>) attributes {dimension_semantics = [#tpu.dimension_semantics<parallel>, #tpu.dimension_semantics<parallel>], iteration_bounds = array<i64: 2, 1>, scalar_prefetch = 0 : i64, scratch_operands = 0 : i64, tpu.core_type = #tpu.core_type<tc>, window_params = [{transform_indices = @transform_0, window_bounds = array<i64: 1, 1, 16, 178>}, {pipeline_mode = #tpu.pipeline_mode<synchronous>, transform_indices = @transform_1, window_bounds = array<i64: 11, 16, 16>}, {pipeline_mode = #tpu.pipeline_mode<synchronous>, transform_indices = @transform_2, window_bounds = array<i64: 16, 1>}, {pipeline_mode = #tpu.pipeline_mode<synchronous>, transform_indices = @transform_3, window_bounds = array<i64: 16, 16>}, {pipeline_mode = #tpu.pipeline_mode<synchronous>, transform_indices = @transform_4, window_bounds = array<i64: 16, 1>}, {transform_indices = @transform_5, window_bounds = array<i64: 1, 16, 128>}]} {
    %c0 = arith.constant 0 : index
    %c0_0 = arith.constant 0 : index
    %c0_1 = arith.constant 0 : index
    %c0_2 = arith.constant 0 : index
    %0 = vector.load %arg2[%c0, %c0_0, %c0_1, %c0_2] : memref<1x1x16x178xbf16, #tpu.memory_space<vmem>>, vector<1x1x16x178xbf16>
    %1 = vector.shape_cast %0 : vector<1x1x16x178xbf16> to vector<16x178xbf16>
    %2 = arith.extf %1 : vector<16x178xbf16> to vector<16x178xf32>
    %cst = arith.constant 0.000000e+00 : f32
    %3 = vector.broadcast %cst : f32 to vector<16x178xf32>
    %4 = arith.cmpf oge, %2, %3 : vector<16x178xf32>
    %cst_3 = arith.constant 1.000000e-01 : f32
    %5 = vector.broadcast %cst_3 : f32 to vector<16x178xf32>
    %6 = arith.mulf %5, %2 : vector<16x178xf32>
    %7 = arith.select %4, %2, %6 : vector<16x178xi1>, vector<16x178xf32>
    %8 = arith.truncf %7 : vector<16x178xf32> to vector<16x178xbf16>
    %cst_4 = arith.constant 0.000000e+00 : f32
    %9 = vector.broadcast %cst_4 : f32 to vector<16x128xf32>
    %c0_5 = arith.constant 0 : index
    %c0_6 = arith.constant 0 : index
    %c0_7 = arith.constant 0 : index
    %10 = vector.load %arg3[%c0_5, %c0_6, %c0_7] : memref<11x16x16xbf16, #tpu.memory_space<vmem>>, vector<1x16x16xbf16>
    %11 = vector.shape_cast %10 : vector<1x16x16xbf16> to vector<16x16xbf16>
    %12 = vector.extract_strided_slice %8 {offsets = [0, 0], sizes = [16, 128], strides = [1, 1]} : vector<16x178xbf16> to vector<16x128xbf16>
    %cst_8 = arith.constant dense<0.000000e+00> : vector<16x128xf32>
    %13 = tpu.matmul %11, %12, %cst_8 {dimension_numbers = #tpu.dot_dimension_numbers<[1], [0], [0], [1], [0, 0, 1, 1], [], []>} : vector<16x16xbf16>, vector<16x128xbf16>, vector<16x128xf32> -> vector<16x128xf32>
    %14 = arith.addf %9, %13 : vector<16x128xf32>
    %c1 = arith.constant 1 : index
    %c0_9 = arith.constant 0 : index
    %c0_10 = arith.constant 0 : index
    %15 = vector.load %arg3[%c1, %c0_9, %c0_10] : memref<11x16x16xbf16, #tpu.memory_space<vmem>>, vector<1x16x16xbf16>
    %16 = vector.shape_cast %15 : vector<1x16x16xbf16> to vector<16x16xbf16>
    %17 = vector.extract_strided_slice %8 {offsets = [0, 5], sizes = [16, 128], strides = [1, 1]} : vector<16x178xbf16> to vector<16x128xbf16>
    %cst_11 = arith.constant dense<0.000000e+00> : vector<16x128xf32>
    %18 = tpu.matmul %16, %17, %cst_11 {dimension_numbers = #tpu.dot_dimension_numbers<[1], [0], [0], [1], [0, 0, 1, 1], [], []>} : vector<16x16xbf16>, vector<16x128xbf16>, vector<16x128xf32> -> vector<16x128xf32>
    %19 = arith.addf %14, %18 : vector<16x128xf32>
    %c2 = arith.constant 2 : index
    %c0_12 = arith.constant 0 : index
    %c0_13 = arith.constant 0 : index
    %20 = vector.load %arg3[%c2, %c0_12, %c0_13] : memref<11x16x16xbf16, #tpu.memory_space<vmem>>, vector<1x16x16xbf16>
    %21 = vector.shape_cast %20 : vector<1x16x16xbf16> to vector<16x16xbf16>
    %22 = vector.extract_strided_slice %8 {offsets = [0, 10], sizes = [16, 128], strides = [1, 1]} : vector<16x178xbf16> to vector<16x128xbf16>
    %cst_14 = arith.constant dense<0.000000e+00> : vector<16x128xf32>
    %23 = tpu.matmul %21, %22, %cst_14 {dimension_numbers = #tpu.dot_dimension_numbers<[1], [0], [0], [1], [0, 0, 1, 1], [], []>} : vector<16x16xbf16>, vector<16x128xbf16>, vector<16x128xf32> -> vector<16x128xf32>
    %24 = arith.addf %19, %23 : vector<16x128xf32>
    %c3 = arith.constant 3 : index
    %c0_15 = arith.constant 0 : index
    %c0_16 = arith.constant 0 : index
    %25 = vector.load %arg3[%c3, %c0_15, %c0_16] : memref<11x16x16xbf16, #tpu.memory_space<vmem>>, vector<1x16x16xbf16>
    %26 = vector.shape_cast %25 : vector<1x16x16xbf16> to vector<16x16xbf16>
    %27 = vector.extract_strided_slice %8 {offsets = [0, 15], sizes = [16, 128], strides = [1, 1]} : vector<16x178xbf16> to vector<16x128xbf16>
    %cst_17 = arith.constant dense<0.000000e+00> : vector<16x128xf32>
    %28 = tpu.matmul %26, %27, %cst_17 {dimension_numbers = #tpu.dot_dimension_numbers<[1], [0], [0], [1], [0, 0, 1, 1], [], []>} : vector<16x16xbf16>, vector<16x128xbf16>, vector<16x128xf32> -> vector<16x128xf32>
    %29 = arith.addf %24, %28 : vector<16x128xf32>
    %c4 = arith.constant 4 : index
    %c0_18 = arith.constant 0 : index
    %c0_19 = arith.constant 0 : index
    %30 = vector.load %arg3[%c4, %c0_18, %c0_19] : memref<11x16x16xbf16, #tpu.memory_space<vmem>>, vector<1x16x16xbf16>
    %31 = vector.shape_cast %30 : vector<1x16x16xbf16> to vector<16x16xbf16>
    %32 = vector.extract_strided_slice %8 {offsets = [0, 20], sizes = [16, 128], strides = [1, 1]} : vector<16x178xbf16> to vector<16x128xbf16>
    %cst_20 = arith.constant dense<0.000000e+00> : vector<16x128xf32>
    %33 = tpu.matmul %31, %32, %cst_20 {dimension_numbers = #tpu.dot_dimension_numbers<[1], [0], [0], [1], [0, 0, 1, 1], [], []>} : vector<16x16xbf16>, vector<16x128xbf16>, vector<16x128xf32> -> vector<16x128xf32>
    %34 = arith.addf %29, %33 : vector<16x128xf32>
    %c5 = arith.constant 5 : index
    %c0_21 = arith.constant 0 : index
    %c0_22 = arith.constant 0 : index
    %35 = vector.load %arg3[%c5, %c0_21, %c0_22] : memref<11x16x16xbf16, #tpu.memory_space<vmem>>, vector<1x16x16xbf16>
    %36 = vector.shape_cast %35 : vector<1x16x16xbf16> to vector<16x16xbf16>
    %37 = vector.extract_strided_slice %8 {offsets = [0, 25], sizes = [16, 128], strides = [1, 1]} : vector<16x178xbf16> to vector<16x128xbf16>
    %cst_23 = arith.constant dense<0.000000e+00> : vector<16x128xf32>
    %38 = tpu.matmul %36, %37, %cst_23 {dimension_numbers = #tpu.dot_dimension_numbers<[1], [0], [0], [1], [0, 0, 1, 1], [], []>} : vector<16x16xbf16>, vector<16x128xbf16>, vector<16x128xf32> -> vector<16x128xf32>
    %39 = arith.addf %34, %38 : vector<16x128xf32>
    %c6 = arith.constant 6 : index
    %c0_24 = arith.constant 0 : index
    %c0_25 = arith.constant 0 : index
    %40 = vector.load %arg3[%c6, %c0_24, %c0_25] : memref<11x16x16xbf16, #tpu.memory_space<vmem>>, vector<1x16x16xbf16>
    %41 = vector.shape_cast %40 : vector<1x16x16xbf16> to vector<16x16xbf16>
    %42 = vector.extract_strided_slice %8 {offsets = [0, 30], sizes = [16, 128], strides = [1, 1]} : vector<16x178xbf16> to vector<16x128xbf16>
    %cst_26 = arith.constant dense<0.000000e+00> : vector<16x128xf32>
    %43 = tpu.matmul %41, %42, %cst_26 {dimension_numbers = #tpu.dot_dimension_numbers<[1], [0], [0], [1], [0, 0, 1, 1], [], []>} : vector<16x16xbf16>, vector<16x128xbf16>, vector<16x128xf32> -> vector<16x128xf32>
    %44 = arith.addf %39, %43 : vector<16x128xf32>
    %c7 = arith.constant 7 : index
    %c0_27 = arith.constant 0 : index
    %c0_28 = arith.constant 0 : index
    %45 = vector.load %arg3[%c7, %c0_27, %c0_28] : memref<11x16x16xbf16, #tpu.memory_space<vmem>>, vector<1x16x16xbf16>
    %46 = vector.shape_cast %45 : vector<1x16x16xbf16> to vector<16x16xbf16>
    %47 = vector.extract_strided_slice %8 {offsets = [0, 35], sizes = [16, 128], strides = [1, 1]} : vector<16x178xbf16> to vector<16x128xbf16>
    %cst_29 = arith.constant dense<0.000000e+00> : vector<16x128xf32>
    %48 = tpu.matmul %46, %47, %cst_29 {dimension_numbers = #tpu.dot_dimension_numbers<[1], [0], [0], [1], [0, 0, 1, 1], [], []>} : vector<16x16xbf16>, vector<16x128xbf16>, vector<16x128xf32> -> vector<16x128xf32>
    %49 = arith.addf %44, %48 : vector<16x128xf32>
    %c8 = arith.constant 8 : index
    %c0_30 = arith.constant 0 : index
    %c0_31 = arith.constant 0 : index
    %50 = vector.load %arg3[%c8, %c0_30, %c0_31] : memref<11x16x16xbf16, #tpu.memory_space<vmem>>, vector<1x16x16xbf16>
    %51 = vector.shape_cast %50 : vector<1x16x16xbf16> to vector<16x16xbf16>
    %52 = vector.extract_strided_slice %8 {offsets = [0, 40], sizes = [16, 128], strides = [1, 1]} : vector<16x178xbf16> to vector<16x128xbf16>
    %cst_32 = arith.constant dense<0.000000e+00> : vector<16x128xf32>
    %53 = tpu.matmul %51, %52, %cst_32 {dimension_numbers = #tpu.dot_dimension_numbers<[1], [0], [0], [1], [0, 0, 1, 1], [], []>} : vector<16x16xbf16>, vector<16x128xbf16>, vector<16x128xf32> -> vector<16x128xf32>
    %54 = arith.addf %49, %53 : vector<16x128xf32>
    %c9 = arith.constant 9 : index
    %c0_33 = arith.constant 0 : index
    %c0_34 = arith.constant 0 : index
    %55 = vector.load %arg3[%c9, %c0_33, %c0_34] : memref<11x16x16xbf16, #tpu.memory_space<vmem>>, vector<1x16x16xbf16>
    %56 = vector.shape_cast %55 : vector<1x16x16xbf16> to vector<16x16xbf16>
    %57 = vector.extract_strided_slice %8 {offsets = [0, 45], sizes = [16, 128], strides = [1, 1]} : vector<16x178xbf16> to vector<16x128xbf16>
    %cst_35 = arith.constant dense<0.000000e+00> : vector<16x128xf32>
    %58 = tpu.matmul %56, %57, %cst_35 {dimension_numbers = #tpu.dot_dimension_numbers<[1], [0], [0], [1], [0, 0, 1, 1], [], []>} : vector<16x16xbf16>, vector<16x128xbf16>, vector<16x128xf32> -> vector<16x128xf32>
    %59 = arith.addf %54, %58 : vector<16x128xf32>
    %c10 = arith.constant 10 : index
    %c0_36 = arith.constant 0 : index
    %c0_37 = arith.constant 0 : index
    %60 = vector.load %arg3[%c10, %c0_36, %c0_37] : memref<11x16x16xbf16, #tpu.memory_space<vmem>>, vector<1x16x16xbf16>
    %61 = vector.shape_cast %60 : vector<1x16x16xbf16> to vector<16x16xbf16>
    %62 = vector.extract_strided_slice %8 {offsets = [0, 50], sizes = [16, 128], strides = [1, 1]} : vector<16x178xbf16> to vector<16x128xbf16>
    %cst_38 = arith.constant dense<0.000000e+00> : vector<16x128xf32>
    %63 = tpu.matmul %61, %62, %cst_38 {dimension_numbers = #tpu.dot_dimension_numbers<[1], [0], [0], [1], [0, 0, 1, 1], [], []>} : vector<16x16xbf16>, vector<16x128xbf16>, vector<16x128xf32> -> vector<16x128xf32>
    %64 = arith.addf %59, %63 : vector<16x128xf32>
    %c0_39 = arith.constant 0 : index
    %c0_40 = arith.constant 0 : index
    %65 = vector.load %arg4[%c0_39, %c0_40] : memref<16x1xf32, #tpu.memory_space<vmem>>, vector<16x1xf32>
    %66 = vector.broadcast %65 : vector<16x1xf32> to vector<16x128xf32>
    %67 = arith.addf %64, %66 : vector<16x128xf32>
    %cst_41 = arith.constant 0.000000e+00 : f32
    %68 = vector.broadcast %cst_41 : f32 to vector<16x128xf32>
    %69 = arith.cmpf oge, %67, %68 : vector<16x128xf32>
    %cst_42 = arith.constant 1.000000e-01 : f32
    %70 = vector.broadcast %cst_42 : f32 to vector<16x128xf32>
    %71 = arith.mulf %70, %67 : vector<16x128xf32>
    %72 = arith.select %69, %67, %71 : vector<16x128xi1>, vector<16x128xf32>
    %73 = arith.truncf %72 : vector<16x128xf32> to vector<16x128xbf16>
    %c0_43 = arith.constant 0 : index
    %c0_44 = arith.constant 0 : index
    %74 = vector.load %arg5[%c0_43, %c0_44] : memref<16x16xbf16, #tpu.memory_space<vmem>>, vector<16x16xbf16>
    %cst_45 = arith.constant dense<0.000000e+00> : vector<16x128xf32>
    %75 = tpu.matmul %74, %73, %cst_45 {dimension_numbers = #tpu.dot_dimension_numbers<[1], [0], [0], [1], [0, 0, 1, 1], [], []>} : vector<16x16xbf16>, vector<16x128xbf16>, vector<16x128xf32> -> vector<16x128xf32>
    %c0_46 = arith.constant 0 : index
    %c0_47 = arith.constant 0 : index
    %76 = vector.load %arg6[%c0_46, %c0_47] : memref<16x1xf32, #tpu.memory_space<vmem>>, vector<16x1xf32>
    %77 = vector.broadcast %76 : vector<16x1xf32> to vector<16x128xf32>
    %78 = arith.addf %75, %77 : vector<16x128xf32>
    %79 = vector.extract_strided_slice %2 {offsets = [0, 25], sizes = [16, 128], strides = [1, 1]} : vector<16x178xf32> to vector<16x128xf32>
    %80 = arith.addf %78, %79 : vector<16x128xf32>
    %81 = arith.truncf %80 : vector<16x128xf32> to vector<16x128xbf16>
    %c0_48 = arith.constant 0 : index
    %c0_49 = arith.constant 0 : index
    %c0_50 = arith.constant 0 : index
    %82 = vector.load %arg7[%c0_48, %c0_49, %c0_50] : memref<1x16x128xbf16, #tpu.memory_space<vmem>>, vector<1x16x128xbf16>
    %83 = vector.shape_cast %82 : vector<1x16x128xbf16> to vector<16x128xbf16>
    %84 = vector.shape_cast %81 : vector<16x128xbf16> to vector<1x16x128xbf16>
    tpu.vector_store %arg7[%c0_48, %c0_49, %c0_50], %84 {strides = array<i32>} : memref<1x16x128xbf16, #tpu.memory_space<vmem>>, vector<1x16x128xbf16>,
    return
  }
  func.func @transform_0(%arg0: i32, %arg1: i32) -> (i32, i32, i32, i32) {
    %c0_i32 = arith.constant 0 : i32
    %c0_i32_0 = arith.constant 0 : i32
    %c0_i32_1 = arith.constant 0 : i32
    return %arg0, %arg1, %c0_i32, %c0_i32_0 : i32, i32, i32, i32
  }
  func.func @transform_1(%arg0: i32, %arg1: i32) -> (i32, i32, i32) {
    %c0_i32 = arith.constant 0 : i32
    %c0_i32_0 = arith.constant 0 : i32
    %c0_i32_1 = arith.constant 0 : i32
    %c0_i32_2 = arith.constant 0 : i32
    return %c0_i32, %c0_i32_0, %c0_i32_1 : i32, i32, i32
  }
  func.func @transform_2(%arg0: i32, %arg1: i32) -> (i32, i32) {
    %c0_i32 = arith.constant 0 : i32
    %c0_i32_0 = arith.constant 0 : i32
    %c0_i32_1 = arith.constant 0 : i32
    return %c0_i32, %c0_i32_0 : i32, i32
  }
  func.func @transform_3(%arg0: i32, %arg1: i32) -> (i32, i32) {
    %c0_i32 = arith.constant 0 : i32
    %c0_i32_0 = arith.constant 0 : i32
    %c0_i32_1 = arith.constant 0 : i32
    return %c0_i32, %c0_i32_0 : i32, i32
  }
  func.func @transform_4(%arg0: i32, %arg1: i32) -> (i32, i32) {
    %c0_i32 = arith.constant 0 : i32
    %c0_i32_0 = arith.constant 0 : i32
    %c0_i32_1 = arith.constant 0 : i32
    return %c0_i32, %c0_i32_0 : i32, i32
  }
  func.func @transform_5(%arg0: i32, %arg1: i32) -> (i32, i32, i32) {
    %c0_i32 = arith.constant 0 : i32
    %c0_i32_0 = arith.constant 0 : i32
    return %arg0, %c0_i32, %arg1 : i32, i32, i32
  }
}

module attributes {stable_mosaic.version = 11 : i64} {
  func.func @_conv_im2col_kernel(%arg0: i32, %arg1: i32, %arg2: i32, %arg3: memref<1x1x16x130xbf16, #tpu.memory_space<vmem>>, %arg4: memref<32x48xbf16, #tpu.memory_space<vmem>>, %arg5: memref<32x1xf32, #tpu.memory_space<vmem>>, %arg6: memref<1x32x128xbf16, #tpu.memory_space<vmem>>) attributes {dimension_semantics = [#tpu.dimension_semantics<parallel>, #tpu.dimension_semantics<parallel>, #tpu.dimension_semantics<parallel>], iteration_bounds = array<i64: 2, 1, 1>, scalar_prefetch = 0 : i64, scratch_operands = 0 : i64, tpu.core_type = #tpu.core_type<tc>, window_params = [{transform_indices = @transform_0, window_bounds = array<i64: 1, 1, 16, 130>}, {transform_indices = @transform_1, window_bounds = array<i64: 32, 48>}, {transform_indices = @transform_2, window_bounds = array<i64: 32, 1>}, {transform_indices = @transform_3, window_bounds = array<i64: 1, 32, 128>}]} {
    %c0 = arith.constant 0 : index
    %c0_0 = arith.constant 0 : index
    %c0_1 = arith.constant 0 : index
    %c0_2 = arith.constant 0 : index
    %0 = vector.load %arg3[%c0, %c0_0, %c0_1, %c0_2] : memref<1x1x16x130xbf16, #tpu.memory_space<vmem>>, vector<1x1x16x130xbf16>
    %1 = vector.shape_cast %0 : vector<1x1x16x130xbf16> to vector<16x130xbf16>
    %2 = arith.extf %1 : vector<16x130xbf16> to vector<16x130xf32>
    %cst = arith.constant 0.000000e+00 : f32
    %3 = vector.broadcast %cst : f32 to vector<16x130xf32>
    %4 = arith.cmpf oge, %2, %3 : vector<16x130xf32>
    %cst_3 = arith.constant 1.000000e-01 : f32
    %5 = vector.broadcast %cst_3 : f32 to vector<16x130xf32>
    %6 = arith.mulf %5, %2 : vector<16x130xf32>
    %7 = arith.select %4, %2, %6 : vector<16x130xi1>, vector<16x130xf32>
    %8 = arith.truncf %7 : vector<16x130xf32> to vector<16x130xbf16>
    %9 = vector.extract_strided_slice %8 {offsets = [0, 0], sizes = [16, 128], strides = [1, 1]} : vector<16x130xbf16> to vector<16x128xbf16>
    %10 = vector.extract_strided_slice %8 {offsets = [0, 1], sizes = [16, 128], strides = [1, 1]} : vector<16x130xbf16> to vector<16x128xbf16>
    %11 = vector.extract_strided_slice %8 {offsets = [0, 2], sizes = [16, 128], strides = [1, 1]} : vector<16x130xbf16> to vector<16x128xbf16>
    %12 = tpu.concatenate %9, %10, %11 in 0 : vector<16x128xbf16>, vector<16x128xbf16>, vector<16x128xbf16> -> vector<48x128xbf16>
    %c0_4 = arith.constant 0 : index
    %c0_5 = arith.constant 0 : index
    %13 = vector.load %arg4[%c0_4, %c0_5] : memref<32x48xbf16, #tpu.memory_space<vmem>>, vector<32x48xbf16>
    %cst_6 = arith.constant dense<0.000000e+00> : vector<32x128xf32>
    %14 = tpu.matmul %13, %12, %cst_6 {dimension_numbers = #tpu.dot_dimension_numbers<[1], [0], [0], [1], [0, 0, 1, 1], [], []>} : vector<32x48xbf16>, vector<48x128xbf16>, vector<32x128xf32> -> vector<32x128xf32>
    %c0_7 = arith.constant 0 : index
    %c0_8 = arith.constant 0 : index
    %15 = vector.load %arg5[%c0_7, %c0_8] : memref<32x1xf32, #tpu.memory_space<vmem>>, vector<32x1xf32>
    %16 = vector.broadcast %15 : vector<32x1xf32> to vector<32x128xf32>
    %17 = arith.addf %14, %16 : vector<32x128xf32>
    %18 = arith.truncf %17 : vector<32x128xf32> to vector<32x128xbf16>
    %c0_9 = arith.constant 0 : index
    %c0_10 = arith.constant 0 : index
    %c0_11 = arith.constant 0 : index
    %19 = vector.load %arg6[%c0_9, %c0_10, %c0_11] : memref<1x32x128xbf16, #tpu.memory_space<vmem>>, vector<1x32x128xbf16>
    %20 = vector.shape_cast %19 : vector<1x32x128xbf16> to vector<32x128xbf16>
    %21 = vector.shape_cast %18 : vector<32x128xbf16> to vector<1x32x128xbf16>
    tpu.vector_store %arg6[%c0_9, %c0_10, %c0_11], %21 {strides = array<i32>} : memref<1x32x128xbf16, #tpu.memory_space<vmem>>, vector<1x32x128xbf16>,
    return
  }
  func.func @transform_0(%arg0: i32, %arg1: i32, %arg2: i32) -> (i32, i32, i32, i32) {
    %c0_i32 = arith.constant 0 : i32
    %c0_i32_0 = arith.constant 0 : i32
    %c0_i32_1 = arith.constant 0 : i32
    return %arg0, %arg2, %c0_i32, %c0_i32_0 : i32, i32, i32, i32
  }
  func.func @transform_1(%arg0: i32, %arg1: i32, %arg2: i32) -> (i32, i32) {
    %c0_i32 = arith.constant 0 : i32
    %c0_i32_0 = arith.constant 0 : i32
    return %arg1, %c0_i32 : i32, i32
  }
  func.func @transform_2(%arg0: i32, %arg1: i32, %arg2: i32) -> (i32, i32) {
    %c0_i32 = arith.constant 0 : i32
    %c0_i32_0 = arith.constant 0 : i32
    return %arg1, %c0_i32 : i32, i32
  }
  func.func @transform_3(%arg0: i32, %arg1: i32, %arg2: i32) -> (i32, i32, i32) {
    %c0_i32 = arith.constant 0 : i32
    return %arg0, %arg1, %arg2 : i32, i32, i32
  }
}

module attributes {stable_mosaic.version = 11 : i64} {
  func.func @_epilogue_kernel(%arg0: i32, %arg1: i32, %arg2: memref<1x1x16x164xbf16, #tpu.memory_space<vmem>>, %arg3: memref<1x1x1x130xf32, #tpu.memory_space<vmem>>, %arg4: memref<16x7xf32, #tpu.memory_space<vmem>>, %arg5: memref<1x1xf32, #tpu.memory_space<vmem>>, %arg6: memref<1x7xf32, #tpu.memory_space<vmem>>, %arg7: memref<1x1xf32, #tpu.memory_space<vmem>>, %arg8: memref<1x31xf32, #tpu.memory_space<vmem>>, %arg9: memref<1x1xf32, #tpu.memory_space<vmem>>, %arg10: memref<1x3xf32, #tpu.memory_space<vmem>>, %arg11: memref<1x1xf32, #tpu.memory_space<vmem>>, %arg12: memref<1x1x128xf32, #tpu.memory_space<vmem>>) attributes {dimension_semantics = [#tpu.dimension_semantics<parallel>, #tpu.dimension_semantics<parallel>], iteration_bounds = array<i64: 2, 1>, scalar_prefetch = 0 : i64, scratch_operands = 0 : i64, tpu.core_type = #tpu.core_type<tc>, window_params = [{transform_indices = @transform_0, window_bounds = array<i64: 1, 1, 16, 164>}, {transform_indices = @transform_1, window_bounds = array<i64: 1, 1, 1, 130>}, {pipeline_mode = #tpu.pipeline_mode<synchronous>, transform_indices = @transform_2, window_bounds = array<i64: 16, 7>}, {pipeline_mode = #tpu.pipeline_mode<synchronous>, transform_indices = @transform_3, window_bounds = array<i64: 1, 1>}, {pipeline_mode = #tpu.pipeline_mode<synchronous>, transform_indices = @transform_4, window_bounds = array<i64: 1, 7>}, {pipeline_mode = #tpu.pipeline_mode<synchronous>, transform_indices = @transform_5, window_bounds = array<i64: 1, 1>}, {pipeline_mode = #tpu.pipeline_mode<synchronous>, transform_indices = @transform_6, window_bounds = array<i64: 1, 31>}, {pipeline_mode = #tpu.pipeline_mode<synchronous>, transform_indices = @transform_7, window_bounds = array<i64: 1, 1>}, {pipeline_mode = #tpu.pipeline_mode<synchronous>, transform_indices = @transform_8, window_bounds = array<i64: 1, 3>}, {pipeline_mode = #tpu.pipeline_mode<synchronous>, transform_indices = @transform_9, window_bounds = array<i64: 1, 1>}, {transform_indices = @transform_10, window_bounds = array<i64: 1, 1, 128>}]} {
    %c0 = arith.constant 0 : index
    %c0_0 = arith.constant 0 : index
    %c0_1 = arith.constant 0 : index
    %c0_2 = arith.constant 0 : index
    %0 = vector.load %arg2[%c0, %c0_0, %c0_1, %c0_2] : memref<1x1x16x164xbf16, #tpu.memory_space<vmem>>, vector<1x1x16x164xbf16>
    %1 = vector.shape_cast %0 : vector<1x1x16x164xbf16> to vector<16x164xbf16>
    %2 = arith.extf %1 : vector<16x164xbf16> to vector<16x164xf32>
    %cst = arith.constant 0.000000e+00 : f32
    %3 = vector.broadcast %cst : f32 to vector<16x164xf32>
    %4 = arith.cmpf oge, %2, %3 : vector<16x164xf32>
    %cst_3 = arith.constant 1.000000e-01 : f32
    %5 = vector.broadcast %cst_3 : f32 to vector<16x164xf32>
    %6 = arith.mulf %5, %2 : vector<16x164xf32>
    %7 = arith.select %4, %2, %6 : vector<16x164xi1>, vector<16x164xf32>
    %cst_4 = arith.constant 0.000000e+00 : f32
    %8 = vector.broadcast %cst_4 : f32 to vector<16x158xf32>
    %9 = vector.extract_strided_slice %7 {offsets = [0, 0], sizes = [16, 158], strides = [1, 1]} : vector<16x164xf32> to vector<16x158xf32>
    %c0_5 = arith.constant 0 : index
    %c0_6 = arith.constant 0 : index
    %10 = vector.load %arg4[%c0_5, %c0_6] : memref<16x7xf32, #tpu.memory_space<vmem>>, vector<16x1xf32>
    %11 = vector.broadcast %10 : vector<16x1xf32> to vector<16x158xf32>
    %12 = arith.mulf %9, %11 : vector<16x158xf32>
    %13 = arith.addf %8, %12 : vector<16x158xf32>
    %14 = vector.extract_strided_slice %7 {offsets = [0, 1], sizes = [16, 158], strides = [1, 1]} : vector<16x164xf32> to vector<16x158xf32>
    %c0_7 = arith.constant 0 : index
    %c1 = arith.constant 1 : index
    %15 = vector.load %arg4[%c0_7, %c1] : memref<16x7xf32, #tpu.memory_space<vmem>>, vector<16x1xf32>
    %16 = vector.broadcast %15 : vector<16x1xf32> to vector<16x158xf32>
    %17 = arith.mulf %14, %16 : vector<16x158xf32>
    %18 = arith.addf %13, %17 : vector<16x158xf32>
    %19 = vector.extract_strided_slice %7 {offsets = [0, 2], sizes = [16, 158], strides = [1, 1]} : vector<16x164xf32> to vector<16x158xf32>
    %c0_8 = arith.constant 0 : index
    %c2 = arith.constant 2 : index
    %20 = vector.load %arg4[%c0_8, %c2] : memref<16x7xf32, #tpu.memory_space<vmem>>, vector<16x1xf32>
    %21 = vector.broadcast %20 : vector<16x1xf32> to vector<16x158xf32>
    %22 = arith.mulf %19, %21 : vector<16x158xf32>
    %23 = arith.addf %18, %22 : vector<16x158xf32>
    %24 = vector.extract_strided_slice %7 {offsets = [0, 3], sizes = [16, 158], strides = [1, 1]} : vector<16x164xf32> to vector<16x158xf32>
    %c0_9 = arith.constant 0 : index
    %c3 = arith.constant 3 : index
    %25 = vector.load %arg4[%c0_9, %c3] : memref<16x7xf32, #tpu.memory_space<vmem>>, vector<16x1xf32>
    %26 = vector.broadcast %25 : vector<16x1xf32> to vector<16x158xf32>
    %27 = arith.mulf %24, %26 : vector<16x158xf32>
    %28 = arith.addf %23, %27 : vector<16x158xf32>
    %29 = vector.extract_strided_slice %7 {offsets = [0, 4], sizes = [16, 158], strides = [1, 1]} : vector<16x164xf32> to vector<16x158xf32>
    %c0_10 = arith.constant 0 : index
    %c4 = arith.constant 4 : index
    %30 = vector.load %arg4[%c0_10, %c4] : memref<16x7xf32, #tpu.memory_space<vmem>>, vector<16x1xf32>
    %31 = vector.broadcast %30 : vector<16x1xf32> to vector<16x158xf32>
    %32 = arith.mulf %29, %31 : vector<16x158xf32>
    %33 = arith.addf %28, %32 : vector<16x158xf32>
    %34 = vector.extract_strided_slice %7 {offsets = [0, 5], sizes = [16, 158], strides = [1, 1]} : vector<16x164xf32> to vector<16x158xf32>
    %c0_11 = arith.constant 0 : index
    %c5 = arith.constant 5 : index
    %35 = vector.load %arg4[%c0_11, %c5] : memref<16x7xf32, #tpu.memory_space<vmem>>, vector<16x1xf32>
    %36 = vector.broadcast %35 : vector<16x1xf32> to vector<16x158xf32>
    %37 = arith.mulf %34, %36 : vector<16x158xf32>
    %38 = arith.addf %33, %37 : vector<16x158xf32>
    %39 = vector.extract_strided_slice %7 {offsets = [0, 6], sizes = [16, 158], strides = [1, 1]} : vector<16x164xf32> to vector<16x158xf32>
    %c0_12 = arith.constant 0 : index
    %c6 = arith.constant 6 : index
    %40 = vector.load %arg4[%c0_12, %c6] : memref<16x7xf32, #tpu.memory_space<vmem>>, vector<16x1xf32>
    %41 = vector.broadcast %40 : vector<16x1xf32> to vector<16x158xf32>
    %42 = arith.mulf %39, %41 : vector<16x158xf32>
    %43 = arith.addf %38, %42 : vector<16x158xf32>
    %cst_13 = arith.constant dense<0.000000e+00> : vector<158xf32>
    %44 = vector.multi_reduction <add>, %43, %cst_13 [0] : vector<16x158xf32> to vector<158xf32>
    %45 = vector.shape_cast %44 : vector<158xf32> to vector<1x158xf32>
    %c0_14 = arith.constant 0 : index
    %c0_15 = arith.constant 0 : index
    %46 = vector.load %arg5[%c0_14, %c0_15] : memref<1x1xf32, #tpu.memory_space<vmem>>, vector<1x1xf32>
    %47 = vector.broadcast %46 : vector<1x1xf32> to vector<1x158xf32>
    %48 = arith.addf %45, %47 : vector<1x158xf32>
    %49 = math.tanh %48 : vector<1x158xf32>
    %c128_i32 = arith.constant 128 : i32
    %50 = arith.muli %arg1, %c128_i32 : i32
    %c15_i32 = arith.constant 15 : i32
    %51 = arith.subi %50, %c15_i32 : i32
    %52 = tpu.iota {dimensions = array<i32: 1>} : vector<1x158xi32>
    %53 = vector.broadcast %51 : i32 to vector<1x158xi32>
    %54 = arith.addi %53, %52 : vector<1x158xi32>
    %c0_i32 = arith.constant 0 : i32
    %55 = vector.broadcast %c0_i32 : i32 to vector<1x158xi32>
    %56 = arith.cmpi sge, %54, %55 : vector<1x158xi32>
    %c32_i32 = arith.constant 32 : i32
    %57 = vector.broadcast %c32_i32 : i32 to vector<1x158xi32>
    %58 = arith.cmpi slt, %54, %57 : vector<1x158xi32>
    %59 = arith.andi %56, %58 : vector<1x158xi1>
    %cst_16 = arith.constant 0.000000e+00 : f32
    %60 = vector.broadcast %cst_16 : f32 to vector<1x158xf32>
    %61 = arith.select %59, %49, %60 : vector<1x158xi1>, vector<1x158xf32>
    %cst_17 = arith.constant 0.000000e+00 : f32
    %62 = vector.broadcast %cst_17 : f32 to vector<1x128xf32>
    %63 = vector.extract_strided_slice %61 {offsets = [0, 12], sizes = [1, 128], strides = [1, 1]} : vector<1x158xf32> to vector<1x128xf32>
    %c0_18 = arith.constant 0 : index
    %c0_19 = arith.constant 0 : index
    %64 = vector.load %arg6[%c0_18, %c0_19] : memref<1x7xf32, #tpu.memory_space<vmem>>, vector<1x1xf32>
    %65 = vector.broadcast %64 : vector<1x1xf32> to vector<1x128xf32>
    %66 = arith.mulf %63, %65 : vector<1x128xf32>
    %67 = arith.addf %62, %66 : vector<1x128xf32>
    %68 = vector.extract_strided_slice %61 {offsets = [0, 13], sizes = [1, 128], strides = [1, 1]} : vector<1x158xf32> to vector<1x128xf32>
    %c0_20 = arith.constant 0 : index
    %c1_21 = arith.constant 1 : index
    %69 = vector.load %arg6[%c0_20, %c1_21] : memref<1x7xf32, #tpu.memory_space<vmem>>, vector<1x1xf32>
    %70 = vector.broadcast %69 : vector<1x1xf32> to vector<1x128xf32>
    %71 = arith.mulf %68, %70 : vector<1x128xf32>
    %72 = arith.addf %67, %71 : vector<1x128xf32>
    %73 = vector.extract_strided_slice %61 {offsets = [0, 14], sizes = [1, 128], strides = [1, 1]} : vector<1x158xf32> to vector<1x128xf32>
    %c0_22 = arith.constant 0 : index
    %c2_23 = arith.constant 2 : index
    %74 = vector.load %arg6[%c0_22, %c2_23] : memref<1x7xf32, #tpu.memory_space<vmem>>, vector<1x1xf32>
    %75 = vector.broadcast %74 : vector<1x1xf32> to vector<1x128xf32>
    %76 = arith.mulf %73, %75 : vector<1x128xf32>
    %77 = arith.addf %72, %76 : vector<1x128xf32>
    %78 = vector.extract_strided_slice %61 {offsets = [0, 15], sizes = [1, 128], strides = [1, 1]} : vector<1x158xf32> to vector<1x128xf32>
    %c0_24 = arith.constant 0 : index
    %c3_25 = arith.constant 3 : index
    %79 = vector.load %arg6[%c0_24, %c3_25] : memref<1x7xf32, #tpu.memory_space<vmem>>, vector<1x1xf32>
    %80 = vector.broadcast %79 : vector<1x1xf32> to vector<1x128xf32>
    %81 = arith.mulf %78, %80 : vector<1x128xf32>
    %82 = arith.addf %77, %81 : vector<1x128xf32>
    %83 = vector.extract_strided_slice %61 {offsets = [0, 16], sizes = [1, 128], strides = [1, 1]} : vector<1x158xf32> to vector<1x128xf32>
    %c0_26 = arith.constant 0 : index
    %c4_27 = arith.constant 4 : index
    %84 = vector.load %arg6[%c0_26, %c4_27] : memref<1x7xf32, #tpu.memory_space<vmem>>, vector<1x1xf32>
    %85 = vector.broadcast %84 : vector<1x1xf32> to vector<1x128xf32>
    %86 = arith.mulf %83, %85 : vector<1x128xf32>
    %87 = arith.addf %82, %86 : vector<1x128xf32>
    %88 = vector.extract_strided_slice %61 {offsets = [0, 17], sizes = [1, 128], strides = [1, 1]} : vector<1x158xf32> to vector<1x128xf32>
    %c0_28 = arith.constant 0 : index
    %c5_29 = arith.constant 5 : index
    %89 = vector.load %arg6[%c0_28, %c5_29] : memref<1x7xf32, #tpu.memory_space<vmem>>, vector<1x1xf32>
    %90 = vector.broadcast %89 : vector<1x1xf32> to vector<1x128xf32>
    %91 = arith.mulf %88, %90 : vector<1x128xf32>
    %92 = arith.addf %87, %91 : vector<1x128xf32>
    %93 = vector.extract_strided_slice %61 {offsets = [0, 18], sizes = [1, 128], strides = [1, 1]} : vector<1x158xf32> to vector<1x128xf32>
    %c0_30 = arith.constant 0 : index
    %c6_31 = arith.constant 6 : index
    %94 = vector.load %arg6[%c0_30, %c6_31] : memref<1x7xf32, #tpu.memory_space<vmem>>, vector<1x1xf32>
    %95 = vector.broadcast %94 : vector<1x1xf32> to vector<1x128xf32>
    %96 = arith.mulf %93, %95 : vector<1x128xf32>
    %97 = arith.addf %92, %96 : vector<1x128xf32>
    %c0_32 = arith.constant 0 : index
    %c0_33 = arith.constant 0 : index
    %98 = vector.load %arg7[%c0_32, %c0_33] : memref<1x1xf32, #tpu.memory_space<vmem>>, vector<1x1xf32>
    %99 = vector.broadcast %98 : vector<1x1xf32> to vector<1x128xf32>
    %100 = arith.addf %97, %99 : vector<1x128xf32>
    %cst_34 = arith.constant 0.000000e+00 : f32
    %101 = vector.broadcast %cst_34 : f32 to vector<1x128xf32>
    %102 = vector.extract_strided_slice %61 {offsets = [0, 0], sizes = [1, 128], strides = [1, 1]} : vector<1x158xf32> to vector<1x128xf32>
    %c0_35 = arith.constant 0 : index
    %c0_36 = arith.constant 0 : index
    %103 = vector.load %arg8[%c0_35, %c0_36] : memref<1x31xf32, #tpu.memory_space<vmem>>, vector<1x1xf32>
    %104 = vector.broadcast %103 : vector<1x1xf32> to vector<1x128xf32>
    %105 = arith.mulf %102, %104 : vector<1x128xf32>
    %106 = arith.addf %101, %105 : vector<1x128xf32>
    %107 = vector.extract_strided_slice %61 {offsets = [0, 1], sizes = [1, 128], strides = [1, 1]} : vector<1x158xf32> to vector<1x128xf32>
    %c0_37 = arith.constant 0 : index
    %c1_38 = arith.constant 1 : index
    %108 = vector.load %arg8[%c0_37, %c1_38] : memref<1x31xf32, #tpu.memory_space<vmem>>, vector<1x1xf32>
    %109 = vector.broadcast %108 : vector<1x1xf32> to vector<1x128xf32>
    %110 = arith.mulf %107, %109 : vector<1x128xf32>
    %111 = arith.addf %106, %110 : vector<1x128xf32>
    %112 = vector.extract_strided_slice %61 {offsets = [0, 2], sizes = [1, 128], strides = [1, 1]} : vector<1x158xf32> to vector<1x128xf32>
    %c0_39 = arith.constant 0 : index
    %c2_40 = arith.constant 2 : index
    %113 = vector.load %arg8[%c0_39, %c2_40] : memref<1x31xf32, #tpu.memory_space<vmem>>, vector<1x1xf32>
    %114 = vector.broadcast %113 : vector<1x1xf32> to vector<1x128xf32>
    %115 = arith.mulf %112, %114 : vector<1x128xf32>
    %116 = arith.addf %111, %115 : vector<1x128xf32>
    %117 = vector.extract_strided_slice %61 {offsets = [0, 3], sizes = [1, 128], strides = [1, 1]} : vector<1x158xf32> to vector<1x128xf32>
    %c0_41 = arith.constant 0 : index
    %c3_42 = arith.constant 3 : index
    %118 = vector.load %arg8[%c0_41, %c3_42] : memref<1x31xf32, #tpu.memory_space<vmem>>, vector<1x1xf32>
    %119 = vector.broadcast %118 : vector<1x1xf32> to vector<1x128xf32>
    %120 = arith.mulf %117, %119 : vector<1x128xf32>
    %121 = arith.addf %116, %120 : vector<1x128xf32>
    %122 = vector.extract_strided_slice %61 {offsets = [0, 4], sizes = [1, 128], strides = [1, 1]} : vector<1x158xf32> to vector<1x128xf32>
    %c0_43 = arith.constant 0 : index
    %c4_44 = arith.constant 4 : index
    %123 = vector.load %arg8[%c0_43, %c4_44] : memref<1x31xf32, #tpu.memory_space<vmem>>, vector<1x1xf32>
    %124 = vector.broadcast %123 : vector<1x1xf32> to vector<1x128xf32>
    %125 = arith.mulf %122, %124 : vector<1x128xf32>
    %126 = arith.addf %121, %125 : vector<1x128xf32>
    %127 = vector.extract_strided_slice %61 {offsets = [0, 5], sizes = [1, 128], strides = [1, 1]} : vector<1x158xf32> to vector<1x128xf32>
    %c0_45 = arith.constant 0 : index
    %c5_46 = arith.constant 5 : index
    %128 = vector.load %arg8[%c0_45, %c5_46] : memref<1x31xf32, #tpu.memory_space<vmem>>, vector<1x1xf32>
    %129 = vector.broadcast %128 : vector<1x1xf32> to vector<1x128xf32>
    %130 = arith.mulf %127, %129 : vector<1x128xf32>
    %131 = arith.addf %126, %130 : vector<1x128xf32>
    %132 = vector.extract_strided_slice %61 {offsets = [0, 6], sizes = [1, 128], strides = [1, 1]} : vector<1x158xf32> to vector<1x128xf32>
    %c0_47 = arith.constant 0 : index
    %c6_48 = arith.constant 6 : index
    %133 = vector.load %arg8[%c0_47, %c6_48] : memref<1x31xf32, #tpu.memory_space<vmem>>, vector<1x1xf32>
    %134 = vector.broadcast %133 : vector<1x1xf32> to vector<1x128xf32>
    %135 = arith.mulf %132, %134 : vector<1x128xf32>
    %136 = arith.addf %131, %135 : vector<1x128xf32>
    %137 = vector.extract_strided_slice %61 {offsets = [0, 7], sizes = [1, 128], strides = [1, 1]} : vector<1x158xf32> to vector<1x128xf32>
    %c0_49 = arith.constant 0 : index
    %c7 = arith.constant 7 : index
    %138 = vector.load %arg8[%c0_49, %c7] : memref<1x31xf32, #tpu.memory_space<vmem>>, vector<1x1xf32>
    %139 = vector.broadcast %138 : vector<1x1xf32> to vector<1x128xf32>
    %140 = arith.mulf %137, %139 : vector<1x128xf32>
    %141 = arith.addf %136, %140 : vector<1x128xf32>
    %142 = vector.extract_strided_slice %61 {offsets = [0, 8], sizes = [1, 128], strides = [1, 1]} : vector<1x158xf32> to vector<1x128xf32>
    %c0_50 = arith.constant 0 : index
    %c8 = arith.constant 8 : index
    %143 = vector.load %arg8[%c0_50, %c8] : memref<1x31xf32, #tpu.memory_space<vmem>>, vector<1x1xf32>
    %144 = vector.broadcast %143 : vector<1x1xf32> to vector<1x128xf32>
    %145 = arith.mulf %142, %144 : vector<1x128xf32>
    %146 = arith.addf %141, %145 : vector<1x128xf32>
    %147 = vector.extract_strided_slice %61 {offsets = [0, 9], sizes = [1, 128], strides = [1, 1]} : vector<1x158xf32> to vector<1x128xf32>
    %c0_51 = arith.constant 0 : index
    %c9 = arith.constant 9 : index
    %148 = vector.load %arg8[%c0_51, %c9] : memref<1x31xf32, #tpu.memory_space<vmem>>, vector<1x1xf32>
    %149 = vector.broadcast %148 : vector<1x1xf32> to vector<1x128xf32>
    %150 = arith.mulf %147, %149 : vector<1x128xf32>
    %151 = arith.addf %146, %150 : vector<1x128xf32>
    %152 = vector.extract_strided_slice %61 {offsets = [0, 10], sizes = [1, 128], strides = [1, 1]} : vector<1x158xf32> to vector<1x128xf32>
    %c0_52 = arith.constant 0 : index
    %c10 = arith.constant 10 : index
    %153 = vector.load %arg8[%c0_52, %c10] : memref<1x31xf32, #tpu.memory_space<vmem>>, vector<1x1xf32>
    %154 = vector.broadcast %153 : vector<1x1xf32> to vector<1x128xf32>
    %155 = arith.mulf %152, %154 : vector<1x128xf32>
    %156 = arith.addf %151, %155 : vector<1x128xf32>
    %157 = vector.extract_strided_slice %61 {offsets = [0, 11], sizes = [1, 128], strides = [1, 1]} : vector<1x158xf32> to vector<1x128xf32>
    %c0_53 = arith.constant 0 : index
    %c11 = arith.constant 11 : index
    %158 = vector.load %arg8[%c0_53, %c11] : memref<1x31xf32, #tpu.memory_space<vmem>>, vector<1x1xf32>
    %159 = vector.broadcast %158 : vector<1x1xf32> to vector<1x128xf32>
    %160 = arith.mulf %157, %159 : vector<1x128xf32>
    %161 = arith.addf %156, %160 : vector<1x128xf32>
    %162 = vector.extract_strided_slice %61 {offsets = [0, 12], sizes = [1, 128], strides = [1, 1]} : vector<1x158xf32> to vector<1x128xf32>
    %c0_54 = arith.constant 0 : index
    %c12 = arith.constant 12 : index
    %163 = vector.load %arg8[%c0_54, %c12] : memref<1x31xf32, #tpu.memory_space<vmem>>, vector<1x1xf32>
    %164 = vector.broadcast %163 : vector<1x1xf32> to vector<1x128xf32>
    %165 = arith.mulf %162, %164 : vector<1x128xf32>
    %166 = arith.addf %161, %165 : vector<1x128xf32>
    %167 = vector.extract_strided_slice %61 {offsets = [0, 13], sizes = [1, 128], strides = [1, 1]} : vector<1x158xf32> to vector<1x128xf32>
    %c0_55 = arith.constant 0 : index
    %c13 = arith.constant 13 : index
    %168 = vector.load %arg8[%c0_55, %c13] : memref<1x31xf32, #tpu.memory_space<vmem>>, vector<1x1xf32>
    %169 = vector.broadcast %168 : vector<1x1xf32> to vector<1x128xf32>
    %170 = arith.mulf %167, %169 : vector<1x128xf32>
    %171 = arith.addf %166, %170 : vector<1x128xf32>
    %172 = vector.extract_strided_slice %61 {offsets = [0, 14], sizes = [1, 128], strides = [1, 1]} : vector<1x158xf32> to vector<1x128xf32>
    %c0_56 = arith.constant 0 : index
    %c14 = arith.constant 14 : index
    %173 = vector.load %arg8[%c0_56, %c14] : memref<1x31xf32, #tpu.memory_space<vmem>>, vector<1x1xf32>
    %174 = vector.broadcast %173 : vector<1x1xf32> to vector<1x128xf32>
    %175 = arith.mulf %172, %174 : vector<1x128xf32>
    %176 = arith.addf %171, %175 : vector<1x128xf32>
    %177 = vector.extract_strided_slice %61 {offsets = [0, 15], sizes = [1, 128], strides = [1, 1]} : vector<1x158xf32> to vector<1x128xf32>
    %c0_57 = arith.constant 0 : index
    %c15 = arith.constant 15 : index
    %178 = vector.load %arg8[%c0_57, %c15] : memref<1x31xf32, #tpu.memory_space<vmem>>, vector<1x1xf32>
    %179 = vector.broadcast %178 : vector<1x1xf32> to vector<1x128xf32>
    %180 = arith.mulf %177, %179 : vector<1x128xf32>
    %181 = arith.addf %176, %180 : vector<1x128xf32>
    %182 = vector.extract_strided_slice %61 {offsets = [0, 16], sizes = [1, 128], strides = [1, 1]} : vector<1x158xf32> to vector<1x128xf32>
    %c0_58 = arith.constant 0 : index
    %c16 = arith.constant 16 : index
    %183 = vector.load %arg8[%c0_58, %c16] : memref<1x31xf32, #tpu.memory_space<vmem>>, vector<1x1xf32>
    %184 = vector.broadcast %183 : vector<1x1xf32> to vector<1x128xf32>
    %185 = arith.mulf %182, %184 : vector<1x128xf32>
    %186 = arith.addf %181, %185 : vector<1x128xf32>
    %187 = vector.extract_strided_slice %61 {offsets = [0, 17], sizes = [1, 128], strides = [1, 1]} : vector<1x158xf32> to vector<1x128xf32>
    %c0_59 = arith.constant 0 : index
    %c17 = arith.constant 17 : index
    %188 = vector.load %arg8[%c0_59, %c17] : memref<1x31xf32, #tpu.memory_space<vmem>>, vector<1x1xf32>
    %189 = vector.broadcast %188 : vector<1x1xf32> to vector<1x128xf32>
    %190 = arith.mulf %187, %189 : vector<1x128xf32>
    %191 = arith.addf %186, %190 : vector<1x128xf32>
    %192 = vector.extract_strided_slice %61 {offsets = [0, 18], sizes = [1, 128], strides = [1, 1]} : vector<1x158xf32> to vector<1x128xf32>
    %c0_60 = arith.constant 0 : index
    %c18 = arith.constant 18 : index
    %193 = vector.load %arg8[%c0_60, %c18] : memref<1x31xf32, #tpu.memory_space<vmem>>, vector<1x1xf32>
    %194 = vector.broadcast %193 : vector<1x1xf32> to vector<1x128xf32>
    %195 = arith.mulf %192, %194 : vector<1x128xf32>
    %196 = arith.addf %191, %195 : vector<1x128xf32>
    %197 = vector.extract_strided_slice %61 {offsets = [0, 19], sizes = [1, 128], strides = [1, 1]} : vector<1x158xf32> to vector<1x128xf32>
    %c0_61 = arith.constant 0 : index
    %c19 = arith.constant 19 : index
    %198 = vector.load %arg8[%c0_61, %c19] : memref<1x31xf32, #tpu.memory_space<vmem>>, vector<1x1xf32>
    %199 = vector.broadcast %198 : vector<1x1xf32> to vector<1x128xf32>
    %200 = arith.mulf %197, %199 : vector<1x128xf32>
    %201 = arith.addf %196, %200 : vector<1x128xf32>
    %202 = vector.extract_strided_slice %61 {offsets = [0, 20], sizes = [1, 128], strides = [1, 1]} : vector<1x158xf32> to vector<1x128xf32>
    %c0_62 = arith.constant 0 : index
    %c20 = arith.constant 20 : index
    %203 = vector.load %arg8[%c0_62, %c20] : memref<1x31xf32, #tpu.memory_space<vmem>>, vector<1x1xf32>
    %204 = vector.broadcast %203 : vector<1x1xf32> to vector<1x128xf32>
    %205 = arith.mulf %202, %204 : vector<1x128xf32>
    %206 = arith.addf %201, %205 : vector<1x128xf32>
    %207 = vector.extract_strided_slice %61 {offsets = [0, 21], sizes = [1, 128], strides = [1, 1]} : vector<1x158xf32> to vector<1x128xf32>
    %c0_63 = arith.constant 0 : index
    %c21 = arith.constant 21 : index
    %208 = vector.load %arg8[%c0_63, %c21] : memref<1x31xf32, #tpu.memory_space<vmem>>, vector<1x1xf32>
    %209 = vector.broadcast %208 : vector<1x1xf32> to vector<1x128xf32>
    %210 = arith.mulf %207, %209 : vector<1x128xf32>
    %211 = arith.addf %206, %210 : vector<1x128xf32>
    %212 = vector.extract_strided_slice %61 {offsets = [0, 22], sizes = [1, 128], strides = [1, 1]} : vector<1x158xf32> to vector<1x128xf32>
    %c0_64 = arith.constant 0 : index
    %c22 = arith.constant 22 : index
    %213 = vector.load %arg8[%c0_64, %c22] : memref<1x31xf32, #tpu.memory_space<vmem>>, vector<1x1xf32>
    %214 = vector.broadcast %213 : vector<1x1xf32> to vector<1x128xf32>
    %215 = arith.mulf %212, %214 : vector<1x128xf32>
    %216 = arith.addf %211, %215 : vector<1x128xf32>
    %217 = vector.extract_strided_slice %61 {offsets = [0, 23], sizes = [1, 128], strides = [1, 1]} : vector<1x158xf32> to vector<1x128xf32>
    %c0_65 = arith.constant 0 : index
    %c23 = arith.constant 23 : index
    %218 = vector.load %arg8[%c0_65, %c23] : memref<1x31xf32, #tpu.memory_space<vmem>>, vector<1x1xf32>
    %219 = vector.broadcast %218 : vector<1x1xf32> to vector<1x128xf32>
    %220 = arith.mulf %217, %219 : vector<1x128xf32>
    %221 = arith.addf %216, %220 : vector<1x128xf32>
    %222 = vector.extract_strided_slice %61 {offsets = [0, 24], sizes = [1, 128], strides = [1, 1]} : vector<1x158xf32> to vector<1x128xf32>
    %c0_66 = arith.constant 0 : index
    %c24 = arith.constant 24 : index
    %223 = vector.load %arg8[%c0_66, %c24] : memref<1x31xf32, #tpu.memory_space<vmem>>, vector<1x1xf32>
    %224 = vector.broadcast %223 : vector<1x1xf32> to vector<1x128xf32>
    %225 = arith.mulf %222, %224 : vector<1x128xf32>
    %226 = arith.addf %221, %225 : vector<1x128xf32>
    %227 = vector.extract_strided_slice %61 {offsets = [0, 25], sizes = [1, 128], strides = [1, 1]} : vector<1x158xf32> to vector<1x128xf32>
    %c0_67 = arith.constant 0 : index
    %c25 = arith.constant 25 : index
    %228 = vector.load %arg8[%c0_67, %c25] : memref<1x31xf32, #tpu.memory_space<vmem>>, vector<1x1xf32>
    %229 = vector.broadcast %228 : vector<1x1xf32> to vector<1x128xf32>
    %230 = arith.mulf %227, %229 : vector<1x128xf32>
    %231 = arith.addf %226, %230 : vector<1x128xf32>
    %232 = vector.extract_strided_slice %61 {offsets = [0, 26], sizes = [1, 128], strides = [1, 1]} : vector<1x158xf32> to vector<1x128xf32>
    %c0_68 = arith.constant 0 : index
    %c26 = arith.constant 26 : index
    %233 = vector.load %arg8[%c0_68, %c26] : memref<1x31xf32, #tpu.memory_space<vmem>>, vector<1x1xf32>
    %234 = vector.broadcast %233 : vector<1x1xf32> to vector<1x128xf32>
    %235 = arith.mulf %232, %234 : vector<1x128xf32>
    %236 = arith.addf %231, %235 : vector<1x128xf32>
    %237 = vector.extract_strided_slice %61 {offsets = [0, 27], sizes = [1, 128], strides = [1, 1]} : vector<1x158xf32> to vector<1x128xf32>
    %c0_69 = arith.constant 0 : index
    %c27 = arith.constant 27 : index
    %238 = vector.load %arg8[%c0_69, %c27] : memref<1x31xf32, #tpu.memory_space<vmem>>, vector<1x1xf32>
    %239 = vector.broadcast %238 : vector<1x1xf32> to vector<1x128xf32>
    %240 = arith.mulf %237, %239 : vector<1x128xf32>
    %241 = arith.addf %236, %240 : vector<1x128xf32>
    %242 = vector.extract_strided_slice %61 {offsets = [0, 28], sizes = [1, 128], strides = [1, 1]} : vector<1x158xf32> to vector<1x128xf32>
    %c0_70 = arith.constant 0 : index
    %c28 = arith.constant 28 : index
    %243 = vector.load %arg8[%c0_70, %c28] : memref<1x31xf32, #tpu.memory_space<vmem>>, vector<1x1xf32>
    %244 = vector.broadcast %243 : vector<1x1xf32> to vector<1x128xf32>
    %245 = arith.mulf %242, %244 : vector<1x128xf32>
    %246 = arith.addf %241, %245 : vector<1x128xf32>
    %247 = vector.extract_strided_slice %61 {offsets = [0, 29], sizes = [1, 128], strides = [1, 1]} : vector<1x158xf32> to vector<1x128xf32>
    %c0_71 = arith.constant 0 : index
    %c29 = arith.constant 29 : index
    %248 = vector.load %arg8[%c0_71, %c29] : memref<1x31xf32, #tpu.memory_space<vmem>>, vector<1x1xf32>
    %249 = vector.broadcast %248 : vector<1x1xf32> to vector<1x128xf32>
    %250 = arith.mulf %247, %249 : vector<1x128xf32>
    %251 = arith.addf %246, %250 : vector<1x128xf32>
    %252 = vector.extract_strided_slice %61 {offsets = [0, 30], sizes = [1, 128], strides = [1, 1]} : vector<1x158xf32> to vector<1x128xf32>
    %c0_72 = arith.constant 0 : index
    %c30 = arith.constant 30 : index
    %253 = vector.load %arg8[%c0_72, %c30] : memref<1x31xf32, #tpu.memory_space<vmem>>, vector<1x1xf32>
    %254 = vector.broadcast %253 : vector<1x1xf32> to vector<1x128xf32>
    %255 = arith.mulf %252, %254 : vector<1x128xf32>
    %256 = arith.addf %251, %255 : vector<1x128xf32>
    %c0_73 = arith.constant 0 : index
    %c0_74 = arith.constant 0 : index
    %257 = vector.load %arg9[%c0_73, %c0_74] : memref<1x1xf32, #tpu.memory_space<vmem>>, vector<1x1xf32>
    %258 = vector.broadcast %257 : vector<1x1xf32> to vector<1x128xf32>
    %259 = arith.addf %256, %258 : vector<1x128xf32>
    %c0_75 = arith.constant 0 : index
    %c0_76 = arith.constant 0 : index
    %c0_77 = arith.constant 0 : index
    %c0_78 = arith.constant 0 : index
    %260 = vector.load %arg3[%c0_75, %c0_76, %c0_77, %c0_78] : memref<1x1x1x130xf32, #tpu.memory_space<vmem>>, vector<1x1x1x130xf32>
    %261 = vector.shape_cast %260 : vector<1x1x1x130xf32> to vector<1x130xf32>
    %cst_79 = arith.constant 0.000000e+00 : f32
    %262 = vector.broadcast %cst_79 : f32 to vector<1x128xf32>
    %263 = vector.extract_strided_slice %261 {offsets = [0, 0], sizes = [1, 128], strides = [1, 1]} : vector<1x130xf32> to vector<1x128xf32>
    %c0_80 = arith.constant 0 : index
    %c0_81 = arith.constant 0 : index
    %264 = vector.load %arg10[%c0_80, %c0_81] : memref<1x3xf32, #tpu.memory_space<vmem>>, vector<1x1xf32>
    %265 = vector.broadcast %264 : vector<1x1xf32> to vector<1x128xf32>
    %266 = arith.mulf %263, %265 : vector<1x128xf32>
    %267 = arith.addf %262, %266 : vector<1x128xf32>
    %268 = vector.extract_strided_slice %261 {offsets = [0, 1], sizes = [1, 128], strides = [1, 1]} : vector<1x130xf32> to vector<1x128xf32>
    %c0_82 = arith.constant 0 : index
    %c1_83 = arith.constant 1 : index
    %269 = vector.load %arg10[%c0_82, %c1_83] : memref<1x3xf32, #tpu.memory_space<vmem>>, vector<1x1xf32>
    %270 = vector.broadcast %269 : vector<1x1xf32> to vector<1x128xf32>
    %271 = arith.mulf %268, %270 : vector<1x128xf32>
    %272 = arith.addf %267, %271 : vector<1x128xf32>
    %273 = vector.extract_strided_slice %261 {offsets = [0, 2], sizes = [1, 128], strides = [1, 1]} : vector<1x130xf32> to vector<1x128xf32>
    %c0_84 = arith.constant 0 : index
    %c2_85 = arith.constant 2 : index
    %274 = vector.load %arg10[%c0_84, %c2_85] : memref<1x3xf32, #tpu.memory_space<vmem>>, vector<1x1xf32>
    %275 = vector.broadcast %274 : vector<1x1xf32> to vector<1x128xf32>
    %276 = arith.mulf %273, %275 : vector<1x128xf32>
    %277 = arith.addf %272, %276 : vector<1x128xf32>
    %c0_86 = arith.constant 0 : index
    %c0_87 = arith.constant 0 : index
    %278 = vector.load %arg11[%c0_86, %c0_87] : memref<1x1xf32, #tpu.memory_space<vmem>>, vector<1x1xf32>
    %279 = vector.broadcast %278 : vector<1x1xf32> to vector<1x128xf32>
    %280 = arith.addf %277, %279 : vector<1x128xf32>
    %281 = arith.negf %280 : vector<1x128xf32>
    %282 = math.exp %281 : vector<1x128xf32>
    %cst_88 = arith.constant 1.000000e+00 : f32
    %283 = vector.broadcast %cst_88 : f32 to vector<1x128xf32>
    %284 = arith.addf %283, %282 : vector<1x128xf32>
    %285 = arith.divf %283, %284 : vector<1x128xf32>
    %286 = arith.mulf %100, %285 : vector<1x128xf32>
    %cst_89 = arith.constant 1.000000e+00 : f32
    %287 = vector.broadcast %cst_89 : f32 to vector<1x128xf32>
    %288 = arith.subf %287, %285 : vector<1x128xf32>
    %289 = arith.mulf %259, %288 : vector<1x128xf32>
    %290 = arith.addf %286, %289 : vector<1x128xf32>
    %c0_90 = arith.constant 0 : index
    %c0_91 = arith.constant 0 : index
    %c0_92 = arith.constant 0 : index
    %291 = vector.load %arg12[%c0_90, %c0_91, %c0_92] : memref<1x1x128xf32, #tpu.memory_space<vmem>>, vector<1x1x128xf32>
    %292 = vector.shape_cast %291 : vector<1x1x128xf32> to vector<1x128xf32>
    %293 = vector.shape_cast %290 : vector<1x128xf32> to vector<1x1x128xf32>
    tpu.vector_store %arg12[%c0_90, %c0_91, %c0_92], %293 {strides = array<i32>} : memref<1x1x128xf32, #tpu.memory_space<vmem>>, vector<1x1x128xf32>,
    return
  }
  func.func @transform_0(%arg0: i32, %arg1: i32) -> (i32, i32, i32, i32) {
    %c0_i32 = arith.constant 0 : i32
    %c0_i32_0 = arith.constant 0 : i32
    %c0_i32_1 = arith.constant 0 : i32
    return %arg0, %arg1, %c0_i32, %c0_i32_0 : i32, i32, i32, i32
  }
  func.func @transform_1(%arg0: i32, %arg1: i32) -> (i32, i32, i32, i32) {
    %c0_i32 = arith.constant 0 : i32
    %c0_i32_0 = arith.constant 0 : i32
    %c0_i32_1 = arith.constant 0 : i32
    return %arg0, %arg1, %c0_i32, %c0_i32_0 : i32, i32, i32, i32
  }
  func.func @transform_2(%arg0: i32, %arg1: i32) -> (i32, i32) {
    %c0_i32 = arith.constant 0 : i32
    %c0_i32_0 = arith.constant 0 : i32
    %c0_i32_1 = arith.constant 0 : i32
    return %c0_i32, %c0_i32_0 : i32, i32
  }
  func.func @transform_3(%arg0: i32, %arg1: i32) -> (i32, i32) {
    %c0_i32 = arith.constant 0 : i32
    %c0_i32_0 = arith.constant 0 : i32
    %c0_i32_1 = arith.constant 0 : i32
    return %c0_i32, %c0_i32_0 : i32, i32
  }
  func.func @transform_4(%arg0: i32, %arg1: i32) -> (i32, i32) {
    %c0_i32 = arith.constant 0 : i32
    %c0_i32_0 = arith.constant 0 : i32
    %c0_i32_1 = arith.constant 0 : i32
    return %c0_i32, %c0_i32_0 : i32, i32
  }
  func.func @transform_5(%arg0: i32, %arg1: i32) -> (i32, i32) {
    %c0_i32 = arith.constant 0 : i32
    %c0_i32_0 = arith.constant 0 : i32
    %c0_i32_1 = arith.constant 0 : i32
    return %c0_i32, %c0_i32_0 : i32, i32
  }
  func.func @transform_6(%arg0: i32, %arg1: i32) -> (i32, i32) {
    %c0_i32 = arith.constant 0 : i32
    %c0_i32_0 = arith.constant 0 : i32
    %c0_i32_1 = arith.constant 0 : i32
    return %c0_i32, %c0_i32_0 : i32, i32
  }
  func.func @transform_7(%arg0: i32, %arg1: i32) -> (i32, i32) {
    %c0_i32 = arith.constant 0 : i32
    %c0_i32_0 = arith.constant 0 : i32
    %c0_i32_1 = arith.constant 0 : i32
    return %c0_i32, %c0_i32_0 : i32, i32
  }
  func.func @transform_8(%arg0: i32, %arg1: i32) -> (i32, i32) {
    %c0_i32 = arith.constant 0 : i32
    %c0_i32_0 = arith.constant 0 : i32
    %c0_i32_1 = arith.constant 0 : i32
    return %c0_i32, %c0_i32_0 : i32, i32
  }
  func.func @transform_9(%arg0: i32, %arg1: i32) -> (i32, i32) {
    %c0_i32 = arith.constant 0 : i32
    %c0_i32_0 = arith.constant 0 : i32
    %c0_i32_1 = arith.constant 0 : i32
    return %c0_i32, %c0_i32_0 : i32, i32
  }
  func.func @transform_10(%arg0: i32, %arg1: i32) -> (i32, i32, i32) {
    %c0_i32 = arith.constant 0 : i32
    %c0_i32_0 = arith.constant 0 : i32
    return %arg0, %c0_i32, %arg1 : i32, i32, i32
  }
}

</mosaic_0001>

<bundles_post_ra>
// kernel: hifigan_forward.22
= control target key start
LH: loop header
LB: loop body
LE: loop exit
PB: predicated region body
PF: predicated region fallthrough
CT: control target
= control target key end

     0   :  { %s660_s12 = smov 0   ;;  %s662_s13 = smov 0   ;;  %s725_s0 = inlined_call_operand.vmem [shape: f32[2,1,16,134], index: 0, kind: input, shape index: {}]   ;;  %s726_s1 = inlined_call_operand.vmem [shape: bf16[32,112], index: 1, kind: input, shape index: {}]   ;;  %s727_s2 = inlined_call_operand.vmem [shape: f32[32,1], index: 2, kind: input, shape index: {}]   ;;  %s728_s3 = inlined_call_operand.vmem [shape: bf16[2,32,128], index: 3, kind: output, shape index: {}]  }
   0x1   :  { %s664_s14 = smov 0  }
   0x2 LB: > { %s32_s15 = sadd.s32 1, %s627_s13  ;;  %p536_p0 = scmp.ge.s32.totalorder %s631_s14, 1  ;;  %s631_s14 = sphi %s664_s14, %s13_s14   ;;  %s627_s13 = sphi %s662_s13, %s730_s13   ;;  %s623_s12 = sphi %s660_s12, %s729_s12  }
   0x3   : > { %p34_p1 = scmp.ge.s32.totalorder %s32_s15, 2  ;;  %p188_p2 = scmp.lt.s32.totalorder %s631_s14, 3 }
   0x5   : > { %s732_s15 = smov (%p34_p1, %s32_s15), 0  ;;  %p189_p3 = pnand %p536_p0, %p188_p2 }
   0x6   : > { %p233_p4 = scmp.lt.s32.totalorder (!%p189_p3), %s623_s12, 1  ;;  %s633_s20 = smov (!%p189_p3), 123  }
   0x7   : > { %192 = sbr.rel (%p189_p3) target bundleno = 314 (0x13a), region = 32  ;;  %s634_s21 = smov (!%p189_p3), 122  }
   0x8   : > { %s635_s22 = smov (!%p189_p3), 124   ;;  %s636_s23 = smov (!%p189_p3), 125  }
   0x9   : > { %s637_s24 = smov (!%p189_p3), 126   ;;  %s638_s25 = smov (!%p189_p3), 127  }
   0xc   : > { %s734_s12 = smov (!%p233_p4, %s623_s12), 1  ;;  %v330_v16 = vld [vmem:[%s727_s2 + $0x8] sm:$0xff]  ;;  %v329_v17 = vld [vmem:[%s727_s2] sm:$0xff]  ;;  %vm322_vm0 = vcmask 998400   ;;  %v639_v18 = vmov 0   ;;  %v331_v19 = vld [vmem:[%s727_s2 + $0x10] sm:$0xff] }
   0xd   : > { %s553_s16 = sshll.u32 %s734_s12, 5  ;;  %607 = vset.pattern.permute.xlu1 %v639_v18  ;;  %606 = vset.pattern.permute.xlu0 %v639_v18  ;;  %vm315_vm1 = vcmask 1006592   ;;  %v332_v23 = vld [vmem:[%s727_s2 + $0x18] sm:$0xff]  ;;  %vm308_vm2 = vcmask 1014784   ;;  %vm301_vm3 = vcmask 1022976   ;;  %vm294_vm4 = vcmask 1031168  }
   0xe   : > { %s241_s19 = scalar_lea.vmem %s725_s0, %s553_s16  ;;  %608 = vset.pattern.permute.xlu2 %v639_v18  ;;  %vm287_vm5 = vcmask 1039360   ;;  %v555_v35 = vld [vmem:[%s726_s1] sm:$0xff]  ;;  %v556_v36 = vld [vmem:[%s726_s1 + $0x8] sm:$0xff]  ;;  %vm363_vm6 = vcmask 916480   ;;  %s554_s11 = sshll.u32 %s734_s12, 4 }
   0xf   : > { %v268_v0 = vld [vmem:[%s241_s19] sm:$0xff]  ;;  %v269_v1 = vld [vmem:[%s241_s19 + $0x8] sm:$0xff]  ;;  %v270_v2 = vld [vmem:[%s241_s19 + $0x10] sm:$0xff]  ;;  %s265_s18 = scalar_lea.vmem %s728_s3, %s554_s11 }
  0x10   : > { %v271_v3 = vld [vmem:[%s241_s19 + $0x18] sm:$0xff]  ;;  %v272_v4 = vpack.c.bf16 %v269_v1, %v268_v0 }
  0x11   : > { %v273_v5 = vpack.c.bf16 %v271_v3, %v270_v2 }
  0x12   : > { %v276_v6 = vunpack.c.l.b16 %v272_v4  ;;  %v280_v9 = vunpack.c.h.b16 %v272_v4 }
  0x13   : > { %v277_v7 = vunpack.c.l.b16 %v273_v5  ;;  %v281_v10 = vunpack.c.h.b16 %v273_v5 }
  0x15   : > { %v684_v8 = vpack.c.b16 %v277_v7, %v276_v6  ;;  %v282_v11 = vpack.c.b16 %v281_v10, %v280_v9 }
  0x17   : > { %311 = vrot.lane.b32.xlu1 %v684_v8, %s633_s20  ;;  %318 = vrot.lane.b32.xlu0 %v684_v8, %s634_s21 }
  0x18   : > { %304 = vrot.lane.b32.xlu2 %v684_v8, %s635_s22 }
  0x1f   : > { %313 = vrot.lane.b32.xlu1 %v282_v11, %s633_s20  ;;  %320 = vrot.lane.b32.xlu0 %v282_v11, %s634_s21 }
  0x20   : > { %306 = vrot.lane.b32.xlu2 %v282_v11, %s635_s22 }
  0x27   : > { %299 = vrot.lane.b32.xlu1 %v282_v11, %s636_s23  ;;  %297 = vrot.lane.b32.xlu0 %v684_v8, %s636_s23 }
  0x28   : > { %290 = vrot.lane.b32.xlu2 %v684_v8, %s637_s24 }
  0x2f   : > { %292 = vrot.lane.b32.xlu0 %v282_v11, %s637_s24  ;;  %283 = vrot.lane.b32.xlu1 %v684_v8, %s638_s25 }
  0x30   : > { %285 = vrot.lane.b32.xlu2 %v282_v11, %s638_s25 }
  0x37   : > { %340 = vperm.xlu1 %607, %v330_v16   ;;  %335 = vperm.xlu0 %606, %v329_v17  }
  0x38   : > { %345 = vperm.xlu2 %608, %v331_v19  }
  0x3f   : > { %350 = vperm.xlu1 %607, %v332_v23  }
  0x72   : > { %v305_v12 = vpop.permute.xlu2 %304 }
  0x7a   : > { %v307_v15 = vpop.permute.xlu2 %306 }
  0x7b   : > { %v309_v28 = vsel %vm308_vm2, %v305_v12, %v307_v15 }
  0x82   : > { %v291_v25 = vpop.permute.xlu2 %290 }
  0x89   : > { %v312_v13 = vpop.permute.xlu1 %311  ;;  %v319_v14 = vpop.permute.xlu0 %318 }
  0x8a   : > { %v286_v30 = vpop.permute.xlu2 %285 }
  0x91   : > { %v314_v20 = vpop.permute.xlu1 %313  ;;  %v321_v21 = vpop.permute.xlu0 %320 }
  0x92   : > { %v323_v22 = vsel %vm322_vm0, %v319_v14, %v321_v21  ;;  %v316_v24 = vsel %vm315_vm1, %v312_v13, %v314_v20  ;;  %v346_v40 = vpop.permute.xlu2 %345 }
  0x93   : > { %371 = vmatpush.bf16.msra.mxu0 %v323_v22  ;;  %568 = vmatpush.bf16.msra.mxu1 %v323_v22 }
  0x97   : > { %372 = vmatpush.bf16.msra.mxu0 %v316_v24  ;;  %569 = vmatpush.bf16.msra.mxu1 %v316_v24 }
  0x99   : > { %v300_v26 = vpop.permute.xlu1 %299  ;;  %v298_v27 = vpop.permute.xlu0 %297 }
  0x9a   : > { %v302_v29 = vsel %vm301_vm3, %v298_v27, %v300_v26 }
  0x9b   : > { %373 = vmatpush.bf16.msra.mxu0 %v309_v28  ;;  %570 = vmatpush.bf16.msra.mxu1 %v309_v28 }
  0x9f   : > { %374 = vmatpush.bf16.msra.mxu0 %v302_v29  ;;  %571 = vmatpush.bf16.msra.mxu1 %v302_v29 }
  0xa1   : > { %v293_v31 = vpop.permute.xlu0 %292  ;;  %v284_v32 = vpop.permute.xlu1 %283 }
  0xa2   : > { %v295_v33 = vsel %vm294_vm4, %v291_v25, %v293_v31  ;;  %v288_v34 = vsel %vm287_vm5, %v284_v32, %v286_v30 }
  0xa3   : > { %375 = vmatpush.bf16.msra.mxu0 %v295_v33  ;;  %572 = vmatpush.bf16.msra.mxu1 %v295_v33 }
  0xa7   : > { %376 = vmatpush.bf16.msra.mxu0 %v288_v34  ;;  %573 = vmatpush.bf16.msra.mxu1 %v288_v34 }
  0xa9   : > { %v341_v37 = vpop.permute.xlu1 %340  ;;  %v336_v41 = vpop.permute.xlu0 %335 }
  0xab   : > { %377 = vmatpush.bf16.msra.mxu0 %v684_v8  ;;  %574 = vmatpush.bf16.msra.mxu1 %v684_v8 }
  0xae   : > { %549 = vmatmul.msk.bf16.vlgmr.msra.gmra.mxu0 %vm363_vm6, %v555_v35  ;;  %550 = vmatmul.msk.bf16.vlgmr.msra.gmra.mxu1 %vm363_vm6, %v556_v36 }
  0xb1   : > { %v351_v42 = vpop.permute.xlu1 %350 }
 0x12b   : > { %v379_v38 = vpop.f32.mrf.mxu0  ;;  %v384_v39 = vpop.f32.mrf.mxu1 }
 0x12c   : > { %v385_v45 = vadd.f32 %v384_v39, %v346_v40  ;;  %v380_v46 = vadd.f32 %v379_v38, %v336_v41 }
 0x133   : > { %v381_v43 = vpop.f32.mrf.mxu0  ;;  %v386_v44 = vpop.f32.mrf.mxu1 }
 0x134   : > { %v382_v47 = vadd.f32 %v381_v43, %v341_v37  ;;  %v387_v48 = vadd.f32 %v386_v44, %v351_v42 }
 0x136   : > { %v560_v49 = vpack.c.bf16 %v382_v47, %v380_v46  ;;  %v565_v50 = vpack.c.bf16 %v387_v48, %v385_v45 }
 0x138   : > { %561 = vst [vmem:[%s265_s18] sm:$0xff] %v560_v49  }
 0x139   : > { %567 = vst [vmem:[%s265_s18 + $0x8] sm:$0xff] %v565_v50  }
 0x13a PF: > { %s13_s14 = sadd.s32 1, %s631_s14   ;;  %s729_s12 = smov %s627_s13 }
 0x13b   : > { %p10_p5 = scmp.ge.s32.totalorder %s13_s14, 4   ;;  %s730_s13 = smov %s732_s15 }
 0x13d   :  { %12 = sbr.rel (!%p10_p5) target bundleno = 2 (0x2), region = 68 }

// kernel: hifigan_forward.23
= control target key start
LH: loop header
LB: loop body
LE: loop exit
PB: predicated region body
PF: predicated region fallthrough
CT: control target
= control target key end

     0   :  { %s678_s12 = smov 0   ;;  %s680_s13 = smov 0   ;;  %s734_s0 = inlined_call_operand.vmem [shape: bf16[2,1,32,130], index: 0, kind: input, shape index: {}]   ;;  %s735_s1 = inlined_call_operand.vmem [shape: bf16[32,96], index: 1, kind: input, shape index: {}]   ;;  %s736_s2 = inlined_call_operand.vmem [shape: f32[32,1], index: 2, kind: input, shape index: {}]   ;;  %s737_s3 = inlined_call_operand.vmem [shape: bf16[2,32,128], index: 3, kind: output, shape index: {}]  }
   0x1   :  { %s682_s14 = smov 0  }
   0x2 LB: > { %s32_s15 = sadd.s32 1, %s649_s13  ;;  %p563_p0 = scmp.ge.s32.totalorder %s653_s14, 1  ;;  %s653_s14 = sphi %s682_s14, %s13_s14   ;;  %s649_s13 = sphi %s680_s13, %s739_s13   ;;  %s645_s12 = sphi %s678_s12, %s738_s12  }
   0x3   : > { %p34_p1 = scmp.ge.s32.totalorder %s32_s15, 2  ;;  %p188_p2 = scmp.lt.s32.totalorder %s653_s14, 3 }
   0x5   : > { %s741_s15 = smov (%p34_p1, %s32_s15), 0  ;;  %p189_p3 = pnand %p563_p0, %p188_p2 }
   0x6   : > { %p233_p4 = scmp.lt.s32.totalorder (!%p189_p3), %s645_s12, 1  ;;  %s655_s20 = smov (!%p189_p3), 126  }
   0x7   : > { %192 = sbr.rel (%p189_p3) target bundleno = 316 (0x13c), region = 32  ;;  %s656_s21 = smov (!%p189_p3), 127  }
   0xc   : > { %s743_s12 = smov (!%p233_p4, %s645_s12), 1  ;;  %v358_v45 = vld [vmem:[%s736_s2 + $0x10] sm:$0xff]  ;;  %v357_v46 = vld [vmem:[%s736_s2 + $0x8] sm:$0xff]  ;;  %v657_v47 = vmov 0   ;;  %v356_v48 = vld [vmem:[%s736_s2] sm:$0xff]  ;;  %vm347_vm8 = vcmask 1031168  }
   0xd   : > { %s580_s16 = sshll.u32 %s743_s12, 5  ;;  %630 = vset.pattern.permute.xlu1 %v657_v47  ;;  %629 = vset.pattern.permute.xlu0 %v657_v47  ;;  %v359_v53 = vld [vmem:[%s736_s2 + $0x18] sm:$0xff]  ;;  %vm334_vm9 = vcmask 1039360   ;;  %v582_v61 = vld [vmem:[%s735_s1] sm:$0xff]  ;;  %v583_v62 = vld [vmem:[%s735_s1 + $0x8] sm:$0xff]  ;;  %vm390_vm10 = vcmask 785408  }
   0xe   : > { %s241_s19 = scalar_lea.vmem %s734_s0, %s580_s16  ;;  %628 = vset.pattern.permute.xlu2 %v657_v47  ;;  %s581_s7 = sshll.u32 %s743_s12, 4 }
   0xf   : > { %v270_v0 = vld [vmem:[%s241_s19 + $0x10] sm:$0xff]  ;;  %v271_v1 = vld [vmem:[%s241_s19 + $0x18] sm:$0xff]  ;;  %v268_v2 = vld [vmem:[%s241_s19] sm:$0xff]  ;;  %s265_s10 = scalar_lea.vmem %s737_s3, %s581_s7 }
  0x10   : > { %v276_v3 = vunpack.c.l.bf16 %v270_v0  ;;  %v277_v4 = vunpack.c.h.bf16 %v270_v0  ;;  %v278_v5 = vunpack.c.l.bf16 %v271_v1  ;;  %v279_v6 = vunpack.c.h.bf16 %v271_v1  ;;  %v269_v7 = vld [vmem:[%s241_s19 + $0x8] sm:$0xff] }
  0x11   : > { %v272_v8 = vunpack.c.l.bf16 %v268_v2  ;;  %v273_v9 = vunpack.c.h.bf16 %v268_v2  ;;  %v274_v10 = vunpack.c.l.bf16 %v269_v7  ;;  %v275_v11 = vunpack.c.h.bf16 %v269_v7 }
  0x12   : > { %vm284_vm0 = vcmp.ge.f32.partialorder %v276_v3, 0.0  ;;  %vm285_vm1 = vcmp.ge.f32.partialorder %v277_v4, 0.0  ;;  %vm286_vm2 = vcmp.ge.f32.partialorder %v278_v5, 0.0  ;;  %vm287_vm3 = vcmp.ge.f32.partialorder %v279_v6, 0.0 }
  0x13   : > { %v292_v12 = vmul.f32 0.1, %v276_v3  ;;  %v293_v13 = vmul.f32 0.1, %v277_v4  ;;  %v294_v14 = vmul.f32 0.1, %v278_v5 }
  0x14   : > { %v295_v15 = vmul.f32 0.1, %v279_v6  ;;  %vm280_vm4 = vcmp.ge.f32.partialorder %v272_v8, 0.0  ;;  %vm281_vm5 = vcmp.ge.f32.partialorder %v273_v9, 0.0  ;;  %vm282_vm6 = vcmp.ge.f32.partialorder %v274_v10, 0.0 }
  0x15   : > { %v300_v16 = vsel %vm284_vm0, %v276_v3, %v292_v12  ;;  %v301_v17 = vsel %vm285_vm1, %v277_v4, %v293_v13  ;;  %v302_v18 = vsel %vm286_vm2, %v278_v5, %v294_v14  ;;  %vm283_vm7 = vcmp.ge.f32.partialorder %v275_v11, 0.0 }
  0x16   : > { %v303_v19 = vsel %vm287_vm3, %v279_v6, %v295_v15  ;;  %v306_v20 = vpack.c.bf16 %v301_v17, %v300_v16  ;;  %v288_v21 = vmul.f32 0.1, %v272_v8  ;;  %v289_v22 = vmul.f32 0.1, %v273_v9 }
  0x17   : > { %v307_v23 = vpack.c.bf16 %v303_v19, %v302_v18  ;;  %v290_v24 = vmul.f32 0.1, %v274_v10  ;;  %v291_v25 = vmul.f32 0.1, %v275_v11 }
  0x18   : > { %v314_v26 = vunpack.c.l.b16 %v306_v20  ;;  %v296_v27 = vsel %vm280_vm4, %v272_v8, %v288_v21  ;;  %v297_v28 = vsel %vm281_vm5, %v273_v9, %v289_v22  ;;  %v322_v37 = vunpack.c.h.b16 %v306_v20 }
  0x19   : > { %v315_v29 = vunpack.c.l.b16 %v307_v23  ;;  %v298_v30 = vsel %vm282_vm6, %v274_v10, %v290_v24  ;;  %v299_v31 = vsel %vm283_vm7, %v275_v11, %v291_v25  ;;  %v304_v32 = vpack.c.bf16 %v297_v28, %v296_v27 }
  0x1a   : > { %v305_v33 = vpack.c.bf16 %v299_v31, %v298_v30  ;;  %v323_v38 = vunpack.c.h.b16 %v307_v23 }
  0x1b   : > { %v317_v34 = vpack.c.b16 %v315_v29, %v314_v26  ;;  %v312_v35 = vunpack.c.l.b16 %v304_v32  ;;  %v320_v40 = vunpack.c.h.b16 %v304_v32 }
  0x1c   : > { %v313_v36 = vunpack.c.l.b16 %v305_v33  ;;  %v321_v41 = vunpack.c.h.b16 %v305_v33  ;;  %v325_v42 = vpack.c.b16 %v323_v38, %v322_v37 }
  0x1d   : > { %343 = vrot.lane.b32.xlu0 %v317_v34, %s655_s20  ;;  %330 = vrot.lane.b32.xlu2 %v317_v34, %s656_s21 }
  0x1e   : > { %v316_v39 = vpack.c.b16 %v313_v36, %v312_v35  ;;  %v324_v43 = vpack.c.b16 %v321_v41, %v320_v40 }
  0x20   : > { %339 = vrot.lane.b32.xlu1 %v316_v39, %s655_s20 }
  0x25   : > { %345 = vrot.lane.b32.xlu0 %v325_v42, %s655_s20  ;;  %332 = vrot.lane.b32.xlu2 %v325_v42, %s656_s21 }
  0x28   : > { %341 = vrot.lane.b32.xlu1 %v324_v43, %s655_s20 }
  0x2d   : > { %326 = vrot.lane.b32.xlu0 %v316_v39, %s656_s21  ;;  %362 = vperm.xlu2 %628, %v356_v48  }
  0x30   : > { %328 = vrot.lane.b32.xlu1 %v324_v43, %s656_s21 }
  0x35   : > { %367 = vperm.xlu0 %629, %v357_v46   ;;  %377 = vperm.xlu2 %628, %v359_v53  }
  0x38   : > { %372 = vperm.xlu1 %630, %v358_v45  }
  0x77   : > { %v331_v50 = vpop.permute.xlu2 %330 }
  0x7f   : > { %v333_v56 = vpop.permute.xlu2 %332 }
  0x80   : > { %v336_v57 = vsel %vm334_vm9, %v331_v50, %v333_v56 }
  0x87   : > { %v363_v63 = vpop.permute.xlu2 %362 }
  0x8f   : > { %v344_v44 = vpop.permute.xlu0 %343  ;;  %v378_v4 = vpop.permute.xlu2 %377 }
  0x92   : > { %v340_v49 = vpop.permute.xlu1 %339 }
  0x97   : > { %v346_v51 = vpop.permute.xlu0 %345 }
  0x98   : > { %v349_v52 = vsel %vm347_vm8, %v344_v44, %v346_v51 }
  0x99   : > { %399 = vmatpush.bf16.msra.mxu0 %v349_v52  ;;  %595 = vmatpush.bf16.msra.mxu1 %v349_v52 }
  0x9a   : > { %v342_v54 = vpop.permute.xlu1 %341 }
  0x9b   : > { %v348_v55 = vsel %vm347_vm8, %v340_v49, %v342_v54 }
  0x9d   : > { %400 = vmatpush.bf16.msra.mxu0 %v348_v55  ;;  %596 = vmatpush.bf16.msra.mxu1 %v348_v55 }
  0x9f   : > { %v327_v58 = vpop.permute.xlu0 %326 }
  0xa1   : > { %401 = vmatpush.bf16.msra.mxu0 %v336_v57  ;;  %597 = vmatpush.bf16.msra.mxu1 %v336_v57 }
  0xa2   : > { %v329_v59 = vpop.permute.xlu1 %328 }
  0xa3   : > { %v335_v60 = vsel %vm334_vm9, %v327_v58, %v329_v59 }
  0xa5   : > { %402 = vmatpush.bf16.msra.mxu0 %v335_v60  ;;  %598 = vmatpush.bf16.msra.mxu1 %v335_v60 }
  0xa7   : > { %v368_v3 = vpop.permute.xlu0 %367 }
  0xa9   : > { %403 = vmatpush.bf16.msra.mxu0 %v317_v34  ;;  %599 = vmatpush.bf16.msra.mxu1 %v317_v34 }
  0xaa   : > { %v373_v2 = vpop.permute.xlu1 %372 }
  0xad   : > { %404 = vmatpush.bf16.msra.mxu0 %v316_v39  ;;  %600 = vmatpush.bf16.msra.mxu1 %v316_v39 }
  0xb0   : > { %576 = vmatmul.msk.bf16.vlgmr.msra.gmra.mxu0 %vm390_vm10, %v582_v61  ;;  %577 = vmatmul.msk.bf16.vlgmr.msra.gmra.mxu1 %vm390_vm10, %v583_v62 }
 0x12d   : > { %v406_v0 = vpop.f32.mrf.mxu0  ;;  %v411_v1 = vpop.f32.mrf.mxu1 }
 0x12e   : > { %v407_v7 = vadd.f32 %v406_v0, %v363_v63  ;;  %v412_v8 = vadd.f32 %v411_v1, %v373_v2 }
 0x135   : > { %v408_v5 = vpop.f32.mrf.mxu0  ;;  %v413_v6 = vpop.f32.mrf.mxu1 }
 0x136   : > { %v409_v9 = vadd.f32 %v408_v5, %v368_v3  ;;  %v414_v10 = vadd.f32 %v413_v6, %v378_v4 }
 0x138   : > { %v587_v11 = vpack.c.bf16 %v409_v9, %v407_v7  ;;  %v592_v12 = vpack.c.bf16 %v414_v10, %v412_v8 }
 0x13a   : > { %588 = vst [vmem:[%s265_s10] sm:$0xff] %v587_v11  }
 0x13b   : > { %594 = vst [vmem:[%s265_s10 + $0x8] sm:$0xff] %v592_v12  }
 0x13c PF: > { %s13_s14 = sadd.s32 1, %s653_s14   ;;  %s738_s12 = smov %s649_s13 }
 0x13d   : > { %p10_p5 = scmp.ge.s32.totalorder %s13_s14, 4   ;;  %s739_s13 = smov %s741_s15 }
 0x13f   :  { %12 = sbr.rel (!%p10_p5) target bundleno = 2 (0x2), region = 68 }

// kernel: hifigan_forward.24
= control target key start
LH: loop header
LB: loop body
LE: loop exit
PB: predicated region body
PF: predicated region fallthrough
CT: control target
= control target key end

     0   :  { %s689_s18 = smov 0   ;;  %s691_s19 = smov 0   ;;  %s767_s0 = inlined_call_operand.vmem [shape: bf16[2,1,16,130], index: 0, kind: input, shape index: {}]   ;;  %s768_s1 = inlined_call_operand.vmem [shape: bf16[3,16,16], index: 1, kind: input, shape index: {}]   ;;  %s769_s2 = inlined_call_operand.vmem [shape: f32[16,1], index: 2, kind: input, shape index: {}]   ;;  %s770_s3 = inlined_call_operand.vmem [shape: bf16[16,16], index: 3, kind: input, shape index: {}]   ;;  %s771_s4 = inlined_call_operand.vmem [shape: f32[16,1], index: 4, kind: input, shape index: {}]   ;;  %s772_s5 = inlined_call_operand.vmem [shape: bf16[2,16,128], index: 5, kind: output, shape index: {}]  }
   0x1   :  { %s693_s20 = smov 0  }
   0x2 LB: > { %s27_s21 = sadd.s32 1, %s650_s19  ;;  %p550_p0 = scmp.ge.s32.totalorder %s654_s20, 1  ;;  %s654_s20 = sphi %s693_s20, %s15_s20   ;;  %s650_s19 = sphi %s691_s19, %s774_s19   ;;  %s646_s18 = sphi %s689_s18, %s773_s18  }
   0x3   : > { %p29_p1 = scmp.ge.s32.totalorder %s27_s21, 2  ;;  %p207_p2 = scmp.lt.s32.totalorder %s654_s20, 3 }
   0x5   : > { %s776_s21 = smov (%p29_p1, %s27_s21), 0  ;;  %p208_p3 = pnand %p550_p0, %p207_p2 }
   0x6   : > { %p242_p4 = scmp.lt.s32.totalorder (!%p208_p3), %s646_s18, 1  ;;  %s656_s26 = smov (!%p208_p3), 127  }
   0x7   : > { %211 = sbr.rel (%p208_p3) target bundleno = 455 (0x1c7), region = 40  ;;  %s657_s27 = smov (!%p208_p3), 126  }
   0xc   : > { %s778_s18 = smov (!%p242_p4, %s646_s18), 1  ;;  %v583_v22 = vld [vmem:[%s768_s1] sm:$0xff]  ;;  %vm305_vm4 = vcmask 130048   ;;  %v658_v24 = vmov 0   ;;  %v381_v25 = vld [vmem:[%s769_s2 + $0x8] sm:$0xff]  ;;  %vm302_vm5 = vcmask 1039360  }
   0xd   : > { %s581_s22 = sshll.u32 %s778_s18, 4  ;;  %v380_v23 = vld [vmem:[%s769_s2] sm:$0xff]  ;;  %619 = vset.pattern.permute.xlu2 %v658_v24  ;;  %621 = vset.pattern.permute.xlu1 %v658_v24  ;;  %vm358_vm6 = vcmask 1031168   ;;  %v584_v32 = vld [vmem:[%s768_s1 + $0x8] sm:$0xff]  ;;  %v585_v33 = vld [vmem:[%s768_s1 + $0x10] sm:$0xff]  ;;  %s582_s23 = sshll.u32 %s778_s18, 3 }
   0xe   : > { %s250_s25 = scalar_lea.vmem %s767_s0, %s581_s22  ;;  %384 = vperm.xlu2 %619, %v380_v23   ;;  %620 = vset.pattern.permute.xlu0 %v658_v24  ;;  %v404_v34 = vld [vmem:[%s771_s4 + $0x8] sm:$0xff]  ;;  %v403_v35 = vld [vmem:[%s771_s4] sm:$0xff] }
   0xf   : > { %v260_v0 = vld [vmem:[%s250_s25] sm:$0xff]  ;;  %v261_v1 = vld [vmem:[%s250_s25 + $0x8] sm:$0xff] }
  0x10   : > { %v262_v2 = vunpack.c.l.bf16 %v260_v0  ;;  %v263_v3 = vunpack.c.h.bf16 %v260_v0  ;;  %v713_v4 = vunpack.c.l.bf16 %v261_v1  ;;  %v265_v5 = vunpack.c.h.bf16 %v261_v1  ;;  %v586_v57 = vld [vmem:[%s770_s3] sm:$0xff] }
  0x12   : > { %vm266_vm0 = vcmp.ge.f32.partialorder %v262_v2, 0.0  ;;  %vm267_vm1 = vcmp.ge.f32.partialorder %v263_v3, 0.0  ;;  %vm268_vm2 = vcmp.ge.f32.partialorder %v713_v4, 0.0  ;;  %vm269_vm3 = vcmp.ge.f32.partialorder %v265_v5, 0.0 }
  0x13   : > { %v270_v6 = vmul.f32 0.1, %v262_v2  ;;  %v271_v7 = vmul.f32 0.1, %v263_v3  ;;  %v272_v8 = vmul.f32 0.1, %v713_v4  ;;  %v622_v36 = vpack.i.bf16 %v263_v3, %v262_v2 }
  0x14   : > { %v273_v9 = vmul.f32 0.1, %v265_v5  ;;  %v627_v38 = vpack.i.bf16 %v265_v5, %v713_v4 }
  0x15   : > { %v274_v10 = vsel %vm266_vm0, %v262_v2, %v270_v6  ;;  %v275_v11 = vsel %vm267_vm1, %v263_v3, %v271_v7  ;;  %v276_v12 = vsel %vm268_vm2, %v713_v4, %v272_v8 }
  0x16   : > { %v277_v13 = vsel %vm269_vm3, %v265_v5, %v273_v9  ;;  %v278_v14 = vpack.c.bf16 %v275_v11, %v274_v10  ;;  %389 = vperm.xlu2 %619, %v381_v25  }
  0x17   : > { %v279_v15 = vpack.c.bf16 %v277_v13, %v276_v12 }
  0x18   : > { %v292_v16 = vunpack.c.l.b16 %v278_v14  ;;  %v293_v19 = vunpack.c.h.b16 %v278_v14 }
  0x19   : > { %v294_v17 = vunpack.c.l.b16 %v279_v15  ;;  %v295_v20 = vunpack.c.h.b16 %v279_v15 }
  0x1b   : > { %v296_v18 = vpack.c.b16 %v294_v17, %v292_v16  ;;  %v297_v21 = vpack.c.b16 %v295_v20, %v293_v19 }
  0x1d   : > { %298 = vrot.lane.b32.xlu1 %v296_v18, %s656_s26  ;;  %354 = vrot.lane.b32.xlu0 %v296_v18, %s657_s27 }
  0x1e   : > { %339 = vmatpush.bf16.msra.mxu1 %v296_v18  ;;  %623 = vrot.lane.b32.xlu2 %v622_v36, %s656_s26 }
  0x21   : > { %566 = vmatmul.msk.bf16.vlgmr.msra.gmra.mxu1 %vm305_vm4, %v583_v22 }
  0x25   : > { %300 = vrot.lane.b32.xlu1 %v297_v21, %s656_s26  ;;  %356 = vrot.lane.b32.xlu0 %v297_v21, %s657_s27 }
  0x2d   : > { %412 = vperm.xlu1 %621, %v404_v34   ;;  %407 = vperm.xlu0 %620, %v403_v35  }
  0x35   : > { %628 = vrot.lane.b32.xlu1 %v627_v38, %s656_s26  ;;  %s258_s26 = scalar_lea.vmem %s772_s5, %s582_s23 }
  0x68   : > { %v385_v41 = vpop.permute.xlu2 %384 }
  0x70   : > { %v390_v50 = vpop.permute.xlu2 %389 }
  0x78   : > { %v624_v60 = vpop.permute.xlu2 %623 }
  0x79   : > { %v626_v62 = vunpack.i.h.bf16 %v624_v60  ;;  %v625_v63 = vunpack.i.l.bf16 %v624_v60 }
  0x7b   : > { %v450_v4 = vsel %vm302_vm5, %v625_v63, %v626_v62 }
  0x8f   : > { %v299_v26 = vpop.permute.xlu1 %298  ;;  %v355_v27 = vpop.permute.xlu0 %354 }
  0x97   : > { %v301_v28 = vpop.permute.xlu1 %300  ;;  %v357_v29 = vpop.permute.xlu0 %356 }
  0x98   : > { %v303_v30 = vsel %vm302_vm5, %v299_v26, %v301_v28  ;;  %v359_v31 = vsel %vm358_vm6, %v355_v27, %v357_v29 }
  0x99   : > { %316 = vmatpush.bf16.msra.mxu0 %v303_v30  ;;  %371 = vmatpush.bf16.msra.mxu2 %v359_v31 }
  0x9c   : > { %561 = vmatmul.msk.bf16.vlgmr.msra.gmra.mxu0 %vm305_vm4, %v584_v32  ;;  %573 = vmatmul.msk.bf16.vlgmr.msra.gmra.mxu2 %vm305_vm4, %v585_v33 }
  0x9e   : > { %v341_v39 = vpop.f32.mrf.mxu1 }
  0x9f   : > { %v413_v58 = vpop.permute.xlu1 %412  ;;  %v408_v0 = vpop.permute.xlu0 %407 }
  0xa6   : > { %v343_v45 = vpop.f32.mrf.mxu1 }
  0xa7   : > { %v629_v61 = vpop.permute.xlu1 %628 }
  0xa8   : > { %v631_v1 = vunpack.i.h.bf16 %v629_v61  ;;  %v630_v2 = vunpack.i.l.bf16 %v629_v61 }
  0xaa   : > { %v451_v6 = vsel %vm302_vm5, %v630_v2, %v631_v1 }
 0x119   : > { %v318_v37 = vpop.f32.mrf.mxu0 }
 0x11a   : > { %v342_v40 = vadd.f32 %v341_v39, %v318_v37 }
 0x11f   : > { %v373_v42 = vpop.f32.mrf.mxu2 }
 0x120   : > { %v378_v43 = vadd.f32 %v373_v42, %v342_v40 }
 0x121   : > { %v320_v44 = vpop.f32.mrf.mxu0 }
 0x122   : > { %v392_v46 = vadd.f32 %v385_v41, %v378_v43  ;;  %v344_v47 = vadd.f32 %v343_v45, %v320_v44 }
 0x124   : > { %v396_v52 = vmul.f32 0.1, %v392_v46  ;;  %vm394_vm7 = vcmp.ge.f32.partialorder %v392_v46, 0.0 }
 0x126   : > { %v398_v54 = vsel %vm394_vm7, %v392_v46, %v396_v52 }
 0x127   : > { %v375_v48 = vpop.f32.mrf.mxu2 }
 0x128   : > { %v379_v49 = vadd.f32 %v375_v48, %v344_v47 }
 0x12a   : > { %v393_v51 = vadd.f32 %v390_v50, %v379_v49 }
 0x12c   : > { %vm395_vm8 = vcmp.ge.f32.partialorder %v393_v51, 0.0  ;;  %v397_v53 = vmul.f32 0.1, %v393_v51 }
 0x12e   : > { %v399_v55 = vsel %vm395_vm8, %v393_v51, %v397_v53 }
 0x12f   : > { %v400_v56 = vpack.c.bf16 %v399_v55, %v398_v54 }
 0x131   : > { %430 = vmatpush.bf16.msra.mxu3 %v400_v56 }
 0x134   : > { %578 = vmatmul.msk.bf16.vlgmr.msra.gmra.mxu3 %vm305_vm4, %v586_v57 }
 0x1b7   : > { %v432_v59 = vpop.f32.mrf.mxu3 }
 0x1b8   : > { %v433_v3 = vadd.f32 %v432_v59, %v408_v0 }
 0x1ba   : > { %v454_v8 = vadd.f32 %v450_v4, %v433_v3 }
 0x1bf   : > { %v434_v5 = vpop.f32.mrf.mxu3 }
 0x1c0   : > { %v435_v7 = vadd.f32 %v434_v5, %v413_v58 }
 0x1c2   : > { %v455_v9 = vadd.f32 %v451_v6, %v435_v7 }
 0x1c4   : > { %v590_v10 = vpack.c.bf16 %v455_v9, %v454_v8 }
 0x1c6   : > { %591 = vst [vmem:[%s258_s26] sm:$0xff] %v590_v10  }
 0x1c7 PF: > { %s15_s20 = sadd.s32 1, %s654_s20   ;;  %s773_s18 = smov %s650_s19 }
 0x1c8   : > { %p12_p5 = scmp.ge.s32.totalorder %s15_s20, 4   ;;  %s774_s19 = smov %s776_s21 }
 0x1ca   :  { %14 = sbr.rel (!%p12_p5) target bundleno = 2 (0x2), region = 72 }

// kernel: hifigan_forward.25
= control target key start
LH: loop header
LB: loop body
LE: loop exit
PB: predicated region body
PF: predicated region fallthrough
CT: control target
= control target key end

     0   :  { %s689_s18 = smov 0   ;;  %s691_s19 = smov 0   ;;  %s767_s0 = inlined_call_operand.vmem [shape: bf16[2,1,16,134], index: 0, kind: input, shape index: {}]   ;;  %s768_s1 = inlined_call_operand.vmem [shape: bf16[3,16,16], index: 1, kind: input, shape index: {}]   ;;  %s769_s2 = inlined_call_operand.vmem [shape: f32[16,1], index: 2, kind: input, shape index: {}]   ;;  %s770_s3 = inlined_call_operand.vmem [shape: bf16[16,16], index: 3, kind: input, shape index: {}]   ;;  %s771_s4 = inlined_call_operand.vmem [shape: f32[16,1], index: 4, kind: input, shape index: {}]   ;;  %s772_s5 = inlined_call_operand.vmem [shape: bf16[2,16,128], index: 5, kind: output, shape index: {}]  }
   0x1   :  { %s693_s20 = smov 0  }
   0x2 LB: > { %s27_s21 = sadd.s32 1, %s650_s19  ;;  %p550_p0 = scmp.ge.s32.totalorder %s654_s20, 1  ;;  %s654_s20 = sphi %s693_s20, %s15_s20   ;;  %s650_s19 = sphi %s691_s19, %s774_s19   ;;  %s646_s18 = sphi %s689_s18, %s773_s18  }
   0x3   : > { %p29_p1 = scmp.ge.s32.totalorder %s27_s21, 2  ;;  %p207_p2 = scmp.lt.s32.totalorder %s654_s20, 3 }
   0x5   : > { %s776_s21 = smov (%p29_p1, %s27_s21), 0  ;;  %p208_p3 = pnand %p550_p0, %p207_p2 }
   0x6   : > { %p242_p4 = scmp.lt.s32.totalorder (!%p208_p3), %s646_s18, 1  ;;  %s656_s26 = smov (!%p208_p3), 125  }
   0x7   : > { %211 = sbr.rel (%p208_p3) target bundleno = 455 (0x1c7), region = 40  ;;  %s657_s27 = smov (!%p208_p3), 122  }
   0xc   : > { %s778_s18 = smov (!%p242_p4, %s646_s18), 1  ;;  %v583_v22 = vld [vmem:[%s768_s1] sm:$0xff]  ;;  %vm305_vm4 = vcmask 130048   ;;  %v658_v24 = vmov 0   ;;  %v381_v25 = vld [vmem:[%s769_s2 + $0x8] sm:$0xff]  ;;  %vm302_vm5 = vcmask 1022976  }
   0xd   : > { %s581_s22 = sshll.u32 %s778_s18, 4  ;;  %v380_v23 = vld [vmem:[%s769_s2] sm:$0xff]  ;;  %619 = vset.pattern.permute.xlu2 %v658_v24  ;;  %621 = vset.pattern.permute.xlu1 %v658_v24  ;;  %vm358_vm6 = vcmask 998400   ;;  %v584_v32 = vld [vmem:[%s768_s1 + $0x8] sm:$0xff]  ;;  %v585_v33 = vld [vmem:[%s768_s1 + $0x10] sm:$0xff]  ;;  %s582_s23 = sshll.u32 %s778_s18, 3 }
   0xe   : > { %s250_s25 = scalar_lea.vmem %s767_s0, %s581_s22  ;;  %384 = vperm.xlu2 %619, %v380_v23   ;;  %620 = vset.pattern.permute.xlu0 %v658_v24  ;;  %v404_v34 = vld [vmem:[%s771_s4 + $0x8] sm:$0xff]  ;;  %v403_v35 = vld [vmem:[%s771_s4] sm:$0xff] }
   0xf   : > { %v260_v0 = vld [vmem:[%s250_s25] sm:$0xff]  ;;  %v261_v1 = vld [vmem:[%s250_s25 + $0x8] sm:$0xff] }
  0x10   : > { %v262_v2 = vunpack.c.l.bf16 %v260_v0  ;;  %v263_v3 = vunpack.c.h.bf16 %v260_v0  ;;  %v713_v4 = vunpack.c.l.bf16 %v261_v1  ;;  %v265_v5 = vunpack.c.h.bf16 %v261_v1  ;;  %v586_v57 = vld [vmem:[%s770_s3] sm:$0xff] }
  0x12   : > { %vm266_vm0 = vcmp.ge.f32.partialorder %v262_v2, 0.0  ;;  %vm267_vm1 = vcmp.ge.f32.partialorder %v263_v3, 0.0  ;;  %vm268_vm2 = vcmp.ge.f32.partialorder %v713_v4, 0.0  ;;  %vm269_vm3 = vcmp.ge.f32.partialorder %v265_v5, 0.0 }
  0x13   : > { %v270_v6 = vmul.f32 0.1, %v262_v2  ;;  %v271_v7 = vmul.f32 0.1, %v263_v3  ;;  %v272_v8 = vmul.f32 0.1, %v713_v4  ;;  %v622_v36 = vpack.i.bf16 %v263_v3, %v262_v2 }
  0x14   : > { %v273_v9 = vmul.f32 0.1, %v265_v5  ;;  %v627_v38 = vpack.i.bf16 %v265_v5, %v713_v4 }
  0x15   : > { %v274_v10 = vsel %vm266_vm0, %v262_v2, %v270_v6  ;;  %v275_v11 = vsel %vm267_vm1, %v263_v3, %v271_v7  ;;  %v276_v12 = vsel %vm268_vm2, %v713_v4, %v272_v8 }
  0x16   : > { %v277_v13 = vsel %vm269_vm3, %v265_v5, %v273_v9  ;;  %v278_v14 = vpack.c.bf16 %v275_v11, %v274_v10  ;;  %389 = vperm.xlu2 %619, %v381_v25  }
  0x17   : > { %v279_v15 = vpack.c.bf16 %v277_v13, %v276_v12 }
  0x18   : > { %v292_v16 = vunpack.c.l.b16 %v278_v14  ;;  %v293_v19 = vunpack.c.h.b16 %v278_v14 }
  0x19   : > { %v294_v17 = vunpack.c.l.b16 %v279_v15  ;;  %v295_v20 = vunpack.c.h.b16 %v279_v15 }
  0x1b   : > { %v296_v18 = vpack.c.b16 %v294_v17, %v292_v16  ;;  %v297_v21 = vpack.c.b16 %v295_v20, %v293_v19 }
  0x1d   : > { %298 = vrot.lane.b32.xlu1 %v296_v18, %s656_s26  ;;  %354 = vrot.lane.b32.xlu0 %v296_v18, %s657_s27 }
  0x1e   : > { %339 = vmatpush.bf16.msra.mxu1 %v296_v18  ;;  %623 = vrot.lane.b32.xlu2 %v622_v36, %s656_s26 }
  0x21   : > { %566 = vmatmul.msk.bf16.vlgmr.msra.gmra.mxu1 %vm305_vm4, %v583_v22 }
  0x25   : > { %300 = vrot.lane.b32.xlu1 %v297_v21, %s656_s26  ;;  %356 = vrot.lane.b32.xlu0 %v297_v21, %s657_s27 }
  0x2d   : > { %412 = vperm.xlu1 %621, %v404_v34   ;;  %407 = vperm.xlu0 %620, %v403_v35  }
  0x35   : > { %628 = vrot.lane.b32.xlu1 %v627_v38, %s656_s26  ;;  %s258_s26 = scalar_lea.vmem %s772_s5, %s582_s23 }
  0x68   : > { %v385_v41 = vpop.permute.xlu2 %384 }
  0x70   : > { %v390_v50 = vpop.permute.xlu2 %389 }
  0x78   : > { %v624_v60 = vpop.permute.xlu2 %623 }
  0x79   : > { %v626_v62 = vunpack.i.h.bf16 %v624_v60  ;;  %v625_v63 = vunpack.i.l.bf16 %v624_v60 }
  0x7b   : > { %v450_v4 = vsel %vm302_vm5, %v625_v63, %v626_v62 }
  0x8f   : > { %v299_v26 = vpop.permute.xlu1 %298  ;;  %v355_v27 = vpop.permute.xlu0 %354 }
  0x97   : > { %v301_v28 = vpop.permute.xlu1 %300  ;;  %v357_v29 = vpop.permute.xlu0 %356 }
  0x98   : > { %v303_v30 = vsel %vm302_vm5, %v299_v26, %v301_v28  ;;  %v359_v31 = vsel %vm358_vm6, %v355_v27, %v357_v29 }
  0x99   : > { %316 = vmatpush.bf16.msra.mxu0 %v303_v30  ;;  %371 = vmatpush.bf16.msra.mxu2 %v359_v31 }
  0x9c   : > { %561 = vmatmul.msk.bf16.vlgmr.msra.gmra.mxu0 %vm305_vm4, %v584_v32  ;;  %573 = vmatmul.msk.bf16.vlgmr.msra.gmra.mxu2 %vm305_vm4, %v585_v33 }
  0x9e   : > { %v341_v39 = vpop.f32.mrf.mxu1 }
  0x9f   : > { %v413_v58 = vpop.permute.xlu1 %412  ;;  %v408_v0 = vpop.permute.xlu0 %407 }
  0xa6   : > { %v343_v45 = vpop.f32.mrf.mxu1 }
  0xa7   : > { %v629_v61 = vpop.permute.xlu1 %628 }
  0xa8   : > { %v631_v1 = vunpack.i.h.bf16 %v629_v61  ;;  %v630_v2 = vunpack.i.l.bf16 %v629_v61 }
  0xaa   : > { %v451_v6 = vsel %vm302_vm5, %v630_v2, %v631_v1 }
 0x119   : > { %v318_v37 = vpop.f32.mrf.mxu0 }
 0x11a   : > { %v342_v40 = vadd.f32 %v341_v39, %v318_v37 }
 0x11f   : > { %v373_v42 = vpop.f32.mrf.mxu2 }
 0x120   : > { %v378_v43 = vadd.f32 %v373_v42, %v342_v40 }
 0x121   : > { %v320_v44 = vpop.f32.mrf.mxu0 }
 0x122   : > { %v392_v46 = vadd.f32 %v385_v41, %v378_v43  ;;  %v344_v47 = vadd.f32 %v343_v45, %v320_v44 }
 0x124   : > { %v396_v52 = vmul.f32 0.1, %v392_v46  ;;  %vm394_vm7 = vcmp.ge.f32.partialorder %v392_v46, 0.0 }
 0x126   : > { %v398_v54 = vsel %vm394_vm7, %v392_v46, %v396_v52 }
 0x127   : > { %v375_v48 = vpop.f32.mrf.mxu2 }
 0x128   : > { %v379_v49 = vadd.f32 %v375_v48, %v344_v47 }
 0x12a   : > { %v393_v51 = vadd.f32 %v390_v50, %v379_v49 }
 0x12c   : > { %vm395_vm8 = vcmp.ge.f32.partialorder %v393_v51, 0.0  ;;  %v397_v53 = vmul.f32 0.1, %v393_v51 }
 0x12e   : > { %v399_v55 = vsel %vm395_vm8, %v393_v51, %v397_v53 }
 0x12f   : > { %v400_v56 = vpack.c.bf16 %v399_v55, %v398_v54 }
 0x131   : > { %430 = vmatpush.bf16.msra.mxu3 %v400_v56 }
 0x134   : > { %578 = vmatmul.msk.bf16.vlgmr.msra.gmra.mxu3 %vm305_vm4, %v586_v57 }
 0x1b7   : > { %v432_v59 = vpop.f32.mrf.mxu3 }
 0x1b8   : > { %v433_v3 = vadd.f32 %v432_v59, %v408_v0 }
 0x1ba   : > { %v454_v8 = vadd.f32 %v450_v4, %v433_v3 }
 0x1bf   : > { %v434_v5 = vpop.f32.mrf.mxu3 }
 0x1c0   : > { %v435_v7 = vadd.f32 %v434_v5, %v413_v58 }
 0x1c2   : > { %v455_v9 = vadd.f32 %v451_v6, %v435_v7 }
 0x1c4   : > { %v590_v10 = vpack.c.bf16 %v455_v9, %v454_v8 }
 0x1c6   : > { %591 = vst [vmem:[%s258_s26] sm:$0xff] %v590_v10  }
 0x1c7 PF: > { %s15_s20 = sadd.s32 1, %s654_s20   ;;  %s773_s18 = smov %s650_s19 }
 0x1c8   : > { %p12_p5 = scmp.ge.s32.totalorder %s15_s20, 4   ;;  %s774_s19 = smov %s776_s21 }
 0x1ca   :  { %14 = sbr.rel (!%p12_p5) target bundleno = 2 (0x2), region = 72 }

// kernel: hifigan_forward.26
= control target key start
LH: loop header
LB: loop body
LE: loop exit
PB: predicated region body
PF: predicated region fallthrough
CT: control target
= control target key end

     0   :  { %s689_s18 = smov 0   ;;  %s691_s19 = smov 0   ;;  %s767_s0 = inlined_call_operand.vmem [shape: bf16[2,1,16,138], index: 0, kind: input, shape index: {}]   ;;  %s768_s1 = inlined_call_operand.vmem [shape: bf16[3,16,16], index: 1, kind: input, shape index: {}]   ;;  %s769_s2 = inlined_call_operand.vmem [shape: f32[16,1], index: 2, kind: input, shape index: {}]   ;;  %s770_s3 = inlined_call_operand.vmem [shape: bf16[16,16], index: 3, kind: input, shape index: {}]   ;;  %s771_s4 = inlined_call_operand.vmem [shape: f32[16,1], index: 4, kind: input, shape index: {}]   ;;  %s772_s5 = inlined_call_operand.vmem [shape: bf16[2,16,128], index: 5, kind: output, shape index: {}]  }
   0x1   :  { %s693_s20 = smov 0  }
   0x2 LB: > { %s27_s21 = sadd.s32 1, %s650_s19  ;;  %p550_p0 = scmp.ge.s32.totalorder %s654_s20, 1  ;;  %s654_s20 = sphi %s693_s20, %s15_s20   ;;  %s650_s19 = sphi %s691_s19, %s774_s19   ;;  %s646_s18 = sphi %s689_s18, %s773_s18  }
   0x3   : > { %p29_p1 = scmp.ge.s32.totalorder %s27_s21, 2  ;;  %p207_p2 = scmp.lt.s32.totalorder %s654_s20, 3 }
   0x5   : > { %s776_s21 = smov (%p29_p1, %s27_s21), 0  ;;  %p208_p3 = pnand %p550_p0, %p207_p2 }
   0x6   : > { %p242_p4 = scmp.lt.s32.totalorder (!%p208_p3), %s646_s18, 1  ;;  %s656_s26 = smov (!%p208_p3), 123  }
   0x7   : > { %211 = sbr.rel (%p208_p3) target bundleno = 455 (0x1c7), region = 40  ;;  %s657_s27 = smov (!%p208_p3), 118  }
   0xc   : > { %s778_s18 = smov (!%p242_p4, %s646_s18), 1  ;;  %v583_v22 = vld [vmem:[%s768_s1] sm:$0xff]  ;;  %vm305_vm4 = vcmask 130048   ;;  %v658_v24 = vmov 0   ;;  %v381_v25 = vld [vmem:[%s769_s2 + $0x8] sm:$0xff]  ;;  %vm302_vm5 = vcmask 1006592  }
   0xd   : > { %s581_s22 = sshll.u32 %s778_s18, 4  ;;  %v380_v23 = vld [vmem:[%s769_s2] sm:$0xff]  ;;  %619 = vset.pattern.permute.xlu2 %v658_v24  ;;  %621 = vset.pattern.permute.xlu1 %v658_v24  ;;  %vm358_vm6 = vcmask 965632   ;;  %v584_v32 = vld [vmem:[%s768_s1 + $0x8] sm:$0xff]  ;;  %v585_v33 = vld [vmem:[%s768_s1 + $0x10] sm:$0xff]  ;;  %s582_s23 = sshll.u32 %s778_s18, 3 }
   0xe   : > { %s250_s25 = scalar_lea.vmem %s767_s0, %s581_s22  ;;  %384 = vperm.xlu2 %619, %v380_v23   ;;  %620 = vset.pattern.permute.xlu0 %v658_v24  ;;  %v404_v34 = vld [vmem:[%s771_s4 + $0x8] sm:$0xff]  ;;  %v403_v35 = vld [vmem:[%s771_s4] sm:$0xff] }
   0xf   : > { %v260_v0 = vld [vmem:[%s250_s25] sm:$0xff]  ;;  %v261_v1 = vld [vmem:[%s250_s25 + $0x8] sm:$0xff] }
  0x10   : > { %v262_v2 = vunpack.c.l.bf16 %v260_v0  ;;  %v263_v3 = vunpack.c.h.bf16 %v260_v0  ;;  %v713_v4 = vunpack.c.l.bf16 %v261_v1  ;;  %v265_v5 = vunpack.c.h.bf16 %v261_v1  ;;  %v586_v57 = vld [vmem:[%s770_s3] sm:$0xff] }
  0x12   : > { %vm266_vm0 = vcmp.ge.f32.partialorder %v262_v2, 0.0  ;;  %vm267_vm1 = vcmp.ge.f32.partialorder %v263_v3, 0.0  ;;  %vm268_vm2 = vcmp.ge.f32.partialorder %v713_v4, 0.0  ;;  %vm269_vm3 = vcmp.ge.f32.partialorder %v265_v5, 0.0 }
  0x13   : > { %v270_v6 = vmul.f32 0.1, %v262_v2  ;;  %v271_v7 = vmul.f32 0.1, %v263_v3  ;;  %v272_v8 = vmul.f32 0.1, %v713_v4  ;;  %v622_v36 = vpack.i.bf16 %v263_v3, %v262_v2 }
  0x14   : > { %v273_v9 = vmul.f32 0.1, %v265_v5  ;;  %v627_v38 = vpack.i.bf16 %v265_v5, %v713_v4 }
  0x15   : > { %v274_v10 = vsel %vm266_vm0, %v262_v2, %v270_v6  ;;  %v275_v11 = vsel %vm267_vm1, %v263_v3, %v271_v7  ;;  %v276_v12 = vsel %vm268_vm2, %v713_v4, %v272_v8 }
  0x16   : > { %v277_v13 = vsel %vm269_vm3, %v265_v5, %v273_v9  ;;  %v278_v14 = vpack.c.bf16 %v275_v11, %v274_v10  ;;  %389 = vperm.xlu2 %619, %v381_v25  }
  0x17   : > { %v279_v15 = vpack.c.bf16 %v277_v13, %v276_v12 }
  0x18   : > { %v292_v16 = vunpack.c.l.b16 %v278_v14  ;;  %v293_v19 = vunpack.c.h.b16 %v278_v14 }
  0x19   : > { %v294_v17 = vunpack.c.l.b16 %v279_v15  ;;  %v295_v20 = vunpack.c.h.b16 %v279_v15 }
  0x1b   : > { %v296_v18 = vpack.c.b16 %v294_v17, %v292_v16  ;;  %v297_v21 = vpack.c.b16 %v295_v20, %v293_v19 }
  0x1d   : > { %298 = vrot.lane.b32.xlu1 %v296_v18, %s656_s26  ;;  %354 = vrot.lane.b32.xlu0 %v296_v18, %s657_s27 }
  0x1e   : > { %339 = vmatpush.bf16.msra.mxu1 %v296_v18  ;;  %623 = vrot.lane.b32.xlu2 %v622_v36, %s656_s26 }
  0x21   : > { %566 = vmatmul.msk.bf16.vlgmr.msra.gmra.mxu1 %vm305_vm4, %v583_v22 }
  0x25   : > { %300 = vrot.lane.b32.xlu1 %v297_v21, %s656_s26  ;;  %356 = vrot.lane.b32.xlu0 %v297_v21, %s657_s27 }
  0x2d   : > { %412 = vperm.xlu1 %621, %v404_v34   ;;  %407 = vperm.xlu0 %620, %v403_v35  }
  0x35   : > { %628 = vrot.lane.b32.xlu1 %v627_v38, %s656_s26  ;;  %s258_s26 = scalar_lea.vmem %s772_s5, %s582_s23 }
  0x68   : > { %v385_v41 = vpop.permute.xlu2 %384 }
  0x70   : > { %v390_v50 = vpop.permute.xlu2 %389 }
  0x78   : > { %v624_v60 = vpop.permute.xlu2 %623 }
  0x79   : > { %v626_v62 = vunpack.i.h.bf16 %v624_v60  ;;  %v625_v63 = vunpack.i.l.bf16 %v624_v60 }
  0x7b   : > { %v450_v4 = vsel %vm302_vm5, %v625_v63, %v626_v62 }
  0x8f   : > { %v299_v26 = vpop.permute.xlu1 %298  ;;  %v355_v27 = vpop.permute.xlu0 %354 }
  0x97   : > { %v301_v28 = vpop.permute.xlu1 %300  ;;  %v357_v29 = vpop.permute.xlu0 %356 }
  0x98   : > { %v303_v30 = vsel %vm302_vm5, %v299_v26, %v301_v28  ;;  %v359_v31 = vsel %vm358_vm6, %v355_v27, %v357_v29 }
  0x99   : > { %316 = vmatpush.bf16.msra.mxu0 %v303_v30  ;;  %371 = vmatpush.bf16.msra.mxu2 %v359_v31 }
  0x9c   : > { %561 = vmatmul.msk.bf16.vlgmr.msra.gmra.mxu0 %vm305_vm4, %v584_v32  ;;  %573 = vmatmul.msk.bf16.vlgmr.msra.gmra.mxu2 %vm305_vm4, %v585_v33 }
  0x9e   : > { %v341_v39 = vpop.f32.mrf.mxu1 }
  0x9f   : > { %v413_v58 = vpop.permute.xlu1 %412  ;;  %v408_v0 = vpop.permute.xlu0 %407 }
  0xa6   : > { %v343_v45 = vpop.f32.mrf.mxu1 }
  0xa7   : > { %v629_v61 = vpop.permute.xlu1 %628 }
  0xa8   : > { %v631_v1 = vunpack.i.h.bf16 %v629_v61  ;;  %v630_v2 = vunpack.i.l.bf16 %v629_v61 }
  0xaa   : > { %v451_v6 = vsel %vm302_vm5, %v630_v2, %v631_v1 }
 0x119   : > { %v318_v37 = vpop.f32.mrf.mxu0 }
 0x11a   : > { %v342_v40 = vadd.f32 %v341_v39, %v318_v37 }
 0x11f   : > { %v373_v42 = vpop.f32.mrf.mxu2 }
 0x120   : > { %v378_v43 = vadd.f32 %v373_v42, %v342_v40 }
 0x121   : > { %v320_v44 = vpop.f32.mrf.mxu0 }
 0x122   : > { %v392_v46 = vadd.f32 %v385_v41, %v378_v43  ;;  %v344_v47 = vadd.f32 %v343_v45, %v320_v44 }
 0x124   : > { %v396_v52 = vmul.f32 0.1, %v392_v46  ;;  %vm394_vm7 = vcmp.ge.f32.partialorder %v392_v46, 0.0 }
 0x126   : > { %v398_v54 = vsel %vm394_vm7, %v392_v46, %v396_v52 }
 0x127   : > { %v375_v48 = vpop.f32.mrf.mxu2 }
 0x128   : > { %v379_v49 = vadd.f32 %v375_v48, %v344_v47 }
 0x12a   : > { %v393_v51 = vadd.f32 %v390_v50, %v379_v49 }
 0x12c   : > { %vm395_vm8 = vcmp.ge.f32.partialorder %v393_v51, 0.0  ;;  %v397_v53 = vmul.f32 0.1, %v393_v51 }
 0x12e   : > { %v399_v55 = vsel %vm395_vm8, %v393_v51, %v397_v53 }
 0x12f   : > { %v400_v56 = vpack.c.bf16 %v399_v55, %v398_v54 }
 0x131   : > { %430 = vmatpush.bf16.msra.mxu3 %v400_v56 }
 0x134   : > { %578 = vmatmul.msk.bf16.vlgmr.msra.gmra.mxu3 %vm305_vm4, %v586_v57 }
 0x1b7   : > { %v432_v59 = vpop.f32.mrf.mxu3 }
 0x1b8   : > { %v433_v3 = vadd.f32 %v432_v59, %v408_v0 }
 0x1ba   : > { %v454_v8 = vadd.f32 %v450_v4, %v433_v3 }
 0x1bf   : > { %v434_v5 = vpop.f32.mrf.mxu3 }
 0x1c0   : > { %v435_v7 = vadd.f32 %v434_v5, %v413_v58 }
 0x1c2   : > { %v455_v9 = vadd.f32 %v451_v6, %v435_v7 }
 0x1c4   : > { %v590_v10 = vpack.c.bf16 %v455_v9, %v454_v8 }
 0x1c6   : > { %591 = vst [vmem:[%s258_s26] sm:$0xff] %v590_v10  }
 0x1c7 PF: > { %s15_s20 = sadd.s32 1, %s654_s20   ;;  %s773_s18 = smov %s650_s19 }
 0x1c8   : > { %p12_p5 = scmp.ge.s32.totalorder %s15_s20, 4   ;;  %s774_s19 = smov %s776_s21 }
 0x1ca   :  { %14 = sbr.rel (!%p12_p5) target bundleno = 2 (0x2), region = 72 }

// kernel: hifigan_forward.27
= control target key start
LH: loop header
LB: loop body
LE: loop exit
PB: predicated region body
PF: predicated region fallthrough
CT: control target
= control target key end

     0   :  { %s865_s18 = smov 0   ;;  %s867_s19 = smov 0   ;;  %s977_s0 = inlined_call_operand.vmem [shape: bf16[2,1,16,134], index: 0, kind: input, shape index: {}]   ;;  %s978_s1 = inlined_call_operand.vmem [shape: bf16[7,16,16], index: 1, kind: input, shape index: {}]   ;;  %s979_s2 = inlined_call_operand.vmem [shape: f32[16,1], index: 2, kind: input, shape index: {}]   ;;  %s980_s3 = inlined_call_operand.vmem [shape: bf16[16,16], index: 3, kind: input, shape index: {}]   ;;  %s981_s4 = inlined_call_operand.vmem [shape: f32[16,1], index: 4, kind: input, shape index: {}]   ;;  %s982_s5 = inlined_call_operand.vmem [shape: bf16[2,16,128], index: 5, kind: output, shape index: {}]  }
   0x1   :  { %s869_s20 = smov 0  }
   0x2 LB: > { %s27_s21 = sadd.s32 1, %s822_s19  ;;  %p686_p0 = scmp.ge.s32.totalorder %s826_s20, 1  ;;  %s826_s20 = sphi %s869_s20, %s15_s20   ;;  %s822_s19 = sphi %s867_s19, %s984_s19   ;;  %s818_s18 = sphi %s865_s18, %s983_s18  }
   0x3   : > { %p29_p1 = scmp.ge.s32.totalorder %s27_s21, 2  ;;  %p207_p2 = scmp.lt.s32.totalorder %s826_s20, 3 }
   0x5   : > { %s986_s21 = smov (%p29_p1, %s27_s21), 0  ;;  %p208_p3 = pnand %p686_p0, %p207_p2 }
   0x6   : > { %p242_p4 = scmp.lt.s32.totalorder (!%p208_p3), %s818_s18, 1  ;;  %s828_s26 = smov (!%p208_p3), 127  }
   0x7   : > { %211 = sbr.rel (%p208_p3) target bundleno = 472 (0x1d8), region = 40  ;;  %s829_s27 = smov (!%p208_p3), 126  }
   0x8   : > { %s830_s28 = smov (!%p208_p3), 125   ;;  %s831_s29 = smov (!%p208_p3), 122  }
   0x9   : > { %s832_s30 = smov (!%p208_p3), 124   ;;  %s833_s6 = smov (!%p208_p3), 123  }
   0xc   : > { %s988_s18 = smov (!%p242_p4, %s818_s18), 1  ;;  %v747_v22 = vld [vmem:[%s978_s1] sm:$0xff]  ;;  %vm305_vm4 = vcmask 130048   ;;  %vm392_vm5 = vcmask 1022976   ;;  %v750_v26 = vld [vmem:[%s978_s1 + $0x18] sm:$0xff]  ;;  %v517_v27 = vld [vmem:[%s979_s2 + $0x8] sm:$0xff] }
   0xd   : > { %s745_s22 = sshll.u32 %s988_s18, 4  ;;  %v516_v28 = vld [vmem:[%s979_s2] sm:$0xff]  ;;  %v834_v29 = vmov 0   ;;  %v540_v32 = vld [vmem:[%s981_s4 + $0x8] sm:$0xff]  ;;  %vm302_vm6 = vcmask 1039360   ;;  %vm358_vm7 = vcmask 1031168  }
   0xe   : > { %s250_s25 = scalar_lea.vmem %s977_s0, %s745_s22  ;;  %792 = vset.pattern.permute.xlu1 %v834_v29  ;;  %791 = vset.pattern.permute.xlu0 %v834_v29  ;;  %v748_v37 = vld [vmem:[%s978_s1 + $0x8] sm:$0xff]  ;;  %v749_v38 = vld [vmem:[%s978_s1 + $0x10] sm:$0xff]  ;;  %vm494_vm8 = vcmask 998400   ;;  %vm426_vm9 = vcmask 1014784   ;;  %vm460_vm10 = vcmask 1006592   ;;  %v751_v48 = vld [vmem:[%s978_s1 + $0x20] sm:$0xff] }
   0xf   : > { %v260_v0 = vld [vmem:[%s250_s25] sm:$0xff]  ;;  %v261_v1 = vld [vmem:[%s250_s25 + $0x8] sm:$0xff]  ;;  %793 = vset.pattern.permute.xlu2 %v834_v29  ;;  %v753_v50 = vld [vmem:[%s978_s1 + $0x30] sm:$0xff]  ;;  %s746_s10 = sshll.u32 %s988_s18, 3 }
  0x10   : > { %v889_v2 = vunpack.c.l.bf16 %v260_v0  ;;  %v891_v3 = vunpack.c.h.bf16 %v260_v0  ;;  %v893_v4 = vunpack.c.l.bf16 %v261_v1  ;;  %v895_v5 = vunpack.c.h.bf16 %v261_v1  ;;  %v752_v49 = vld [vmem:[%s978_s1 + $0x28] sm:$0xff]  ;;  %v539_v59 = vld [vmem:[%s981_s4] sm:$0xff]  ;;  %s258_s13 = scalar_lea.vmem %s982_s5, %s746_s10 }
  0x12   : > { %vm266_vm0 = vcmp.ge.f32.partialorder %v889_v2, 0.0  ;;  %vm267_vm1 = vcmp.ge.f32.partialorder %v891_v3, 0.0  ;;  %vm268_vm2 = vcmp.ge.f32.partialorder %v893_v4, 0.0  ;;  %vm269_vm3 = vcmp.ge.f32.partialorder %v895_v5, 0.0 }
  0x13   : > { %v270_v6 = vmul.f32 0.1, %v889_v2  ;;  %v271_v7 = vmul.f32 0.1, %v891_v3  ;;  %v272_v8 = vmul.f32 0.1, %v893_v4  ;;  %v799_v58 = vpack.i.bf16 %v895_v5, %v893_v4 }
  0x14   : > { %v273_v9 = vmul.f32 0.1, %v895_v5  ;;  %v794_v63 = vpack.i.bf16 %v891_v3, %v889_v2 }
  0x15   : > { %v274_v10 = vsel %vm266_vm0, %v889_v2, %v270_v6  ;;  %v275_v11 = vsel %vm267_vm1, %v891_v3, %v271_v7  ;;  %v276_v12 = vsel %vm268_vm2, %v893_v4, %v272_v8 }
  0x16   : > { %v277_v13 = vsel %vm269_vm3, %v895_v5, %v273_v9  ;;  %v278_v14 = vpack.c.bf16 %v275_v11, %v274_v10 }
  0x17   : > { %v279_v15 = vpack.c.bf16 %v277_v13, %v276_v12 }
  0x18   : > { %v292_v16 = vunpack.c.l.b16 %v278_v14  ;;  %v293_v19 = vunpack.c.h.b16 %v278_v14 }
  0x19   : > { %v294_v17 = vunpack.c.l.b16 %v279_v15  ;;  %v295_v20 = vunpack.c.h.b16 %v279_v15 }
  0x1b   : > { %v296_v18 = vpack.c.b16 %v294_v17, %v292_v16  ;;  %v297_v21 = vpack.c.b16 %v295_v20, %v293_v19 }
  0x1d   : > { %298 = vrot.lane.b32.xlu1 %v296_v18, %s828_s26  ;;  %354 = vrot.lane.b32.xlu0 %v296_v18, %s829_s27 }
  0x1e   : > { %388 = vrot.lane.b32.xlu2 %v296_v18, %s830_s28  ;;  %339 = vmatpush.bf16.msra.mxu1 %v296_v18 }
  0x21   : > { %702 = vmatmul.msk.bf16.vlgmr.msra.gmra.mxu1 %vm305_vm4, %v747_v22 }
  0x25   : > { %300 = vrot.lane.b32.xlu1 %v297_v21, %s828_s26  ;;  %356 = vrot.lane.b32.xlu0 %v297_v21, %s829_s27 }
  0x26   : > { %390 = vrot.lane.b32.xlu2 %v297_v21, %s830_s28 }
  0x2d   : > { %492 = vrot.lane.b32.xlu1 %v297_v21, %s831_s29  ;;  %490 = vrot.lane.b32.xlu0 %v296_v18, %s831_s29 }
  0x2e   : > { %422 = vrot.lane.b32.xlu2 %v296_v18, %s832_s30 }
  0x35   : > { %456 = vrot.lane.b32.xlu1 %v296_v18, %s833_s6  ;;  %424 = vrot.lane.b32.xlu0 %v297_v21, %s832_s30 }
  0x36   : > { %458 = vrot.lane.b32.xlu2 %v297_v21, %s833_s6 }
  0x3d   : > { %525 = vperm.xlu1 %792, %v517_v27   ;;  %520 = vperm.xlu0 %791, %v516_v28  }
  0x3e   : > { %543 = vperm.xlu2 %793, %v539_v59  }
  0x45   : > { %548 = vperm.xlu1 %792, %v540_v32   ;;  %800 = vrot.lane.b32.xlu0 %v799_v58, %s830_s28 }
  0x46   : > { %795 = vrot.lane.b32.xlu2 %v794_v63, %s830_s28 }
  0x78   : > { %v389_v23 = vpop.permute.xlu2 %388 }
  0x80   : > { %v391_v24 = vpop.permute.xlu2 %390 }
  0x81   : > { %v393_v25 = vsel %vm392_vm5, %v389_v23, %v391_v24 }
  0x82   : > { %405 = vmatpush.bf16.msra.mxu3 %v393_v25  ;;  %v754_v25 = vld [vmem:[%s980_s3] sm:$0xff] }
  0x85   : > { %716 = vmatmul.msk.bf16.vlgmr.msra.gmra.mxu3 %vm305_vm4, %v750_v26 }
  0x88   : > { %v423_v39 = vpop.permute.xlu2 %422 }
  0x8f   : > { %v299_v30 = vpop.permute.xlu1 %298  ;;  %v355_v31 = vpop.permute.xlu0 %354 }
  0x90   : > { %v459_v43 = vpop.permute.xlu2 %458 }
  0x97   : > { %v301_v33 = vpop.permute.xlu1 %300  ;;  %v357_v34 = vpop.permute.xlu0 %356 }
  0x98   : > { %v303_v35 = vsel %vm302_vm6, %v299_v30, %v301_v33  ;;  %v359_v36 = vsel %vm358_vm7, %v355_v31, %v357_v34  ;;  %v544_v26 = vpop.permute.xlu2 %543 }
  0x99   : > { %316 = vmatpush.bf16.msra.mxu0 %v303_v35  ;;  %371 = vmatpush.bf16.msra.mxu2 %v359_v36 }
  0x9c   : > { %697 = vmatmul.msk.bf16.vlgmr.msra.gmra.mxu0 %vm305_vm4, %v748_v37  ;;  %709 = vmatmul.msk.bf16.vlgmr.msra.gmra.mxu2 %vm305_vm4, %v749_v38 }
  0x9e   : > { %v341_v52 = vpop.f32.mrf.mxu1 }
  0x9f   : > { %v493_v40 = vpop.permute.xlu1 %492  ;;  %v491_v41 = vpop.permute.xlu0 %490 }
  0xa0   : > { %v495_v42 = vsel %vm494_vm8, %v491_v41, %v493_v40  ;;  %v796_v28 = vpop.permute.xlu2 %795 }
  0xa1   : > { %507 = vmatpush.bf16.msrb.mxu2 %v495_v42  ;;  %v798_v30 = vunpack.i.h.bf16 %v796_v28  ;;  %v797_v31 = vunpack.i.l.bf16 %v796_v28 }
  0xa3   : > { %v586_v36 = vsel %vm392_vm5, %v797_v31, %v798_v30 }
  0xa6   : > { %v343_v55 = vpop.f32.mrf.mxu1 }
  0xa7   : > { %v457_v44 = vpop.permute.xlu1 %456  ;;  %v425_v45 = vpop.permute.xlu0 %424 }
  0xa8   : > { %v427_v46 = vsel %vm426_vm9, %v423_v39, %v425_v45  ;;  %v461_v47 = vsel %vm460_vm10, %v457_v44, %v459_v43 }
  0xa9   : > { %439 = vmatpush.bf16.msrb.mxu0 %v427_v46  ;;  %473 = vmatpush.bf16.msrb.mxu1 %v461_v47 }
  0xac   : > { %723 = vmatmul.msk.bf16.vlgmr.msrb.gmra.mxu0 %vm305_vm4, %v751_v48  ;;  %730 = vmatmul.msk.bf16.vlgmr.msrb.gmra.mxu1 %vm305_vm4, %v752_v49 }
  0xad   : > { %737 = vmatmul.msk.bf16.vlgmr.msrb.gmra.mxu2 %vm305_vm4, %v753_v50 }
  0xaf   : > { %v521_v14 = vpop.permute.xlu0 %520  ;;  %v526_v3 = vpop.permute.xlu1 %525 }
  0xb7   : > { %v801_v29 = vpop.permute.xlu0 %800  ;;  %v549_v35 = vpop.permute.xlu1 %548 }
  0xb8   : > { %v803_v32 = vunpack.i.h.bf16 %v801_v29  ;;  %v802_v33 = vunpack.i.l.bf16 %v801_v29 }
  0xba   : > { %v587_v38 = vsel %vm392_vm5, %v802_v33, %v803_v32 }
 0x108   : > { %v407_v56 = vpop.f32.mrf.mxu3 }
 0x110   : > { %v409_v9 = vpop.f32.mrf.mxu3 }
 0x119   : > { %v318_v51 = vpop.f32.mrf.mxu0 }
 0x11a   : > { %v342_v57 = vadd.f32 %v341_v52, %v318_v51 }
 0x11f   : > { %v373_v53 = vpop.f32.mrf.mxu2 }
 0x120   : > { %v378_v60 = vadd.f32 %v373_v53, %v342_v57 }
 0x121   : > { %v320_v54 = vpop.f32.mrf.mxu0 }
 0x122   : > { %v344_v0 = vadd.f32 %v343_v55, %v320_v54  ;;  %v412_v1 = vadd.f32 %v407_v56, %v378_v60 }
 0x127   : > { %v375_v61 = vpop.f32.mrf.mxu2 }
 0x128   : > { %v379_v7 = vadd.f32 %v375_v61, %v344_v0 }
 0x129   : > { %v441_v62 = vpop.f32.mrf.mxu0  ;;  %v475_v6 = vpop.f32.mrf.mxu1 }
 0x12a   : > { %v446_v8 = vadd.f32 %v441_v62, %v412_v1  ;;  %v413_v5 = vadd.f32 %v409_v9, %v379_v7 }
 0x12c   : > { %v480_v10 = vadd.f32 %v475_v6, %v446_v8 }
 0x130   : > { %v509_v4 = vpop.f32.mrf.mxu2 }
 0x131   : > { %v443_v11 = vpop.f32.mrf.mxu0  ;;  %v514_v12 = vadd.f32 %v509_v4, %v480_v10  ;;  %v477_v15 = vpop.f32.mrf.mxu1 }
 0x132   : > { %v447_v13 = vadd.f32 %v443_v11, %v413_v5 }
 0x133   : > { %v528_v16 = vadd.f32 %v521_v14, %v514_v12 }
 0x134   : > { %v481_v17 = vadd.f32 %v477_v15, %v447_v13 }
 0x135   : > { %v532_v19 = vmul.f32 0.1, %v528_v16  ;;  %vm530_vm11 = vcmp.ge.f32.partialorder %v528_v16, 0.0 }
 0x137   : > { %v534_v22 = vsel %vm530_vm11, %v528_v16, %v532_v19 }
 0x138   : > { %v511_v18 = vpop.f32.mrf.mxu2 }
 0x139   : > { %v515_v2 = vadd.f32 %v511_v18, %v481_v17 }
 0x13b   : > { %v529_v20 = vadd.f32 %v526_v3, %v515_v2 }
 0x13d   : > { %vm531_vm12 = vcmp.ge.f32.partialorder %v529_v20, 0.0  ;;  %v533_v21 = vmul.f32 0.1, %v529_v20 }
 0x13f   : > { %v535_v23 = vsel %vm531_vm12, %v529_v20, %v533_v21 }
 0x140   : > { %v536_v24 = vpack.c.bf16 %v535_v23, %v534_v22 }
 0x142   : > { %566 = vmatpush.bf16.msrb.mxu3 %v536_v24 }
 0x145   : > { %742 = vmatmul.msk.bf16.vlgmr.msrb.gmra.mxu3 %vm305_vm4, %v754_v25 }
 0x1c8   : > { %v568_v27 = vpop.f32.mrf.mxu3 }
 0x1c9   : > { %v569_v34 = vadd.f32 %v568_v27, %v544_v26 }
 0x1cb   : > { %v590_v40 = vadd.f32 %v586_v36, %v569_v34 }
 0x1d0   : > { %v570_v37 = vpop.f32.mrf.mxu3 }
 0x1d1   : > { %v571_v39 = vadd.f32 %v570_v37, %v549_v35 }
 0x1d3   : > { %v591_v41 = vadd.f32 %v587_v38, %v571_v39 }
 0x1d5   : > { %v758_v42 = vpack.c.bf16 %v591_v41, %v590_v40 }
 0x1d7   : > { %759 = vst [vmem:[%s258_s13] sm:$0xff] %v758_v42  }
 0x1d8 PF: > { %s15_s20 = sadd.s32 1, %s826_s20   ;;  %s983_s18 = smov %s822_s19 }
 0x1d9   : > { %p12_p5 = scmp.ge.s32.totalorder %s15_s20, 4   ;;  %s984_s19 = smov %s986_s21 }
 0x1db   :  { %14 = sbr.rel (!%p12_p5) target bundleno = 2 (0x2), region = 76 }

// kernel: hifigan_forward.28
= control target key start
LH: loop header
LB: loop body
LE: loop exit
PB: predicated region body
PF: predicated region fallthrough
CT: control target
= control target key end

     0   :  { %s865_s18 = smov 0   ;;  %s867_s19 = smov 0   ;;  %s977_s0 = inlined_call_operand.vmem [shape: bf16[2,1,16,146], index: 0, kind: input, shape index: {}]   ;;  %s978_s1 = inlined_call_operand.vmem [shape: bf16[7,16,16], index: 1, kind: input, shape index: {}]   ;;  %s979_s2 = inlined_call_operand.vmem [shape: f32[16,1], index: 2, kind: input, shape index: {}]   ;;  %s980_s3 = inlined_call_operand.vmem [shape: bf16[16,16], index: 3, kind: input, shape index: {}]   ;;  %s981_s4 = inlined_call_operand.vmem [shape: f32[16,1], index: 4, kind: input, shape index: {}]   ;;  %s982_s5 = inlined_call_operand.vmem [shape: bf16[2,16,128], index: 5, kind: output, shape index: {}]  }
   0x1   :  { %s869_s20 = smov 0  }
   0x2 LB: > { %s27_s21 = sadd.s32 1, %s822_s19  ;;  %p686_p0 = scmp.ge.s32.totalorder %s826_s20, 1  ;;  %s826_s20 = sphi %s869_s20, %s15_s20   ;;  %s822_s19 = sphi %s867_s19, %s984_s19   ;;  %s818_s18 = sphi %s865_s18, %s983_s18  }
   0x3   : > { %p29_p1 = scmp.ge.s32.totalorder %s27_s21, 2  ;;  %p207_p2 = scmp.lt.s32.totalorder %s826_s20, 3 }
   0x5   : > { %s986_s21 = smov (%p29_p1, %s27_s21), 0  ;;  %p208_p3 = pnand %p686_p0, %p207_p2 }
   0x6   : > { %p242_p4 = scmp.lt.s32.totalorder (!%p208_p3), %s818_s18, 1  ;;  %s828_s26 = smov (!%p208_p3), 125  }
   0x7   : > { %211 = sbr.rel (%p208_p3) target bundleno = 472 (0x1d8), region = 40  ;;  %s829_s27 = smov (!%p208_p3), 122  }
   0x8   : > { %s830_s28 = smov (!%p208_p3), 119   ;;  %s831_s29 = smov (!%p208_p3), 110  }
   0x9   : > { %s832_s30 = smov (!%p208_p3), 116   ;;  %s833_s6 = smov (!%p208_p3), 113  }
   0xc   : > { %s988_s18 = smov (!%p242_p4, %s818_s18), 1  ;;  %v747_v22 = vld [vmem:[%s978_s1] sm:$0xff]  ;;  %vm305_vm4 = vcmask 130048   ;;  %vm392_vm5 = vcmask 973824   ;;  %v750_v26 = vld [vmem:[%s978_s1 + $0x18] sm:$0xff]  ;;  %v517_v27 = vld [vmem:[%s979_s2 + $0x8] sm:$0xff] }
   0xd   : > { %s745_s22 = sshll.u32 %s988_s18, 4  ;;  %v516_v28 = vld [vmem:[%s979_s2] sm:$0xff]  ;;  %v834_v29 = vmov 0   ;;  %v540_v32 = vld [vmem:[%s981_s4 + $0x8] sm:$0xff]  ;;  %vm302_vm6 = vcmask 1022976   ;;  %vm358_vm7 = vcmask 998400  }
   0xe   : > { %s250_s25 = scalar_lea.vmem %s977_s0, %s745_s22  ;;  %792 = vset.pattern.permute.xlu1 %v834_v29  ;;  %791 = vset.pattern.permute.xlu0 %v834_v29  ;;  %v748_v37 = vld [vmem:[%s978_s1 + $0x8] sm:$0xff]  ;;  %v749_v38 = vld [vmem:[%s978_s1 + $0x10] sm:$0xff]  ;;  %vm494_vm8 = vcmask 900096   ;;  %vm426_vm9 = vcmask 949248   ;;  %vm460_vm10 = vcmask 924672   ;;  %v751_v48 = vld [vmem:[%s978_s1 + $0x20] sm:$0xff] }
   0xf   : > { %v260_v0 = vld [vmem:[%s250_s25] sm:$0xff]  ;;  %v261_v1 = vld [vmem:[%s250_s25 + $0x8] sm:$0xff]  ;;  %793 = vset.pattern.permute.xlu2 %v834_v29  ;;  %v753_v50 = vld [vmem:[%s978_s1 + $0x30] sm:$0xff]  ;;  %s746_s10 = sshll.u32 %s988_s18, 3 }
  0x10   : > { %v889_v2 = vunpack.c.l.bf16 %v260_v0  ;;  %v891_v3 = vunpack.c.h.bf16 %v260_v0  ;;  %v893_v4 = vunpack.c.l.bf16 %v261_v1  ;;  %v895_v5 = vunpack.c.h.bf16 %v261_v1  ;;  %v752_v49 = vld [vmem:[%s978_s1 + $0x28] sm:$0xff]  ;;  %v539_v59 = vld [vmem:[%s981_s4] sm:$0xff]  ;;  %s258_s13 = scalar_lea.vmem %s982_s5, %s746_s10 }
  0x12   : > { %vm266_vm0 = vcmp.ge.f32.partialorder %v889_v2, 0.0  ;;  %vm267_vm1 = vcmp.ge.f32.partialorder %v891_v3, 0.0  ;;  %vm268_vm2 = vcmp.ge.f32.partialorder %v893_v4, 0.0  ;;  %vm269_vm3 = vcmp.ge.f32.partialorder %v895_v5, 0.0 }
  0x13   : > { %v270_v6 = vmul.f32 0.1, %v889_v2  ;;  %v271_v7 = vmul.f32 0.1, %v891_v3  ;;  %v272_v8 = vmul.f32 0.1, %v893_v4  ;;  %v799_v58 = vpack.i.bf16 %v895_v5, %v893_v4 }
  0x14   : > { %v273_v9 = vmul.f32 0.1, %v895_v5  ;;  %v794_v63 = vpack.i.bf16 %v891_v3, %v889_v2 }
  0x15   : > { %v274_v10 = vsel %vm266_vm0, %v889_v2, %v270_v6  ;;  %v275_v11 = vsel %vm267_vm1, %v891_v3, %v271_v7  ;;  %v276_v12 = vsel %vm268_vm2, %v893_v4, %v272_v8 }
  0x16   : > { %v277_v13 = vsel %vm269_vm3, %v895_v5, %v273_v9  ;;  %v278_v14 = vpack.c.bf16 %v275_v11, %v274_v10 }
  0x17   : > { %v279_v15 = vpack.c.bf16 %v277_v13, %v276_v12 }
  0x18   : > { %v292_v16 = vunpack.c.l.b16 %v278_v14  ;;  %v293_v19 = vunpack.c.h.b16 %v278_v14 }
  0x19   : > { %v294_v17 = vunpack.c.l.b16 %v279_v15  ;;  %v295_v20 = vunpack.c.h.b16 %v279_v15 }
  0x1b   : > { %v296_v18 = vpack.c.b16 %v294_v17, %v292_v16  ;;  %v297_v21 = vpack.c.b16 %v295_v20, %v293_v19 }
  0x1d   : > { %298 = vrot.lane.b32.xlu1 %v296_v18, %s828_s26  ;;  %354 = vrot.lane.b32.xlu0 %v296_v18, %s829_s27 }
  0x1e   : > { %388 = vrot.lane.b32.xlu2 %v296_v18, %s830_s28  ;;  %339 = vmatpush.bf16.msra.mxu1 %v296_v18 }
  0x21   : > { %702 = vmatmul.msk.bf16.vlgmr.msra.gmra.mxu1 %vm305_vm4, %v747_v22 }
  0x25   : > { %300 = vrot.lane.b32.xlu1 %v297_v21, %s828_s26  ;;  %356 = vrot.lane.b32.xlu0 %v297_v21, %s829_s27 }
  0x26   : > { %390 = vrot.lane.b32.xlu2 %v297_v21, %s830_s28 }
  0x2d   : > { %492 = vrot.lane.b32.xlu1 %v297_v21, %s831_s29  ;;  %490 = vrot.lane.b32.xlu0 %v296_v18, %s831_s29 }
  0x2e   : > { %422 = vrot.lane.b32.xlu2 %v296_v18, %s832_s30 }
  0x35   : > { %456 = vrot.lane.b32.xlu1 %v296_v18, %s833_s6  ;;  %424 = vrot.lane.b32.xlu0 %v297_v21, %s832_s30 }
  0x36   : > { %458 = vrot.lane.b32.xlu2 %v297_v21, %s833_s6 }
  0x3d   : > { %525 = vperm.xlu1 %792, %v517_v27   ;;  %520 = vperm.xlu0 %791, %v516_v28  }
  0x3e   : > { %543 = vperm.xlu2 %793, %v539_v59  }
  0x45   : > { %548 = vperm.xlu1 %792, %v540_v32   ;;  %800 = vrot.lane.b32.xlu0 %v799_v58, %s830_s28 }
  0x46   : > { %795 = vrot.lane.b32.xlu2 %v794_v63, %s830_s28 }
  0x78   : > { %v389_v23 = vpop.permute.xlu2 %388 }
  0x80   : > { %v391_v24 = vpop.permute.xlu2 %390 }
  0x81   : > { %v393_v25 = vsel %vm392_vm5, %v389_v23, %v391_v24 }
  0x82   : > { %405 = vmatpush.bf16.msra.mxu3 %v393_v25  ;;  %v754_v25 = vld [vmem:[%s980_s3] sm:$0xff] }
  0x85   : > { %716 = vmatmul.msk.bf16.vlgmr.msra.gmra.mxu3 %vm305_vm4, %v750_v26 }
  0x88   : > { %v423_v39 = vpop.permute.xlu2 %422 }
  0x8f   : > { %v299_v30 = vpop.permute.xlu1 %298  ;;  %v355_v31 = vpop.permute.xlu0 %354 }
  0x90   : > { %v459_v43 = vpop.permute.xlu2 %458 }
  0x97   : > { %v301_v33 = vpop.permute.xlu1 %300  ;;  %v357_v34 = vpop.permute.xlu0 %356 }
  0x98   : > { %v303_v35 = vsel %vm302_vm6, %v299_v30, %v301_v33  ;;  %v359_v36 = vsel %vm358_vm7, %v355_v31, %v357_v34  ;;  %v544_v26 = vpop.permute.xlu2 %543 }
  0x99   : > { %316 = vmatpush.bf16.msra.mxu0 %v303_v35  ;;  %371 = vmatpush.bf16.msra.mxu2 %v359_v36 }
  0x9c   : > { %697 = vmatmul.msk.bf16.vlgmr.msra.gmra.mxu0 %vm305_vm4, %v748_v37  ;;  %709 = vmatmul.msk.bf16.vlgmr.msra.gmra.mxu2 %vm305_vm4, %v749_v38 }
  0x9e   : > { %v341_v52 = vpop.f32.mrf.mxu1 }
  0x9f   : > { %v493_v40 = vpop.permute.xlu1 %492  ;;  %v491_v41 = vpop.permute.xlu0 %490 }
  0xa0   : > { %v495_v42 = vsel %vm494_vm8, %v491_v41, %v493_v40  ;;  %v796_v28 = vpop.permute.xlu2 %795 }
  0xa1   : > { %507 = vmatpush.bf16.msrb.mxu2 %v495_v42  ;;  %v798_v30 = vunpack.i.h.bf16 %v796_v28  ;;  %v797_v31 = vunpack.i.l.bf16 %v796_v28 }
  0xa3   : > { %v586_v36 = vsel %vm392_vm5, %v797_v31, %v798_v30 }
  0xa6   : > { %v343_v55 = vpop.f32.mrf.mxu1 }
  0xa7   : > { %v457_v44 = vpop.permute.xlu1 %456  ;;  %v425_v45 = vpop.permute.xlu0 %424 }
  0xa8   : > { %v427_v46 = vsel %vm426_vm9, %v423_v39, %v425_v45  ;;  %v461_v47 = vsel %vm460_vm10, %v457_v44, %v459_v43 }
  0xa9   : > { %439 = vmatpush.bf16.msrb.mxu0 %v427_v46  ;;  %473 = vmatpush.bf16.msrb.mxu1 %v461_v47 }
  0xac   : > { %723 = vmatmul.msk.bf16.vlgmr.msrb.gmra.mxu0 %vm305_vm4, %v751_v48  ;;  %730 = vmatmul.msk.bf16.vlgmr.msrb.gmra.mxu1 %vm305_vm4, %v752_v49 }
  0xad   : > { %737 = vmatmul.msk.bf16.vlgmr.msrb.gmra.mxu2 %vm305_vm4, %v753_v50 }
  0xaf   : > { %v521_v14 = vpop.permute.xlu0 %520  ;;  %v526_v3 = vpop.permute.xlu1 %525 }
  0xb7   : > { %v801_v29 = vpop.permute.xlu0 %800  ;;  %v549_v35 = vpop.permute.xlu1 %548 }
  0xb8   : > { %v803_v32 = vunpack.i.h.bf16 %v801_v29  ;;  %v802_v33 = vunpack.i.l.bf16 %v801_v29 }
  0xba   : > { %v587_v38 = vsel %vm392_vm5, %v802_v33, %v803_v32 }
 0x108   : > { %v407_v56 = vpop.f32.mrf.mxu3 }
 0x110   : > { %v409_v9 = vpop.f32.mrf.mxu3 }
 0x119   : > { %v318_v51 = vpop.f32.mrf.mxu0 }
 0x11a   : > { %v342_v57 = vadd.f32 %v341_v52, %v318_v51 }
 0x11f   : > { %v373_v53 = vpop.f32.mrf.mxu2 }
 0x120   : > { %v378_v60 = vadd.f32 %v373_v53, %v342_v57 }
 0x121   : > { %v320_v54 = vpop.f32.mrf.mxu0 }
 0x122   : > { %v344_v0 = vadd.f32 %v343_v55, %v320_v54  ;;  %v412_v1 = vadd.f32 %v407_v56, %v378_v60 }
 0x127   : > { %v375_v61 = vpop.f32.mrf.mxu2 }
 0x128   : > { %v379_v7 = vadd.f32 %v375_v61, %v344_v0 }
 0x129   : > { %v441_v62 = vpop.f32.mrf.mxu0  ;;  %v475_v6 = vpop.f32.mrf.mxu1 }
 0x12a   : > { %v446_v8 = vadd.f32 %v441_v62, %v412_v1  ;;  %v413_v5 = vadd.f32 %v409_v9, %v379_v7 }
 0x12c   : > { %v480_v10 = vadd.f32 %v475_v6, %v446_v8 }
 0x130   : > { %v509_v4 = vpop.f32.mrf.mxu2 }
 0x131   : > { %v443_v11 = vpop.f32.mrf.mxu0  ;;  %v514_v12 = vadd.f32 %v509_v4, %v480_v10  ;;  %v477_v15 = vpop.f32.mrf.mxu1 }
 0x132   : > { %v447_v13 = vadd.f32 %v443_v11, %v413_v5 }
 0x133   : > { %v528_v16 = vadd.f32 %v521_v14, %v514_v12 }
 0x134   : > { %v481_v17 = vadd.f32 %v477_v15, %v447_v13 }
 0x135   : > { %v532_v19 = vmul.f32 0.1, %v528_v16  ;;  %vm530_vm11 = vcmp.ge.f32.partialorder %v528_v16, 0.0 }
 0x137   : > { %v534_v22 = vsel %vm530_vm11, %v528_v16, %v532_v19 }
 0x138   : > { %v511_v18 = vpop.f32.mrf.mxu2 }
 0x139   : > { %v515_v2 = vadd.f32 %v511_v18, %v481_v17 }
 0x13b   : > { %v529_v20 = vadd.f32 %v526_v3, %v515_v2 }
 0x13d   : > { %vm531_vm12 = vcmp.ge.f32.partialorder %v529_v20, 0.0  ;;  %v533_v21 = vmul.f32 0.1, %v529_v20 }
 0x13f   : > { %v535_v23 = vsel %vm531_vm12, %v529_v20, %v533_v21 }
 0x140   : > { %v536_v24 = vpack.c.bf16 %v535_v23, %v534_v22 }
 0x142   : > { %566 = vmatpush.bf16.msrb.mxu3 %v536_v24 }
 0x145   : > { %742 = vmatmul.msk.bf16.vlgmr.msrb.gmra.mxu3 %vm305_vm4, %v754_v25 }
 0x1c8   : > { %v568_v27 = vpop.f32.mrf.mxu3 }
 0x1c9   : > { %v569_v34 = vadd.f32 %v568_v27, %v544_v26 }
 0x1cb   : > { %v590_v40 = vadd.f32 %v586_v36, %v569_v34 }
 0x1d0   : > { %v570_v37 = vpop.f32.mrf.mxu3 }
 0x1d1   : > { %v571_v39 = vadd.f32 %v570_v37, %v549_v35 }
 0x1d3   : > { %v591_v41 = vadd.f32 %v587_v38, %v571_v39 }
 0x1d5   : > { %v758_v42 = vpack.c.bf16 %v591_v41, %v590_v40 }
 0x1d7   : > { %759 = vst [vmem:[%s258_s13] sm:$0xff] %v758_v42  }
 0x1d8 PF: > { %s15_s20 = sadd.s32 1, %s826_s20   ;;  %s983_s18 = smov %s822_s19 }
 0x1d9   : > { %p12_p5 = scmp.ge.s32.totalorder %s15_s20, 4   ;;  %s984_s19 = smov %s986_s21 }
 0x1db   :  { %14 = sbr.rel (!%p12_p5) target bundleno = 2 (0x2), region = 76 }

// kernel: hifigan_forward.29
= control target key start
LH: loop header
LB: loop body
LE: loop exit
PB: predicated region body
PF: predicated region fallthrough
CT: control target
= control target key end

     0   :  { %s865_s18 = smov 0   ;;  %s867_s19 = smov 0   ;;  %s977_s0 = inlined_call_operand.vmem [shape: bf16[2,1,16,158], index: 0, kind: input, shape index: {}]   ;;  %s978_s1 = inlined_call_operand.vmem [shape: bf16[7,16,16], index: 1, kind: input, shape index: {}]   ;;  %s979_s2 = inlined_call_operand.vmem [shape: f32[16,1], index: 2, kind: input, shape index: {}]   ;;  %s980_s3 = inlined_call_operand.vmem [shape: bf16[16,16], index: 3, kind: input, shape index: {}]   ;;  %s981_s4 = inlined_call_operand.vmem [shape: f32[16,1], index: 4, kind: input, shape index: {}]   ;;  %s982_s5 = inlined_call_operand.vmem [shape: bf16[2,16,128], index: 5, kind: output, shape index: {}]  }
   0x1   :  { %s869_s20 = smov 0  }
   0x2 LB: > { %s27_s21 = sadd.s32 1, %s822_s19  ;;  %p686_p0 = scmp.ge.s32.totalorder %s826_s20, 1  ;;  %s826_s20 = sphi %s869_s20, %s15_s20   ;;  %s822_s19 = sphi %s867_s19, %s984_s19   ;;  %s818_s18 = sphi %s865_s18, %s983_s18  }
   0x3   : > { %p29_p1 = scmp.ge.s32.totalorder %s27_s21, 2  ;;  %p207_p2 = scmp.lt.s32.totalorder %s826_s20, 3 }
   0x5   : > { %s986_s21 = smov (%p29_p1, %s27_s21), 0  ;;  %p208_p3 = pnand %p686_p0, %p207_p2 }
   0x6   : > { %p242_p4 = scmp.lt.s32.totalorder (!%p208_p3), %s818_s18, 1  ;;  %s828_s26 = smov (!%p208_p3), 123  }
   0x7   : > { %211 = sbr.rel (%p208_p3) target bundleno = 472 (0x1d8), region = 40  ;;  %s829_s27 = smov (!%p208_p3), 118  }
   0x8   : > { %s830_s28 = smov (!%p208_p3), 113   ;;  %s831_s29 = smov (!%p208_p3), 98  }
   0x9   : > { %s832_s30 = smov (!%p208_p3), 108   ;;  %s833_s6 = smov (!%p208_p3), 103  }
   0xc   : > { %s988_s18 = smov (!%p242_p4, %s818_s18), 1  ;;  %v747_v22 = vld [vmem:[%s978_s1] sm:$0xff]  ;;  %vm305_vm4 = vcmask 130048   ;;  %vm392_vm5 = vcmask 924672   ;;  %v750_v26 = vld [vmem:[%s978_s1 + $0x18] sm:$0xff]  ;;  %v517_v27 = vld [vmem:[%s979_s2 + $0x8] sm:$0xff] }
   0xd   : > { %s745_s22 = sshll.u32 %s988_s18, 4  ;;  %v516_v28 = vld [vmem:[%s979_s2] sm:$0xff]  ;;  %v834_v29 = vmov 0   ;;  %v540_v32 = vld [vmem:[%s981_s4 + $0x8] sm:$0xff]  ;;  %vm302_vm6 = vcmask 1006592   ;;  %vm358_vm7 = vcmask 965632  }
   0xe   : > { %s250_s25 = scalar_lea.vmem %s977_s0, %s745_s22  ;;  %792 = vset.pattern.permute.xlu1 %v834_v29  ;;  %791 = vset.pattern.permute.xlu0 %v834_v29  ;;  %v748_v37 = vld [vmem:[%s978_s1 + $0x8] sm:$0xff]  ;;  %v749_v38 = vld [vmem:[%s978_s1 + $0x10] sm:$0xff]  ;;  %vm494_vm8 = vcmask 801792   ;;  %vm426_vm9 = vcmask 883712   ;;  %vm460_vm10 = vcmask 842752   ;;  %v751_v48 = vld [vmem:[%s978_s1 + $0x20] sm:$0xff] }
   0xf   : > { %v260_v0 = vld [vmem:[%s250_s25] sm:$0xff]  ;;  %v261_v1 = vld [vmem:[%s250_s25 + $0x8] sm:$0xff]  ;;  %793 = vset.pattern.permute.xlu2 %v834_v29  ;;  %v753_v50 = vld [vmem:[%s978_s1 + $0x30] sm:$0xff]  ;;  %s746_s10 = sshll.u32 %s988_s18, 3 }
  0x10   : > { %v889_v2 = vunpack.c.l.bf16 %v260_v0  ;;  %v891_v3 = vunpack.c.h.bf16 %v260_v0  ;;  %v893_v4 = vunpack.c.l.bf16 %v261_v1  ;;  %v895_v5 = vunpack.c.h.bf16 %v261_v1  ;;  %v752_v49 = vld [vmem:[%s978_s1 + $0x28] sm:$0xff]  ;;  %v539_v59 = vld [vmem:[%s981_s4] sm:$0xff]  ;;  %s258_s13 = scalar_lea.vmem %s982_s5, %s746_s10 }
  0x12   : > { %vm266_vm0 = vcmp.ge.f32.partialorder %v889_v2, 0.0  ;;  %vm267_vm1 = vcmp.ge.f32.partialorder %v891_v3, 0.0  ;;  %vm268_vm2 = vcmp.ge.f32.partialorder %v893_v4, 0.0  ;;  %vm269_vm3 = vcmp.ge.f32.partialorder %v895_v5, 0.0 }
  0x13   : > { %v270_v6 = vmul.f32 0.1, %v889_v2  ;;  %v271_v7 = vmul.f32 0.1, %v891_v3  ;;  %v272_v8 = vmul.f32 0.1, %v893_v4  ;;  %v799_v58 = vpack.i.bf16 %v895_v5, %v893_v4 }
  0x14   : > { %v273_v9 = vmul.f32 0.1, %v895_v5  ;;  %v794_v63 = vpack.i.bf16 %v891_v3, %v889_v2 }
  0x15   : > { %v274_v10 = vsel %vm266_vm0, %v889_v2, %v270_v6  ;;  %v275_v11 = vsel %vm267_vm1, %v891_v3, %v271_v7  ;;  %v276_v12 = vsel %vm268_vm2, %v893_v4, %v272_v8 }
  0x16   : > { %v277_v13 = vsel %vm269_vm3, %v895_v5, %v273_v9  ;;  %v278_v14 = vpack.c.bf16 %v275_v11, %v274_v10 }
  0x17   : > { %v279_v15 = vpack.c.bf16 %v277_v13, %v276_v12 }
  0x18   : > { %v292_v16 = vunpack.c.l.b16 %v278_v14  ;;  %v293_v19 = vunpack.c.h.b16 %v278_v14 }
  0x19   : > { %v294_v17 = vunpack.c.l.b16 %v279_v15  ;;  %v295_v20 = vunpack.c.h.b16 %v279_v15 }
  0x1b   : > { %v296_v18 = vpack.c.b16 %v294_v17, %v292_v16  ;;  %v297_v21 = vpack.c.b16 %v295_v20, %v293_v19 }
  0x1d   : > { %298 = vrot.lane.b32.xlu1 %v296_v18, %s828_s26  ;;  %354 = vrot.lane.b32.xlu0 %v296_v18, %s829_s27 }
  0x1e   : > { %388 = vrot.lane.b32.xlu2 %v296_v18, %s830_s28  ;;  %339 = vmatpush.bf16.msra.mxu1 %v296_v18 }
  0x21   : > { %702 = vmatmul.msk.bf16.vlgmr.msra.gmra.mxu1 %vm305_vm4, %v747_v22 }
  0x25   : > { %300 = vrot.lane.b32.xlu1 %v297_v21, %s828_s26  ;;  %356 = vrot.lane.b32.xlu0 %v297_v21, %s829_s27 }
  0x26   : > { %390 = vrot.lane.b32.xlu2 %v297_v21, %s830_s28 }
  0x2d   : > { %492 = vrot.lane.b32.xlu1 %v297_v21, %s831_s29  ;;  %490 = vrot.lane.b32.xlu0 %v296_v18, %s831_s29 }
  0x2e   : > { %422 = vrot.lane.b32.xlu2 %v296_v18, %s832_s30 }
  0x35   : > { %456 = vrot.lane.b32.xlu1 %v296_v18, %s833_s6  ;;  %424 = vrot.lane.b32.xlu0 %v297_v21, %s832_s30 }
  0x36   : > { %458 = vrot.lane.b32.xlu2 %v297_v21, %s833_s6 }
  0x3d   : > { %525 = vperm.xlu1 %792, %v517_v27   ;;  %520 = vperm.xlu0 %791, %v516_v28  }
  0x3e   : > { %543 = vperm.xlu2 %793, %v539_v59  }
  0x45   : > { %548 = vperm.xlu1 %792, %v540_v32   ;;  %800 = vrot.lane.b32.xlu0 %v799_v58, %s830_s28 }
  0x46   : > { %795 = vrot.lane.b32.xlu2 %v794_v63, %s830_s28 }
  0x78   : > { %v389_v23 = vpop.permute.xlu2 %388 }
  0x80   : > { %v391_v24 = vpop.permute.xlu2 %390 }
  0x81   : > { %v393_v25 = vsel %vm392_vm5, %v389_v23, %v391_v24 }
  0x82   : > { %405 = vmatpush.bf16.msra.mxu3 %v393_v25  ;;  %v754_v25 = vld [vmem:[%s980_s3] sm:$0xff] }
  0x85   : > { %716 = vmatmul.msk.bf16.vlgmr.msra.gmra.mxu3 %vm305_vm4, %v750_v26 }
  0x88   : > { %v423_v39 = vpop.permute.xlu2 %422 }
  0x8f   : > { %v299_v30 = vpop.permute.xlu1 %298  ;;  %v355_v31 = vpop.permute.xlu0 %354 }
  0x90   : > { %v459_v43 = vpop.permute.xlu2 %458 }
  0x97   : > { %v301_v33 = vpop.permute.xlu1 %300  ;;  %v357_v34 = vpop.permute.xlu0 %356 }
  0x98   : > { %v303_v35 = vsel %vm302_vm6, %v299_v30, %v301_v33  ;;  %v359_v36 = vsel %vm358_vm7, %v355_v31, %v357_v34  ;;  %v544_v26 = vpop.permute.xlu2 %543 }
  0x99   : > { %316 = vmatpush.bf16.msra.mxu0 %v303_v35  ;;  %371 = vmatpush.bf16.msra.mxu2 %v359_v36 }
  0x9c   : > { %697 = vmatmul.msk.bf16.vlgmr.msra.gmra.mxu0 %vm305_vm4, %v748_v37  ;;  %709 = vmatmul.msk.bf16.vlgmr.msra.gmra.mxu2 %vm305_vm4, %v749_v38 }
  0x9e   : > { %v341_v52 = vpop.f32.mrf.mxu1 }
  0x9f   : > { %v493_v40 = vpop.permute.xlu1 %492  ;;  %v491_v41 = vpop.permute.xlu0 %490 }
  0xa0   : > { %v495_v42 = vsel %vm494_vm8, %v491_v41, %v493_v40  ;;  %v796_v28 = vpop.permute.xlu2 %795 }
  0xa1   : > { %507 = vmatpush.bf16.msrb.mxu2 %v495_v42  ;;  %v798_v30 = vunpack.i.h.bf16 %v796_v28  ;;  %v797_v31 = vunpack.i.l.bf16 %v796_v28 }
  0xa3   : > { %v586_v36 = vsel %vm392_vm5, %v797_v31, %v798_v30 }
  0xa6   : > { %v343_v55 = vpop.f32.mrf.mxu1 }
  0xa7   : > { %v457_v44 = vpop.permute.xlu1 %456  ;;  %v425_v45 = vpop.permute.xlu0 %424 }
  0xa8   : > { %v427_v46 = vsel %vm426_vm9, %v423_v39, %v425_v45  ;;  %v461_v47 = vsel %vm460_vm10, %v457_v44, %v459_v43 }
  0xa9   : > { %439 = vmatpush.bf16.msrb.mxu0 %v427_v46  ;;  %473 = vmatpush.bf16.msrb.mxu1 %v461_v47 }
  0xac   : > { %723 = vmatmul.msk.bf16.vlgmr.msrb.gmra.mxu0 %vm305_vm4, %v751_v48  ;;  %730 = vmatmul.msk.bf16.vlgmr.msrb.gmra.mxu1 %vm305_vm4, %v752_v49 }
  0xad   : > { %737 = vmatmul.msk.bf16.vlgmr.msrb.gmra.mxu2 %vm305_vm4, %v753_v50 }
  0xaf   : > { %v521_v14 = vpop.permute.xlu0 %520  ;;  %v526_v3 = vpop.permute.xlu1 %525 }
  0xb7   : > { %v801_v29 = vpop.permute.xlu0 %800  ;;  %v549_v35 = vpop.permute.xlu1 %548 }
  0xb8   : > { %v803_v32 = vunpack.i.h.bf16 %v801_v29  ;;  %v802_v33 = vunpack.i.l.bf16 %v801_v29 }
  0xba   : > { %v587_v38 = vsel %vm392_vm5, %v802_v33, %v803_v32 }
 0x108   : > { %v407_v56 = vpop.f32.mrf.mxu3 }
 0x110   : > { %v409_v9 = vpop.f32.mrf.mxu3 }
 0x119   : > { %v318_v51 = vpop.f32.mrf.mxu0 }
 0x11a   : > { %v342_v57 = vadd.f32 %v341_v52, %v318_v51 }
 0x11f   : > { %v373_v53 = vpop.f32.mrf.mxu2 }
 0x120   : > { %v378_v60 = vadd.f32 %v373_v53, %v342_v57 }
 0x121   : > { %v320_v54 = vpop.f32.mrf.mxu0 }
 0x122   : > { %v344_v0 = vadd.f32 %v343_v55, %v320_v54  ;;  %v412_v1 = vadd.f32 %v407_v56, %v378_v60 }
 0x127   : > { %v375_v61 = vpop.f32.mrf.mxu2 }
 0x128   : > { %v379_v7 = vadd.f32 %v375_v61, %v344_v0 }
 0x129   : > { %v441_v62 = vpop.f32.mrf.mxu0  ;;  %v475_v6 = vpop.f32.mrf.mxu1 }
 0x12a   : > { %v446_v8 = vadd.f32 %v441_v62, %v412_v1  ;;  %v413_v5 = vadd.f32 %v409_v9, %v379_v7 }
 0x12c   : > { %v480_v10 = vadd.f32 %v475_v6, %v446_v8 }
 0x130   : > { %v509_v4 = vpop.f32.mrf.mxu2 }
 0x131   : > { %v443_v11 = vpop.f32.mrf.mxu0  ;;  %v514_v12 = vadd.f32 %v509_v4, %v480_v10  ;;  %v477_v15 = vpop.f32.mrf.mxu1 }
 0x132   : > { %v447_v13 = vadd.f32 %v443_v11, %v413_v5 }
 0x133   : > { %v528_v16 = vadd.f32 %v521_v14, %v514_v12 }
 0x134   : > { %v481_v17 = vadd.f32 %v477_v15, %v447_v13 }
 0x135   : > { %v532_v19 = vmul.f32 0.1, %v528_v16  ;;  %vm530_vm11 = vcmp.ge.f32.partialorder %v528_v16, 0.0 }
 0x137   : > { %v534_v22 = vsel %vm530_vm11, %v528_v16, %v532_v19 }
 0x138   : > { %v511_v18 = vpop.f32.mrf.mxu2 }
 0x139   : > { %v515_v2 = vadd.f32 %v511_v18, %v481_v17 }
 0x13b   : > { %v529_v20 = vadd.f32 %v526_v3, %v515_v2 }
 0x13d   : > { %vm531_vm12 = vcmp.ge.f32.partialorder %v529_v20, 0.0  ;;  %v533_v21 = vmul.f32 0.1, %v529_v20 }
 0x13f   : > { %v535_v23 = vsel %vm531_vm12, %v529_v20, %v533_v21 }
 0x140   : > { %v536_v24 = vpack.c.bf16 %v535_v23, %v534_v22 }
 0x142   : > { %566 = vmatpush.bf16.msrb.mxu3 %v536_v24 }
 0x145   : > { %742 = vmatmul.msk.bf16.vlgmr.msrb.gmra.mxu3 %vm305_vm4, %v754_v25 }
 0x1c8   : > { %v568_v27 = vpop.f32.mrf.mxu3 }
 0x1c9   : > { %v569_v34 = vadd.f32 %v568_v27, %v544_v26 }
 0x1cb   : > { %v590_v40 = vadd.f32 %v586_v36, %v569_v34 }
 0x1d0   : > { %v570_v37 = vpop.f32.mrf.mxu3 }
 0x1d1   : > { %v571_v39 = vadd.f32 %v570_v37, %v549_v35 }
 0x1d3   : > { %v591_v41 = vadd.f32 %v587_v38, %v571_v39 }
 0x1d5   : > { %v758_v42 = vpack.c.bf16 %v591_v41, %v590_v40 }
 0x1d7   : > { %759 = vst [vmem:[%s258_s13] sm:$0xff] %v758_v42  }
 0x1d8 PF: > { %s15_s20 = sadd.s32 1, %s826_s20   ;;  %s983_s18 = smov %s822_s19 }
 0x1d9   : > { %p12_p5 = scmp.ge.s32.totalorder %s15_s20, 4   ;;  %s984_s19 = smov %s986_s21 }
 0x1db   :  { %14 = sbr.rel (!%p12_p5) target bundleno = 2 (0x2), region = 76 }

// kernel: hifigan_forward.30
= control target key start
LH: loop header
LB: loop body
LE: loop exit
PB: predicated region body
PF: predicated region fallthrough
CT: control target
= control target key end

     0   :  { %s1041_s18 = smov 0   ;;  %s1043_s19 = smov 0   ;;  %s1169_s0 = inlined_call_operand.vmem [shape: bf16[2,1,16,138], index: 0, kind: input, shape index: {}]   ;;  %s1170_s1 = inlined_call_operand.vmem [shape: bf16[11,16,16], index: 1, kind: input, shape index: {}]   ;;  %s1171_s2 = inlined_call_operand.vmem [shape: f32[16,1], index: 2, kind: input, shape index: {}]   ;;  %s1172_s3 = inlined_call_operand.vmem [shape: bf16[16,16], index: 3, kind: input, shape index: {}]   ;;  %s1173_s4 = inlined_call_operand.vmem [shape: f32[16,1], index: 4, kind: input, shape index: {}]   ;;  %s1174_s5 = inlined_call_operand.vmem [shape: bf16[2,16,128], index: 5, kind: output, shape index: {}]  }
   0x1   :  { %s1045_s20 = smov 0  }
   0x2 LB: > { %s27_s21 = sadd.s32 1, %s994_s19  ;;  %p822_p0 = scmp.ge.s32.totalorder %s998_s20, 1  ;;  %s998_s20 = sphi %s1045_s20, %s15_s20   ;;  %s994_s19 = sphi %s1043_s19, %s1176_s19   ;;  %s990_s18 = sphi %s1041_s18, %s1175_s18  }
   0x3   : > { %p29_p1 = scmp.ge.s32.totalorder %s27_s21, 2  ;;  %p207_p2 = scmp.lt.s32.totalorder %s998_s20, 3 }
   0x5   : > { %s1178_s21 = smov (%p29_p1, %s27_s21), 0  ;;  %p208_p3 = pnand %p822_p0, %p207_p2 }
   0x6   : > { %p242_p4 = scmp.lt.s32.totalorder (!%p208_p3), %s990_s18, 1  ;;  %s1000_s26 = smov (!%p208_p3), 127  }
   0x7   : > { %211 = sbr.rel (%p208_p3) target bundleno = 491 (0x1eb), region = 40  ;;  %s1001_s27 = smov (!%p208_p3), 126  }
   0x8   : > { %s1002_s28 = smov (!%p208_p3), 125   ;;  %s1003_s29 = smov (!%p208_p3), 122  }
   0x9   : > { %s1004_s30 = smov (!%p208_p3), 124   ;;  %s1005_s6 = smov (!%p208_p3), 123  }
   0xa   : > { %s1006_s7 = smov (!%p208_p3), 121   ;;  %s1007_s8 = smov (!%p208_p3), 118  }
   0xb   : > { %s1008_s9 = smov (!%p208_p3), 120   ;;  %s1009_s10 = smov (!%p208_p3), 119  }
   0xc   : > { %s1180_s18 = smov (!%p242_p4, %s990_s18), 1  ;;  %vm305_vm4 = vcmask 130048   ;;  %v911_v23 = vld [vmem:[%s1170_s1] sm:$0xff]  ;;  %vm392_vm5 = vcmask 1022976   ;;  %v914_v26 = vld [vmem:[%s1170_s1 + $0x18] sm:$0xff]  ;;  %vm302_vm6 = vcmask 1039360  }
   0xd   : > { %s909_s22 = sshll.u32 %s1180_s18, 4  ;;  %vm358_vm7 = vcmask 1031168   ;;  %v912_v34 = vld [vmem:[%s1170_s1 + $0x8] sm:$0xff]  ;;  %v913_v35 = vld [vmem:[%s1170_s1 + $0x10] sm:$0xff]  ;;  %vm494_vm8 = vcmask 998400   ;;  %v652_v41 = vld [vmem:[%s1171_s2] sm:$0xff] }
   0xe   : > { %s250_s25 = scalar_lea.vmem %s1169_s0, %s909_s22  ;;  %v653_v40 = vld [vmem:[%s1171_s2 + $0x8] sm:$0xff]  ;;  %vm426_vm9 = vcmask 1014784   ;;  %vm460_vm10 = vcmask 1006592   ;;  %v1010_v42 = vmov 0   ;;  %v915_v47 = vld [vmem:[%s1170_s1 + $0x20] sm:$0xff]  ;;  %v917_v49 = vld [vmem:[%s1170_s1 + $0x30] sm:$0xff] }
   0xf   : > { %v260_v0 = vld [vmem:[%s250_s25] sm:$0xff]  ;;  %v261_v1 = vld [vmem:[%s250_s25 + $0x8] sm:$0xff]  ;;  %964 = vset.pattern.permute.xlu0 %v1010_v42  ;;  %963 = vset.pattern.permute.xlu2 %v1010_v42  ;;  %vm528_vm11 = vcmask 990208   ;;  %v918_v55 = vld [vmem:[%s1170_s1 + $0x38] sm:$0xff]  ;;  %vm562_vm12 = vcmask 982016   ;;  %vm630_vm13 = vcmask 965632  }
  0x10   : > { %v1065_v2 = vunpack.c.l.bf16 %v260_v0  ;;  %v1067_v3 = vunpack.c.h.bf16 %v260_v0  ;;  %v1069_v4 = vunpack.c.l.bf16 %v261_v1  ;;  %v1071_v5 = vunpack.c.h.bf16 %v261_v1  ;;  %965 = vset.pattern.permute.xlu1 %v1010_v42  ;;  %v916_v48 = vld [vmem:[%s1170_s1 + $0x28] sm:$0xff]  ;;  %v919_v61 = vld [vmem:[%s1170_s1 + $0x40] sm:$0xff]  ;;  %v921_v62 = vld [vmem:[%s1170_s1 + $0x50] sm:$0xff] }
  0x11   : > { %v676_v51 = vld [vmem:[%s1173_s4 + $0x8] sm:$0xff]  ;;  %vm596_vm14 = vcmask 973824  }
  0x12   : > { %vm266_vm0 = vcmp.ge.f32.partialorder %v1065_v2, 0.0  ;;  %vm267_vm1 = vcmp.ge.f32.partialorder %v1067_v3, 0.0  ;;  %vm268_vm2 = vcmp.ge.f32.partialorder %v1069_v4, 0.0  ;;  %vm269_vm3 = vcmp.ge.f32.partialorder %v1071_v5, 0.0 }
  0x13   : > { %v270_v6 = vmul.f32 0.1, %v1065_v2  ;;  %v271_v7 = vmul.f32 0.1, %v1067_v3  ;;  %v272_v8 = vmul.f32 0.1, %v1069_v4 }
  0x14   : > { %v273_v9 = vmul.f32 0.1, %v1071_v5 }
  0x15   : > { %v274_v10 = vsel %vm266_vm0, %v1065_v2, %v270_v6  ;;  %v275_v11 = vsel %vm267_vm1, %v1067_v3, %v271_v7  ;;  %v276_v12 = vsel %vm268_vm2, %v1069_v4, %v272_v8  ;;  %v920_v6 = vld [vmem:[%s1170_s1 + $0x48] sm:$0xff] }
  0x16   : > { %v277_v13 = vsel %vm269_vm3, %v1071_v5, %v273_v9  ;;  %v278_v14 = vpack.c.bf16 %v275_v11, %v274_v10 }
  0x17   : > { %v279_v15 = vpack.c.bf16 %v277_v13, %v276_v12 }
  0x18   : > { %v292_v16 = vunpack.c.l.b16 %v278_v14  ;;  %v293_v19 = vunpack.c.h.b16 %v278_v14 }
  0x19   : > { %v294_v17 = vunpack.c.l.b16 %v279_v15  ;;  %v295_v20 = vunpack.c.h.b16 %v279_v15 }
  0x1b   : > { %v296_v18 = vpack.c.b16 %v294_v17, %v292_v16  ;;  %v297_v21 = vpack.c.b16 %v295_v20, %v293_v19 }
  0x1d   : > { %298 = vrot.lane.b32.xlu1 %v296_v18, %s1000_s26  ;;  %354 = vrot.lane.b32.xlu0 %v296_v18, %s1001_s27 }
  0x1e   : > { %388 = vrot.lane.b32.xlu2 %v296_v18, %s1002_s28  ;;  %339 = vmatpush.bf16.msra.mxu1 %v296_v18 }
  0x21   : > { %838 = vmatmul.msk.bf16.vlgmr.msra.gmra.mxu1 %vm305_vm4, %v911_v23 }
  0x25   : > { %300 = vrot.lane.b32.xlu1 %v297_v21, %s1000_s26  ;;  %356 = vrot.lane.b32.xlu0 %v297_v21, %s1001_s27  ;;  %s910_s26 = sshll.u32 %s1180_s18, 3 }
  0x26   : > { %390 = vrot.lane.b32.xlu2 %v297_v21, %s1002_s28 }
  0x2d   : > { %492 = vrot.lane.b32.xlu1 %v297_v21, %s1003_s29  ;;  %490 = vrot.lane.b32.xlu0 %v296_v18, %s1003_s29  ;;  %s258_s29 = scalar_lea.vmem %s1174_s5, %s910_s26 }
  0x2e   : > { %422 = vrot.lane.b32.xlu2 %v296_v18, %s1004_s30 }
  0x35   : > { %456 = vrot.lane.b32.xlu1 %v296_v18, %s1005_s6  ;;  %424 = vrot.lane.b32.xlu0 %v297_v21, %s1004_s30 }
  0x36   : > { %458 = vrot.lane.b32.xlu2 %v297_v21, %s1005_s6 }
  0x3d   : > { %526 = vrot.lane.b32.xlu1 %v297_v21, %s1006_s7  ;;  %524 = vrot.lane.b32.xlu0 %v296_v18, %s1006_s7 }
  0x3e   : > { %626 = vrot.lane.b32.xlu2 %v296_v18, %s1007_s8 }
  0x45   : > { %558 = vrot.lane.b32.xlu1 %v296_v18, %s1008_s9  ;;  %628 = vrot.lane.b32.xlu0 %v297_v21, %s1007_s8 }
  0x46   : > { %560 = vrot.lane.b32.xlu2 %v297_v21, %s1008_s9 }
  0x4d   : > { %594 = vrot.lane.b32.xlu1 %v297_v21, %s1009_s10  ;;  %592 = vrot.lane.b32.xlu0 %v296_v18, %s1009_s10 }
  0x4e   : > { %656 = vperm.xlu2 %963, %v652_v41  }
  0x55   : > { %661 = vperm.xlu0 %964, %v653_v40  }
  0x56   : > { %684 = vperm.xlu2 %963, %v676_v51  }
  0x78   : > { %v389_v22 = vpop.permute.xlu2 %388 }
  0x80   : > { %v391_v24 = vpop.permute.xlu2 %390 }
  0x81   : > { %v393_v25 = vsel %vm392_vm5, %v389_v22, %v391_v24 }
  0x82   : > { %405 = vmatpush.bf16.msra.mxu3 %v393_v25 }
  0x85   : > { %852 = vmatmul.msk.bf16.vlgmr.msra.gmra.mxu3 %vm305_vm4, %v914_v26 }
  0x88   : > { %v423_v29 = vpop.permute.xlu2 %422 }
  0x8f   : > { %v299_v27 = vpop.permute.xlu1 %298  ;;  %v355_v28 = vpop.permute.xlu0 %354 }
  0x90   : > { %v459_v39 = vpop.permute.xlu2 %458 }
  0x97   : > { %v301_v30 = vpop.permute.xlu1 %300  ;;  %v357_v31 = vpop.permute.xlu0 %356 }
  0x98   : > { %v303_v32 = vsel %vm302_vm6, %v299_v27, %v301_v30  ;;  %v359_v33 = vsel %vm358_vm7, %v355_v28, %v357_v31  ;;  %v627_v50 = vpop.permute.xlu2 %626  ;;  %v675_v28 = vld [vmem:[%s1173_s4] sm:$0xff] }
  0x99   : > { %316 = vmatpush.bf16.msra.mxu0 %v303_v32  ;;  %371 = vmatpush.bf16.msra.mxu2 %v359_v33 }
  0x9a   : > { %679 = vperm.xlu1 %965, %v675_v28  }
  0x9c   : > { %833 = vmatmul.msk.bf16.vlgmr.msra.gmra.mxu0 %vm305_vm4, %v912_v34  ;;  %845 = vmatmul.msk.bf16.vlgmr.msra.gmra.mxu2 %vm305_vm4, %v913_v35 }
  0x9e   : > { %v341_v8 = vpop.f32.mrf.mxu1 }
  0x9f   : > { %v493_v36 = vpop.permute.xlu1 %492  ;;  %v491_v37 = vpop.permute.xlu0 %490 }
  0xa0   : > { %v495_v38 = vsel %vm494_vm8, %v491_v37, %v493_v36  ;;  %v561_v56 = vpop.permute.xlu2 %560  ;;  %v966_v36 = vpack.i.bf16 %v1067_v3, %v1065_v2 }
  0xa1   : > { %507 = vmatpush.bf16.msrb.mxu2 %v495_v38 }
  0xa2   : > { %967 = vrot.lane.b32.xlu1 %v966_v36, %s1005_s6 }
  0xa6   : > { %v343_v11 = vpop.f32.mrf.mxu1 }
  0xa7   : > { %v457_v43 = vpop.permute.xlu1 %456  ;;  %v425_v44 = vpop.permute.xlu0 %424 }
  0xa8   : > { %v427_v45 = vsel %vm426_vm9, %v423_v29, %v425_v44  ;;  %v461_v46 = vsel %vm460_vm10, %v457_v43, %v459_v39  ;;  %v971_v29 = vpack.i.bf16 %v1071_v5, %v1069_v4 }
  0xa9   : > { %439 = vmatpush.bf16.msrb.mxu0 %v427_v45  ;;  %473 = vmatpush.bf16.msrb.mxu1 %v461_v46  ;;  %v657_v45 = vpop.permute.xlu2 %656 }
  0xaa   : > { %972 = vrot.lane.b32.xlu2 %v971_v29, %s1005_s6 }
  0xac   : > { %859 = vmatmul.msk.bf16.vlgmr.msrb.gmra.mxu0 %vm305_vm4, %v915_v47  ;;  %866 = vmatmul.msk.bf16.vlgmr.msrb.gmra.mxu1 %vm305_vm4, %v916_v48 }
  0xad   : > { %873 = vmatmul.msk.bf16.vlgmr.msrb.gmra.mxu2 %vm305_vm4, %v917_v49 }
  0xaf   : > { %v527_v52 = vpop.permute.xlu1 %526  ;;  %v525_v53 = vpop.permute.xlu0 %524 }
  0xb0   : > { %v529_v54 = vsel %vm528_vm11, %v525_v53, %v527_v52 }
  0xb1   : > { %541 = vmatpush.bf16.msrb.mxu3 %v529_v54 }
  0xb4   : > { %880 = vmatmul.msk.bf16.vlgmr.msrb.gmra.mxu3 %vm305_vm4, %v918_v55 }
  0xb7   : > { %v559_v57 = vpop.permute.xlu1 %558  ;;  %v629_v58 = vpop.permute.xlu0 %628 }
  0xb8   : > { %v563_v59 = vsel %vm562_vm12, %v559_v57, %v561_v56  ;;  %v631_v60 = vsel %vm630_vm13, %v627_v50, %v629_v58  ;;  %v922_v57 = vld [vmem:[%s1172_s3] sm:$0xff] }
  0xb9   : > { %575 = vmatpush.bf16.msra.mxu0 %v563_v59  ;;  %643 = vmatpush.bf16.msra.mxu2 %v631_v60  ;;  %v685_v59 = vpop.permute.xlu2 %684 }
  0xbc   : > { %887 = vmatmul.msk.bf16.vlgmr.msra.gmra.mxu0 %vm305_vm4, %v919_v61 }
  0xbd   : > { %901 = vmatmul.msk.bf16.vlgmr.msra.gmra.mxu2 %vm305_vm4, %v921_v62 }
  0xbf   : > { %v595_v63 = vpop.permute.xlu1 %594  ;;  %v593_v0 = vpop.permute.xlu0 %592 }
  0xc0   : > { %v597_v1 = vsel %vm596_vm14, %v593_v0, %v595_v63 }
  0xc1   : > { %609 = vmatpush.bf16.msra.mxu1 %v597_v1 }
  0xc4   : > { %894 = vmatmul.msk.bf16.vlgmr.msra.gmra.mxu1 %vm305_vm4, %v920_v6 }
  0xc7   : > { %v662_v51 = vpop.permute.xlu0 %661 }
 0x104   : > { %v973_v61 = vpop.permute.xlu2 %972 }
 0x105   : > { %v975_v63 = vunpack.i.h.bf16 %v973_v61  ;;  %v974_v0 = vunpack.i.l.bf16 %v973_v61 }
 0x108   : > { %v407_v12 = vpop.f32.mrf.mxu3 }
 0x10c   : > { %v680_v58 = vpop.permute.xlu1 %679 }
 0x110   : > { %v409_v17 = vpop.f32.mrf.mxu3 }
 0x114   : > { %v968_v62 = vpop.permute.xlu1 %967 }
 0x115   : > { %v970_v1 = vunpack.i.h.bf16 %v968_v62  ;;  %v969_v6 = vunpack.i.l.bf16 %v968_v62 }
 0x119   : > { %v318_v7 = vpop.f32.mrf.mxu0 }
 0x11a   : > { %v342_v15 = vadd.f32 %v341_v8, %v318_v7  ;;  %v722_v8 = vsel %vm460_vm10, %v969_v6, %v970_v1 }
 0x11f   : > { %v373_v9 = vpop.f32.mrf.mxu2 }
 0x120   : > { %v378_v16 = vadd.f32 %v373_v9, %v342_v15 }
 0x121   : > { %v320_v10 = vpop.f32.mrf.mxu0 }
 0x122   : > { %v412_v21 = vadd.f32 %v407_v12, %v378_v16  ;;  %v344_v22 = vadd.f32 %v343_v11, %v320_v10  ;;  %v723_v10 = vsel %vm460_vm10, %v974_v0, %v975_v63 }
 0x127   : > { %v375_v13 = vpop.f32.mrf.mxu2 }
 0x128   : > { %v379_v24 = vadd.f32 %v375_v13, %v344_v22 }
 0x129   : > { %v441_v14 = vpop.f32.mrf.mxu0  ;;  %v475_v18 = vpop.f32.mrf.mxu1 }
 0x12a   : > { %v446_v23 = vadd.f32 %v441_v14, %v412_v21  ;;  %v413_v31 = vadd.f32 %v409_v17, %v379_v24 }
 0x12c   : > { %v480_v26 = vadd.f32 %v475_v18, %v446_v23 }
 0x130   : > { %v509_v19 = vpop.f32.mrf.mxu2 }
 0x131   : > { %v443_v20 = vpop.f32.mrf.mxu0  ;;  %v477_v30 = vpop.f32.mrf.mxu1  ;;  %v514_v32 = vadd.f32 %v509_v19, %v480_v26 }
 0x132   : > { %v447_v34 = vadd.f32 %v443_v20, %v413_v31 }
 0x134   : > { %v481_v37 = vadd.f32 %v477_v30, %v447_v34 }
 0x137   : > { %v543_v25 = vpop.f32.mrf.mxu3 }
 0x138   : > { %v511_v27 = vpop.f32.mrf.mxu2  ;;  %v548_v35 = vadd.f32 %v543_v25, %v514_v32 }
 0x139   : > { %v577_v33 = vpop.f32.mrf.mxu0  ;;  %v515_v4 = vadd.f32 %v511_v27, %v481_v37 }
 0x13a   : > { %v582_v38 = vadd.f32 %v577_v33, %v548_v35 }
 0x13f   : > { %v545_v39 = vpop.f32.mrf.mxu3 }
 0x140   : > { %v645_v40 = vpop.f32.mrf.mxu2  ;;  %v549_v42 = vadd.f32 %v545_v39, %v515_v4 }
 0x141   : > { %v611_v41 = vpop.f32.mrf.mxu1  ;;  %v579_v43 = vpop.f32.mrf.mxu0 }
 0x142   : > { %v616_v5 = vadd.f32 %v611_v41, %v582_v38  ;;  %v583_v46 = vadd.f32 %v579_v43, %v549_v42 }
 0x144   : > { %v650_v44 = vadd.f32 %v645_v40, %v616_v5 }
 0x146   : > { %v664_v48 = vadd.f32 %v657_v45, %v650_v44 }
 0x148   : > { %v647_v50 = vpop.f32.mrf.mxu2  ;;  %v668_v3 = vmul.f32 0.1, %v664_v48  ;;  %vm666_vm15 = vcmp.ge.f32.partialorder %v664_v48, 0.0 }
 0x149   : > { %v613_v47 = vpop.f32.mrf.mxu1 }
 0x14a   : > { %v617_v49 = vadd.f32 %v613_v47, %v583_v46  ;;  %v670_v54 = vsel %vm666_vm15, %v664_v48, %v668_v3 }
 0x14c   : > { %v651_v2 = vadd.f32 %v647_v50, %v617_v49 }
 0x14e   : > { %v665_v52 = vadd.f32 %v662_v51, %v651_v2 }
 0x150   : > { %vm667_vm0 = vcmp.ge.f32.partialorder %v665_v52, 0.0  ;;  %v669_v53 = vmul.f32 0.1, %v665_v52 }
 0x152   : > { %v671_v55 = vsel %vm667_vm0, %v665_v52, %v669_v53 }
 0x153   : > { %v672_v56 = vpack.c.bf16 %v671_v55, %v670_v54 }
 0x155   : > { %702 = vmatpush.bf16.msra.mxu3 %v672_v56 }
 0x158   : > { %906 = vmatmul.msk.bf16.vlgmr.msra.gmra.mxu3 %vm305_vm4, %v922_v57 }
 0x1db   : > { %v704_v60 = vpop.f32.mrf.mxu3 }
 0x1dc   : > { %v705_v7 = vadd.f32 %v704_v60, %v680_v58 }
 0x1de   : > { %v726_v12 = vadd.f32 %v722_v8, %v705_v7 }
 0x1e3   : > { %v706_v9 = vpop.f32.mrf.mxu3 }
 0x1e4   : > { %v707_v11 = vadd.f32 %v706_v9, %v685_v59 }
 0x1e6   : > { %v727_v13 = vadd.f32 %v723_v10, %v707_v11 }
 0x1e8   : > { %v926_v14 = vpack.c.bf16 %v727_v13, %v726_v12 }
 0x1ea   : > { %927 = vst [vmem:[%s258_s29] sm:$0xff] %v926_v14  }
 0x1eb PF: > { %s15_s20 = sadd.s32 1, %s998_s20   ;;  %s1175_s18 = smov %s994_s19 }
 0x1ec   : > { %p12_p5 = scmp.ge.s32.totalorder %s15_s20, 4   ;;  %s1176_s19 = smov %s1178_s21 }
 0x1ee   :  { %14 = sbr.rel (!%p12_p5) target bundleno = 2 (0x2), region = 80 }

// kernel: hifigan_forward.31
= control target key start
LH: loop header
LB: loop body
LE: loop exit
PB: predicated region body
PF: predicated region fallthrough
CT: control target
= control target key end

     0   :  { %s1041_s18 = smov 0   ;;  %s1043_s19 = smov 0   ;;  %s1169_s0 = inlined_call_operand.vmem [shape: bf16[2,1,16,158], index: 0, kind: input, shape index: {}]   ;;  %s1170_s1 = inlined_call_operand.vmem [shape: bf16[11,16,16], index: 1, kind: input, shape index: {}]   ;;  %s1171_s2 = inlined_call_operand.vmem [shape: f32[16,1], index: 2, kind: input, shape index: {}]   ;;  %s1172_s3 = inlined_call_operand.vmem [shape: bf16[16,16], index: 3, kind: input, shape index: {}]   ;;  %s1173_s4 = inlined_call_operand.vmem [shape: f32[16,1], index: 4, kind: input, shape index: {}]   ;;  %s1174_s5 = inlined_call_operand.vmem [shape: bf16[2,16,128], index: 5, kind: output, shape index: {}]  }
   0x1   :  { %s1045_s20 = smov 0  }
   0x2 LB: > { %s27_s21 = sadd.s32 1, %s994_s19  ;;  %p822_p0 = scmp.ge.s32.totalorder %s998_s20, 1  ;;  %s998_s20 = sphi %s1045_s20, %s15_s20   ;;  %s994_s19 = sphi %s1043_s19, %s1176_s19   ;;  %s990_s18 = sphi %s1041_s18, %s1175_s18  }
   0x3   : > { %p29_p1 = scmp.ge.s32.totalorder %s27_s21, 2  ;;  %p207_p2 = scmp.lt.s32.totalorder %s998_s20, 3 }
   0x5   : > { %s1178_s21 = smov (%p29_p1, %s27_s21), 0  ;;  %p208_p3 = pnand %p822_p0, %p207_p2 }
   0x6   : > { %p242_p4 = scmp.lt.s32.totalorder (!%p208_p3), %s990_s18, 1  ;;  %s1000_s26 = smov (!%p208_p3), 125  }
   0x7   : > { %211 = sbr.rel (%p208_p3) target bundleno = 491 (0x1eb), region = 40  ;;  %s1001_s27 = smov (!%p208_p3), 122  }
   0x8   : > { %s1002_s28 = smov (!%p208_p3), 119   ;;  %s1003_s29 = smov (!%p208_p3), 110  }
   0x9   : > { %s1004_s30 = smov (!%p208_p3), 116   ;;  %s1005_s6 = smov (!%p208_p3), 113  }
   0xa   : > { %s1006_s7 = smov (!%p208_p3), 107   ;;  %s1007_s8 = smov (!%p208_p3), 98  }
   0xb   : > { %s1008_s9 = smov (!%p208_p3), 104   ;;  %s1009_s10 = smov (!%p208_p3), 101  }
   0xc   : > { %s1180_s18 = smov (!%p242_p4, %s990_s18), 1  ;;  %vm305_vm4 = vcmask 130048   ;;  %v911_v23 = vld [vmem:[%s1170_s1] sm:$0xff]  ;;  %vm392_vm5 = vcmask 973824   ;;  %v914_v26 = vld [vmem:[%s1170_s1 + $0x18] sm:$0xff]  ;;  %vm302_vm6 = vcmask 1022976  }
   0xd   : > { %s909_s22 = sshll.u32 %s1180_s18, 4  ;;  %vm358_vm7 = vcmask 998400   ;;  %v912_v34 = vld [vmem:[%s1170_s1 + $0x8] sm:$0xff]  ;;  %v913_v35 = vld [vmem:[%s1170_s1 + $0x10] sm:$0xff]  ;;  %vm494_vm8 = vcmask 900096   ;;  %v652_v41 = vld [vmem:[%s1171_s2] sm:$0xff] }
   0xe   : > { %s250_s25 = scalar_lea.vmem %s1169_s0, %s909_s22  ;;  %v653_v40 = vld [vmem:[%s1171_s2 + $0x8] sm:$0xff]  ;;  %vm426_vm9 = vcmask 949248   ;;  %vm460_vm10 = vcmask 924672   ;;  %v1010_v42 = vmov 0   ;;  %v915_v47 = vld [vmem:[%s1170_s1 + $0x20] sm:$0xff]  ;;  %v917_v49 = vld [vmem:[%s1170_s1 + $0x30] sm:$0xff] }
   0xf   : > { %v260_v0 = vld [vmem:[%s250_s25] sm:$0xff]  ;;  %v261_v1 = vld [vmem:[%s250_s25 + $0x8] sm:$0xff]  ;;  %964 = vset.pattern.permute.xlu0 %v1010_v42  ;;  %963 = vset.pattern.permute.xlu2 %v1010_v42  ;;  %vm528_vm11 = vcmask 875520   ;;  %v918_v55 = vld [vmem:[%s1170_s1 + $0x38] sm:$0xff]  ;;  %vm562_vm12 = vcmask 850944   ;;  %vm630_vm13 = vcmask 801792  }
  0x10   : > { %v1065_v2 = vunpack.c.l.bf16 %v260_v0  ;;  %v1067_v3 = vunpack.c.h.bf16 %v260_v0  ;;  %v1069_v4 = vunpack.c.l.bf16 %v261_v1  ;;  %v1071_v5 = vunpack.c.h.bf16 %v261_v1  ;;  %965 = vset.pattern.permute.xlu1 %v1010_v42  ;;  %v916_v48 = vld [vmem:[%s1170_s1 + $0x28] sm:$0xff]  ;;  %v919_v61 = vld [vmem:[%s1170_s1 + $0x40] sm:$0xff]  ;;  %v921_v62 = vld [vmem:[%s1170_s1 + $0x50] sm:$0xff] }
  0x11   : > { %v676_v51 = vld [vmem:[%s1173_s4 + $0x8] sm:$0xff]  ;;  %vm596_vm14 = vcmask 826368  }
  0x12   : > { %vm266_vm0 = vcmp.ge.f32.partialorder %v1065_v2, 0.0  ;;  %vm267_vm1 = vcmp.ge.f32.partialorder %v1067_v3, 0.0  ;;  %vm268_vm2 = vcmp.ge.f32.partialorder %v1069_v4, 0.0  ;;  %vm269_vm3 = vcmp.ge.f32.partialorder %v1071_v5, 0.0 }
  0x13   : > { %v270_v6 = vmul.f32 0.1, %v1065_v2  ;;  %v271_v7 = vmul.f32 0.1, %v1067_v3  ;;  %v272_v8 = vmul.f32 0.1, %v1069_v4 }
  0x14   : > { %v273_v9 = vmul.f32 0.1, %v1071_v5 }
  0x15   : > { %v274_v10 = vsel %vm266_vm0, %v1065_v2, %v270_v6  ;;  %v275_v11 = vsel %vm267_vm1, %v1067_v3, %v271_v7  ;;  %v276_v12 = vsel %vm268_vm2, %v1069_v4, %v272_v8  ;;  %v920_v6 = vld [vmem:[%s1170_s1 + $0x48] sm:$0xff] }
  0x16   : > { %v277_v13 = vsel %vm269_vm3, %v1071_v5, %v273_v9  ;;  %v278_v14 = vpack.c.bf16 %v275_v11, %v274_v10 }
  0x17   : > { %v279_v15 = vpack.c.bf16 %v277_v13, %v276_v12 }
  0x18   : > { %v292_v16 = vunpack.c.l.b16 %v278_v14  ;;  %v293_v19 = vunpack.c.h.b16 %v278_v14 }
  0x19   : > { %v294_v17 = vunpack.c.l.b16 %v279_v15  ;;  %v295_v20 = vunpack.c.h.b16 %v279_v15 }
  0x1b   : > { %v296_v18 = vpack.c.b16 %v294_v17, %v292_v16  ;;  %v297_v21 = vpack.c.b16 %v295_v20, %v293_v19 }
  0x1d   : > { %298 = vrot.lane.b32.xlu1 %v296_v18, %s1000_s26  ;;  %354 = vrot.lane.b32.xlu0 %v296_v18, %s1001_s27 }
  0x1e   : > { %388 = vrot.lane.b32.xlu2 %v296_v18, %s1002_s28  ;;  %339 = vmatpush.bf16.msra.mxu1 %v296_v18 }
  0x21   : > { %838 = vmatmul.msk.bf16.vlgmr.msra.gmra.mxu1 %vm305_vm4, %v911_v23 }
  0x25   : > { %300 = vrot.lane.b32.xlu1 %v297_v21, %s1000_s26  ;;  %356 = vrot.lane.b32.xlu0 %v297_v21, %s1001_s27  ;;  %s910_s26 = sshll.u32 %s1180_s18, 3 }
  0x26   : > { %390 = vrot.lane.b32.xlu2 %v297_v21, %s1002_s28 }
  0x2d   : > { %492 = vrot.lane.b32.xlu1 %v297_v21, %s1003_s29  ;;  %490 = vrot.lane.b32.xlu0 %v296_v18, %s1003_s29  ;;  %s258_s29 = scalar_lea.vmem %s1174_s5, %s910_s26 }
  0x2e   : > { %422 = vrot.lane.b32.xlu2 %v296_v18, %s1004_s30 }
  0x35   : > { %456 = vrot.lane.b32.xlu1 %v296_v18, %s1005_s6  ;;  %424 = vrot.lane.b32.xlu0 %v297_v21, %s1004_s30 }
  0x36   : > { %458 = vrot.lane.b32.xlu2 %v297_v21, %s1005_s6 }
  0x3d   : > { %526 = vrot.lane.b32.xlu1 %v297_v21, %s1006_s7  ;;  %524 = vrot.lane.b32.xlu0 %v296_v18, %s1006_s7 }
  0x3e   : > { %626 = vrot.lane.b32.xlu2 %v296_v18, %s1007_s8 }
  0x45   : > { %558 = vrot.lane.b32.xlu1 %v296_v18, %s1008_s9  ;;  %628 = vrot.lane.b32.xlu0 %v297_v21, %s1007_s8 }
  0x46   : > { %560 = vrot.lane.b32.xlu2 %v297_v21, %s1008_s9 }
  0x4d   : > { %594 = vrot.lane.b32.xlu1 %v297_v21, %s1009_s10  ;;  %592 = vrot.lane.b32.xlu0 %v296_v18, %s1009_s10 }
  0x4e   : > { %656 = vperm.xlu2 %963, %v652_v41  }
  0x55   : > { %661 = vperm.xlu0 %964, %v653_v40  }
  0x56   : > { %684 = vperm.xlu2 %963, %v676_v51  }
  0x78   : > { %v389_v22 = vpop.permute.xlu2 %388 }
  0x80   : > { %v391_v24 = vpop.permute.xlu2 %390 }
  0x81   : > { %v393_v25 = vsel %vm392_vm5, %v389_v22, %v391_v24 }
  0x82   : > { %405 = vmatpush.bf16.msra.mxu3 %v393_v25 }
  0x85   : > { %852 = vmatmul.msk.bf16.vlgmr.msra.gmra.mxu3 %vm305_vm4, %v914_v26 }
  0x88   : > { %v423_v29 = vpop.permute.xlu2 %422 }
  0x8f   : > { %v299_v27 = vpop.permute.xlu1 %298  ;;  %v355_v28 = vpop.permute.xlu0 %354 }
  0x90   : > { %v459_v39 = vpop.permute.xlu2 %458 }
  0x97   : > { %v301_v30 = vpop.permute.xlu1 %300  ;;  %v357_v31 = vpop.permute.xlu0 %356 }
  0x98   : > { %v303_v32 = vsel %vm302_vm6, %v299_v27, %v301_v30  ;;  %v359_v33 = vsel %vm358_vm7, %v355_v28, %v357_v31  ;;  %v627_v50 = vpop.permute.xlu2 %626  ;;  %v675_v28 = vld [vmem:[%s1173_s4] sm:$0xff] }
  0x99   : > { %316 = vmatpush.bf16.msra.mxu0 %v303_v32  ;;  %371 = vmatpush.bf16.msra.mxu2 %v359_v33 }
  0x9a   : > { %679 = vperm.xlu1 %965, %v675_v28  }
  0x9c   : > { %833 = vmatmul.msk.bf16.vlgmr.msra.gmra.mxu0 %vm305_vm4, %v912_v34  ;;  %845 = vmatmul.msk.bf16.vlgmr.msra.gmra.mxu2 %vm305_vm4, %v913_v35 }
  0x9e   : > { %v341_v8 = vpop.f32.mrf.mxu1 }
  0x9f   : > { %v493_v36 = vpop.permute.xlu1 %492  ;;  %v491_v37 = vpop.permute.xlu0 %490 }
  0xa0   : > { %v495_v38 = vsel %vm494_vm8, %v491_v37, %v493_v36  ;;  %v561_v56 = vpop.permute.xlu2 %560  ;;  %v966_v36 = vpack.i.bf16 %v1067_v3, %v1065_v2 }
  0xa1   : > { %507 = vmatpush.bf16.msrb.mxu2 %v495_v38 }
  0xa2   : > { %967 = vrot.lane.b32.xlu1 %v966_v36, %s1005_s6 }
  0xa6   : > { %v343_v11 = vpop.f32.mrf.mxu1 }
  0xa7   : > { %v457_v43 = vpop.permute.xlu1 %456  ;;  %v425_v44 = vpop.permute.xlu0 %424 }
  0xa8   : > { %v427_v45 = vsel %vm426_vm9, %v423_v29, %v425_v44  ;;  %v461_v46 = vsel %vm460_vm10, %v457_v43, %v459_v39  ;;  %v971_v29 = vpack.i.bf16 %v1071_v5, %v1069_v4 }
  0xa9   : > { %439 = vmatpush.bf16.msrb.mxu0 %v427_v45  ;;  %473 = vmatpush.bf16.msrb.mxu1 %v461_v46  ;;  %v657_v45 = vpop.permute.xlu2 %656 }
  0xaa   : > { %972 = vrot.lane.b32.xlu2 %v971_v29, %s1005_s6 }
  0xac   : > { %859 = vmatmul.msk.bf16.vlgmr.msrb.gmra.mxu0 %vm305_vm4, %v915_v47  ;;  %866 = vmatmul.msk.bf16.vlgmr.msrb.gmra.mxu1 %vm305_vm4, %v916_v48 }
  0xad   : > { %873 = vmatmul.msk.bf16.vlgmr.msrb.gmra.mxu2 %vm305_vm4, %v917_v49 }
  0xaf   : > { %v527_v52 = vpop.permute.xlu1 %526  ;;  %v525_v53 = vpop.permute.xlu0 %524 }
  0xb0   : > { %v529_v54 = vsel %vm528_vm11, %v525_v53, %v527_v52 }
  0xb1   : > { %541 = vmatpush.bf16.msrb.mxu3 %v529_v54 }
  0xb4   : > { %880 = vmatmul.msk.bf16.vlgmr.msrb.gmra.mxu3 %vm305_vm4, %v918_v55 }
  0xb7   : > { %v559_v57 = vpop.permute.xlu1 %558  ;;  %v629_v58 = vpop.permute.xlu0 %628 }
  0xb8   : > { %v563_v59 = vsel %vm562_vm12, %v559_v57, %v561_v56  ;;  %v631_v60 = vsel %vm630_vm13, %v627_v50, %v629_v58  ;;  %v922_v57 = vld [vmem:[%s1172_s3] sm:$0xff] }
  0xb9   : > { %575 = vmatpush.bf16.msra.mxu0 %v563_v59  ;;  %643 = vmatpush.bf16.msra.mxu2 %v631_v60  ;;  %v685_v59 = vpop.permute.xlu2 %684 }
  0xbc   : > { %887 = vmatmul.msk.bf16.vlgmr.msra.gmra.mxu0 %vm305_vm4, %v919_v61 }
  0xbd   : > { %901 = vmatmul.msk.bf16.vlgmr.msra.gmra.mxu2 %vm305_vm4, %v921_v62 }
  0xbf   : > { %v595_v63 = vpop.permute.xlu1 %594  ;;  %v593_v0 = vpop.permute.xlu0 %592 }
  0xc0   : > { %v597_v1 = vsel %vm596_vm14, %v593_v0, %v595_v63 }
  0xc1   : > { %609 = vmatpush.bf16.msra.mxu1 %v597_v1 }
  0xc4   : > { %894 = vmatmul.msk.bf16.vlgmr.msra.gmra.mxu1 %vm305_vm4, %v920_v6 }
  0xc7   : > { %v662_v51 = vpop.permute.xlu0 %661 }
 0x104   : > { %v973_v61 = vpop.permute.xlu2 %972 }
 0x105   : > { %v975_v63 = vunpack.i.h.bf16 %v973_v61  ;;  %v974_v0 = vunpack.i.l.bf16 %v973_v61 }
 0x108   : > { %v407_v12 = vpop.f32.mrf.mxu3 }
 0x10c   : > { %v680_v58 = vpop.permute.xlu1 %679 }
 0x110   : > { %v409_v17 = vpop.f32.mrf.mxu3 }
 0x114   : > { %v968_v62 = vpop.permute.xlu1 %967 }
 0x115   : > { %v970_v1 = vunpack.i.h.bf16 %v968_v62  ;;  %v969_v6 = vunpack.i.l.bf16 %v968_v62 }
 0x119   : > { %v318_v7 = vpop.f32.mrf.mxu0 }
 0x11a   : > { %v342_v15 = vadd.f32 %v341_v8, %v318_v7  ;;  %v722_v8 = vsel %vm460_vm10, %v969_v6, %v970_v1 }
 0x11f   : > { %v373_v9 = vpop.f32.mrf.mxu2 }
 0x120   : > { %v378_v16 = vadd.f32 %v373_v9, %v342_v15 }
 0x121   : > { %v320_v10 = vpop.f32.mrf.mxu0 }
 0x122   : > { %v412_v21 = vadd.f32 %v407_v12, %v378_v16  ;;  %v344_v22 = vadd.f32 %v343_v11, %v320_v10  ;;  %v723_v10 = vsel %vm460_vm10, %v974_v0, %v975_v63 }
 0x127   : > { %v375_v13 = vpop.f32.mrf.mxu2 }
 0x128   : > { %v379_v24 = vadd.f32 %v375_v13, %v344_v22 }
 0x129   : > { %v441_v14 = vpop.f32.mrf.mxu0  ;;  %v475_v18 = vpop.f32.mrf.mxu1 }
 0x12a   : > { %v446_v23 = vadd.f32 %v441_v14, %v412_v21  ;;  %v413_v31 = vadd.f32 %v409_v17, %v379_v24 }
 0x12c   : > { %v480_v26 = vadd.f32 %v475_v18, %v446_v23 }
 0x130   : > { %v509_v19 = vpop.f32.mrf.mxu2 }
 0x131   : > { %v443_v20 = vpop.f32.mrf.mxu0  ;;  %v477_v30 = vpop.f32.mrf.mxu1  ;;  %v514_v32 = vadd.f32 %v509_v19, %v480_v26 }
 0x132   : > { %v447_v34 = vadd.f32 %v443_v20, %v413_v31 }
 0x134   : > { %v481_v37 = vadd.f32 %v477_v30, %v447_v34 }
 0x137   : > { %v543_v25 = vpop.f32.mrf.mxu3 }
 0x138   : > { %v511_v27 = vpop.f32.mrf.mxu2  ;;  %v548_v35 = vadd.f32 %v543_v25, %v514_v32 }
 0x139   : > { %v577_v33 = vpop.f32.mrf.mxu0  ;;  %v515_v4 = vadd.f32 %v511_v27, %v481_v37 }
 0x13a   : > { %v582_v38 = vadd.f32 %v577_v33, %v548_v35 }
 0x13f   : > { %v545_v39 = vpop.f32.mrf.mxu3 }
 0x140   : > { %v645_v40 = vpop.f32.mrf.mxu2  ;;  %v549_v42 = vadd.f32 %v545_v39, %v515_v4 }
 0x141   : > { %v611_v41 = vpop.f32.mrf.mxu1  ;;  %v579_v43 = vpop.f32.mrf.mxu0 }
 0x142   : > { %v616_v5 = vadd.f32 %v611_v41, %v582_v38  ;;  %v583_v46 = vadd.f32 %v579_v43, %v549_v42 }
 0x144   : > { %v650_v44 = vadd.f32 %v645_v40, %v616_v5 }
 0x146   : > { %v664_v48 = vadd.f32 %v657_v45, %v650_v44 }
 0x148   : > { %v647_v50 = vpop.f32.mrf.mxu2  ;;  %v668_v3 = vmul.f32 0.1, %v664_v48  ;;  %vm666_vm15 = vcmp.ge.f32.partialorder %v664_v48, 0.0 }
 0x149   : > { %v613_v47 = vpop.f32.mrf.mxu1 }
 0x14a   : > { %v617_v49 = vadd.f32 %v613_v47, %v583_v46  ;;  %v670_v54 = vsel %vm666_vm15, %v664_v48, %v668_v3 }
 0x14c   : > { %v651_v2 = vadd.f32 %v647_v50, %v617_v49 }
 0x14e   : > { %v665_v52 = vadd.f32 %v662_v51, %v651_v2 }
 0x150   : > { %vm667_vm0 = vcmp.ge.f32.partialorder %v665_v52, 0.0  ;;  %v669_v53 = vmul.f32 0.1, %v665_v52 }
 0x152   : > { %v671_v55 = vsel %vm667_vm0, %v665_v52, %v669_v53 }
 0x153   : > { %v672_v56 = vpack.c.bf16 %v671_v55, %v670_v54 }
 0x155   : > { %702 = vmatpush.bf16.msra.mxu3 %v672_v56 }
 0x158   : > { %906 = vmatmul.msk.bf16.vlgmr.msra.gmra.mxu3 %vm305_vm4, %v922_v57 }
 0x1db   : > { %v704_v60 = vpop.f32.mrf.mxu3 }
 0x1dc   : > { %v705_v7 = vadd.f32 %v704_v60, %v680_v58 }
 0x1de   : > { %v726_v12 = vadd.f32 %v722_v8, %v705_v7 }
 0x1e3   : > { %v706_v9 = vpop.f32.mrf.mxu3 }
 0x1e4   : > { %v707_v11 = vadd.f32 %v706_v9, %v685_v59 }
 0x1e6   : > { %v727_v13 = vadd.f32 %v723_v10, %v707_v11 }
 0x1e8   : > { %v926_v14 = vpack.c.bf16 %v727_v13, %v726_v12 }
 0x1ea   : > { %927 = vst [vmem:[%s258_s29] sm:$0xff] %v926_v14  }
 0x1eb PF: > { %s15_s20 = sadd.s32 1, %s998_s20   ;;  %s1175_s18 = smov %s994_s19 }
 0x1ec   : > { %p12_p5 = scmp.ge.s32.totalorder %s15_s20, 4   ;;  %s1176_s19 = smov %s1178_s21 }
 0x1ee   :  { %14 = sbr.rel (!%p12_p5) target bundleno = 2 (0x2), region = 80 }

// kernel: hifigan_forward.33
= control target key start
LH: loop header
LB: loop body
LE: loop exit
PB: predicated region body
PF: predicated region fallthrough
CT: control target
= control target key end

     0   :  { %s634_s12 = smov 0   ;;  %s636_s13 = smov 0   ;;  %s692_s0 = inlined_call_operand.vmem [shape: bf16[2,1,16,130], index: 0, kind: input, shape index: {}]   ;;  %s693_s1 = inlined_call_operand.vmem [shape: bf16[32,48], index: 1, kind: input, shape index: {}]   ;;  %s694_s2 = inlined_call_operand.vmem [shape: f32[32,1], index: 2, kind: input, shape index: {}]   ;;  %s695_s3 = inlined_call_operand.vmem [shape: bf16[2,32,128], index: 3, kind: output, shape index: {}]  }
   0x1   :  { %s638_s14 = smov 0  }
   0x2 LB: > { %s32_s15 = sadd.s32 1, %s605_s13  ;;  %p522_p0 = scmp.ge.s32.totalorder %s609_s14, 1  ;;  %s609_s14 = sphi %s638_s14, %s13_s14   ;;  %s605_s13 = sphi %s636_s13, %s697_s13   ;;  %s601_s12 = sphi %s634_s12, %s696_s12  }
   0x3   : > { %p34_p1 = scmp.ge.s32.totalorder %s32_s15, 2  ;;  %p188_p2 = scmp.lt.s32.totalorder %s609_s14, 3 }
   0x5   : > { %s699_s15 = smov (%p34_p1, %s32_s15), 0  ;;  %p189_p3 = pnand %p522_p0, %p188_p2 }
   0x6   : > { %p233_p4 = scmp.lt.s32.totalorder (!%p189_p3), %s601_s12, 1  ;;  %s611_s20 = smov (!%p189_p3), 127  }
   0x7   : > { %192 = sbr.rel (%p189_p3) target bundleno = 304 (0x130), region = 32  ;;  %s612_s21 = smov (!%p189_p3), 126  }
   0xc   : > { %s701_s12 = smov (!%p233_p4, %s601_s12), 1  ;;  %v317_v22 = vld [vmem:[%s694_s2 + $0x10] sm:$0xff]  ;;  %v318_v23 = vld [vmem:[%s694_s2 + $0x18] sm:$0xff]  ;;  %v613_v24 = vmov 0   ;;  %v315_v25 = vld [vmem:[%s694_s2] sm:$0xff]  ;;  %vm308_vm4 = vcmask 1031168  }
   0xd   : > { %s539_s16 = sshll.u32 %s701_s12, 4  ;;  %585 = vset.pattern.permute.xlu0 %v613_v24  ;;  %586 = vset.pattern.permute.xlu1 %v613_v24  ;;  %v316_v26 = vld [vmem:[%s694_s2 + $0x8] sm:$0xff]  ;;  %vm301_vm5 = vcmask 1039360   ;;  %v541_v33 = vld [vmem:[%s693_s1] sm:$0xff]  ;;  %vm349_vm6 = vcmask 392192  }
   0xe   : > { %s241_s19 = scalar_lea.vmem %s692_s0, %s539_s16  ;;  %584 = vset.pattern.permute.xlu2 %v613_v24  ;;  %v542_v34 = vld [vmem:[%s693_s1 + $0x8] sm:$0xff]  ;;  %s265_s9 = scalar_lea.vmem %s695_s3, %s539_s16 }
   0xf   : > { %v268_v0 = vld [vmem:[%s241_s19] sm:$0xff]  ;;  %v269_v1 = vld [vmem:[%s241_s19 + $0x8] sm:$0xff]  ;;  %321 = vperm.xlu2 %584, %v315_v25  }
  0x10   : > { %v270_v2 = vunpack.c.l.bf16 %v268_v0  ;;  %v271_v3 = vunpack.c.h.bf16 %v268_v0  ;;  %v272_v4 = vunpack.c.l.bf16 %v269_v1  ;;  %v273_v5 = vunpack.c.h.bf16 %v269_v1 }
  0x12   : > { %vm274_vm0 = vcmp.ge.f32.partialorder %v270_v2, 0.0  ;;  %vm275_vm1 = vcmp.ge.f32.partialorder %v271_v3, 0.0  ;;  %vm276_vm2 = vcmp.ge.f32.partialorder %v272_v4, 0.0  ;;  %vm277_vm3 = vcmp.ge.f32.partialorder %v273_v5, 0.0 }
  0x13   : > { %v278_v6 = vmul.f32 0.1, %v270_v2  ;;  %v279_v7 = vmul.f32 0.1, %v271_v3  ;;  %v280_v8 = vmul.f32 0.1, %v272_v4 }
  0x14   : > { %v281_v9 = vmul.f32 0.1, %v273_v5 }
  0x15   : > { %v282_v10 = vsel %vm274_vm0, %v270_v2, %v278_v6  ;;  %v283_v11 = vsel %vm275_vm1, %v271_v3, %v279_v7  ;;  %v284_v12 = vsel %vm276_vm2, %v272_v4, %v280_v8 }
  0x16   : > { %v285_v13 = vsel %vm277_vm3, %v273_v5, %v281_v9  ;;  %v286_v14 = vpack.c.bf16 %v283_v11, %v282_v10 }
  0x17   : > { %v287_v15 = vpack.c.bf16 %v285_v13, %v284_v12  ;;  %326 = vperm.xlu2 %584, %v316_v26  }
  0x18   : > { %v290_v16 = vunpack.c.l.b16 %v286_v14  ;;  %v294_v19 = vunpack.c.h.b16 %v286_v14 }
  0x19   : > { %v291_v17 = vunpack.c.l.b16 %v287_v15  ;;  %v295_v20 = vunpack.c.h.b16 %v287_v15 }
  0x1b   : > { %v292_v18 = vpack.c.b16 %v291_v17, %v290_v16  ;;  %v296_v21 = vpack.c.b16 %v295_v20, %v294_v19 }
  0x1d   : > { %297 = vrot.lane.b32.xlu1 %v292_v18, %s611_s20  ;;  %304 = vrot.lane.b32.xlu0 %v292_v18, %s612_s21 }
  0x25   : > { %299 = vrot.lane.b32.xlu1 %v296_v21, %s611_s20  ;;  %306 = vrot.lane.b32.xlu0 %v296_v21, %s612_s21 }
  0x2d   : > { %331 = vperm.xlu0 %585, %v317_v22   ;;  %336 = vperm.xlu1 %586, %v318_v23  }
  0x69   : > { %v322_v35 = vpop.permute.xlu2 %321 }
  0x71   : > { %v327_v40 = vpop.permute.xlu2 %326 }
  0x8f   : > { %v298_v27 = vpop.permute.xlu1 %297  ;;  %v305_v28 = vpop.permute.xlu0 %304 }
  0x97   : > { %v307_v29 = vpop.permute.xlu0 %306  ;;  %v300_v31 = vpop.permute.xlu1 %299 }
  0x98   : > { %v309_v30 = vsel %vm308_vm4, %v305_v28, %v307_v29  ;;  %v302_v32 = vsel %vm301_vm5, %v298_v27, %v300_v31 }
  0x99   : > { %361 = vmatpush.bf16.msra.mxu0 %v309_v30  ;;  %554 = vmatpush.bf16.msra.mxu1 %v309_v30 }
  0x9d   : > { %362 = vmatpush.bf16.msra.mxu0 %v302_v32  ;;  %555 = vmatpush.bf16.msra.mxu1 %v302_v32 }
  0x9f   : > { %v332_v38 = vpop.permute.xlu0 %331  ;;  %v337_v39 = vpop.permute.xlu1 %336 }
  0xa1   : > { %363 = vmatpush.bf16.msra.mxu0 %v292_v18  ;;  %556 = vmatpush.bf16.msra.mxu1 %v292_v18 }
  0xa4   : > { %535 = vmatmul.msk.bf16.vlgmr.msra.gmra.mxu0 %vm349_vm6, %v541_v33  ;;  %536 = vmatmul.msk.bf16.vlgmr.msra.gmra.mxu1 %vm349_vm6, %v542_v34 }
 0x121   : > { %v365_v36 = vpop.f32.mrf.mxu0  ;;  %v370_v37 = vpop.f32.mrf.mxu1 }
 0x122   : > { %v366_v43 = vadd.f32 %v365_v36, %v322_v35  ;;  %v371_v44 = vadd.f32 %v370_v37, %v332_v38 }
 0x129   : > { %v367_v41 = vpop.f32.mrf.mxu0  ;;  %v372_v42 = vpop.f32.mrf.mxu1 }
 0x12a   : > { %v368_v45 = vadd.f32 %v367_v41, %v327_v40  ;;  %v373_v46 = vadd.f32 %v372_v42, %v337_v39 }
 0x12c   : > { %v546_v47 = vpack.c.bf16 %v368_v45, %v366_v43  ;;  %v551_v48 = vpack.c.bf16 %v373_v46, %v371_v44 }
 0x12e   : > { %547 = vst [vmem:[%s265_s9] sm:$0xff] %v546_v47  }
 0x12f   : > { %553 = vst [vmem:[%s265_s9 + $0x8] sm:$0xff] %v551_v48  }
 0x130 PF: > { %s13_s14 = sadd.s32 1, %s609_s14   ;;  %s696_s12 = smov %s605_s13 }
 0x131   : > { %p10_p5 = scmp.ge.s32.totalorder %s13_s14, 4   ;;  %s697_s13 = smov %s699_s15 }
 0x133   :  { %12 = sbr.rel (!%p10_p5) target bundleno = 2 (0x2), region = 68 }

// kernel: hifigan_forward.32
= control target key start
LH: loop header
LB: loop body
LE: loop exit
PB: predicated region body
PF: predicated region fallthrough
CT: control target
= control target key end

     0   :  { %s1041_s18 = smov 0   ;;  %s1043_s19 = smov 0   ;;  %s1169_s0 = inlined_call_operand.vmem [shape: bf16[2,1,16,178], index: 0, kind: input, shape index: {}]   ;;  %s1170_s1 = inlined_call_operand.vmem [shape: bf16[11,16,16], index: 1, kind: input, shape index: {}]   ;;  %s1171_s2 = inlined_call_operand.vmem [shape: f32[16,1], index: 2, kind: input, shape index: {}]   ;;  %s1172_s3 = inlined_call_operand.vmem [shape: bf16[16,16], index: 3, kind: input, shape index: {}]   ;;  %s1173_s4 = inlined_call_operand.vmem [shape: f32[16,1], index: 4, kind: input, shape index: {}]   ;;  %s1174_s5 = inlined_call_operand.vmem [shape: bf16[2,16,128], index: 5, kind: output, shape index: {}]  }
   0x1   :  { %s1045_s20 = smov 0  }
   0x2 LB: > { %s27_s21 = sadd.s32 1, %s994_s19  ;;  %p822_p0 = scmp.ge.s32.totalorder %s998_s20, 1  ;;  %s998_s20 = sphi %s1045_s20, %s15_s20   ;;  %s994_s19 = sphi %s1043_s19, %s1176_s19   ;;  %s990_s18 = sphi %s1041_s18, %s1175_s18  }
   0x3   : > { %p29_p1 = scmp.ge.s32.totalorder %s27_s21, 2  ;;  %p207_p2 = scmp.lt.s32.totalorder %s998_s20, 3 }
   0x5   : > { %s1178_s21 = smov (%p29_p1, %s27_s21), 0  ;;  %p208_p3 = pnand %p822_p0, %p207_p2 }
   0x6   : > { %p242_p4 = scmp.lt.s32.totalorder (!%p208_p3), %s990_s18, 1  ;;  %s1000_s26 = smov (!%p208_p3), 123  }
   0x7   : > { %211 = sbr.rel (%p208_p3) target bundleno = 491 (0x1eb), region = 40  ;;  %s1001_s27 = smov (!%p208_p3), 118  }
   0x8   : > { %s1002_s28 = smov (!%p208_p3), 113   ;;  %s1003_s29 = smov (!%p208_p3), 98  }
   0x9   : > { %s1004_s30 = smov (!%p208_p3), 108   ;;  %s1005_s6 = smov (!%p208_p3), 103  }
   0xa   : > { %s1006_s7 = smov (!%p208_p3), 93   ;;  %s1007_s8 = smov (!%p208_p3), 78  }
   0xb   : > { %s1008_s9 = smov (!%p208_p3), 88   ;;  %s1009_s10 = smov (!%p208_p3), 83  }
   0xc   : > { %s1180_s18 = smov (!%p242_p4, %s990_s18), 1  ;;  %vm305_vm4 = vcmask 130048   ;;  %v911_v23 = vld [vmem:[%s1170_s1] sm:$0xff]  ;;  %vm392_vm5 = vcmask 924672   ;;  %v914_v26 = vld [vmem:[%s1170_s1 + $0x18] sm:$0xff]  ;;  %vm302_vm6 = vcmask 1006592  }
   0xd   : > { %s909_s22 = sshll.u32 %s1180_s18, 4  ;;  %vm358_vm7 = vcmask 965632   ;;  %v912_v34 = vld [vmem:[%s1170_s1 + $0x8] sm:$0xff]  ;;  %v913_v35 = vld [vmem:[%s1170_s1 + $0x10] sm:$0xff]  ;;  %vm494_vm8 = vcmask 801792   ;;  %v652_v41 = vld [vmem:[%s1171_s2] sm:$0xff] }
   0xe   : > { %s250_s25 = scalar_lea.vmem %s1169_s0, %s909_s22  ;;  %v653_v40 = vld [vmem:[%s1171_s2 + $0x8] sm:$0xff]  ;;  %vm426_vm9 = vcmask 883712   ;;  %vm460_vm10 = vcmask 842752   ;;  %v1010_v42 = vmov 0   ;;  %v915_v47 = vld [vmem:[%s1170_s1 + $0x20] sm:$0xff]  ;;  %v917_v49 = vld [vmem:[%s1170_s1 + $0x30] sm:$0xff] }
   0xf   : > { %v260_v0 = vld [vmem:[%s250_s25] sm:$0xff]  ;;  %v261_v1 = vld [vmem:[%s250_s25 + $0x8] sm:$0xff]  ;;  %964 = vset.pattern.permute.xlu0 %v1010_v42  ;;  %963 = vset.pattern.permute.xlu2 %v1010_v42  ;;  %vm528_vm11 = vcmask 760832   ;;  %v918_v55 = vld [vmem:[%s1170_s1 + $0x38] sm:$0xff]  ;;  %vm562_vm12 = vcmask 719872   ;;  %vm630_vm13 = vcmask 637952  }
  0x10   : > { %v1065_v2 = vunpack.c.l.bf16 %v260_v0  ;;  %v1067_v3 = vunpack.c.h.bf16 %v260_v0  ;;  %v1069_v4 = vunpack.c.l.bf16 %v261_v1  ;;  %v1071_v5 = vunpack.c.h.bf16 %v261_v1  ;;  %965 = vset.pattern.permute.xlu1 %v1010_v42  ;;  %v916_v48 = vld [vmem:[%s1170_s1 + $0x28] sm:$0xff]  ;;  %v919_v61 = vld [vmem:[%s1170_s1 + $0x40] sm:$0xff]  ;;  %v921_v62 = vld [vmem:[%s1170_s1 + $0x50] sm:$0xff] }
  0x11   : > { %v676_v51 = vld [vmem:[%s1173_s4 + $0x8] sm:$0xff]  ;;  %vm596_vm14 = vcmask 678912  }
  0x12   : > { %vm266_vm0 = vcmp.ge.f32.partialorder %v1065_v2, 0.0  ;;  %vm267_vm1 = vcmp.ge.f32.partialorder %v1067_v3, 0.0  ;;  %vm268_vm2 = vcmp.ge.f32.partialorder %v1069_v4, 0.0  ;;  %vm269_vm3 = vcmp.ge.f32.partialorder %v1071_v5, 0.0 }
  0x13   : > { %v270_v6 = vmul.f32 0.1, %v1065_v2  ;;  %v271_v7 = vmul.f32 0.1, %v1067_v3  ;;  %v272_v8 = vmul.f32 0.1, %v1069_v4 }
  0x14   : > { %v273_v9 = vmul.f32 0.1, %v1071_v5 }
  0x15   : > { %v274_v10 = vsel %vm266_vm0, %v1065_v2, %v270_v6  ;;  %v275_v11 = vsel %vm267_vm1, %v1067_v3, %v271_v7  ;;  %v276_v12 = vsel %vm268_vm2, %v1069_v4, %v272_v8  ;;  %v920_v6 = vld [vmem:[%s1170_s1 + $0x48] sm:$0xff] }
  0x16   : > { %v277_v13 = vsel %vm269_vm3, %v1071_v5, %v273_v9  ;;  %v278_v14 = vpack.c.bf16 %v275_v11, %v274_v10 }
  0x17   : > { %v279_v15 = vpack.c.bf16 %v277_v13, %v276_v12 }
  0x18   : > { %v292_v16 = vunpack.c.l.b16 %v278_v14  ;;  %v293_v19 = vunpack.c.h.b16 %v278_v14 }
  0x19   : > { %v294_v17 = vunpack.c.l.b16 %v279_v15  ;;  %v295_v20 = vunpack.c.h.b16 %v279_v15 }
  0x1b   : > { %v296_v18 = vpack.c.b16 %v294_v17, %v292_v16  ;;  %v297_v21 = vpack.c.b16 %v295_v20, %v293_v19 }
  0x1d   : > { %298 = vrot.lane.b32.xlu1 %v296_v18, %s1000_s26  ;;  %354 = vrot.lane.b32.xlu0 %v296_v18, %s1001_s27 }
  0x1e   : > { %388 = vrot.lane.b32.xlu2 %v296_v18, %s1002_s28  ;;  %339 = vmatpush.bf16.msra.mxu1 %v296_v18 }
  0x21   : > { %838 = vmatmul.msk.bf16.vlgmr.msra.gmra.mxu1 %vm305_vm4, %v911_v23 }
  0x25   : > { %300 = vrot.lane.b32.xlu1 %v297_v21, %s1000_s26  ;;  %356 = vrot.lane.b32.xlu0 %v297_v21, %s1001_s27  ;;  %s910_s26 = sshll.u32 %s1180_s18, 3 }
  0x26   : > { %390 = vrot.lane.b32.xlu2 %v297_v21, %s1002_s28 }
  0x2d   : > { %492 = vrot.lane.b32.xlu1 %v297_v21, %s1003_s29  ;;  %490 = vrot.lane.b32.xlu0 %v296_v18, %s1003_s29  ;;  %s258_s29 = scalar_lea.vmem %s1174_s5, %s910_s26 }
  0x2e   : > { %422 = vrot.lane.b32.xlu2 %v296_v18, %s1004_s30 }
  0x35   : > { %456 = vrot.lane.b32.xlu1 %v296_v18, %s1005_s6  ;;  %424 = vrot.lane.b32.xlu0 %v297_v21, %s1004_s30 }
  0x36   : > { %458 = vrot.lane.b32.xlu2 %v297_v21, %s1005_s6 }
  0x3d   : > { %526 = vrot.lane.b32.xlu1 %v297_v21, %s1006_s7  ;;  %524 = vrot.lane.b32.xlu0 %v296_v18, %s1006_s7 }
  0x3e   : > { %626 = vrot.lane.b32.xlu2 %v296_v18, %s1007_s8 }
  0x45   : > { %558 = vrot.lane.b32.xlu1 %v296_v18, %s1008_s9  ;;  %628 = vrot.lane.b32.xlu0 %v297_v21, %s1007_s8 }
  0x46   : > { %560 = vrot.lane.b32.xlu2 %v297_v21, %s1008_s9 }
  0x4d   : > { %594 = vrot.lane.b32.xlu1 %v297_v21, %s1009_s10  ;;  %592 = vrot.lane.b32.xlu0 %v296_v18, %s1009_s10 }
  0x4e   : > { %656 = vperm.xlu2 %963, %v652_v41  }
  0x55   : > { %661 = vperm.xlu0 %964, %v653_v40  }
  0x56   : > { %684 = vperm.xlu2 %963, %v676_v51  }
  0x78   : > { %v389_v22 = vpop.permute.xlu2 %388 }
  0x80   : > { %v391_v24 = vpop.permute.xlu2 %390 }
  0x81   : > { %v393_v25 = vsel %vm392_vm5, %v389_v22, %v391_v24 }
  0x82   : > { %405 = vmatpush.bf16.msra.mxu3 %v393_v25 }
  0x85   : > { %852 = vmatmul.msk.bf16.vlgmr.msra.gmra.mxu3 %vm305_vm4, %v914_v26 }
  0x88   : > { %v423_v29 = vpop.permute.xlu2 %422 }
  0x8f   : > { %v299_v27 = vpop.permute.xlu1 %298  ;;  %v355_v28 = vpop.permute.xlu0 %354 }
  0x90   : > { %v459_v39 = vpop.permute.xlu2 %458 }
  0x97   : > { %v301_v30 = vpop.permute.xlu1 %300  ;;  %v357_v31 = vpop.permute.xlu0 %356 }
  0x98   : > { %v303_v32 = vsel %vm302_vm6, %v299_v27, %v301_v30  ;;  %v359_v33 = vsel %vm358_vm7, %v355_v28, %v357_v31  ;;  %v627_v50 = vpop.permute.xlu2 %626  ;;  %v675_v28 = vld [vmem:[%s1173_s4] sm:$0xff] }
  0x99   : > { %316 = vmatpush.bf16.msra.mxu0 %v303_v32  ;;  %371 = vmatpush.bf16.msra.mxu2 %v359_v33 }
  0x9a   : > { %679 = vperm.xlu1 %965, %v675_v28  }
  0x9c   : > { %833 = vmatmul.msk.bf16.vlgmr.msra.gmra.mxu0 %vm305_vm4, %v912_v34  ;;  %845 = vmatmul.msk.bf16.vlgmr.msra.gmra.mxu2 %vm305_vm4, %v913_v35 }
  0x9e   : > { %v341_v8 = vpop.f32.mrf.mxu1 }
  0x9f   : > { %v493_v36 = vpop.permute.xlu1 %492  ;;  %v491_v37 = vpop.permute.xlu0 %490 }
  0xa0   : > { %v495_v38 = vsel %vm494_vm8, %v491_v37, %v493_v36  ;;  %v561_v56 = vpop.permute.xlu2 %560  ;;  %v966_v36 = vpack.i.bf16 %v1067_v3, %v1065_v2 }
  0xa1   : > { %507 = vmatpush.bf16.msrb.mxu2 %v495_v38 }
  0xa2   : > { %967 = vrot.lane.b32.xlu1 %v966_v36, %s1005_s6 }
  0xa6   : > { %v343_v11 = vpop.f32.mrf.mxu1 }
  0xa7   : > { %v457_v43 = vpop.permute.xlu1 %456  ;;  %v425_v44 = vpop.permute.xlu0 %424 }
  0xa8   : > { %v427_v45 = vsel %vm426_vm9, %v423_v29, %v425_v44  ;;  %v461_v46 = vsel %vm460_vm10, %v457_v43, %v459_v39  ;;  %v971_v29 = vpack.i.bf16 %v1071_v5, %v1069_v4 }
  0xa9   : > { %439 = vmatpush.bf16.msrb.mxu0 %v427_v45  ;;  %473 = vmatpush.bf16.msrb.mxu1 %v461_v46  ;;  %v657_v45 = vpop.permute.xlu2 %656 }
  0xaa   : > { %972 = vrot.lane.b32.xlu2 %v971_v29, %s1005_s6 }
  0xac   : > { %859 = vmatmul.msk.bf16.vlgmr.msrb.gmra.mxu0 %vm305_vm4, %v915_v47  ;;  %866 = vmatmul.msk.bf16.vlgmr.msrb.gmra.mxu1 %vm305_vm4, %v916_v48 }
  0xad   : > { %873 = vmatmul.msk.bf16.vlgmr.msrb.gmra.mxu2 %vm305_vm4, %v917_v49 }
  0xaf   : > { %v527_v52 = vpop.permute.xlu1 %526  ;;  %v525_v53 = vpop.permute.xlu0 %524 }
  0xb0   : > { %v529_v54 = vsel %vm528_vm11, %v525_v53, %v527_v52 }
  0xb1   : > { %541 = vmatpush.bf16.msrb.mxu3 %v529_v54 }
  0xb4   : > { %880 = vmatmul.msk.bf16.vlgmr.msrb.gmra.mxu3 %vm305_vm4, %v918_v55 }
  0xb7   : > { %v559_v57 = vpop.permute.xlu1 %558  ;;  %v629_v58 = vpop.permute.xlu0 %628 }
  0xb8   : > { %v563_v59 = vsel %vm562_vm12, %v559_v57, %v561_v56  ;;  %v631_v60 = vsel %vm630_vm13, %v627_v50, %v629_v58  ;;  %v922_v57 = vld [vmem:[%s1172_s3] sm:$0xff] }
  0xb9   : > { %575 = vmatpush.bf16.msra.mxu0 %v563_v59  ;;  %643 = vmatpush.bf16.msra.mxu2 %v631_v60  ;;  %v685_v59 = vpop.permute.xlu2 %684 }
  0xbc   : > { %887 = vmatmul.msk.bf16.vlgmr.msra.gmra.mxu0 %vm305_vm4, %v919_v61 }
  0xbd   : > { %901 = vmatmul.msk.bf16.vlgmr.msra.gmra.mxu2 %vm305_vm4, %v921_v62 }
  0xbf   : > { %v595_v63 = vpop.permute.xlu1 %594  ;;  %v593_v0 = vpop.permute.xlu0 %592 }
  0xc0   : > { %v597_v1 = vsel %vm596_vm14, %v593_v0, %v595_v63 }
  0xc1   : > { %609 = vmatpush.bf16.msra.mxu1 %v597_v1 }
  0xc4   : > { %894 = vmatmul.msk.bf16.vlgmr.msra.gmra.mxu1 %vm305_vm4, %v920_v6 }
  0xc7   : > { %v662_v51 = vpop.permute.xlu0 %661 }
 0x104   : > { %v973_v61 = vpop.permute.xlu2 %972 }
 0x105   : > { %v975_v63 = vunpack.i.h.bf16 %v973_v61  ;;  %v974_v0 = vunpack.i.l.bf16 %v973_v61 }
 0x108   : > { %v407_v12 = vpop.f32.mrf.mxu3 }
 0x10c   : > { %v680_v58 = vpop.permute.xlu1 %679 }
 0x110   : > { %v409_v17 = vpop.f32.mrf.mxu3 }
 0x114   : > { %v968_v62 = vpop.permute.xlu1 %967 }
 0x115   : > { %v970_v1 = vunpack.i.h.bf16 %v968_v62  ;;  %v969_v6 = vunpack.i.l.bf16 %v968_v62 }
 0x119   : > { %v318_v7 = vpop.f32.mrf.mxu0 }
 0x11a   : > { %v342_v15 = vadd.f32 %v341_v8, %v318_v7  ;;  %v722_v8 = vsel %vm460_vm10, %v969_v6, %v970_v1 }
 0x11f   : > { %v373_v9 = vpop.f32.mrf.mxu2 }
 0x120   : > { %v378_v16 = vadd.f32 %v373_v9, %v342_v15 }
 0x121   : > { %v320_v10 = vpop.f32.mrf.mxu0 }
 0x122   : > { %v412_v21 = vadd.f32 %v407_v12, %v378_v16  ;;  %v344_v22 = vadd.f32 %v343_v11, %v320_v10  ;;  %v723_v10 = vsel %vm460_vm10, %v974_v0, %v975_v63 }
 0x127   : > { %v375_v13 = vpop.f32.mrf.mxu2 }
 0x128   : > { %v379_v24 = vadd.f32 %v375_v13, %v344_v22 }
 0x129   : > { %v441_v14 = vpop.f32.mrf.mxu0  ;;  %v475_v18 = vpop.f32.mrf.mxu1 }
 0x12a   : > { %v446_v23 = vadd.f32 %v441_v14, %v412_v21  ;;  %v413_v31 = vadd.f32 %v409_v17, %v379_v24 }
 0x12c   : > { %v480_v26 = vadd.f32 %v475_v18, %v446_v23 }
 0x130   : > { %v509_v19 = vpop.f32.mrf.mxu2 }
 0x131   : > { %v443_v20 = vpop.f32.mrf.mxu0  ;;  %v477_v30 = vpop.f32.mrf.mxu1  ;;  %v514_v32 = vadd.f32 %v509_v19, %v480_v26 }
 0x132   : > { %v447_v34 = vadd.f32 %v443_v20, %v413_v31 }
 0x134   : > { %v481_v37 = vadd.f32 %v477_v30, %v447_v34 }
 0x137   : > { %v543_v25 = vpop.f32.mrf.mxu3 }
 0x138   : > { %v511_v27 = vpop.f32.mrf.mxu2  ;;  %v548_v35 = vadd.f32 %v543_v25, %v514_v32 }
 0x139   : > { %v577_v33 = vpop.f32.mrf.mxu0  ;;  %v515_v4 = vadd.f32 %v511_v27, %v481_v37 }
 0x13a   : > { %v582_v38 = vadd.f32 %v577_v33, %v548_v35 }
 0x13f   : > { %v545_v39 = vpop.f32.mrf.mxu3 }
 0x140   : > { %v645_v40 = vpop.f32.mrf.mxu2  ;;  %v549_v42 = vadd.f32 %v545_v39, %v515_v4 }
 0x141   : > { %v611_v41 = vpop.f32.mrf.mxu1  ;;  %v579_v43 = vpop.f32.mrf.mxu0 }
 0x142   : > { %v616_v5 = vadd.f32 %v611_v41, %v582_v38  ;;  %v583_v46 = vadd.f32 %v579_v43, %v549_v42 }
 0x144   : > { %v650_v44 = vadd.f32 %v645_v40, %v616_v5 }
 0x146   : > { %v664_v48 = vadd.f32 %v657_v45, %v650_v44 }
 0x148   : > { %v647_v50 = vpop.f32.mrf.mxu2  ;;  %v668_v3 = vmul.f32 0.1, %v664_v48  ;;  %vm666_vm15 = vcmp.ge.f32.partialorder %v664_v48, 0.0 }
 0x149   : > { %v613_v47 = vpop.f32.mrf.mxu1 }
 0x14a   : > { %v617_v49 = vadd.f32 %v613_v47, %v583_v46  ;;  %v670_v54 = vsel %vm666_vm15, %v664_v48, %v668_v3 }
 0x14c   : > { %v651_v2 = vadd.f32 %v647_v50, %v617_v49 }
 0x14e   : > { %v665_v52 = vadd.f32 %v662_v51, %v651_v2 }
 0x150   : > { %vm667_vm0 = vcmp.ge.f32.partialorder %v665_v52, 0.0  ;;  %v669_v53 = vmul.f32 0.1, %v665_v52 }
 0x152   : > { %v671_v55 = vsel %vm667_vm0, %v665_v52, %v669_v53 }
 0x153   : > { %v672_v56 = vpack.c.bf16 %v671_v55, %v670_v54 }
 0x155   : > { %702 = vmatpush.bf16.msra.mxu3 %v672_v56 }
 0x158   : > { %906 = vmatmul.msk.bf16.vlgmr.msra.gmra.mxu3 %vm305_vm4, %v922_v57 }
 0x1db   : > { %v704_v60 = vpop.f32.mrf.mxu3 }
 0x1dc   : > { %v705_v7 = vadd.f32 %v704_v60, %v680_v58 }
 0x1de   : > { %v726_v12 = vadd.f32 %v722_v8, %v705_v7 }
 0x1e3   : > { %v706_v9 = vpop.f32.mrf.mxu3 }
 0x1e4   : > { %v707_v11 = vadd.f32 %v706_v9, %v685_v59 }
 0x1e6   : > { %v727_v13 = vadd.f32 %v723_v10, %v707_v11 }
 0x1e8   : > { %v926_v14 = vpack.c.bf16 %v727_v13, %v726_v12 }
 0x1ea   : > { %927 = vst [vmem:[%s258_s29] sm:$0xff] %v926_v14  }
 0x1eb PF: > { %s15_s20 = sadd.s32 1, %s998_s20   ;;  %s1175_s18 = smov %s994_s19 }
 0x1ec   : > { %p12_p5 = scmp.ge.s32.totalorder %s15_s20, 4   ;;  %s1176_s19 = smov %s1178_s21 }
 0x1ee   :  { %14 = sbr.rel (!%p12_p5) target bundleno = 2 (0x2), region = 80 }

// kernel: hifigan_forward.43
= control target key start
LH: loop header
LB: loop body
LE: loop exit
PB: predicated region body
PF: predicated region fallthrough
CT: control target
= control target key end

     0   :  { %s2507_s0 = inlined_call_operand.vmem [shape: bf16[2,1,16,164], index: 0, kind: input, shape index: {}]   ;;  %s2508_s1 = inlined_call_operand.vmem [shape: f32[2,1,1,130], index: 1, kind: input, shape index: {}]   ;;  %s2509_s2 = inlined_call_operand.vmem [shape: f32[16,7], index: 2, kind: input, shape index: {}]   ;;  %s2510_s3 = inlined_call_operand.<no memory space> [shape: f32[1,1], index: 3, kind: input, shape index: {}]   ;;  %s2511_s4 = inlined_call_operand.vmem [shape: f32[1,7], index: 4, kind: input, shape index: {}]   ;;  %s2512_s6 = inlined_call_operand.vmem [shape: f32[1,31], index: 6, kind: input, shape index: {}]   ;;  %s2513_s8 = inlined_call_operand.vmem [shape: f32[1,3], index: 8, kind: input, shape index: {}]   ;;  %s2514_s10 = inlined_call_operand.hbm [shape: f32[2,1,128], index: 10, kind: output, shape index: {}]   ;;  %s2515_s5 = inlined_call_operand.<no memory space> [shape: f32[1,1], index: 5, kind: input, shape index: {}]   ;;  %s2516_s7 = inlined_call_operand.<no memory space> [shape: f32[1,1], index: 7, kind: input, shape index: {}]   ;;  %s2517_s9 = inlined_call_operand.<no memory space> [shape: f32[1,1], index: 9, kind: input, shape index: {}]  }
   0x1   :  { %v15_v0 = vstv %s2510_s3  ;;  %v17_v1 = vstv %s2515_s5  ;;  %v19_v2 = vstv %s2516_s7  ;;  %v21_v3 = vstv %s2517_s9 }
   0x2   :  { %16 = vst [vmem:[#allocation2] sm:$0x1] %v15_v0 }
   0x3   :  { %18 = vst [vmem:[#allocation3] sm:$0x1] %v17_v1 }
   0x4   :  { %20 = vst [vmem:[#allocation4] sm:$0x1] %v19_v2 }
   0x5   :  { %22 = vst [vmem:[#allocation5] sm:$0x1] %v21_v3 }
   0x6   :  { %23 = vsyncpa [#allocation7], 0 }
   0x7   :  { %25 = vsyncpa [#allocation7 + $0x1], 0  ;;  %s1955_s21 = smov 0   ;;  %s1957_s3 = smov 0  }
   0x8   :  { %s1959_s22 = smov 0   ;;  %s1961_s5 = smov 0  }
   0x9   :  { %s1963_s23 = smov 0   ;;  %s1965_s7 = smov 0  }
   0xa LB: > { %s1557_s9 = sadd.s32 4294967295, %s1824_s7   ;;  %s1558_s24 = sadd.s32 4294967294, %s1824_s7   ;;  %s1824_s7 = sphi %s1965_s7, %s31_s7   ;;  %s1820_s23 = sphi %s1963_s23, %s2530_s23   ;;  %s1816_s5 = sphi %s1961_s5, %s2529_s5   ;;  %s1812_s22 = sphi %s1959_s22, %s2528_s22   ;;  %s1808_s3 = sphi %s1957_s3, %s2527_s3   ;;  %s1804_s21 = sphi %s1955_s21, %s2526_s21  }
   0xb   : > { %s43_s25 = sadd.s32 1, %s1820_s23  ;;  %s276_s26 = sadd.s32 1, %s1812_s22 }
   0xc   : > { %p45_p0 = scmp.ge.s32.totalorder %s43_s25, 2  ;;  %p286_p1 = scmp.ne.s32.totalorder %s1812_s22, %s1808_s3 }
   0xd   : > { %p287_p2 = scmp.eq.s32.totalorder %s1557_s9, 1  ;;  %p292_p3 = scmp.ne.s32.totalorder %s1808_s3, %s1804_s21 }
   0xe   : > { %s2532_s25 = smov (%p45_p0, %s43_s25), 0  ;;  %p293_p5 = scmp.eq.s32.totalorder %s1558_s24, 1 }
   0xf   : > { %p1995_p4 = por %p287_p2, %p286_p1  ;;  %s271_s28 = ssub.s32 %s1820_s23, %s2532_s25 }
  0x10   : > { %p1561_p6 = scmp.ge.s32.totalorder %s1824_s7, 1  ;;  %p274_p7 = scmp.eq.s32.totalorder %s271_s28, 0 }
  0x11   : > { %p2002_p8 = por %p293_p5, %p292_p3  ;;  %p358_p9 = scmp.lt.s32.totalorder %s1824_s7, 3 }
  0x12   : > { %s2008_s30 = scalar_select %p274_p7, %s1812_s22, %s276_s26  }
  0x13   : > { %p359_p10 = pnand %p1561_p6, %p358_p9 }
  0x14   : > { %p407_p11 = scmp.lt.s32.totalorder (!%p359_p10), %s1816_s5, 1  ;;  %s2520_s24 = smov (!%p359_p10), 127  }
  0x15   : > { %362 = sbr.rel (%p359_p10) target bundleno = 1194 (0x4aa), region = 60  ;;  %s2519_s26 = smov (!%p359_p10), 126  }
  0x16   : > { %s1835_s28 = smov (!%p359_p10), 125   ;;  %s1836_s11 = smov (!%p359_p10), 124  }
  0x17   : > { %s1837_s12 = smov (!%p359_p10), 123   ;;  %s1838_s13 = smov (!%p359_p10), 122  }
  0x18   : > { %s1847_s16 = smov (!%p359_p10), 121   ;;  %s1849_s19 = smov (!%p359_p10), 119  }
  0x19   : > { %s1850_s20 = smov (!%p359_p10), 118   ;;  %s1852_s14 = smov (!%p359_p10), 116  }
  0x1a   : > { %v442_v4 = vld [vmem:[%s2509_s2] sm:$0xff]  ;;  %v1826_v5 = vmov 1   ;;  %v1827_v6 = vmov 0   ;;  %v1828_v7 = vmov 2   ;;  %v443_v8 = vld [vmem:[%s2509_s2 + $0x8] sm:$0xff]  ;;  %v1829_v9 = vmov 4  }
  0x1b   : > { %1687 = vset.pattern.permute.xlu1 %v1826_v5  ;;  %1686 = vset.pattern.permute.xlu0 %v1827_v6  ;;  %v1830_v10 = vmov 3   ;;  %v1831_v11 = vmov 5   ;;  %v1832_v12 = vmov 6   ;;  %v2031_v13 = vld [vmem:[%s2511_s4] sm:$0x1]  ;;  %s2039_s17 = scalar_select %p407_p11, %s1816_s5, 1 }
  0x1c   : > { %463 = vperm.xlu1 %1687, %v442_v4   ;;  %446 = vperm.xlu0 %1686, %v442_v4   ;;  %v689_v14 = vld [vmem:[#allocation2] sm:$0x1]  ;;  %vm486_vm4 = vcmask 1039360   ;;  %vm521_vm5 = vcmask 1031168   ;;  %vm556_vm6 = vcmask 1022976   ;;  %vm591_vm7 = vcmask 1014784  }
  0x1d   : > { %1688 = vset.pattern.permute.xlu2 %v1828_v7  ;;  %s1568_s18 = sshll.u32 %s2039_s17, 4  ;;  %vm626_vm8 = vcmask 1006592   ;;  %vm661_vm9 = vcmask 998400   ;;  %s2518_s15 = smov 115   ;;  %vm962_vm13 = vcmask 990208   ;;  %vm979_vm14 = vcmask 982016  }
  0x1e   : > { %498 = vperm.xlu2 %1688, %v442_v4   ;;  %s415_s9 = scalar_lea.vmem %s2507_s0, %s1568_s18  ;;  %s1848_s18 = smov 120   ;;  %vm996_vm15 = vcmask 973824  }
  0x1f   : > { %v424_v15 = vld [vmem:[%s415_s9] sm:$0xff]  ;;  %v425_v18 = vld [vmem:[%s415_s9 + $0x8] sm:$0xff]  ;;  %s1851_s9 = smov 117  }
  0x20   : > { %v426_v16 = vunpack.c.l.bf16 %v424_v15  ;;  %v428_v20 = vunpack.c.l.bf16 %v425_v18  ;;  %v429_v21 = vunpack.c.h.bf16 %v425_v18  ;;  %v427_v22 = vunpack.c.h.bf16 %v424_v15  ;;  %v835_v15 = vld [vmem:[#allocation3] sm:$0x1]  ;;  %v2118_v18 = vld [vmem:[%s2512_s6] sm:$0x1] }
  0x22   : > { %v434_v17 = vmul.f32 0.1, %v426_v16  ;;  %vm430_vm0 = vcmp.ge.f32.partialorder %v426_v16, 0.0  ;;  %v436_v27 = vmul.f32 0.1, %v428_v20  ;;  %vm432_vm1 = vcmp.ge.f32.partialorder %v428_v20, 0.0 }
  0x23   : > { %v437_v28 = vmul.f32 0.1, %v429_v21  ;;  %v435_v29 = vmul.f32 0.1, %v427_v22  ;;  %vm433_vm2 = vcmp.ge.f32.partialorder %v429_v21, 0.0  ;;  %vm431_vm3 = vcmp.ge.f32.partialorder %v427_v22, 0.0 }
  0x24   : > { %467 = vperm.xlu1 %1687, %v443_v8   ;;  %451 = vperm.xlu0 %1686, %v443_v8   ;;  %v2046_v19 = vsel %vm430_vm0, %v426_v16, %v434_v17  ;;  %v2053_v30 = vsel %vm432_vm1, %v428_v20, %v436_v27  ;;  %vm1013_vm0 = vcmask 965632   ;;  %vm1030_vm1 = vcmask 957440  }
  0x25   : > { %v2055_v31 = vsel %vm433_vm2, %v429_v21, %v437_v28  ;;  %v439_v32 = vsel %vm431_vm3, %v427_v22, %v435_v29  ;;  %v1839_v29 = vmov 7   ;;  %vm1047_vm2 = vcmask 949248  }
  0x26   : > { %1693 = vset.pattern.permute.xlu2 %v1829_v9  ;;  %vm1064_vm3 = vcmask 941056  }
  0x27   : > { %572 = vperm.xlu2 %1693, %v443_v8  }
  0x2c   : > { %1691 = vset.pattern.permute.xlu1 %v1830_v10  ;;  %1689 = vset.pattern.permute.xlu0 %v1828_v7 }
  0x2d   : > { %537 = vperm.xlu1 %1691, %v443_v8   ;;  %502 = vperm.xlu0 %1689, %v443_v8  }
  0x2f   : > { %1695 = vset.pattern.permute.xlu2 %v1831_v11 }
  0x30   : > { %607 = vperm.xlu2 %1695, %v443_v8  }
  0x35   : > { %1692 = vset.pattern.permute.xlu1 %v1829_v9  ;;  %1690 = vset.pattern.permute.xlu0 %v1830_v10 }
  0x36   : > { %568 = vperm.xlu1 %1692, %v442_v4   ;;  %533 = vperm.xlu0 %1690, %v442_v4  }
  0x38   : > { %1697 = vset.pattern.permute.xlu2 %v1832_v12 }
  0x39   : > { %642 = vperm.xlu2 %1697, %v443_v8  }
  0x3e   : > { %1694 = vset.pattern.permute.xlu1 %v1831_v11  ;;  %1700 = vset.pattern.permute.xlu0 %v1826_v5 }
  0x3f   : > { %603 = vperm.xlu1 %1694, %v442_v4  }
  0x41   : > { %1699 = vset.pattern.permute.xlu2 %v1827_v6 }
  0x42   : > { %719 = vperm.xlu2 %1699, %v2031_v13  }
  0x47   : > { %1696 = vset.pattern.permute.xlu1 %v1832_v12 }
  0x48   : > { %638 = vperm.xlu1 %1696, %v442_v4  }
  0x50   : > { %1698 = vset.pattern.permute.xlu1 %v1827_v6 }
  0x51   : > { %692 = vperm.xlu1 %1698, %v689_v14  }
  0x59   : > { %1701 = vset.pattern.permute.xlu1 %v1828_v7 }
  0x78   : > { %v499_v39 = vpop.permute.xlu2 %498 }
  0x79   : > { %v505_v40 = vmul.f32 %v499_v39, %v2046_v19  ;;  %v506_v41 = vmul.f32 %v499_v39, %v439_v32 }
  0x81   : > { %v573_v50 = vpop.permute.xlu2 %572 }
  0x82   : > { %v578_v53 = vmul.f32 %v573_v50, %v2055_v31  ;;  %v577_v60 = vmul.f32 %v573_v50, %v2053_v30 }
  0x8a   : > { %v608_v58 = vpop.permute.xlu2 %607 }
  0x8b   : > { %v613_v61 = vmul.f32 %v608_v58, %v2055_v31  ;;  %v612_v0 = vmul.f32 %v608_v58, %v2053_v30 }
  0x8e   : > { %v464_v23 = vpop.permute.xlu1 %463  ;;  %v447_v24 = vpop.permute.xlu0 %446 }
  0x8f   : > { %v470_v25 = vmul.f32 %v464_v23, %v2046_v19  ;;  %v2050_v26 = vmul.f32 %v447_v24, %v2046_v19  ;;  %v471_v38 = vmul.f32 %v464_v23, %v439_v32 }
  0x91   : > { %478 = vrot.lane.b32.xlu2 %v470_v25, %s2520_s24 }
  0x93   : > { %v643_v2 = vpop.permute.xlu2 %642 }
  0x94   : > { %v647_v3 = vmul.f32 %v643_v2, %v2053_v30  ;;  %v648_v4 = vmul.f32 %v643_v2, %v2055_v31 }
  0x96   : > { %v468_v33 = vpop.permute.xlu1 %467  ;;  %v452_v34 = vpop.permute.xlu0 %451 }
  0x97   : > { %v472_v35 = vmul.f32 %v468_v33, %v2053_v30  ;;  %v473_v36 = vmul.f32 %v468_v33, %v2055_v31  ;;  %v2060_v37 = vmul.f32 %v452_v34, %v2053_v30 }
  0x99   : > { %484 = vrot.lane.b32.xlu1 %v473_v36, %s2520_s24  ;;  %482 = vrot.lane.b32.xlu0 %v472_v35, %s2520_s24 }
  0x9a   : > { %480 = vrot.lane.b32.xlu2 %v471_v38, %s2520_s24 }
  0x9c   : > { %v2108_v8 = vpop.permute.xlu2 %719 }
  0x9f   : > { %v538_v42 = vpop.permute.xlu1 %537  ;;  %v503_v44 = vpop.permute.xlu0 %502 }
  0xa0   : > { %v543_v43 = vmul.f32 %v538_v42, %v2055_v31  ;;  %v507_v45 = vmul.f32 %v503_v44, %v2053_v30  ;;  %v508_v46 = vmul.f32 %v503_v44, %v2055_v31  ;;  %v542_v57 = vmul.f32 %v538_v42, %v2053_v30 }
  0xa1   : > { %513 = vrot.lane.b32.xlu1 %v505_v40, %s2519_s26  ;;  %v1841_v42 = vmov 9  }
  0xa2   : > { %515 = vrot.lane.b32.xlu2 %v506_v41, %s2519_s26  ;;  %554 = vrot.lane.b32.xlu0 %v543_v43, %s1835_s28 }
  0xa8   : > { %v569_v47 = vpop.permute.xlu1 %568  ;;  %v534_v49 = vpop.permute.xlu0 %533 }
  0xa9   : > { %v575_v48 = vmul.f32 %v569_v47, %v2046_v19  ;;  %517 = vrot.lane.b32.xlu1 %v507_v45, %s2519_s26  ;;  %v541_v51 = vmul.f32 %v534_v49, %v439_v32  ;;  %v540_v52 = vmul.f32 %v534_v49, %v2046_v19  ;;  %v576_v55 = vmul.f32 %v569_v47, %v439_v32 }
  0xaa   : > { %519 = vrot.lane.b32.xlu2 %v508_v46, %s2519_s26 }
  0xab   : > { %583 = vrot.lane.b32.xlu0 %v575_v48, %s1836_s11 }
  0xb1   : > { %550 = vrot.lane.b32.xlu1 %v541_v51, %s1835_s28  ;;  %v604_v54 = vpop.permute.xlu1 %603 }
  0xb2   : > { %548 = vrot.lane.b32.xlu2 %v540_v52, %s1835_s28  ;;  %v610_v56 = vmul.f32 %v604_v54, %v2046_v19  ;;  %v611_v59 = vmul.f32 %v604_v54, %v439_v32 }
  0xb3   : > { %589 = vrot.lane.b32.xlu0 %v578_v53, %s1836_s11 }
  0xb9   : > { %585 = vrot.lane.b32.xlu1 %v576_v55, %s1836_s11 }
  0xba   : > { %552 = vrot.lane.b32.xlu2 %v542_v57, %s1835_s28  ;;  %v639_v62 = vpop.permute.xlu1 %638 }
  0xbb   : > { %618 = vrot.lane.b32.xlu0 %v610_v56, %s1837_s12  ;;  %v646_v63 = vmul.f32 %v639_v62, %v439_v32  ;;  %v645_v1 = vmul.f32 %v639_v62, %v2046_v19  ;;  %v1842_v62 = vmov 10  }
  0xc1   : > { %620 = vrot.lane.b32.xlu1 %v611_v59, %s1837_s12 }
  0xc2   : > { %587 = vrot.lane.b32.xlu2 %v577_v60, %s1836_s11 }
  0xc3   : > { %624 = vrot.lane.b32.xlu0 %v613_v61, %s1837_s12  ;;  %v2113_v16 = vpop.permute.xlu1 %692 }
  0xc9   : > { %655 = vrot.lane.b32.xlu1 %v646_v63, %s1838_s13 }
  0xca   : > { %622 = vrot.lane.b32.xlu2 %v612_v0, %s1837_s12 }
  0xcb   : > { %653 = vrot.lane.b32.xlu0 %v645_v1, %s1838_s13 }
  0xd1   : > { %746 = vperm.xlu1 %1701, %v2031_v13  }
  0xd2   : > { %657 = vrot.lane.b32.xlu2 %v647_v3, %s1838_s13 }
  0xd3   : > { %659 = vrot.lane.b32.xlu0 %v648_v4, %s1838_s13 }
  0xd9   : > { %1702 = vset.pattern.permute.xlu1 %v1830_v10 }
  0xda   : > { %764 = vperm.xlu1 %1702, %v2031_v13  }
  0xdb   : > { %728 = vperm.xlu0 %1700, %v2031_v13  }
  0xe2   : > { %1703 = vset.pattern.permute.xlu1 %v1829_v9 }
  0xe3   : > { %782 = vperm.xlu1 %1703, %v2031_v13  }
  0xeb   : > { %1704 = vset.pattern.permute.xlu1 %v1831_v11  ;;  %v479_v14 = vpop.permute.xlu2 %478 }
  0xec   : > { %800 = vperm.xlu1 %1704, %v2031_v13  }
  0xf4   : > { %1705 = vset.pattern.permute.xlu1 %v1832_v12  ;;  %v481_v17 = vpop.permute.xlu2 %480 }
  0xf5   : > { %818 = vperm.xlu1 %1705, %v2031_v13   ;;  %v487_v35 = vsel %vm486_vm4, %v479_v14, %v481_v17 }
  0xf6   : > { %v493_v43 = vadd.f32 %v487_v35, %v2050_v26 }
  0xfc   : > { %v516_v13 = vpop.permute.xlu2 %515 }
  0xfd   : > { %1706 = vset.pattern.permute.xlu1 %v1827_v6 }
  0xfe   : > { %838 = vperm.xlu1 %1706, %v835_v15  }
 0x104   : > { %v520_v23 = vpop.permute.xlu2 %519 }
 0x106   : > { %1708 = vset.pattern.permute.xlu1 %v1830_v10 }
 0x107   : > { %886 = vperm.xlu1 %1708, %v2118_v18  }
 0x10b   : > { %v485_v19 = vpop.permute.xlu1 %484  ;;  %v483_v20 = vpop.permute.xlu0 %482 }
 0x10c   : > { %v549_v27 = vpop.permute.xlu2 %548 }
 0x10f   : > { %1709 = vset.pattern.permute.xlu1 %v1829_v9 }
 0x110   : > { %902 = vperm.xlu1 %1709, %v2118_v18  }
 0x113   : > { %v514_v21 = vpop.permute.xlu1 %513 }
 0x114   : > { %v555_v22 = vpop.permute.xlu0 %554  ;;  %v553_v9 = vpop.permute.xlu2 %552  ;;  %v522_v41 = vsel %vm521_vm5, %v514_v21, %v516_v13  ;;  %v1843_v13 = vmov 11  }
 0x115   : > { %v528_v47 = vadd.f32 %v522_v41, %v493_v43 }
 0x118   : > { %1710 = vset.pattern.permute.xlu1 %v1831_v11  ;;  %v1840_v11 = vmov 8  }
 0x119   : > { %918 = vperm.xlu1 %1710, %v2118_v18  }
 0x11b   : > { %v518_v24 = vpop.permute.xlu1 %517 }
 0x11c   : > { %v588_v32 = vpop.permute.xlu2 %587  ;;  %v523_v36 = vsel %vm521_vm5, %v518_v24, %v520_v23 }
 0x11d   : > { %v584_v25 = vpop.permute.xlu0 %583 }
 0x121   : > { %1711 = vset.pattern.permute.xlu1 %v1832_v12  ;;  %v488_v12 = vsel %vm486_vm4, %v483_v20, %v485_v19 }
 0x122   : > { %934 = vperm.xlu1 %1711, %v2118_v18   ;;  %v495_v38 = vadd.f32 %v488_v12, %v2060_v37  ;;  %v558_v37 = vsel %vm556_vm6, %v553_v9, %v555_v22  ;;  %v702_v9 = vlaneseq  ;;  %v1845_v12 = vmov 13  }
 0x123   : > { %v551_v10 = vpop.permute.xlu1 %550 }
 0x124   : > { %v623_v39 = vpop.permute.xlu2 %622  ;;  %v530_v44 = vadd.f32 %v523_v36, %v495_v38  ;;  %v557_v46 = vsel %vm556_vm6, %v549_v27, %v551_v10  ;;  %v1844_v10 = vmov 12  }
 0x125   : > { %v590_v28 = vpop.permute.xlu0 %589  ;;  %v563_v50 = vadd.f32 %v557_v46, %v528_v47 }
 0x126   : > { %v593_v48 = vsel %vm591_vm7, %v588_v32, %v590_v28  ;;  %v565_v51 = vadd.f32 %v558_v37, %v530_v44 }
 0x128   : > { %v600_v53 = vadd.f32 %v593_v48, %v565_v51 }
 0x12a   : > { %1712 = vset.pattern.permute.xlu1 %v1839_v29 }
 0x12b   : > { %950 = vperm.xlu1 %1712, %v2118_v18   ;;  %v586_v30 = vpop.permute.xlu1 %585 }
 0x12c   : > { %v592_v49 = vsel %vm591_vm7, %v584_v25, %v586_v30  ;;  %v658_v56 = vpop.permute.xlu2 %657 }
 0x12d   : > { %v619_v31 = vpop.permute.xlu0 %618  ;;  %v598_v54 = vadd.f32 %v592_v49, %v563_v50 }
 0x133   : > { %1713 = vset.pattern.permute.xlu1 %v1840_v11  ;;  %v621_v33 = vpop.permute.xlu1 %620  ;;  %v703_v11 = vand.u32 127, %v702_v9 }
 0x134   : > { %967 = vperm.xlu1 %1713, %v2118_v18   ;;  %v627_v26 = vsel %vm626_vm8, %v619_v31, %v621_v33  ;;  %v695_v31 = vperm.slane %v2113_v16, 0 }
 0x135   : > { %v625_v34 = vpop.permute.xlu0 %624  ;;  %v633_v59 = vadd.f32 %v627_v26, %v598_v54  ;;  %v706_v36 = vadd.s32 4294967281, %v703_v11  ;;  %v1853_v11 = vmov 15  }
 0x136   : > { %v628_v52 = vsel %vm626_vm8, %v623_v39, %v625_v34  ;;  %v1846_v39 = vmov 14  }
 0x137   : > { %v635_v60 = vadd.f32 %v628_v52, %v600_v53  ;;  %vm708_vm10 = vcmp.ge.s32.totalorder %v706_v36, 0  ;;  %vm710_vm11 = vcmp.lt.s32.totalorder %v706_v36, 32 }
 0x138   : > { %vm712_vm12 = vmand %vm708_vm10, %vm710_vm11 }
 0x13b   : > { %v656_v40 = vpop.permute.xlu1 %655 }
 0x13c   : > { %1714 = vset.pattern.permute.xlu1 %v1841_v42 }
 0x13d   : > { %v654_v45 = vpop.permute.xlu0 %653  ;;  %984 = vperm.xlu1 %1714, %v2118_v18  }
 0x13e   : > { %v662_v57 = vsel %vm661_vm9, %v654_v45, %v656_v40 }
 0x13f   : > { %v668_v1 = vadd.f32 %v662_v57, %v633_v59 }
 0x143   : > { %v2143_v55 = vpop.permute.xlu1 %746 }
 0x144   : > { %v749_v58 = vperm.slane %v2143_v55, 0  ;;  %v1857_v55 = vmov 17  }
 0x145   : > { %v660_v61 = vpop.permute.xlu0 %659  ;;  %1715 = vset.pattern.permute.xlu1 %v1842_v62 }
 0x146   : > { %v751_v63 = vmul.f32 0.0, %v749_v58  ;;  %v663_v0 = vsel %vm661_vm9, %v658_v56, %v660_v61  ;;  %1001 = vperm.xlu1 %1715, %v2118_v18  }
 0x147   : > { %v670_v2 = vadd.f32 %v663_v0, %v635_v60 }
 0x148   : > { %756 = vrot.lane.b32.xlu0 %v751_v63, %s2519_s26 }
 0x149   : > { %v672_v3 = vadd.f32 %v670_v2, %v668_v1 }
 0x14b   : > { %v673_v4 = vrot.slane %v672_v3, 4 }
 0x14c   : > { %v2152_v14 = vpop.permute.xlu1 %764 }
 0x14d   : > { %v674_v15 = vadd.f32 %v673_v4, %v672_v3  ;;  %v767_v17 = vperm.slane %v2152_v14, 0  ;;  %v729_v19 = vpop.permute.xlu0 %728  ;;  %v2319_v14 = vld [vmem:[%s2513_s8] sm:$0x1] }
 0x14e   : > { %v731_v20 = vperm.slane %v729_v19, 0  ;;  %1716 = vset.pattern.permute.xlu1 %v1843_v13 }
 0x14f   : > { %v769_v21 = vmul.f32 0.0, %v767_v17  ;;  %1018 = vperm.xlu1 %1716, %v2118_v18   ;;  %v675_v22 = vrot.slane %v674_v15, 2 }
 0x150   : > { %v733_v23 = vmul.f32 0.0, %v731_v20 }
 0x151   : > { %774 = vrot.lane.b32.xlu0 %v769_v21, %s1835_s28  ;;  %v676_v24 = vadd.f32 %v675_v22, %v674_v15 }
 0x152   : > { %738 = vrot.lane.b32.xlu2 %v733_v23, %s2520_s24 }
 0x153   : > { %v677_v28 = vrot.slane %v676_v24, 1 }
 0x155   : > { %v2160_v25 = vpop.permute.xlu1 %782  ;;  %v678_v30 = vadd.f32 %v677_v28, %v676_v24 }
 0x156   : > { %v785_v27 = vperm.slane %v2160_v25, 0  ;;  %v1858_v25 = vmov 19  }
 0x157   : > { %1717 = vset.pattern.permute.xlu1 %v1844_v10  ;;  %v696_v34 = vadd.f32 %v695_v31, %v678_v30  ;;  %v722_v10 = vperm.slane %v2108_v8, 0 }
 0x158   : > { %v787_v29 = vmul.f32 0.0, %v785_v27  ;;  %1035 = vperm.xlu1 %1717, %v2118_v18  }
 0x159   : > { %1740 = vtanh.f32 %v696_v34 }
 0x15a   : > { %792 = vrot.lane.b32.xlu0 %v787_v29, %s1836_s11  ;;  %847 = vperm.xlu2 %1699, %v2118_v18   ;;  %v724_v29 = vmul.f32 0.0, %v722_v10 }
 0x15e   : > { %v2169_v32 = vpop.permute.xlu1 %800 }
 0x15f   : > { %v803_v33 = vperm.slane %v2169_v32, 0  ;;  %v1741_v40 = vpop.eup %1740  ;;  %v1859_v32 = vmov 21  }
 0x160   : > { %1718 = vset.pattern.permute.xlu1 %v1845_v12  ;;  %v2184_v42 = vsel %vm712_vm12, %v1741_v40, 0.0  ;;  %vm1149_vm12 = vcmask 900096  }
 0x161   : > { %1052 = vperm.xlu1 %1718, %v2118_v18   ;;  %v805_v35 = vmul.f32 0.0, %v803_v33  ;;  %v732_v43 = vmul.f32 %v731_v20, %v2184_v42 }
 0x162   : > { %1724 = vset.pattern.permute.xlu2 %v1828_v7 }
 0x163   : > { %810 = vrot.lane.b32.xlu0 %v805_v35, %s1837_s12 }
 0x167   : > { %v2177_v16 = vpop.permute.xlu1 %818 }
 0x168   : > { %v821_v38 = vperm.slane %v2177_v16, 0 }
 0x169   : > { %1719 = vset.pattern.permute.xlu1 %v1846_v39 }
 0x16a   : > { %v823_v41 = vmul.f32 0.0, %v821_v38  ;;  %1069 = vperm.xlu1 %1719, %v2118_v18  }
 0x16c   : > { %828 = vrot.lane.b32.xlu0 %v823_v41, %s1838_s13 }
 0x170   : > { %v2187_v44 = vpop.permute.xlu1 %838 }
 0x171   : > { %v841_v41 = vperm.slane %v2187_v44, 0 }
 0x172   : > { %736 = vrot.lane.b32.xlu1 %v732_v43, %s2520_s24 }
 0x173   : > { %1720 = vset.pattern.permute.xlu1 %v1853_v11 }
 0x174   : > { %854 = vperm.xlu0 %1700, %v2118_v18  }
 0x179   : > { %v2191_v45 = vpop.permute.xlu1 %886 }
 0x17a   : > { %v889_v46 = vperm.slane %v2191_v45, 0  ;;  %v1861_v45 = vmov 26  }
 0x17c   : > { %1707 = vset.pattern.permute.xlu0 %v1828_v7  ;;  %v891_v47 = vmul.f32 0.0, %v889_v46 }
 0x17d   : > { %870 = vperm.xlu0 %1707, %v2118_v18  }
 0x182   : > { %v2198_v37 = vpop.permute.xlu1 %902 }
 0x183   : > { %v905_v48 = vperm.slane %v2198_v37, 0 }
 0x185   : > { %896 = vrot.lane.b32.xlu0 %v891_v47, %s1835_s28  ;;  %v907_v49 = vmul.f32 0.0, %v905_v48 }
 0x18b   : > { %v2204_v50 = vpop.permute.xlu1 %918 }
 0x18c   : > { %v921_v7 = vperm.slane %v2204_v50, 0 }
 0x18d   : > { %912 = vrot.lane.b32.xlu0 %v907_v49, %s1836_s11 }
 0x18e   : > { %v923_v51 = vmul.f32 0.0, %v921_v7  ;;  %v922_v16 = vmul.f32 %v921_v7, %v2184_v42 }
 0x194   : > { %v2210_v26 = vpop.permute.xlu1 %934 }
 0x195   : > { %928 = vrot.lane.b32.xlu0 %v923_v51, %s1837_s12  ;;  %v937_v52 = vperm.slane %v2210_v26, 0 }
 0x197   : > { %v939_v53 = vmul.f32 0.0, %v937_v52 }
 0x19d   : > { %v2216_v54 = vpop.permute.xlu1 %950  ;;  %944 = vrot.lane.b32.xlu0 %v939_v53, %s1838_s13 }
 0x19e   : > { %v953_v56 = vperm.slane %v2216_v54, 0 }
 0x1a0   : > { %v955_v57 = vmul.f32 0.0, %v953_v56  ;;  %v954_v37 = vmul.f32 %v953_v56, %v2184_v42 }
 0x1a5   : > { %960 = vrot.lane.b32.xlu0 %v955_v57, %s1847_s16 }
 0x1a6   : > { %v2223_v59 = vpop.permute.xlu1 %967 }
 0x1a7   : > { %v970_v60 = vperm.slane %v2223_v59, 0  ;;  %v723_v59 = vmul.f32 %v722_v10, %v2184_v42 }
 0x1a9   : > { %v972_v61 = vmul.f32 0.0, %v970_v60  ;;  %v971_v7 = vmul.f32 %v970_v60, %v2184_v42 }
 0x1ac   : > { %v2260_v28 = vpop.permute.xlu2 %738 }
 0x1ad   : > { %977 = vrot.lane.b32.xlu0 %v972_v61, %s1848_s18  ;;  %v744_v31 = vadd.f32 %v2260_v28, %v724_v29 }
 0x1af   : > { %v2229_v62 = vpop.permute.xlu1 %984 }
 0x1b0   : > { %v987_v63 = vperm.slane %v2229_v62, 0 }
 0x1b2   : > { %v989_v0 = vmul.f32 0.0, %v987_v63  ;;  %v988_v54 = vmul.f32 %v987_v63, %v2184_v42 }
 0x1b5   : > { %994 = vrot.lane.b32.xlu0 %v989_v0, %s1849_s19 }
 0x1b8   : > { %v2235_v1 = vpop.permute.xlu1 %1001 }
 0x1b9   : > { %v1004_v2 = vperm.slane %v2235_v1, 0 }
 0x1ba   : > { %v2238_v3 = vpop.permute.xlu0 %756 }
 0x1bb   : > { %v1006_v4 = vmul.f32 0.0, %v1004_v2  ;;  %v762_v35 = vadd.f32 %v2238_v3, %v744_v31  ;;  %v1005_v62 = vmul.f32 %v1004_v2, %v2184_v42 }
 0x1bd   : > { %1011 = vrot.lane.b32.xlu0 %v1006_v4, %s1850_s20 }
 0x1c1   : > { %v2243_v15 = vpop.permute.xlu1 %1018 }
 0x1c2   : > { %v1021_v19 = vperm.slane %v2243_v15, 0 }
 0x1c3   : > { %v2246_v20 = vpop.permute.xlu0 %774 }
 0x1c4   : > { %v1023_v13 = vmul.f32 0.0, %v1021_v19  ;;  %v780_v36 = vadd.f32 %v2246_v20, %v762_v35  ;;  %v768_v35 = vmul.f32 %v767_v17, %v2184_v42  ;;  %v822_v17 = vmul.f32 %v821_v38, %v2184_v42 }
 0x1c5   : > { %v938_v38 = vmul.f32 %v937_v52, %v2184_v42 }
 0x1c6   : > { %1028 = vrot.lane.b32.xlu0 %v1023_v13, %s1851_s9 }
 0x1ca   : > { %v2251_v21 = vpop.permute.xlu1 %1035 }
 0x1cb   : > { %v1038_v22 = vperm.slane %v2251_v21, 0 }
 0x1cc   : > { %v2254_v23 = vpop.permute.xlu0 %792 }
 0x1cd   : > { %v1040_v24 = vmul.f32 0.0, %v1038_v22  ;;  %v798_v39 = vadd.f32 %v2254_v23, %v780_v36  ;;  %v1856_v36 = vmov 16   ;;  %v1039_v15 = vmul.f32 %v1038_v22, %v2184_v42 }
 0x1cf   : > { %1045 = vrot.lane.b32.xlu0 %v1040_v24, %s1852_s14 }
 0x1d3   : > { %v2264_v9 = vpop.permute.xlu1 %1052 }
 0x1d4   : > { %v1055_v30 = vperm.slane %v2264_v9, 0 }
 0x1d5   : > { %v2270_v12 = vpop.permute.xlu0 %810 }
 0x1d6   : > { %v1057_v34 = vmul.f32 0.0, %v1055_v30  ;;  %v816_v43 = vadd.f32 %v2270_v12, %v798_v39  ;;  %v786_v39 = vmul.f32 %v785_v27, %v2184_v42  ;;  %v890_v27 = vmul.f32 %v889_v46, %v2184_v42  ;;  %v848_v46 = vpop.permute.xlu2 %847 }
 0x1d7   : > { %v850_v10 = vperm.slane %v848_v46, 0 }
 0x1d8   : > { %1062 = vrot.lane.b32.xlu0 %v1057_v34, %s2518_s15  ;;  %s1855_s15 = smov 114   ;;  %v750_v34 = vmul.f32 %v749_v58, %v2184_v42  ;;  %v804_v58 = vmul.f32 %v803_v33, %v2184_v42  ;;  %v1860_v33 = vmov 24  }
 0x1dc   : > { %v2276_v40 = vpop.permute.xlu1 %1069 }
 0x1dd   : > { %v1072_v47 = vperm.slane %v2276_v40, 0 }
 0x1de   : > { %v2281_v49 = vpop.permute.xlu0 %828 }
 0x1df   : > { %v1074_v51 = vmul.f32 0.0, %v1072_v47  ;;  %v834_v53 = vadd.f32 %v2281_v49, %v816_v43 }
 0x1e1   : > { %1079 = vrot.lane.b32.xlu0 %v1074_v51, %s1855_s15  ;;  %v2289_v57 = vadd.f32 %v841_v41, %v834_v53 }
 0x1e4   : > { %v737_v52 = vpop.permute.xlu1 %736 }
 0x1e5   : > { %v740_v56 = vsel %vm486_vm4, %v737_v52, %v2260_v28 }
 0x1e6   : > { %v855_v61 = vpop.permute.xlu0 %854  ;;  %v743_v60 = vadd.f32 %v740_v56, %v723_v59 }
 0x1e7   : > { %v857_v0 = vperm.slane %v855_v61, 0 }
 0x1e9   : > { %v858_v4 = vmul.f32 %v857_v0, %v2184_v42  ;;  %v859_v13 = vmul.f32 0.0, %v857_v0 }
 0x1eb   : > { %864 = vrot.lane.b32.xlu2 %v859_v13, %s2520_s24  ;;  %862 = vrot.lane.b32.xlu1 %v858_v4, %s2520_s24  ;;  %v851_v4 = vmul.f32 %v850_v10, %v2184_v42  ;;  %s1864_s24 = smov 113   ;;  %v1869_v10 = vmov 28  }
 0x1ef   : > { %v871_v24 = vpop.permute.xlu0 %870 }
 0x1f0   : > { %v873_v29 = vperm.slane %v871_v24, 0 }
 0x1f2   : > { %v874_v31 = vmul.f32 %v873_v29, %v2184_v42  ;;  %v875_v11 = vmul.f32 0.0, %v873_v29 }
 0x1f4   : > { %880 = vrot.lane.b32.xlu2 %v875_v11, %s2519_s26  ;;  %878 = vrot.lane.b32.xlu1 %v874_v31, %s2519_s26 }
 0x1f7   : > { %v897_v31 = vpop.permute.xlu0 %896 }
 0x1fc   : > { %754 = vrot.lane.b32.xlu2 %v750_v34, %s2519_s26  ;;  %1086 = vperm.xlu1 %1720, %v2118_v18   ;;  %s2523_s26 = smov 115  }
 0x1ff   : > { %v913_v21 = vpop.permute.xlu0 %912 }
 0x204   : > { %772 = vrot.lane.b32.xlu2 %v768_v35, %s1835_s28  ;;  %1721 = vset.pattern.permute.xlu1 %v1856_v36 }
 0x205   : > { %1103 = vperm.xlu1 %1721, %v2118_v18  }
 0x20c   : > { %790 = vrot.lane.b32.xlu2 %v786_v39, %s1836_s11 }
 0x20d   : > { %1722 = vset.pattern.permute.xlu1 %v1857_v55 }
 0x20e   : > { %1120 = vperm.xlu1 %1722, %v2118_v18  }
 0x214   : > { %808 = vrot.lane.b32.xlu2 %v804_v58, %s1837_s12 }
 0x216   : > { %1723 = vset.pattern.permute.xlu1 %v1826_v5  ;;  %v906_v5 = vmul.f32 %v905_v48, %v2184_v42  ;;  %v1862_v48 = vmov 29  }
 0x217   : > { %1376 = vperm.xlu1 %1723, %v2319_v14  }
 0x21c   : > { %826 = vrot.lane.b32.xlu2 %v822_v17, %s1838_s13  ;;  %v1056_v17 = vmul.f32 %v1055_v30, %v2184_v42  ;;  %v929_v30 = vpop.permute.xlu0 %928 }
 0x21f   : > { %1726 = vset.pattern.permute.xlu1 %v1858_v25 }
 0x220   : > { %1154 = vperm.xlu1 %1726, %v2118_v18  }
 0x224   : > { %894 = vrot.lane.b32.xlu2 %v890_v27, %s1835_s28  ;;  %s1865_s28 = smov 112   ;;  %v945_v44 = vpop.permute.xlu0 %944 }
 0x228   : > { %1728 = vset.pattern.permute.xlu1 %v1859_v32 }
 0x229   : > { %1188 = vperm.xlu1 %1728, %v2118_v18  }
 0x22c   : > { %910 = vrot.lane.b32.xlu2 %v906_v5, %s1836_s11  ;;  %v1073_v5 = vmul.f32 %v1072_v47, %v2184_v42  ;;  %s1866_s11 = smov 111  }
 0x231   : > { %1731 = vset.pattern.permute.xlu1 %v1860_v33 }
 0x232   : > { %1239 = vperm.xlu1 %1731, %v2118_v18  }
 0x234   : > { %926 = vrot.lane.b32.xlu2 %v922_v16, %s1837_s12  ;;  %s1868_s12 = smov 109  }
 0x23a   : > { %1733 = vset.pattern.permute.xlu1 %v1861_v45 }
 0x23b   : > { %1273 = vperm.xlu1 %1733, %v2118_v18  }
 0x23c   : > { %942 = vrot.lane.b32.xlu2 %v938_v38, %s1838_s13  ;;  %s1564_s13 = sshll.u32 %s2039_s17, 1  ;;  %s2524_s17 = smov 127  }
 0x243   : > { %1736 = vset.pattern.permute.xlu1 %v1862_v48 }
 0x244   : > { %958 = vrot.lane.b32.xlu2 %v954_v37, %s1847_s16  ;;  %1324 = vperm.xlu1 %1736, %v2118_v18   ;;  %s1883_s16 = smov 100  }
 0x245   : > { %v865_v50 = vpop.permute.xlu2 %864 }
 0x24c   : > { %975 = vrot.lane.b32.xlu2 %v971_v7, %s1848_s18  ;;  %1738 = vset.pattern.permute.xlu1 %v1827_v6  ;;  %s1884_s18 = smov 101  }
 0x24d   : > { %1369 = vperm.xlu1 %1738, %v2319_v14  }
 0x24e   : > { %v881_v26 = vpop.permute.xlu2 %880 }
 0x254   : > { %992 = vrot.lane.b32.xlu2 %v988_v54, %s1849_s19  ;;  %v961_v54 = vpop.permute.xlu0 %960  ;;  %s423_s19 = scalar_lea.vmem %s2508_s1, %s1564_s13  ;;  %s1882_s13 = smov 102  }
 0x256   : > { %v755_v43 = vpop.permute.xlu2 %754 }
 0x257   : > { %v758_v51 = vsel %vm521_vm5, %v755_v43, %v2238_v3  ;;  %v1022_v3 = vmul.f32 %v1021_v19, %v2184_v42  ;;  %v1863_v19 = vmov 18  }
 0x258   : > { %v761_v53 = vadd.f32 %v758_v51, %v743_v60  ;;  %1725 = vset.pattern.permute.xlu0 %v1863_v19  ;;  %v1872_v19 = vmov 25  }
 0x25c   : > { %1009 = vrot.lane.b32.xlu2 %v1005_v62, %s1850_s20  ;;  %s2525_s20 = smov 126  }
 0x25d   : > { %v863_v63 = vpop.permute.xlu1 %862 }
 0x25e   : > { %v866_v28 = vsel %vm486_vm4, %v863_v63, %v865_v50  ;;  %v773_v61 = vpop.permute.xlu2 %772 }
 0x25f   : > { %v776_v8 = vsel %vm556_vm6, %v773_v61, %v2246_v20  ;;  %v868_v1 = vadd.f32 %v866_v28, %v851_v4  ;;  %v978_v61 = vpop.permute.xlu0 %977 }
 0x260   : > { %v779_v0 = vadd.f32 %v776_v8, %v761_v53  ;;  %v1867_v53 = vmov 23  }
 0x264   : > { %1026 = vrot.lane.b32.xlu2 %v1022_v3, %s1851_s9  ;;  %s1875_s9 = smov 110  }
 0x266   : > { %v791_v2 = vpop.permute.xlu2 %790  ;;  %v879_v13 = vpop.permute.xlu1 %878 }
 0x267   : > { %v794_v24 = vsel %vm591_vm7, %v791_v2, %v2254_v23  ;;  %v882_v29 = vsel %vm521_vm5, %v879_v13, %v881_v26  ;;  %v1401_v23 = vld [vmem:[#allocation5] sm:$0x1]  ;;  %v995_v4 = vpop.permute.xlu0 %994 }
 0x268   : > { %v797_v20 = vadd.f32 %v794_v24, %v779_v0  ;;  %v884_v11 = vadd.f32 %v882_v29, %v868_v1  ;;  %1404 = vperm.xlu1 %1738, %v1401_v23   ;;  %v1870_v1 = vmov 20   ;;  %v1873_v23 = vmov 27  }
 0x26c   : > { %1043 = vrot.lane.b32.xlu2 %v1039_v15, %s1852_s14 }
 0x26e   : > { %v809_v34 = vpop.permute.xlu2 %808  ;;  %v1087_v35 = vpop.permute.xlu1 %1086 }
 0x26f   : > { %v812_v36 = vsel %vm626_vm8, %v809_v34, %v2270_v12  ;;  %v1089_v39 = vperm.slane %v1087_v35, 0  ;;  %v1012_v29 = vpop.permute.xlu0 %1011 }
 0x270   : > { %v815_v55 = vadd.f32 %v812_v36, %v797_v20 }
 0x271   : > { %v1091_v58 = vmul.f32 0.0, %v1089_v39  ;;  %v1090_v37 = vmul.f32 %v1089_v39, %v2184_v42 }
 0x273   : > { %1096 = vrot.lane.b32.xlu0 %v1091_v58, %s1864_s24 }
 0x274   : > { %1060 = vrot.lane.b32.xlu2 %v1056_v17, %s2523_s26  ;;  %s1878_s26 = smov 107  }
 0x276   : > { %v827_v22 = vpop.permute.xlu2 %826 }
 0x277   : > { %v830_v25 = vsel %vm661_vm9, %v827_v22, %v2281_v49  ;;  %v1104_v27 = vpop.permute.xlu1 %1103  ;;  %v1029_v35 = vpop.permute.xlu0 %1028 }
 0x278   : > { %v833_v12 = vadd.f32 %v830_v25, %v815_v55  ;;  %v1106_v32 = vperm.slane %v1104_v27, 0  ;;  %v1874_v25 = vmov 30  }
 0x27a   : > { %v1108_v33 = vmul.f32 0.0, %v1106_v32  ;;  %v2401_v9 = vadd.f32 %v841_v41, %v833_v12  ;;  %v1107_v7 = vmul.f32 %v1106_v32, %v2184_v42  ;;  %v2436_v12 = vld [vmem:[%s423_s19] sm:$0x3]  ;;  %s1885_s19 = smov 99  }
 0x27c   : > { %1077 = vrot.lane.b32.xlu2 %v1073_v5, %s1855_s15  ;;  %1113 = vrot.lane.b32.xlu0 %v1108_v33, %s1865_s28  ;;  %s1876_s15 = smov 108  }
 0x27e   : > { %v895_v16 = vpop.permute.xlu2 %894 }
 0x27f   : > { %v898_v49 = vsel %vm556_vm6, %v895_v16, %v897_v31  ;;  %v1046_v58 = vpop.permute.xlu0 %1045  ;;  %vm1081_vm6 = vcmask 932864  }
 0x280   : > { %v900_v38 = vadd.f32 %v898_v49, %v884_v11  ;;  %v1121_v45 = vpop.permute.xlu1 %1120 }
 0x281   : > { %v1123_v46 = vperm.slane %v1121_v45, 0 }
 0x283   : > { %v1125_v40 = vmul.f32 0.0, %v1123_v46  ;;  %v1124_v59 = vmul.f32 %v1123_v46, %v2184_v42 }
 0x284   : > { %1094 = vrot.lane.b32.xlu2 %v1090_v37, %s1864_s24  ;;  %s1877_s24 = smov 106  }
 0x285   : > { %1130 = vrot.lane.b32.xlu0 %v1125_v40, %s1866_s11 }
 0x286   : > { %v911_v41 = vpop.permute.xlu2 %910 }
 0x287   : > { %v914_v47 = vsel %vm591_vm7, %v911_v41, %v913_v21  ;;  %v1063_v32 = vpop.permute.xlu0 %1062  ;;  %vm1098_vm7 = vcmask 924672  }
 0x288   : > { %v916_v48 = vadd.f32 %v914_v47, %v900_v38 }
 0x289   : > { %v2407_v50 = vpop.permute.xlu1 %1376 }
 0x28a   : > { %v1379_v27 = vperm.slane %v2407_v50, 0 }
 0x28c   : > { %1111 = vrot.lane.b32.xlu2 %v1107_v7, %s1865_s28  ;;  %v1380_v5 = vmul.f32 %v1379_v27, %v2436_v12  ;;  %s1879_s28 = smov 105  }
 0x28d   : > { %1137 = vperm.xlu0 %1725, %v2118_v18  }
 0x28e   : > { %v927_v26 = vpop.permute.xlu2 %926 }
 0x28f   : > { %v930_v52 = vsel %vm626_vm8, %v927_v26, %v929_v30  ;;  %v1080_v49 = vpop.permute.xlu0 %1079  ;;  %vm1115_vm8 = vcmask 916480  }
 0x290   : > { %v932_v56 = vadd.f32 %v930_v52, %v916_v48 }
 0x292   : > { %v2413_v60 = vpop.permute.xlu1 %1154 }
 0x293   : > { %v1157_v43 = vperm.slane %v2413_v60, 0 }
 0x294   : > { %1128 = vrot.lane.b32.xlu2 %v1124_v59, %s1866_s11  ;;  %s1880_s11 = smov 103  }
 0x295   : > { %v1158_v51 = vmul.f32 %v1157_v43, %v2184_v42  ;;  %1730 = vset.pattern.permute.xlu0 %v1867_v53 }
 0x296   : > { %v943_v62 = vpop.permute.xlu2 %942  ;;  %1222 = vperm.xlu0 %1730, %v2118_v18  }
 0x297   : > { %v946_v63 = vsel %vm661_vm9, %v943_v62, %v945_v44  ;;  %1162 = vrot.lane.b32.xlu1 %v1158_v51, %s1868_s12  ;;  %vm1132_vm9 = vcmask 908288  }
 0x298   : > { %v948_v28 = vadd.f32 %v946_v63, %v932_v56 }
 0x29c   : > { %1389 = vperm.xlu2 %1724, %v2319_v14   ;;  %v1871_v14 = vmov 22  }
 0x29e   : > { %v959_v8 = vpop.permute.xlu2 %958  ;;  %1735 = vset.pattern.permute.xlu0 %v1869_v10 }
 0x29f   : > { %v963_v0 = vsel %vm962_vm13, %v959_v8, %v961_v54  ;;  %1307 = vperm.xlu0 %1735, %v2118_v18   ;;  %vm1166_vm13 = vcmask 891904  }
 0x2a0   : > { %v965_v3 = vadd.f32 %v963_v0, %v948_v28  ;;  %v1189_v0 = vpop.permute.xlu1 %1188 }
 0x2a4   : > { %1727 = vset.pattern.permute.xlu2 %v1870_v1  ;;  %v1159_v1 = vmul.f32 0.0, %v1157_v43 }
 0x2a5   : > { %1171 = vperm.xlu2 %1727, %v2118_v18  }
 0x2a6   : > { %v976_v2 = vpop.permute.xlu2 %975 }
 0x2a7   : > { %v980_v13 = vsel %vm979_vm14, %v976_v2, %v978_v61  ;;  %1739 = vset.pattern.permute.xlu0 %v1827_v6  ;;  %vm1183_vm14 = vcmask 883712  }
 0x2a8   : > { %v982_v24 = vadd.f32 %v980_v13, %v965_v3 }
 0x2ad   : > { %1729 = vset.pattern.permute.xlu2 %v1871_v14  ;;  %v1191_v14 = vperm.slane %v1189_v0, 0 }
 0x2ae   : > { %v993_v31 = vpop.permute.xlu2 %992  ;;  %1205 = vperm.xlu2 %1729, %v2118_v18  }
 0x2af   : > { %v997_v20 = vsel %vm996_vm15, %v993_v31, %v995_v4  ;;  %v1193_v31 = vmul.f32 0.0, %v1191_v14  ;;  %vm1200_vm15 = vcmask 875520  }
 0x2b0   : > { %v999_v11 = vadd.f32 %v997_v20, %v982_v24 }
 0x2b6   : > { %v1010_v15 = vpop.permute.xlu2 %1009  ;;  %1732 = vset.pattern.permute.xlu2 %v1872_v19 }
 0x2b7   : > { %v1014_v34 = vsel %vm1013_vm0, %v1010_v15, %v1012_v29  ;;  %1256 = vperm.xlu2 %1732, %v2118_v18   ;;  %v1240_v15 = vpop.permute.xlu1 %1239  ;;  %vm1217_vm0 = vcmask 867328  }
 0x2b8   : > { %v1016_v6 = vadd.f32 %v1014_v34, %v999_v11  ;;  %v1192_v11 = vmul.f32 %v1191_v14, %v2184_v42 }
 0x2be   : > { %v1027_v36 = vpop.permute.xlu2 %1026 }
 0x2bf   : > { %v1031_v39 = vsel %vm1030_vm1, %v1027_v36, %v1029_v35  ;;  %1734 = vset.pattern.permute.xlu2 %v1873_v23  ;;  %v1242_v36 = vperm.slane %v1240_v15, 0  ;;  %vm1234_vm1 = vcmask 859136  }
 0x2c0   : > { %v1033_v55 = vadd.f32 %v1031_v39, %v1016_v6  ;;  %1290 = vperm.xlu2 %1734, %v2118_v18   ;;  %v1274_v6 = vpop.permute.xlu1 %1273 }
 0x2c1   : > { %v1276_v39 = vperm.slane %v1274_v6, 0  ;;  %v1244_v23 = vmul.f32 0.0, %v1242_v36 }
 0x2c6   : > { %v1044_v17 = vpop.permute.xlu2 %1043 }
 0x2c7   : > { %v1048_v21 = vsel %vm1047_vm2, %v1044_v17, %v1046_v58  ;;  %v1243_v58 = vmul.f32 %v1242_v36, %v2184_v42 }
 0x2c8   : > { %v1050_v22 = vadd.f32 %v1048_v21, %v1033_v55  ;;  %1737 = vset.pattern.permute.xlu2 %v1874_v25  ;;  %v1278_v55 = vmul.f32 0.0, %v1276_v39 }
 0x2c9   : > { %1341 = vperm.xlu2 %1737, %v2118_v18  }
 0x2ce   : > { %v1061_v33 = vpop.permute.xlu2 %1060 }
 0x2cf   : > { %v1065_v30 = vsel %vm1064_vm3, %v1061_v33, %v1063_v32  ;;  %vm1251_vm3 = vcmask 850944  }
 0x2d0   : > { %v1067_v16 = vadd.f32 %v1065_v30, %v1050_v22  ;;  %v1277_v22 = vmul.f32 %v1276_v39, %v2184_v42 }
 0x2d1   : > { %1382 = vrot.lane.b32.xlu2 %v1380_v5, %s2524_s17  ;;  %v1325_v5 = vpop.permute.xlu1 %1324  ;;  %s1886_s17 = smov 98  }
 0x2d2   : > { %v1327_v30 = vperm.slane %v1325_v5, 0 }
 0x2d6   : > { %v1078_v38 = vpop.permute.xlu2 %1077 }
 0x2d7   : > { %v1082_v45 = vsel %vm1081_vm6, %v1078_v38, %v1080_v49  ;;  %v1329_v49 = vmul.f32 0.0, %v1327_v30  ;;  %vm1268_vm6 = vcmask 842752  }
 0x2d8   : > { %v1084_v46 = vadd.f32 %v1082_v45, %v1067_v16  ;;  %v1328_v45 = vmul.f32 %v1327_v30, %v2184_v42 }
 0x2de   : > { %v1095_v37 = vpop.permute.xlu2 %1094 }
 0x2e5   : > { %v1097_v40 = vpop.permute.xlu0 %1096 }
 0x2e6   : > { %v1099_v18 = vsel %vm1098_vm7, %v1095_v37, %v1097_v40  ;;  %v1112_v44 = vpop.permute.xlu2 %1111  ;;  %v1357_v37 = vld [vmem:[#allocation4] sm:$0x1]  ;;  %vm1285_vm7 = vcmask 834560  }
 0x2e7   : > { %v1101_v41 = vadd.f32 %v1099_v18, %v1084_v46 }
 0x2ee   : > { %v1114_v47 = vpop.permute.xlu0 %1113  ;;  %v1129_v48 = vpop.permute.xlu2 %1128 }
 0x2ef   : > { %v1116_v50 = vsel %vm1115_vm8, %v1112_v44, %v1114_v47  ;;  %v1370_v47 = vpop.permute.xlu1 %1369  ;;  %vm1302_vm8 = vcmask 826368  }
 0x2f0   : > { %v1118_v7 = vadd.f32 %v1116_v50, %v1101_v41 }
 0x2f6   : > { %v1390_v26 = vpop.permute.xlu2 %1389 }
 0x2f7   : > { %v1392_v52 = vperm.slane %v1390_v26, 0  ;;  %v1131_v54 = vpop.permute.xlu0 %1130  ;;  %v1405_v50 = vpop.permute.xlu1 %1404  ;;  %v1372_v26 = vperm.slane %v1370_v47, 0 }
 0x2f8   : > { %v1133_v56 = vsel %vm1132_vm9, %v1129_v48, %v1131_v54  ;;  %vm1319_vm9 = vcmask 818176  }
 0x2f9   : > { %v1393_v59 = vmul.f32 %v1392_v52, %v2436_v12  ;;  %v2441_v51 = vadd.f32 %v1133_v56, %v1118_v7  ;;  %v1373_v54 = vmul.f32 %v1372_v26, %v2436_v12 }
 0x2fb   : > { %1395 = vrot.lane.b32.xlu0 %v1393_v59, %s2525_s20  ;;  %s1887_s20 = smov 12  }
 0x2ff   : > { %v1138_v53 = vpop.permute.xlu0 %1137  ;;  %v1172_v62 = vpop.permute.xlu2 %1171 }
 0x300   : > { %v1140_v63 = vperm.slane %v1138_v53, 0  ;;  %v1174_v28 = vperm.slane %v1172_v62, 0 }
 0x302   : > { %v1141_v61 = vmul.f32 %v1140_v63, %v2184_v42  ;;  %v1142_v8 = vmul.f32 0.0, %v1140_v63  ;;  %v1176_v10 = vmul.f32 0.0, %v1174_v28  ;;  %v1175_v2 = vmul.f32 %v1174_v28, %v2184_v42 }
 0x304   : > { %1147 = vrot.lane.b32.xlu0 %v1142_v8, %s1875_s9  ;;  %1145 = vrot.lane.b32.xlu2 %v1141_v61, %s1875_s9  ;;  %v1407_v61 = vperm.slane %v1405_v50, 0  ;;  %s405_s9 = sand.u32 1, %s1808_s3  }
 0x305   : > { %1181 = vrot.lane.b32.xlu1 %v1176_v10, %s1876_s15 }
 0x308   : > { %v1206_v3 = vpop.permute.xlu2 %1205  ;;  %v1223_v24 = vpop.permute.xlu0 %1222 }
 0x309   : > { %v1208_v4 = vperm.slane %v1206_v3, 0  ;;  %v1225_v29 = vperm.slane %v1223_v24, 0  ;;  %v1163_v62 = vpop.permute.xlu1 %1162 }
 0x30b   : > { %v1209_v13 = vmul.f32 %v1208_v4, %v2184_v42  ;;  %v1227_v20 = vmul.f32 0.0, %v1225_v29  ;;  %v1226_v43 = vmul.f32 %v1225_v29, %v2184_v42  ;;  %v1210_v34 = vmul.f32 0.0, %v1208_v4 }
 0x30c   : > { %1179 = vrot.lane.b32.xlu0 %v1175_v2, %s1876_s15  ;;  %1164 = vrot.lane.b32.xlu2 %v1159_v1, %s1868_s12  ;;  %s1881_s12 = smov 104  }
 0x30d   : > { %1213 = vrot.lane.b32.xlu1 %v1209_v13, %s1877_s24 }
 0x311   : > { %v1257_v19 = vpop.permute.xlu2 %1256  ;;  %v1308_v17 = vpop.permute.xlu0 %1307 }
 0x312   : > { %v1259_v60 = vperm.slane %v1257_v19, 0  ;;  %v1310_v21 = vperm.slane %v1308_v17, 0 }
 0x314   : > { %1198 = vrot.lane.b32.xlu0 %v1193_v31, %s1878_s26  ;;  %1196 = vrot.lane.b32.xlu2 %v1192_v11, %s1878_s26  ;;  %v1260_v35 = vmul.f32 %v1259_v60, %v2184_v42  ;;  %v1261_v25 = vmul.f32 0.0, %v1259_v60  ;;  %v1311_v27 = vmul.f32 %v1310_v21, %v2184_v42  ;;  %v1312_v46 = vmul.f32 0.0, %v1310_v21  ;;  %s1462_s26 = scalar_lea.hbm %s2514_s10, %s1816_s5 }
 0x315   : > { %1232 = vrot.lane.b32.xlu1 %v1227_v20, %s1879_s28 }
 0x31a   : > { %v1291_v32 = vpop.permute.xlu2 %1290 }
 0x31b   : > { %v1293_v33 = vperm.slane %v1291_v32, 0 }
 0x31c   : > { %1230 = vrot.lane.b32.xlu0 %v1226_v43, %s1879_s28  ;;  %1215 = vrot.lane.b32.xlu2 %v1210_v34, %s1877_s24  ;;  %s406_s28 = scalar_lea.vmem [#allocation6], %s405_s9 }
 0x31d   : > { %1264 = vrot.lane.b32.xlu1 %v1260_v35, %s1880_s11  ;;  %v1295_v16 = vmul.f32 0.0, %v1293_v33  ;;  %v1294_v38 = vmul.f32 %v1293_v33, %v2184_v42 }
 0x323   : > { %v1342_v40 = vpop.permute.xlu2 %1341 }
 0x324   : > { %1249 = vrot.lane.b32.xlu0 %v1244_v23, %s1881_s12  ;;  %1247 = vrot.lane.b32.xlu2 %v1243_v58, %s1881_s12  ;;  %v1344_v18 = vperm.slane %v1342_v40, 0  ;;  %s1466_s12 = sshll.u32 %s1462_s26, 4  ;;  %s1467_s12 = int_to_ptr.hbm [resolvable:$true] %s1466_s12 }
 0x325   : > { %1283 = vrot.lane.b32.xlu1 %v1278_v55, %s1882_s13 }
 0x326   : > { %v1346_v44 = vmul.f32 0.0, %v1344_v18  ;;  %v1345_v41 = vmul.f32 %v1344_v18, %v2184_v42 }
 0x32b   : > { %v1383_v48 = vpop.permute.xlu2 %1382 }
 0x32c   : > { %1266 = vrot.lane.b32.xlu2 %v1261_v25, %s1880_s11  ;;  %1281 = vrot.lane.b32.xlu0 %v1277_v22, %s1882_s13  ;;  %v1384_v52 = vrot.slane %v1383_v48, 1  ;;  %s1464_s11 = sshll.u32 %s406_s28, 4  ;;  %s1453_s13 = scalar_lea.sflag [#allocation7], %s405_s9  ;;  %s1465_s11 = int_to_ptr.vmem [resolvable:$true] %s1464_s11 }
 0x32d   : > { %1315 = vrot.lane.b32.xlu1 %v1311_v27, %s1883_s16 }
 0x32e   : > { %v1385_v56 = vsel %vm486_vm4, %v1383_v48, %v1384_v52 }
 0x32f   : > { %v1387_v63 = vadd.f32 %v1385_v56, %v1373_v54 }
 0x334   : > { %1298 = vrot.lane.b32.xlu2 %v1294_v38, %s1884_s18  ;;  %1300 = vrot.lane.b32.xlu0 %v1295_v16, %s1884_s18 }
 0x335   : > { %1334 = vrot.lane.b32.xlu1 %v1329_v49, %s1885_s19 }
 0x33c   : > { %1317 = vrot.lane.b32.xlu2 %v1312_v46, %s1883_s16  ;;  %1332 = vrot.lane.b32.xlu0 %v1328_v45, %s1885_s19  ;;  %s1760_s16 = sshra.s32 %s1467_s12, 4  ;;  %s1766_s19 = scalar_lea.hbm %s2514_s10, 2  ;;  %s1761_s16 = int_to_ptr.hbm [resolvable:$true] %s1760_s16 }
 0x33d   : > { %1360 = vperm.xlu1 %1738, %v1357_v37   ;;  %p1767_p1 = scmp.lt.s32.totalorder %s1761_s16, %s2514_s10 }
 0x344   : > { %1349 = vrot.lane.b32.xlu2 %v1345_v41, %s1886_s17  ;;  %1351 = vrot.lane.b32.xlu0 %v1346_v44, %s1886_s17 }
 0x35e   : > { %v1146_v7 = vpop.permute.xlu2 %1145 }
 0x366   : > { %v1165_v28 = vpop.permute.xlu2 %1164 }
 0x367   : > { %v1167_v32 = vsel %vm1166_vm13, %v1163_v62, %v1165_v28 }
 0x36d   : > { %v1396_v59 = vpop.permute.xlu0 %1395 }
 0x36e   : > { %v1397_v53 = vrot.slane %v1396_v59, 1  ;;  %v1197_v1 = vpop.permute.xlu2 %1196 }
 0x370   : > { %v1398_v42 = vsel %vm521_vm5, %v1396_v59, %v1397_v53 }
 0x371   : > { %v1400_v8 = vadd.f32 %v1398_v42, %v1387_v63 }
 0x373   : > { %v1408_v10 = vadd.f32 %v1407_v61, %v1400_v8 }
 0x375   : > { %v1565_v0 = vmul.f32 -1.442695, %v1408_v10 }
 0x376   : > { %v1148_v3 = vpop.permute.xlu0 %1147  ;;  %v1216_v14 = vpop.permute.xlu2 %1215 }
 0x377   : > { %1742 = vpow2.f32 %v1565_v0  ;;  %v1182_v4 = vpop.permute.xlu1 %1181  ;;  %v1150_v17 = vsel %vm1149_vm12, %v1146_v7, %v1148_v3 }
 0x378   : > { %v1152_v25 = vadd.f32 %v1150_v17, %v2441_v51 }
 0x37a   : > { %v1169_v33 = vadd.f32 %v1167_v32, %v1152_v25 }
 0x37d   : > { %v1743_v2 = vpop.eup %1742 }
 0x37e   : > { %v1412_v13 = vadd.f32 1.0, %v1743_v2  ;;  %v1180_v12 = vpop.permute.xlu0 %1179  ;;  %v1248_v35 = vpop.permute.xlu2 %1247 }
 0x37f   : > { %v1214_v24 = vpop.permute.xlu1 %1213  ;;  %v1184_v5 = vsel %vm1183_vm14, %v1180_v12, %v1182_v4 }
 0x380   : > { %1744 = vrcp.f32 %v1412_v13  ;;  %v1424_v19 = vand.u32 2147483648, %v1412_v13  ;;  %v1422_v43 = vand.u32 2147483647, %v1412_v13  ;;  %vm1418_vm5 = vweird.f32 %v1412_v13 }
 0x381   : > { %v1186_v16 = vadd.f32 %v1184_v5, %v1169_v33  ;;  %v1218_v37 = vsel %vm1217_vm0, %v1214_v24, %v1216_v14 }
 0x382   : > { %v1425_v36 = vor.u32 1.1754944e-38, %v1424_v19  ;;  %vm1423_vm11 = vcmp.eq.f32.partialorder %v1422_v43, 8.507059e+37 }
 0x386   : > { %v1745_v29 = vpop.eup %1744  ;;  %v1199_v31 = vpop.permute.xlu0 %1198 }
 0x387   : > { %v1233_v20 = vpop.permute.xlu1 %1232  ;;  %v1414_v11 = vmul.f32 %v1745_v29, %v1412_v13  ;;  %vm1419_vm4 = vweird.f32 %v1745_v29  ;;  %v1267_v27 = vpop.permute.xlu2 %1266  ;;  %v1201_v30 = vsel %vm1200_vm15, %v1197_v1, %v1199_v31 }
 0x388   : > { %vm1420_vm10 = vmor %vm1418_vm5, %vm1419_vm4  ;;  %v1203_v38 = vadd.f32 %v1201_v30, %v1186_v16  ;;  %vm1336_vm4 = vcmask 809984   ;;  %vm1353_vm5 = vcmask 801792  }
 0x389   : > { %v1415_v15 = vsub.f32 1.0, %v1414_v11 }
 0x38a   : > { %v1220_v18 = vadd.f32 %v1218_v37, %v1203_v38 }
 0x38b   : > { %v1416_v60 = vmul.f32 %v1745_v29, %v1415_v15 }
 0x38d   : > { %v1417_v34 = vadd.f32 %v1745_v29, %v1416_v60 }
 0x38e   : > { %v1231_v6 = vpop.permute.xlu0 %1230 }
 0x38f   : > { %v1265_v39 = vpop.permute.xlu1 %1264  ;;  %v1421_v23 = vsel %vm1420_vm10, %v1745_v29, %v1417_v34  ;;  %v1299_v46 = vpop.permute.xlu2 %1298  ;;  %v1235_v40 = vsel %vm1234_vm1, %v1231_v6, %v1233_v20 }
 0x390   : > { %v1426_v55 = vsel %vm1423_vm11, %v1425_v36, %v1421_v23  ;;  %v1237_v51 = vadd.f32 %v1235_v40, %v1220_v18  ;;  %v1269_v48 = vsel %vm1268_vm6, %v1265_v39, %v1267_v27 }
 0x391   : > { %v1429_v58 = vperm.slane %v1426_v55, 0  ;;  %v1435_v2 = vsub.f32 1.0, %v1426_v55 }
 0x393   : > { %1430 = vrot.lane.b32.xlu2 %v1429_v58, %s1887_s20 }
 0x396   : > { %v1250_v21 = vpop.permute.xlu0 %1249 }
 0x397   : > { %v1284_v22 = vpop.permute.xlu1 %1283  ;;  %v1252_v44 = vsel %vm1251_vm3, %v1248_v35, %v1250_v21  ;;  %v1318_v26 = vpop.permute.xlu2 %1317 }
 0x398   : > { %v1254_v47 = vadd.f32 %v1252_v44, %v1237_v51 }
 0x39a   : > { %v1271_v52 = vadd.f32 %v1269_v48, %v1254_v47 }
 0x39e   : > { %v1282_v49 = vpop.permute.xlu0 %1281 }
 0x39f   : > { %v1316_v45 = vpop.permute.xlu1 %1315  ;;  %v1286_v50 = vsel %vm1285_vm7, %v1282_v49, %v1284_v22  ;;  %v1350_v61 = vpop.permute.xlu2 %1349 }
 0x3a0   : > { %v1288_v56 = vadd.f32 %v1286_v50, %v1271_v52  ;;  %v1320_v62 = vsel %vm1319_vm9, %v1316_v45, %v1318_v26 }
 0x3a6   : > { %v1301_v41 = vpop.permute.xlu0 %1300 }
 0x3a7   : > { %v1335_v7 = vpop.permute.xlu1 %1334  ;;  %v1303_v54 = vsel %vm1302_vm8, %v1299_v46, %v1301_v41 }
 0x3a8   : > { %v1305_v53 = vadd.f32 %v1303_v54, %v1288_v56 }
 0x3aa   : > { %v1322_v28 = vadd.f32 %v1320_v62, %v1305_v53 }
 0x3ae   : > { %v1333_v59 = vpop.permute.xlu0 %1332 }
 0x3af   : > { %v1337_v63 = vsel %vm1336_vm4, %v1333_v59, %v1335_v7  ;;  %v1361_v42 = vpop.permute.xlu1 %1360 }
 0x3b0   : > { %v1339_v8 = vadd.f32 %v1337_v63, %v1322_v28  ;;  %v1363_v3 = vperm.slane %v1361_v42, 0 }
 0x3b6   : > { %v1352_v10 = vpop.permute.xlu0 %1351 }
 0x3b7   : > { %v1354_v0 = vsel %vm1353_vm5, %v1350_v61, %v1352_v10 }
 0x3b8   : > { %v1356_v4 = vadd.f32 %v1354_v0, %v1339_v8 }
 0x3ba   : > { %v1364_v1 = vadd.f32 %v1363_v3, %v1356_v4 }
 0x3bc   : > { %v1436_v13 = vmul.f32 %v1435_v2, %v1364_v1 }
 0x3be   : > { %1438 = vrot.lane.b32.xlu0 %v1436_v13, %s1887_s20 }
 0x3ed   : > { %v1431_v12 = vpop.permute.xlu2 %1430 }
 0x3ee   : > { %v1433_v24 = vmul.f32 %v1431_v12, %v2401_v9  ;;  %v1434_v14 = vmul.f32 %v1431_v12, %v2289_v57 }
 0x430   : > { %v1439_v29 = vpop.permute.xlu0 %1438 }
 0x431   : > { %v1441_v31 = vadd.f32 %v1439_v29, %v1433_v24  ;;  %v1442_v20 = vadd.f32 %v1439_v29, %v1434_v14 }
 0x433   : > { %1447 = vrot.lane.b32.xlu2 %v1442_v20, %s1852_s14  ;;  %1445 = vrot.lane.b32.xlu1 %v1441_v31, %s1852_s14  ;;  %s1762_s14 = scalar_lea.hbm %s1761_s16, 1 }
 0x434   : > { %p1763_p12 = scmp.ne.s32.totalorder %s1761_s16, %s1762_s14  ;;  %p1768_p2 = scmp.lt.s32.totalorder %s1766_s19, %s1762_s14 }
 0x436   : > { %p1764_p13 = pnand %p1763_p12, %p1995_p4  ;;  %p1769_p3 = por %p1768_p2, %p1767_p1 }
 0x438   : > { %p1765_p0 = pneg %p1764_p13 }
 0x43a   : > { %p1770_p5 = pnand %p1769_p3, %p1765_p0 }
 0x48d   : > { %v1448_v11 = vpop.permute.xlu2 %1447 }
 0x4a5   : > { %v1446_v9 = vpop.permute.xlu1 %1445 }
 0x4a6   : > { %v1449_v57 = vsel %vm1047_vm2, %v1446_v9, %v1448_v11 }
 0x4a7   : > { %1451 = vst [vmem:[%s406_s28] sm:$0x1] %v1449_v57 }
 0x4a8   : > { %1773 = shalt.err (!%p1770_p5)
}
 0x4a9   : > { %1569 = dma.vmem_to_hbm [thread:$0]  (%p1995_p4), %s1465_s11, 16, %s1467_s12, %s1453_s13  }
 0x4aa PF: > { %p1575_p6 = scmp.ge.s32.totalorder %s1824_s7, 2  ;;  %s1478_s9 = sand.u32 1, %s1804_s21  }
 0x4ab   : > { %s1479_s15 = scalar_lea.sflag [#allocation7], %s1478_s9 }
 0x4ac   : > { %p1572_p7 = pnand %p1575_p6, %p2002_p8 }
 0x4ae   : > { %p1573_p9 = pneg %p1572_p7 }
 0x4b0   : > { %1799 = dma.done.wait (%p1573_p9), %s1479_s15, 16  }
 0x4b1   : > { %1801 = vsyncadd (%p1573_p9), %s1479_s15, 4294967280  ;;  %s31_s7 = sadd.s32 1, %s1824_s7   ;;  %s2526_s21 = smov %s1808_s3 }
 0x4b2   : > { %p28_p10 = scmp.ge.s32.totalorder %s31_s7, 4   ;;  %s2527_s3 = smov %s1812_s22 }
 0x4b3   : > { %s2528_s22 = smov %s2008_s30  ;;  %s2529_s5 = smov %s1820_s23 }
 0x4b4   : > { %s2530_s23 = smov %s2532_s25  ;;  %30 = sbr.rel (!%p28_p10) target bundleno = 10 (0xa), region = 98 }
 0x4b9   :  { %1484 = vsyncpa [#allocation7], 1 }
 0x4ba   :  { %1486 = vsyncpa [#allocation7 + $0x1], 1 }

</bundles_post_ra>
